<compile_context>
chip_gen: v7x
topology: tpu7x:2x2x1
jax: 0.10.0
libtpu: 0.0.40
codegen_flags: <defaults>
</compile_context>

<pallas_src>
import numpy as np
import jax
import jax.numpy as jnp
from jax.experimental import pallas as pl
from jax.experimental.pallas import tpu as pltpu


# ------------------------------ fused kernel -------------------------------

def _fused_forward_kernel(xs_ref, w1_ref, b1_ref, w2_ref, b2_ref,
                          wf1_ref, bf1_ref, wf2_ref, bf2_ref,
                          wf3_ref, bf3_ref, o_ref):
    tb = xs_ref.shape[1]

    # conv1 (stride-2 Toeplitz GEMM; 4 pool corners batched on the rows)
    x = xs_ref[...].reshape(4 * tb, 784)                      # layout-trivial
    y1 = jnp.dot(x, w1_ref[...], preferred_element_type=jnp.float32)
    y1 = y1.reshape(4, tb, 1440)
    h1 = jnp.maximum(jnp.maximum(y1[0], y1[1]), jnp.maximum(y1[2], y1[3]))
    h1 = jnp.maximum(h1 + b1_ref[...], 0.0)                   # (tb, 1440) f32

    # conv2 (Toeplitz GEMM; pool-corner-major, 384-lane-aligned column blocks)
    y2 = jnp.dot(h1.astype(jnp.bfloat16), w2_ref[...],
                 preferred_element_type=jnp.float32) + b2_ref[...]   # (tb,1536)
    p2 = jnp.maximum(jnp.maximum(y2[:, 0:384], y2[:, 384:768]),
                     jnp.maximum(y2[:, 768:1152], y2[:, 1152:1536]))
    h2 = jnp.maximum(p2, 0.0)        # (tb, 384); lanes 0..319 = NCHW flatten

    # fc head + stable log_softmax
    h3 = jnp.maximum(
        jnp.dot(h2, wf1_ref[...], preferred_element_type=jnp.float32)
        + bf1_ref[...], 0.0)
    h4 = jnp.maximum(
        jnp.dot(h3, wf2_ref[...], preferred_element_type=jnp.float32)
        + bf2_ref[...], 0.0)
    logits = jnp.dot(h4, wf3_ref[...],
                     preferred_element_type=jnp.float32) + bf3_ref[...]
    m = jnp.max(logits, axis=-1, keepdims=True)
    lse = jnp.log(jnp.sum(jnp.exp(logits - m), axis=-1, keepdims=True)) + m
    o_ref[...] = logits - lse                                 # (tb, 10)


# ------------------------------- JAX wrapper --------------------------------

def model_forward(x_nchw, p):
    N = x_nchw.shape[0]
    TB = min(64, ((N + 15) // 16) * 16)          # batch tile (multiple of 16)
    padded = ((N + TB - 1) // TB) * TB

    img = x_nchw[:, 0, :, :]
    if padded != N:
        img = jnp.pad(img, ((0, padded - N), (0, 0), (0, 0)))
    # 4 shifted copies of the raw image = the 2x2 maxpool corners of conv1.
    imgp = jnp.pad(img, ((0, 0), (0, 1), (0, 1)))
    shifts = [imgp[:, dy:dy + 28, dx:dx + 28].reshape(padded, 784)
              for dy in (0, 1) for dx in (0, 1)]
    xs = jnp.stack(shifts, axis=0).astype(jnp.bfloat16)       # (4, padded, 784)

    out = pl.pallas_call(
        _fused_forward_kernel,
        out_shape=jax.ShapeDtypeStruct((padded, 10), jnp.float32),
        grid_spec=pltpu.PrefetchScalarGridSpec(
            num_scalar_prefetch=0,
            grid=(padded // TB,),
            in_specs=[
                pl.BlockSpec((4, TB, 784), lambda i: (0, i, 0)),
                pl.BlockSpec((784, 1440), lambda i: (0, 0)),
                pl.BlockSpec((1, 1440), lambda i: (0, 0)),
                pl.BlockSpec((1440, 1536), lambda i: (0, 0)),
                pl.BlockSpec((1, 1536), lambda i: (0, 0)),
                pl.BlockSpec((384, 300), lambda i: (0, 0)),
                pl.BlockSpec((1, 300), lambda i: (0, 0)),
                pl.BlockSpec((300, 200), lambda i: (0, 0)),
                pl.BlockSpec((1, 200), lambda i: (0, 0)),
                pl.BlockSpec((200, 10), lambda i: (0, 0)),
                pl.BlockSpec((1, 10), lambda i: (0, 0)),
            ],
            out_specs=pl.BlockSpec((TB, 10), lambda i: (i, 0)),
        ),
        compiler_params=pltpu.CompilerParams(
            dimension_semantics=("parallel",),
            vmem_limit_bytes=40 * 1024 * 1024,
        ),
    )(xs, p["w1"], p["b1"], p["w2"], p["b2"],
      p["wf1"], p["bf1"], p["wf2"], p["bf2"], p["wf3"], p["bf3"])
    return out[:N]


# ---------------------- one-time parameter preparation ----------------------

def prepare_params(params):
    """Build Toeplitz / padded weight matrices once, host-side (numpy)."""
    f32 = np.float32

    # conv1 -> stride-2 Toeplitz (784, 1440): row = y*28+x, col = (py*12+px)*10+ci
    w1 = np.asarray(params["conv1_w"], f32)            # (10,1,5,5)
    ker1 = np.transpose(w1[:, 0], (1, 2, 0))           # (5,5,10) [kh,kw,ci]
    W1 = np.zeros((28, 28, 12, 12, 10), f32)
    for py in range(12):
        for px in range(12):
            W1[2 * py:2 * py + 5, 2 * px:2 * px + 5, py, px, :] = ker1
    W1 = W1.reshape(784, 1440)

    # conv2 -> Toeplitz (1440, 4*384): row = (py*12+px)*10+ci,
    # col = corner*384 + co*16 + ry*4 + rx  (lanes 320..383 of each block zero)
    w2 = np.asarray(params["conv2_w"], f32)             # (20,10,5,5)
    ker2 = np.transpose(w2, (2, 3, 1, 0))               # (5,5,10,20)
    W2 = np.zeros((12, 12, 10, 4, 20, 4, 4), f32)
    for dy2 in range(2):
        for dx2 in range(2):
            e = dy2 * 2 + dx2
            for ry in range(4):
                for rx in range(4):
                    qy, qx = 2 * ry + dy2, 2 * rx + dx2
                    W2[qy:qy + 5, qx:qx + 5, :, e, :, ry, rx] = ker2
    W2p = np.zeros((12, 12, 10, 4, 384), f32)
    W2p[..., :320] = W2.reshape(12, 12, 10, 4, 320)
    W2 = W2p.reshape(1440, 1536)

    # Biases tiled to the GEMM-output lane layouts.
    b1big = np.tile(np.asarray(params["conv1_b"], f32), 144)[None, :]   # (1,1440)
    inner = np.zeros((384,), f32)
    inner[:320] = np.repeat(np.asarray(params["conv2_b"], f32), 16)
    b2big = np.tile(inner, 4)[None, :]                                  # (1,1536)

    # fc1 weights padded 320 -> 384 rows (extra rows multiply zeros).
    Wf1 = np.zeros((384, 300), f32)
    Wf1[:320] = np.asarray(params["fc1_w"], f32).T

    return {
        "w1": jnp.asarray(W1, jnp.bfloat16),
        "b1": jnp.asarray(b1big),
        "w2": jnp.asarray(W2, jnp.bfloat16),
        "b2": jnp.asarray(b2big),
        "wf1": jnp.asarray(Wf1),
        "bf1": jnp.asarray(params["fc1_b"], jnp.float32).reshape(1, 300),
        "wf2": jnp.asarray(params["fc2_w"], jnp.float32).T,
        "bf2": jnp.asarray(params["fc2_b"], jnp.float32).reshape(1, 200),
        "wf3": jnp.asarray(params["fc3_w"], jnp.float32).T,
        "bf3": jnp.asarray(params["fc3_b"], jnp.float32).reshape(1, 10),
    }


def init_params(key):
    ks = jax.random.split(key, 10)
    s = 0.05
    return {
        "conv1_w": s * jax.random.normal(ks[0], (10, 1, 5, 5), jnp.float32),
        "conv1_b": s * jax.random.normal(ks[1], (10,), jnp.float32),
        "conv2_w": s * jax.random.normal(ks[2], (20, 10, 5, 5), jnp.float32),
        "conv2_b": s * jax.random.normal(ks[3], (20,), jnp.float32),
        "fc1_w": s * jax.random.normal(ks[4], (300, 320), jnp.float32),
        "fc1_b": s * jax.random.normal(ks[5], (300,), jnp.float32),
        "fc2_w": s * jax.random.normal(ks[6], (200, 300), jnp.float32),
        "fc2_b": s * jax.random.normal(ks[7], (200,), jnp.float32),
        "fc3_w": s * jax.random.normal(ks[8], (10, 200), jnp.float32),
        "fc3_b": s * jax.random.normal(ks[9], (10,), jnp.float32),
    }


# ------------------------- pure-JAX reference (XLA) --------------------------

def reference_forward(x, params):
    dn = ("NCHW", "OIHW", "NCHW")
    y = jax.lax.conv_general_dilated(x, params["conv1_w"], (1, 1), "VALID",
                                     dimension_numbers=dn)
    y = y + params["conv1_b"][None, :, None, None]
    y = jax.lax.reduce_window(y, -jnp.inf, jax.lax.max,
                              (1, 1, 2, 2), (1, 1, 2, 2), "VALID")
    y = jnp.maximum(y, 0.0)
    y = jax.lax.conv_general_dilated(y, params["conv2_w"], (1, 1), "VALID",
                                     dimension_numbers=dn)
    y = y + params["conv2_b"][None, :, None, None]
    y = jax.lax.reduce_window(y, -jnp.inf, jax.lax.max,
                              (1, 1, 2, 2), (1, 1, 2, 2), "VALID")
    y = jnp.maximum(y, 0.0)
    y = y.reshape(x.shape[0], 320)
    y = jnp.maximum(y @ params["fc1_w"].T + params["fc1_b"], 0.0)
    y = jnp.maximum(y @ params["fc2_w"].T + params["fc2_b"], 0.0)
    y = y @ params["fc3_w"].T + params["fc3_b"]
    return jax.nn.log_softmax(y, axis=-1)


if __name__ == "__main__":
    key = jax.random.PRNGKey(0)
    k_param, k_x = jax.random.split(key)
    params = init_params(k_param)
    prepped = prepare_params(params)          # one-time, outside jit

    # 28x28 single-channel input is implied by fc1's 320 = 20*4*4 features.
    x = jax.random.normal(k_x, (2, 1, 28, 28), jnp.float32)

    out = jax.jit(model_forward)(x, prepped)
    out = jax.block_until_ready(out)

    assert out.shape == (2, 10), out.shape
    # log_softmax rows should exp-sum to ~1
    assert bool(jnp.all(jnp.abs(jnp.sum(jnp.exp(out), axis=1) - 1.0) < 1e-4))
    # numerical parity with the plain-XLA f32 reference (bf16 matmul operands
    # inside the kernel -> slightly relaxed tolerance)
    ref = reference_forward(x, params)
    err = float(jnp.max(jnp.abs(out - ref)))
    assert err < 2e-2, err
    print("KERNEL_OK")
</pallas_src>

<mosaic_0001>
module attributes {stable_mosaic.version = 11 : i64} {
  func.func @_fused_forward_kernel(%arg0: i32, %arg1: memref<4x16x784xbf16, #tpu.memory_space<vmem>>, %arg2: memref<784x1440xbf16, #tpu.memory_space<vmem>>, %arg3: memref<1x1440xf32, #tpu.memory_space<vmem>>, %arg4: memref<1440x1536xbf16, #tpu.memory_space<vmem>>, %arg5: memref<1x1536xf32, #tpu.memory_space<vmem>>, %arg6: memref<384x300xf32, #tpu.memory_space<vmem>>, %arg7: memref<1x300xf32, #tpu.memory_space<vmem>>, %arg8: memref<300x200xf32, #tpu.memory_space<vmem>>, %arg9: memref<1x200xf32, #tpu.memory_space<vmem>>, %arg10: memref<200x10xf32, #tpu.memory_space<vmem>>, %arg11: memref<1x10xf32, #tpu.memory_space<vmem>>, %arg12: memref<16x10xf32, #tpu.memory_space<vmem>>) attributes {dimension_semantics = [#tpu.dimension_semantics<parallel>], iteration_bounds = array<i64: 1>, scalar_prefetch = 0 : i64, scratch_operands = 0 : i64, tpu.core_type = #tpu.core_type<tc>, window_params = [{transform_indices = @transform_0, window_bounds = array<i64: 4, 16, 784>}, {pipeline_mode = #tpu.pipeline_mode<synchronous>, transform_indices = @transform_1, window_bounds = array<i64: 784, 1440>}, {pipeline_mode = #tpu.pipeline_mode<synchronous>, transform_indices = @transform_2, window_bounds = array<i64: 1, 1440>}, {pipeline_mode = #tpu.pipeline_mode<synchronous>, transform_indices = @transform_3, window_bounds = array<i64: 1440, 1536>}, {pipeline_mode = #tpu.pipeline_mode<synchronous>, transform_indices = @transform_4, window_bounds = array<i64: 1, 1536>}, {pipeline_mode = #tpu.pipeline_mode<synchronous>, transform_indices = @transform_5, window_bounds = array<i64: 384, 300>}, {pipeline_mode = #tpu.pipeline_mode<synchronous>, transform_indices = @transform_6, window_bounds = array<i64: 1, 300>}, {pipeline_mode = #tpu.pipeline_mode<synchronous>, transform_indices = @transform_7, window_bounds = array<i64: 300, 200>}, {pipeline_mode = #tpu.pipeline_mode<synchronous>, transform_indices = @transform_8, window_bounds = array<i64: 1, 200>}, {pipeline_mode = #tpu.pipeline_mode<synchronous>, transform_indices = @transform_9, window_bounds = array<i64: 200, 10>}, {pipeline_mode = #tpu.pipeline_mode<synchronous>, transform_indices = @transform_10, window_bounds = array<i64: 1, 10>}, {transform_indices = @transform_11, window_bounds = array<i64: 16, 10>}]} {
    %c0 = arith.constant 0 : index
    %c0_0 = arith.constant 0 : index
    %c0_1 = arith.constant 0 : index
    %0 = vector.load %arg1[%c0, %c0_0, %c0_1] : memref<4x16x784xbf16, #tpu.memory_space<vmem>>, vector<4x16x784xbf16>
    %1 = vector.shape_cast %0 : vector<4x16x784xbf16> to vector<64x784xbf16>
    %c0_2 = arith.constant 0 : index
    %c0_3 = arith.constant 0 : index
    %2 = vector.load %arg2[%c0_2, %c0_3] : memref<784x1440xbf16, #tpu.memory_space<vmem>>, vector<784x1440xbf16>
    %cst = arith.constant dense<0.000000e+00> : vector<64x1440xf32>
    %3 = tpu.matmul %1, %2, %cst {dimension_numbers = #tpu.dot_dimension_numbers<[1], [0], [0], [1], [0, 0, 1, 1], [], []>} : vector<64x784xbf16>, vector<784x1440xbf16>, vector<64x1440xf32> -> vector<64x1440xf32>
    %4 = vector.shape_cast %3 : vector<64x1440xf32> to vector<4x16x1440xf32>
    %5 = vector.extract_strided_slice %4 {offsets = [0, 0, 0], sizes = [1, 16, 1440], strides = [1, 1, 1]} : vector<4x16x1440xf32> to vector<1x16x1440xf32>
    %6 = vector.shape_cast %5 : vector<1x16x1440xf32> to vector<16x1440xf32>
    %7 = vector.extract_strided_slice %4 {offsets = [1, 0, 0], sizes = [1, 16, 1440], strides = [1, 1, 1]} : vector<4x16x1440xf32> to vector<1x16x1440xf32>
    %8 = vector.shape_cast %7 : vector<1x16x1440xf32> to vector<16x1440xf32>
    %9 = arith.maximumf %6, %8 : vector<16x1440xf32>
    %10 = vector.extract_strided_slice %4 {offsets = [2, 0, 0], sizes = [1, 16, 1440], strides = [1, 1, 1]} : vector<4x16x1440xf32> to vector<1x16x1440xf32>
    %11 = vector.shape_cast %10 : vector<1x16x1440xf32> to vector<16x1440xf32>
    %12 = vector.extract_strided_slice %4 {offsets = [3, 0, 0], sizes = [1, 16, 1440], strides = [1, 1, 1]} : vector<4x16x1440xf32> to vector<1x16x1440xf32>
    %13 = vector.shape_cast %12 : vector<1x16x1440xf32> to vector<16x1440xf32>
    %14 = arith.maximumf %11, %13 : vector<16x1440xf32>
    %15 = arith.maximumf %9, %14 : vector<16x1440xf32>
    %c0_4 = arith.constant 0 : index
    %c0_5 = arith.constant 0 : index
    %16 = vector.load %arg3[%c0_4, %c0_5] : memref<1x1440xf32, #tpu.memory_space<vmem>>, vector<1x1440xf32>
    %17 = vector.broadcast %16 : vector<1x1440xf32> to vector<16x1440xf32>
    %18 = arith.addf %15, %17 : vector<16x1440xf32>
    %cst_6 = arith.constant 0.000000e+00 : f32
    %19 = vector.broadcast %cst_6 : f32 to vector<16x1440xf32>
    %20 = arith.maximumf %18, %19 : vector<16x1440xf32>
    %21 = arith.truncf %20 : vector<16x1440xf32> to vector<16x1440xbf16>
    %c0_7 = arith.constant 0 : index
    %c0_8 = arith.constant 0 : index
    %22 = vector.load %arg4[%c0_7, %c0_8] : memref<1440x1536xbf16, #tpu.memory_space<vmem>>, vector<1440x1536xbf16>
    %cst_9 = arith.constant dense<0.000000e+00> : vector<16x1536xf32>
    %23 = tpu.matmul %21, %22, %cst_9 {dimension_numbers = #tpu.dot_dimension_numbers<[1], [0], [0], [1], [0, 0, 1, 1], [], []>} : vector<16x1440xbf16>, vector<1440x1536xbf16>, vector<16x1536xf32> -> vector<16x1536xf32>
    %c0_10 = arith.constant 0 : index
    %c0_11 = arith.constant 0 : index
    %24 = vector.load %arg5[%c0_10, %c0_11] : memref<1x1536xf32, #tpu.memory_space<vmem>>, vector<1x1536xf32>
    %25 = vector.broadcast %24 : vector<1x1536xf32> to vector<16x1536xf32>
    %26 = arith.addf %23, %25 : vector<16x1536xf32>
    %27 = vector.extract_strided_slice %26 {offsets = [0, 0], sizes = [16, 384], strides = [1, 1]} : vector<16x1536xf32> to vector<16x384xf32>
    %28 = vector.extract_strided_slice %26 {offsets = [0, 384], sizes = [16, 384], strides = [1, 1]} : vector<16x1536xf32> to vector<16x384xf32>
    %29 = arith.maximumf %27, %28 : vector<16x384xf32>
    %30 = vector.extract_strided_slice %26 {offsets = [0, 768], sizes = [16, 384], strides = [1, 1]} : vector<16x1536xf32> to vector<16x384xf32>
    %31 = vector.extract_strided_slice %26 {offsets = [0, 1152], sizes = [16, 384], strides = [1, 1]} : vector<16x1536xf32> to vector<16x384xf32>
    %32 = arith.maximumf %30, %31 : vector<16x384xf32>
    %33 = arith.maximumf %29, %32 : vector<16x384xf32>
    %cst_12 = arith.constant 0.000000e+00 : f32
    %34 = vector.broadcast %cst_12 : f32 to vector<16x384xf32>
    %35 = arith.maximumf %33, %34 : vector<16x384xf32>
    %c0_13 = arith.constant 0 : index
    %c0_14 = arith.constant 0 : index
    %36 = vector.load %arg6[%c0_13, %c0_14] : memref<384x300xf32, #tpu.memory_space<vmem>>, vector<384x300xf32>
    %cst_15 = arith.constant dense<0.000000e+00> : vector<16x300xf32>
    %37 = tpu.matmul %35, %36, %cst_15 {dimension_numbers = #tpu.dot_dimension_numbers<[1], [0], [0], [1], [0, 0, 1, 1], [], []>} : vector<16x384xf32>, vector<384x300xf32>, vector<16x300xf32> -> vector<16x300xf32>
    %c0_16 = arith.constant 0 : index
    %c0_17 = arith.constant 0 : index
    %38 = vector.load %arg7[%c0_16, %c0_17] : memref<1x300xf32, #tpu.memory_space<vmem>>, vector<1x300xf32>
    %39 = vector.broadcast %38 : vector<1x300xf32> to vector<16x300xf32>
    %40 = arith.addf %37, %39 : vector<16x300xf32>
    %cst_18 = arith.constant 0.000000e+00 : f32
    %41 = vector.broadcast %cst_18 : f32 to vector<16x300xf32>
    %42 = arith.maximumf %40, %41 : vector<16x300xf32>
    %c0_19 = arith.constant 0 : index
    %c0_20 = arith.constant 0 : index
    %43 = vector.load %arg8[%c0_19, %c0_20] : memref<300x200xf32, #tpu.memory_space<vmem>>, vector<300x200xf32>
    %cst_21 = arith.constant dense<0.000000e+00> : vector<16x200xf32>
    %44 = tpu.matmul %42, %43, %cst_21 {dimension_numbers = #tpu.dot_dimension_numbers<[1], [0], [0], [1], [0, 0, 1, 1], [], []>} : vector<16x300xf32>, vector<300x200xf32>, vector<16x200xf32> -> vector<16x200xf32>
    %c0_22 = arith.constant 0 : index
    %c0_23 = arith.constant 0 : index
    %45 = vector.load %arg9[%c0_22, %c0_23] : memref<1x200xf32, #tpu.memory_space<vmem>>, vector<1x200xf32>
    %46 = vector.broadcast %45 : vector<1x200xf32> to vector<16x200xf32>
    %47 = arith.addf %44, %46 : vector<16x200xf32>
    %cst_24 = arith.constant 0.000000e+00 : f32
    %48 = vector.broadcast %cst_24 : f32 to vector<16x200xf32>
    %49 = arith.maximumf %47, %48 : vector<16x200xf32>
    %c0_25 = arith.constant 0 : index
    %c0_26 = arith.constant 0 : index
    %50 = vector.load %arg10[%c0_25, %c0_26] : memref<200x10xf32, #tpu.memory_space<vmem>>, vector<200x10xf32>
    %cst_27 = arith.constant dense<0.000000e+00> : vector<16x10xf32>
    %51 = tpu.matmul %49, %50, %cst_27 {dimension_numbers = #tpu.dot_dimension_numbers<[1], [0], [0], [1], [0, 0, 1, 1], [], []>} : vector<16x200xf32>, vector<200x10xf32>, vector<16x10xf32> -> vector<16x10xf32>
    %c0_28 = arith.constant 0 : index
    %c0_29 = arith.constant 0 : index
    %52 = vector.load %arg11[%c0_28, %c0_29] : memref<1x10xf32, #tpu.memory_space<vmem>>, vector<1x10xf32>
    %53 = vector.broadcast %52 : vector<1x10xf32> to vector<16x10xf32>
    %54 = arith.addf %51, %53 : vector<16x10xf32>
    %cst_30 = arith.constant dense<0xFF800000> : vector<16xf32>
    %55 = vector.multi_reduction <maximumf>, %54, %cst_30 [1] : vector<16x10xf32> to vector<16xf32>
    %56 = vector.shape_cast %55 : vector<16xf32> to vector<16x1xf32>
    %57 = vector.broadcast %56 : vector<16x1xf32> to vector<16x10xf32>
    %58 = arith.subf %54, %57 : vector<16x10xf32>
    %59 = math.exp %58 : vector<16x10xf32>
    %cst_31 = arith.constant dense<0.000000e+00> : vector<16xf32>
    %60 = vector.multi_reduction <add>, %59, %cst_31 [1] : vector<16x10xf32> to vector<16xf32>
    %61 = vector.shape_cast %60 : vector<16xf32> to vector<16x1xf32>
    %62 = math.log %61 : vector<16x1xf32>
    %63 = arith.addf %62, %56 : vector<16x1xf32>
    %64 = vector.broadcast %63 : vector<16x1xf32> to vector<16x10xf32>
    %65 = arith.subf %54, %64 : vector<16x10xf32>
    %c0_32 = arith.constant 0 : index
    %c0_33 = arith.constant 0 : index
    %66 = vector.load %arg12[%c0_32, %c0_33] : memref<16x10xf32, #tpu.memory_space<vmem>>, vector<16x10xf32>
    tpu.vector_store %arg12[%c0_32, %c0_33], %65 {strides = array<i32>} : memref<16x10xf32, #tpu.memory_space<vmem>>, vector<16x10xf32>,
    return
  }
  func.func @transform_0(%arg0: i32) -> (i32, i32, i32) {
    %c0_i32 = arith.constant 0 : i32
    %c0_i32_0 = arith.constant 0 : i32
    %c0_i32_1 = arith.constant 0 : i32
    return %c0_i32, %arg0, %c0_i32_0 : i32, i32, i32
  }
  func.func @transform_1(%arg0: i32) -> (i32, i32) {
    %c0_i32 = arith.constant 0 : i32
    %c0_i32_0 = arith.constant 0 : i32
    %c0_i32_1 = arith.constant 0 : i32
    return %c0_i32, %c0_i32_0 : i32, i32
  }
  func.func @transform_2(%arg0: i32) -> (i32, i32) {
    %c0_i32 = arith.constant 0 : i32
    %c0_i32_0 = arith.constant 0 : i32
    %c0_i32_1 = arith.constant 0 : i32
    return %c0_i32, %c0_i32_0 : i32, i32
  }
  func.func @transform_3(%arg0: i32) -> (i32, i32) {
    %c0_i32 = arith.constant 0 : i32
    %c0_i32_0 = arith.constant 0 : i32
    %c0_i32_1 = arith.constant 0 : i32
    return %c0_i32, %c0_i32_0 : i32, i32
  }
  func.func @transform_4(%arg0: i32) -> (i32, i32) {
    %c0_i32 = arith.constant 0 : i32
    %c0_i32_0 = arith.constant 0 : i32
    %c0_i32_1 = arith.constant 0 : i32
    return %c0_i32, %c0_i32_0 : i32, i32
  }
  func.func @transform_5(%arg0: i32) -> (i32, i32) {
    %c0_i32 = arith.constant 0 : i32
    %c0_i32_0 = arith.constant 0 : i32
    %c0_i32_1 = arith.constant 0 : i32
    return %c0_i32, %c0_i32_0 : i32, i32
  }
  func.func @transform_6(%arg0: i32) -> (i32, i32) {
    %c0_i32 = arith.constant 0 : i32
    %c0_i32_0 = arith.constant 0 : i32
    %c0_i32_1 = arith.constant 0 : i32
    return %c0_i32, %c0_i32_0 : i32, i32
  }
  func.func @transform_7(%arg0: i32) -> (i32, i32) {
    %c0_i32 = arith.constant 0 : i32
    %c0_i32_0 = arith.constant 0 : i32
    %c0_i32_1 = arith.constant 0 : i32
    return %c0_i32, %c0_i32_0 : i32, i32
  }
  func.func @transform_8(%arg0: i32) -> (i32, i32) {
    %c0_i32 = arith.constant 0 : i32
    %c0_i32_0 = arith.constant 0 : i32
    %c0_i32_1 = arith.constant 0 : i32
    return %c0_i32, %c0_i32_0 : i32, i32
  }
  func.func @transform_9(%arg0: i32) -> (i32, i32) {
    %c0_i32 = arith.constant 0 : i32
    %c0_i32_0 = arith.constant 0 : i32
    %c0_i32_1 = arith.constant 0 : i32
    return %c0_i32, %c0_i32_0 : i32, i32
  }
  func.func @transform_10(%arg0: i32) -> (i32, i32) {
    %c0_i32 = arith.constant 0 : i32
    %c0_i32_0 = arith.constant 0 : i32
    %c0_i32_1 = arith.constant 0 : i32
    return %c0_i32, %c0_i32_0 : i32, i32
  }
  func.func @transform_11(%arg0: i32) -> (i32, i32) {
    %c0_i32 = arith.constant 0 : i32
    %c0_i32_0 = arith.constant 0 : i32
    return %arg0, %c0_i32 : i32, i32
  }
}

</mosaic_0001>

<bundles_post_ra>
// kernel: model_forward.1
= control target key start
LH: loop header
LB: loop body
LE: loop exit
PB: predicated region body
PF: predicated region fallthrough
CT: control target
= control target key end

     0   :  { %16 = vsyncpa [#allocation3], 0  ;;  %s19903_s17 = smov [#allocation2]   ;;  %s25004_s0 = inlined_call_operand.vmem [shape: bf16[4,16,784], index: 0, kind: input, shape index: {}]   ;;  %s25005_s1 = inlined_call_operand.hbm [shape: bf16[784,1440], index: 1, kind: input, shape index: {}]   ;;  %s25006_s2 = inlined_call_operand.vmem [shape: f32[1,1440], index: 2, kind: input, shape index: {}]   ;;  %s25007_s3 = inlined_call_operand.vmem [shape: bf16[1440,1536], index: 3, kind: input, shape index: {}]   ;;  %s25008_s4 = inlined_call_operand.vmem [shape: f32[1,1536], index: 4, kind: input, shape index: {}]   ;;  %s25009_s5 = inlined_call_operand.vmem [shape: f32[384,300], index: 5, kind: input, shape index: {}]   ;;  %s25010_s6 = inlined_call_operand.vmem [shape: f32[1,300], index: 6, kind: input, shape index: {}]   ;;  %s25011_s7 = inlined_call_operand.vmem [shape: f32[300,200], index: 7, kind: input, shape index: {}]   ;;  %s25012_s8 = inlined_call_operand.vmem [shape: f32[1,200], index: 8, kind: input, shape index: {}]   ;;  %s25013_s9 = inlined_call_operand.vmem [shape: f32[200,10], index: 9, kind: input, shape index: {}]   ;;  %s25014_s10 = inlined_call_operand.vmem [shape: f32[1,10], index: 10, kind: input, shape index: {}]   ;;  %s25015_s11 = inlined_call_operand.vmem [shape: f32[16,10], index: 11, kind: output, shape index: {}]  }
   0x1   :  { %s24_s18 = sshll.u32 %s19903_s17, 4  ;;  %s19879_s21 = scalar_lea.hbm %s25005_s1, 75264  ;;  %s25_s18 = int_to_ptr.vmem [resolvable:$true] %s24_s18 }
   0x2   :  { %p19880_p0 = scmp.ne.s32.totalorder %s25005_s1, %s19879_s21  ;;  %p19883_p1 = scmp.lt.u32.totalorder %s19879_s21, %s25005_s1 }
   0x4   :  { %p19885_p2 = pnand %p19883_p1, %p19880_p0 }
   0x6   :  { %19888 = shalt.err (!%p19885_p2)
}
   0x7   :  { %s19889_s26 = scalar_lea.vmem %s25_s18, 75264  ;;  %p19894_p4 = scmp.lt.s32.totalorder %s25_s18, %s25_s18 }
   0x8   :  { %p19890_p3 = scmp.ne.s32.totalorder %s25_s18, %s19889_s26  ;;  %p19895_p5 = scmp.lt.s32.totalorder %s19889_s26, %s19889_s26 }
   0xa   :  { %p19896_p6 = por %p19895_p5, %p19894_p4 }
   0xc   :  { %p19897_p7 = pnand %p19896_p6, %p19890_p3 }
   0xe   :  { %19900 = shalt.err (!%p19897_p7)
}
   0xf   :  { %s19904_s27 = smov 768   ;;  %s19905_s28 = smov 48  }
  0x10   :  { %30 = dma.hbm_to_vmem [thread:$0]  %s25005_s1, 75264, %s25_s18, [#allocation3], %s19904_s27, %s19904_s27, %s19905_s28  }
  0x11   :  { %19901 = dma.done.wait [#allocation3], 75264  }
  0x12   :  { %19902 = vsyncadd [#allocation3], 4294892032  ;;  %v19906_v0 = vmov 0   ;;  %v17266_v1 = vld [vmem:[#allocation2 + $0x4] ss:$48 sps:$4 sm:$0xff]   ;;  %vm3753_vm0 = vcmask 130048  }
  0x13   :  { %4017 = vmatprep.mubr.bf16.mxu1 %v19906_v0  ;;  %v17268_v2 = vld [vmem:[#allocation2 + $0x1204] ss:$48 sps:$4 sm:$0xff]   ;;  %3766 = vmatprep.subr.bf16.mxu0 %v17266_v1  ;;  %v17270_v3 = vld [vmem:[#allocation2] ss:$48 sps:$4 sm:$0xff]   ;;  %v17275_v7 = vld [vmem:[#allocation2 + $0x8] ss:$48 sps:$4 sm:$0xff]  }
  0x14   :  { %v17271_v4 = vld [vmem:[#allocation2 + $0x1200] ss:$48 sps:$4 sm:$0xff]   ;;  %3985 = vmatprep.subr.bf16.mxu1 %v17268_v2  ;;  %v17272_v5 = vld [vmem:[#allocation2 + $0x64] ss:$48 sps:$4 sm:$0xff]   ;;  %3767 = vmatpush1.bf16.msra.mxu0 %v17270_v3  ;;  %v17277_v8 = vld [vmem:[#allocation2 + $0xc] ss:$48 sps:$4 sm:$0xff]  }
  0x15   :  { %3986 = vmatpush1.bf16.msra.mxu1 %v17271_v4  ;;  %v17274_v6 = vld [vmem:[%s25004_s0 + $0x18] ss:$28 sps:$4 sm:$0xff]   ;;  %3768 = vmatprep.subr.bf16.mxu0 %v17272_v5  ;;  %v17279_v10 = vld [vmem:[#allocation2 + $0xc4] ss:$48 sps:$4 sm:$0xff]   ;;  %v17281_v11 = vld [vmem:[#allocation2 + $0x68] ss:$48 sps:$4 sm:$0xff]  }
  0x16   :  { %v17278_v9 = vld [vmem:[#allocation2 + $0x60] ss:$48 sps:$4 sm:$0xff]   ;;  %4058 = vmatprep.subr.bf16.mxu1 %v17277_v8  ;;  %v17283_v12 = vld [vmem:[#allocation2 + $0x6c] ss:$48 sps:$4 sm:$0xff]   ;;  %v17285_v14 = vld [vmem:[#allocation2 + $0x124] ss:$48 sps:$4 sm:$0xff]  }
  0x17   :  { %v17284_v13 = vld [vmem:[#allocation2 + $0xc0] ss:$48 sps:$4 sm:$0xff]   ;;  %v17287_v15 = vld [vmem:[#allocation2 + $0xc8] ss:$48 sps:$4 sm:$0xff]   ;;  %v17289_v16 = vld [vmem:[#allocation2 + $0xcc] ss:$48 sps:$4 sm:$0xff]  }
  0x18   :  { %15329 = vmatmul.mubr.msk.bf16.vlgmr.msra.gmra.mrb[0].mxu1 %vm3753_vm0, %v17274_v6  ;;  %3769 = vmatpush1.bf16.msra.mxu0 %v17278_v9  ;;  %v17290_v17 = vld [vmem:[#allocation2 + $0x120] ss:$48 sps:$4 sm:$0xff]   ;;  %v17291_v18 = vld [vmem:[#allocation2 + $0x184] ss:$48 sps:$4 sm:$0xff]   ;;  %v17295_v19 = vld [vmem:[#allocation2 + $0x12c] ss:$48 sps:$4 sm:$0xff]  }
  0x19   :  { %4059 = vmatpush1.bf16.msra.mxu1 %v17275_v7  ;;  %3770 = vmatprep.subr.bf16.mxu0 %v17279_v10  ;;  %v17293_v20 = vld [vmem:[#allocation2 + $0x128] ss:$48 sps:$4 sm:$0xff]   ;;  %v17296_v21 = vld [vmem:[#allocation2 + $0x180] ss:$48 sps:$4 sm:$0xff]   ;;  %v17297_v22 = vld [vmem:[#allocation2 + $0x1e4] ss:$48 sps:$4 sm:$0xff]  }
  0x1a   :  { %4027 = vmatprep.mubr.bf16.mxu1 %v19906_v0  ;;  %4060 = vmatprep.subr.bf16.mxu1 %v17283_v12  ;;  %v17301_v23 = vld [vmem:[#allocation2 + $0x18c] ss:$48 sps:$4 sm:$0xff]   ;;  %v17299_v24 = vld [vmem:[#allocation2 + $0x188] ss:$48 sps:$4 sm:$0xff]   ;;  %v17302_v25 = vld [vmem:[#allocation2 + $0x1e0] ss:$48 sps:$4 sm:$0xff]  }
  0x1b   :  { %v17303_v26 = vld [vmem:[#allocation2 + $0x244] ss:$48 sps:$4 sm:$0xff]   ;;  %v17307_v27 = vld [vmem:[#allocation2 + $0x1ec] ss:$48 sps:$4 sm:$0xff]   ;;  %v17305_v28 = vld [vmem:[#allocation2 + $0x1e8] ss:$48 sps:$4 sm:$0xff]  }
  0x1c   :  { %3771 = vmatpush1.bf16.msra.mxu0 %v17284_v13  ;;  %v17308_v29 = vld [vmem:[#allocation2 + $0x240] ss:$48 sps:$4 sm:$0xff]   ;;  %v17309_v30 = vld [vmem:[#allocation2 + $0x2a4] ss:$48 sps:$4 sm:$0xff]   ;;  %v17313_v31 = vld [vmem:[#allocation2 + $0x24c] ss:$48 sps:$4 sm:$0xff]  }
  0x1d   :  { %4061 = vmatpush1.bf16.msra.mxu1 %v17281_v11  ;;  %3772 = vmatprep.subr.bf16.mxu0 %v17285_v14  ;;  %v17311_v32 = vld [vmem:[#allocation2 + $0x248] ss:$48 sps:$4 sm:$0xff]   ;;  %v17314_v33 = vld [vmem:[#allocation2 + $0x2a0] ss:$48 sps:$4 sm:$0xff]   ;;  %v17315_v34 = vld [vmem:[#allocation2 + $0x304] ss:$48 sps:$4 sm:$0xff]  }
  0x1e   :  { %4062 = vmatprep.subr.bf16.mxu1 %v17289_v16  ;;  %v17319_v35 = vld [vmem:[#allocation2 + $0x2ac] ss:$48 sps:$4 sm:$0xff]   ;;  %v17317_v36 = vld [vmem:[#allocation2 + $0x2a8] ss:$48 sps:$4 sm:$0xff]   ;;  %v17320_v38 = vld [vmem:[#allocation2 + $0x300] ss:$48 sps:$4 sm:$0xff]  }
  0x1f   :  { %v17333_v37 = vld [vmem:[%s25004_s0 + $0x50] ss:$28 sps:$4 sm:$0xff]   ;;  %v17325_v40 = vld [vmem:[#allocation2 + $0x30c] ss:$48 sps:$4 sm:$0xff]   ;;  %v17326_v42 = vld [vmem:[#allocation2 + $0x360] ss:$48 sps:$4 sm:$0xff]  }
  0x20   :  { %3773 = vmatpush1.bf16.msra.mxu0 %v17290_v17  ;;  %v17321_v39 = vld [vmem:[#allocation2 + $0x364] ss:$48 sps:$4 sm:$0xff]   ;;  %15330 = vmatmul.mubr.msk.bf16.gmra.mrb[4].mxu1 %vm3753_vm0, %v17333_v37  ;;  %v17323_v41 = vld [vmem:[#allocation2 + $0x308] ss:$48 sps:$4 sm:$0xff]   ;;  %v17331_v44 = vld [vmem:[#allocation2 + $0x36c] ss:$48 sps:$4 sm:$0xff]  }
  0x21   :  { %4063 = vmatpush1.bf16.msra.mxu1 %v17287_v15  ;;  %3774 = vmatprep.subr.bf16.mxu0 %v17291_v18  ;;  %v17327_v43 = vld [vmem:[#allocation2 + $0x3c4] ss:$48 sps:$4 sm:$0xff]   ;;  %v17346_v45 = vld [vmem:[%s25004_s0 + $0x88] ss:$28 sps:$4 sm:$0xff]   ;;  %v17329_v46 = vld [vmem:[#allocation2 + $0x368] ss:$48 sps:$4 sm:$0xff]  }
  0x22   :  { %4064 = vmatprep.subr.bf16.mxu1 %v17295_v19  ;;  %4037 = vmatprep.mubr.bf16.mxu1 %v19906_v0  ;;  %v17332_v47 = vld [vmem:[#allocation2 + $0x3c0] ss:$48 sps:$4 sm:$0xff]   ;;  %v17334_v48 = vld [vmem:[#allocation2 + $0x424] ss:$48 sps:$4 sm:$0xff]   ;;  %v17338_v49 = vld [vmem:[#allocation2 + $0x3cc] ss:$48 sps:$4 sm:$0xff]  }
  0x23   :  { %v17336_v50 = vld [vmem:[#allocation2 + $0x3c8] ss:$48 sps:$4 sm:$0xff]   ;;  %v17339_v51 = vld [vmem:[#allocation2 + $0x420] ss:$48 sps:$4 sm:$0xff]   ;;  %v17340_v52 = vld [vmem:[#allocation2 + $0x484] ss:$48 sps:$4 sm:$0xff]  }
  0x24   :  { %3775 = vmatpush1.bf16.msra.mxu0 %v17296_v21  ;;  %v17344_v53 = vld [vmem:[#allocation2 + $0x42c] ss:$48 sps:$4 sm:$0xff]   ;;  %v17342_v54 = vld [vmem:[#allocation2 + $0x428] ss:$48 sps:$4 sm:$0xff]   ;;  %v17345_v57 = vld [vmem:[#allocation2 + $0x480] ss:$48 sps:$4 sm:$0xff]  }
  0x25   :  { %4065 = vmatpush1.bf16.msra.mxu1 %v17293_v20  ;;  %3776 = vmatprep.subr.bf16.mxu0 %v17297_v22  ;;  %v17359_v55 = vld [vmem:[%s25004_s0 + $0xc0] ss:$28 sps:$4 sm:$0xff]   ;;  %v17351_v59 = vld [vmem:[#allocation2 + $0x48c] ss:$48 sps:$4 sm:$0xff]   ;;  %v17352_v61 = vld [vmem:[#allocation2 + $0x4e0] ss:$48 sps:$4 sm:$0xff]  }
  0x26   :  { %4066 = vmatprep.subr.bf16.mxu1 %v17301_v23  ;;  %v17366_v56 = vld [vmem:[%s25004_s0 + $0x4] ss:$28 sps:$4 sm:$0xff]   ;;  %v17347_v58 = vld [vmem:[#allocation2 + $0x4e4] ss:$48 sps:$4 sm:$0xff]   ;;  %v17358_v2 = vld [vmem:[#allocation2 + $0x540] ss:$48 sps:$4 sm:$0xff]  }
  0x27   :  { %3798 = vmatprep.mubr.bf16.mxu0 %v17366_v56  ;;  %v17349_v60 = vld [vmem:[#allocation2 + $0x488] ss:$48 sps:$4 sm:$0xff]   ;;  %v17353_v62 = vld [vmem:[#allocation2 + $0x544] ss:$48 sps:$4 sm:$0xff]   ;;  %v17357_v63 = vld [vmem:[#allocation2 + $0x4ec] ss:$48 sps:$4 sm:$0xff]  }
  0x28   :  { %3777 = vmatpush1.bf16.msra.mxu0 %v17302_v25  ;;  %15331 = vmatmul.mubr.msk.bf16.gmra.mrb[8].mxu1 %vm3753_vm0, %v17346_v45  ;;  %v17355_v1 = vld [vmem:[#allocation2 + $0x4e8] ss:$48 sps:$4 sm:$0xff]   ;;  %v17360_v3 = vld [vmem:[#allocation2 + $0x5a4] ss:$48 sps:$4 sm:$0xff]   ;;  %v17364_v4 = vld [vmem:[#allocation2 + $0x54c] ss:$48 sps:$4 sm:$0xff]  }
  0x29   :  { %4067 = vmatpush1.bf16.msra.mxu1 %v17299_v24  ;;  %3778 = vmatprep.subr.bf16.mxu0 %v17303_v26  ;;  %v17362_v5 = vld [vmem:[#allocation2 + $0x548] ss:$48 sps:$4 sm:$0xff]   ;;  %v17365_v6 = vld [vmem:[#allocation2 + $0x5a0] ss:$48 sps:$4 sm:$0xff]   ;;  %v17370_v7 = vld [vmem:[#allocation2 + $0x604] ss:$48 sps:$4 sm:$0xff]  }
  0x2a   :  { %4068 = vmatprep.subr.bf16.mxu1 %v17307_v27  ;;  %4047 = vmatprep.mubr.bf16.mxu1 %v19906_v0  ;;  %v17373_v8 = vld [vmem:[#allocation2 + $0x5ac] ss:$48 sps:$4 sm:$0xff]   ;;  %v17368_v9 = vld [vmem:[#allocation2 + $0x600] ss:$48 sps:$4 sm:$0xff]   ;;  %v17371_v10 = vld [vmem:[#allocation2 + $0x5a8] ss:$48 sps:$4 sm:$0xff]  }
  0x2b   :  { %v17374_v11 = vld [vmem:[%s25004_s0] ss:$28 sps:$4 sm:$0xff]   ;;  %v17380_v13 = vld [vmem:[#allocation2 + $0x60c] ss:$48 sps:$4 sm:$0xff]   ;;  %v17375_v14 = vld [vmem:[#allocation2 + $0x660] ss:$48 sps:$4 sm:$0xff]  }
  0x2c   :  { %3779 = vmatpush1.bf16.msra.mxu0 %v17308_v29  ;;  %v17377_v12 = vld [vmem:[#allocation2 + $0x664] ss:$48 sps:$4 sm:$0xff]   ;;  %v17378_v15 = vld [vmem:[#allocation2 + $0x608] ss:$48 sps:$4 sm:$0xff]   ;;  %v17386_v17 = vld [vmem:[#allocation2 + $0x66c] ss:$48 sps:$4 sm:$0xff]  }
  0x2d   :  { %4069 = vmatpush1.bf16.msra.mxu1 %v17305_v28  ;;  %3780 = vmatprep.subr.bf16.mxu0 %v17309_v30  ;;  %v17383_v16 = vld [vmem:[#allocation2 + $0x6c4] ss:$48 sps:$4 sm:$0xff]   ;;  %v17381_v18 = vld [vmem:[#allocation2 + $0x6c0] ss:$48 sps:$4 sm:$0xff]   ;;  %v17384_v19 = vld [vmem:[#allocation2 + $0x668] ss:$48 sps:$4 sm:$0xff]  }
  0x2e   :  { %4070 = vmatprep.subr.bf16.mxu1 %v17313_v31  ;;  %v17389_v20 = vld [vmem:[#allocation2 + $0x724] ss:$48 sps:$4 sm:$0xff]   ;;  %v17392_v21 = vld [vmem:[#allocation2 + $0x6cc] ss:$48 sps:$4 sm:$0xff]   ;;  %v17387_v22 = vld [vmem:[#allocation2 + $0x720] ss:$48 sps:$4 sm:$0xff]  }
  0x2f   :  { %v17429_v23 = vld [vmem:[%s25004_s0 + $0x3c] ss:$28 sps:$4 sm:$0xff]   ;;  %v17390_v24 = vld [vmem:[#allocation2 + $0x6c8] ss:$48 sps:$4 sm:$0xff]   ;;  %v17398_v26 = vld [vmem:[#allocation2 + $0x72c] ss:$48 sps:$4 sm:$0xff]  }
  0x30   :  { %3781 = vmatpush1.bf16.msra.mxu0 %v17314_v33  ;;  %15332 = vmatmul.mubr.msk.bf16.gmra.mrb[12].mxu1 %vm3753_vm0, %v17359_v55  ;;  %v17395_v25 = vld [vmem:[#allocation2 + $0x784] ss:$48 sps:$4 sm:$0xff]   ;;  %v17437_v27 = vld [vmem:[%s25004_s0 + $0x38] ss:$28 sps:$4 sm:$0xff]   ;;  %v17396_v29 = vld [vmem:[#allocation2 + $0x728] ss:$48 sps:$4 sm:$0xff]  }
  0x31   :  { %4071 = vmatpush1.bf16.msra.mxu1 %v17311_v32  ;;  %3782 = vmatprep.subr.bf16.mxu0 %v17315_v34  ;;  %v17393_v28 = vld [vmem:[#allocation2 + $0x780] ss:$48 sps:$4 sm:$0xff]   ;;  %v17401_v30 = vld [vmem:[#allocation2 + $0x7e4] ss:$48 sps:$4 sm:$0xff]   ;;  %v17404_v31 = vld [vmem:[#allocation2 + $0x78c] ss:$48 sps:$4 sm:$0xff]  }
  0x32   :  { %4072 = vmatprep.subr.bf16.mxu1 %v17319_v35  ;;  %4090 = vmatprep.mubr.bf16.mxu1 %v17366_v56  ;;  %v17444_v32 = vld [vmem:[%s25004_s0 + $0x74] ss:$28 sps:$4 sm:$0xff]   ;;  %v17399_v33 = vld [vmem:[#allocation2 + $0x7e0] ss:$48 sps:$4 sm:$0xff]   ;;  %v17407_v35 = vld [vmem:[#allocation2 + $0x844] ss:$48 sps:$4 sm:$0xff]  }
  0x33   :  { %v17402_v34 = vld [vmem:[#allocation2 + $0x788] ss:$48 sps:$4 sm:$0xff]   ;;  %v17405_v37 = vld [vmem:[#allocation2 + $0x840] ss:$48 sps:$4 sm:$0xff]   ;;  %v17419_v45 = vld [vmem:[#allocation2 + $0x904] ss:$48 sps:$4 sm:$0xff]  }
  0x34   :  { %3783 = vmatpush1.bf16.msra.mxu0 %v17320_v38  ;;  %v17452_v38 = vld [vmem:[%s25004_s0 + $0x70] ss:$28 sps:$4 sm:$0xff]   ;;  %v17436_v56 = vld [vmem:[#allocation2 + $0x96c] ss:$48 sps:$4 sm:$0xff]   ;;  %vm12258_vm1 = vcmask 261120   ;;  %vm14400_vm2 = vcmask 1043456  }
  0x35   :  { %4073 = vmatpush1.bf16.msra.mxu1 %v17317_v36  ;;  %3784 = vmatprep.subr.bf16.mxu0 %v17321_v39  ;;  %v17410_v36 = vld [vmem:[#allocation2 + $0x7ec] ss:$48 sps:$4 sm:$0xff]   ;;  %v17408_v39 = vld [vmem:[#allocation2 + $0x7e8] ss:$48 sps:$4 sm:$0xff]   ;;  %v17433_v55 = vld [vmem:[#allocation2 + $0x9c4] ss:$48 sps:$4 sm:$0xff]  }
  0x36   :  { %4074 = vmatprep.subr.bf16.mxu1 %v17325_v40  ;;  %v17413_v40 = vld [vmem:[#allocation2 + $0x8a4] ss:$48 sps:$4 sm:$0xff]   ;;  %vm19908_vm3 = vmmov 1   ;;  %vm14393_vm5 = vcmask 359424   ;;  %vm14597_vm6 = vcmask 588800   ;;  %vm14679_vm7 = vcmask 80896  }
  0x37   :  { %vm16770_vm4 = vmpackc.low %vm14400_vm2, %vm19908_vm3 }
  0x38   :  { %3785 = vmatpush1.bf16.msra.mxu0 %v17326_v42  ;;  %v17416_v42 = vld [vmem:[#allocation2 + $0x84c] ss:$48 sps:$4 sm:$0xff]  }
  0x39   :  { %4075 = vmatpush1.bf16.msra.mxu1 %v17323_v41  ;;  %3786 = vmatprep.subr.bf16.mxu0 %v17327_v43  ;;  %v17459_v41 = vld [vmem:[%s25004_s0 + $0xac] ss:$28 sps:$4 sm:$0xff]  }
  0x3a   :  { %4076 = vmatprep.subr.bf16.mxu1 %v17331_v44  ;;  %v17411_v43 = vld [vmem:[#allocation2 + $0x8a0] ss:$48 sps:$4 sm:$0xff]   ;;  %v17414_v44 = vld [vmem:[#allocation2 + $0x848] ss:$48 sps:$4 sm:$0xff]  }
  0x3c   :  { %3787 = vmatpush1.bf16.msra.mxu0 %v17332_v47  ;;  %v17417_v47 = vld [vmem:[#allocation2 + $0x900] ss:$48 sps:$4 sm:$0xff]  }
  0x3d   :  { %4077 = vmatpush1.bf16.msra.mxu1 %v17329_v46  ;;  %3788 = vmatprep.subr.bf16.mxu0 %v17334_v48  ;;  %v17422_v46 = vld [vmem:[#allocation2 + $0x8ac] ss:$48 sps:$4 sm:$0xff]  }
  0x3e   :  { %4078 = vmatprep.subr.bf16.mxu1 %v17338_v49  ;;  %v17467_v48 = vld [vmem:[%s25004_s0 + $0xa8] ss:$28 sps:$4 sm:$0xff]  }
  0x3f   :  { %v17474_v49 = vld [vmem:[%s25004_s0 + $0xc] ss:$28 sps:$4 sm:$0xff]  }
  0x40   :  { %3789 = vmatpush1.bf16.msra.mxu0 %v17339_v51  ;;  %v17425_v51 = vld [vmem:[#allocation2 + $0x964] ss:$48 sps:$4 sm:$0xff]  }
  0x41   :  { %4079 = vmatpush1.bf16.msra.mxu1 %v17336_v50  ;;  %3790 = vmatprep.subr.bf16.mxu0 %v17340_v52  ;;  %v17420_v50 = vld [vmem:[#allocation2 + $0x8a8] ss:$48 sps:$4 sm:$0xff]   ;;  %v17428_v52 = vld [vmem:[#allocation2 + $0x90c] ss:$48 sps:$4 sm:$0xff]  }
  0x42   :  { %4080 = vmatprep.subr.bf16.mxu1 %v17344_v53  ;;  %v17423_v53 = vld [vmem:[#allocation2 + $0x960] ss:$48 sps:$4 sm:$0xff]  }
  0x44   :  { %3791 = vmatpush1.bf16.msra.mxu0 %v17345_v57  ;;  %v17431_v57 = vld [vmem:[#allocation2 + $0x9c0] ss:$48 sps:$4 sm:$0xff]  }
  0x45   :  { %4081 = vmatpush1.bf16.msra.mxu1 %v17342_v54  ;;  %3792 = vmatprep.subr.bf16.mxu0 %v17347_v58  ;;  %v17426_v54 = vld [vmem:[#allocation2 + $0x908] ss:$48 sps:$4 sm:$0xff]  }
  0x46   :  { %4082 = vmatprep.subr.bf16.mxu1 %v17351_v59  ;;  %v17434_v58 = vld [vmem:[#allocation2 + $0x968] ss:$48 sps:$4 sm:$0xff]   ;;  %v17440_v59 = vld [vmem:[#allocation2 + $0xa24] ss:$48 sps:$4 sm:$0xff]  }
  0x48   :  { %3793 = vmatpush1.bf16.msra.mxu0 %v17352_v61  ;;  %v17438_v61 = vld [vmem:[#allocation2 + $0xa20] ss:$48 sps:$4 sm:$0xff]  }
  0x49   :  { %4083 = vmatpush1.bf16.msra.mxu1 %v17349_v60  ;;  %3794 = vmatprep.subr.bf16.mxu0 %v17353_v62  ;;  %v17443_v60 = vld [vmem:[#allocation2 + $0x9cc] ss:$48 sps:$4 sm:$0xff]   ;;  %v17441_v62 = vld [vmem:[#allocation2 + $0x9c8] ss:$48 sps:$4 sm:$0xff]  }
  0x4a   :  { %4084 = vmatprep.subr.bf16.mxu1 %v17357_v63  ;;  %v17448_v63 = vld [vmem:[#allocation2 + $0xa84] ss:$48 sps:$4 sm:$0xff]  }
  0x4c   :  { %3795 = vmatpush1.bf16.msra.mxu0 %v17358_v2  ;;  %v17446_v2 = vld [vmem:[#allocation2 + $0xa80] ss:$48 sps:$4 sm:$0xff]  }
  0x4d   :  { %4085 = vmatpush1.bf16.msra.mxu1 %v17355_v1  ;;  %3796 = vmatprep.subr.bf16.mxu0 %v17360_v3  ;;  %v17451_v1 = vld [vmem:[#allocation2 + $0xa2c] ss:$48 sps:$4 sm:$0xff]   ;;  %v17449_v3 = vld [vmem:[#allocation2 + $0xa28] ss:$48 sps:$4 sm:$0xff]  }
  0x4e   :  { %4086 = vmatprep.subr.bf16.mxu1 %v17364_v4  ;;  %v17455_v4 = vld [vmem:[#allocation2 + $0xae4] ss:$48 sps:$4 sm:$0xff]  }
  0x50   :  { %3797 = vmatpush1.bf16.msra.mxu0 %v17365_v6  ;;  %v17453_v6 = vld [vmem:[#allocation2 + $0xae0] ss:$48 sps:$4 sm:$0xff]  }
  0x51   :  { %4087 = vmatpush1.bf16.msra.mxu1 %v17362_v5  ;;  %3839 = vmatprep.subr.bf16.mxu0 %v17370_v7  ;;  %v17458_v5 = vld [vmem:[#allocation2 + $0xa8c] ss:$48 sps:$4 sm:$0xff]   ;;  %v17456_v7 = vld [vmem:[#allocation2 + $0xa88] ss:$48 sps:$4 sm:$0xff]  }
  0x52   :  { %4088 = vmatprep.subr.bf16.mxu1 %v17373_v8  ;;  %v17463_v8 = vld [vmem:[#allocation2 + $0xb44] ss:$48 sps:$4 sm:$0xff]  }
  0x53   :  { %3799 = vmatmul.mubr.bf16.vlgmr.msra.gmra.mrb[0].mxu0 %v17374_v11 }
  0x54   :  { %3840 = vmatpush1.bf16.msra.mxu0 %v17368_v9  ;;  %3808 = vmatprep.mubr.bf16.mxu0 %v17429_v23  ;;  %v17466_v9 = vld [vmem:[#allocation2 + $0xaec] ss:$48 sps:$4 sm:$0xff]  }
  0x55   :  { %4089 = vmatpush1.bf16.msra.mxu1 %v17371_v10  ;;  %3841 = vmatprep.subr.bf16.mxu0 %v17377_v12  ;;  %v17461_v10 = vld [vmem:[#allocation2 + $0xb40] ss:$48 sps:$4 sm:$0xff]   ;;  %v17470_v12 = vld [vmem:[#allocation2 + $0xba4] ss:$48 sps:$4 sm:$0xff]  }
  0x56   :  { %4131 = vmatprep.subr.bf16.mxu1 %v17380_v13  ;;  %v17473_v13 = vld [vmem:[#allocation2 + $0xb4c] ss:$48 sps:$4 sm:$0xff]  }
  0x58   :  { %4091 = vmatmul.mubr.bf16.vlgmr.msra.gmra.mrb[16].mxu1 %v17374_v11  ;;  %3842 = vmatpush1.bf16.msra.mxu0 %v17375_v14  ;;  %v17464_v11 = vld [vmem:[#allocation2 + $0xae8] ss:$48 sps:$4 sm:$0xff]   ;;  %v17468_v14 = vld [vmem:[#allocation2 + $0xba0] ss:$48 sps:$4 sm:$0xff]  }
  0x59   :  { %4132 = vmatpush1.bf16.msra.mxu1 %v17378_v15  ;;  %3843 = vmatprep.subr.bf16.mxu0 %v17383_v16  ;;  %v17471_v15 = vld [vmem:[#allocation2 + $0xb48] ss:$48 sps:$4 sm:$0xff]   ;;  %v17478_v16 = vld [vmem:[#allocation2 + $0xc04] ss:$48 sps:$4 sm:$0xff]  }
  0x5a   :  { %4133 = vmatprep.subr.bf16.mxu1 %v17386_v17  ;;  %4100 = vmatprep.mubr.bf16.mxu1 %v17429_v23  ;;  %v17481_v17 = vld [vmem:[#allocation2 + $0xbac] ss:$48 sps:$4 sm:$0xff]  }
  0x5b   :  { %3809 = vmatmul.mubr.bf16.gmra.mrb[4].mxu0 %v17437_v27  ;;  %v17537_v23 = vld [vmem:[%s25004_s0 + $0x44] ss:$28 sps:$4 sm:$0xff]  }
  0x5c   :  { %3844 = vmatpush1.bf16.msra.mxu0 %v17381_v18  ;;  %3818 = vmatprep.mubr.bf16.mxu0 %v17444_v32  ;;  %v17476_v18 = vld [vmem:[#allocation2 + $0xc00] ss:$48 sps:$4 sm:$0xff]  }
  0x5d   :  { %4134 = vmatpush1.bf16.msra.mxu1 %v17384_v19  ;;  %3845 = vmatprep.subr.bf16.mxu0 %v17389_v20  ;;  %v17479_v19 = vld [vmem:[#allocation2 + $0xba8] ss:$48 sps:$4 sm:$0xff]   ;;  %v17482_v20 = vld [vmem:[%s25004_s0 + $0x8] ss:$28 sps:$4 sm:$0xff]  }
  0x5e   :  { %4135 = vmatprep.subr.bf16.mxu1 %v17392_v21  ;;  %v17485_v21 = vld [vmem:[#allocation2 + $0xc64] ss:$48 sps:$4 sm:$0xff]  }
  0x60   :  { %3846 = vmatpush1.bf16.msra.mxu0 %v17387_v22  ;;  %4101 = vmatmul.mubr.bf16.gmra.mrb[20].mxu1 %v17437_v27  ;;  %v17488_v22 = vld [vmem:[#allocation2 + $0xc0c] ss:$48 sps:$4 sm:$0xff]  }
  0x61   :  { %4136 = vmatpush1.bf16.msra.mxu1 %v17390_v24  ;;  %3847 = vmatprep.subr.bf16.mxu0 %v17395_v25  ;;  %v17483_v24 = vld [vmem:[#allocation2 + $0xc60] ss:$48 sps:$4 sm:$0xff]   ;;  %v17486_v25 = vld [vmem:[#allocation2 + $0xc08] ss:$48 sps:$4 sm:$0xff]   ;;  %v17494_v27 = vld [vmem:[#allocation2 + $0xc6c] ss:$48 sps:$4 sm:$0xff]  }
  0x62   :  { %4137 = vmatprep.subr.bf16.mxu1 %v17398_v26  ;;  %4110 = vmatprep.mubr.bf16.mxu1 %v17444_v32  ;;  %v17491_v26 = vld [vmem:[#allocation2 + $0xcc4] ss:$48 sps:$4 sm:$0xff]   ;;  %v17500_v32 = vld [vmem:[#allocation2 + $0xccc] ss:$48 sps:$4 sm:$0xff]  }
  0x63   :  { %3819 = vmatmul.mubr.bf16.gmra.mrb[8].mxu0 %v17452_v38 }
  0x64   :  { %3848 = vmatpush1.bf16.msra.mxu0 %v17393_v28  ;;  %3828 = vmatprep.mubr.bf16.mxu0 %v17459_v41  ;;  %v17489_v28 = vld [vmem:[#allocation2 + $0xcc0] ss:$48 sps:$4 sm:$0xff]  }
  0x65   :  { %4138 = vmatpush1.bf16.msra.mxu1 %v17396_v29  ;;  %3849 = vmatprep.subr.bf16.mxu0 %v17401_v30  ;;  %v17492_v29 = vld [vmem:[#allocation2 + $0xc68] ss:$48 sps:$4 sm:$0xff]  }
  0x66   :  { %4139 = vmatprep.subr.bf16.mxu1 %v17404_v31  ;;  %v17539_v30 = vld [vmem:[%s25004_s0 + $0x40] ss:$28 sps:$4 sm:$0xff]  }
  0x67   :  { %v17497_v31 = vld [vmem:[#allocation2 + $0xd24] ss:$48 sps:$4 sm:$0xff]  }
  0x68   :  { %3850 = vmatpush1.bf16.msra.mxu0 %v17399_v33  ;;  %4111 = vmatmul.mubr.bf16.gmra.mrb[24].mxu1 %v17452_v38  ;;  %v17552_v33 = vld [vmem:[%s25004_s0 + $0x7c] ss:$28 sps:$4 sm:$0xff]  }
  0x69   :  { %4140 = vmatpush1.bf16.msra.mxu1 %v17402_v34  ;;  %3851 = vmatprep.subr.bf16.mxu0 %v17407_v35  ;;  %v17495_v34 = vld [vmem:[#allocation2 + $0xd20] ss:$48 sps:$4 sm:$0xff]   ;;  %v17498_v35 = vld [vmem:[#allocation2 + $0xcc8] ss:$48 sps:$4 sm:$0xff]  }
  0x6a   :  { %4141 = vmatprep.subr.bf16.mxu1 %v17410_v36  ;;  %4120 = vmatprep.mubr.bf16.mxu1 %v17459_v41  ;;  %v17503_v36 = vld [vmem:[#allocation2 + $0xd84] ss:$48 sps:$4 sm:$0xff]   ;;  %v17501_v38 = vld [vmem:[#allocation2 + $0xd80] ss:$48 sps:$4 sm:$0xff]  }
  0x6b   :  { %3829 = vmatmul.mubr.bf16.gmra.mrb[12].mxu0 %v17467_v48  ;;  %v17509_v41 = vld [vmem:[#allocation2 + $0xde4] ss:$48 sps:$4 sm:$0xff]  }
  0x6c   :  { %3852 = vmatpush1.bf16.msra.mxu0 %v17405_v37  ;;  %3871 = vmatprep.mubr.bf16.mxu0 %v17474_v49  ;;  %v17506_v37 = vld [vmem:[#allocation2 + $0xd2c] ss:$48 sps:$4 sm:$0xff]  }
  0x6d   :  { %4142 = vmatpush1.bf16.msra.mxu1 %v17408_v39  ;;  %3853 = vmatprep.subr.bf16.mxu0 %v17413_v40  ;;  %v17504_v39 = vld [vmem:[#allocation2 + $0xd28] ss:$48 sps:$4 sm:$0xff]   ;;  %v17554_v40 = vld [vmem:[%s25004_s0 + $0x78] ss:$28 sps:$4 sm:$0xff]  }
  0x6e   :  { %4143 = vmatprep.subr.bf16.mxu1 %v17416_v42  ;;  %v17512_v42 = vld [vmem:[#allocation2 + $0xd8c] ss:$48 sps:$4 sm:$0xff]  }
  0x70   :  { %3854 = vmatpush1.bf16.msra.mxu0 %v17411_v43  ;;  %4121 = vmatmul.mubr.bf16.gmra.mrb[28].mxu1 %v17467_v48  ;;  %v17567_v43 = vld [vmem:[%s25004_s0 + $0xb4] ss:$28 sps:$4 sm:$0xff]   ;;  %v17513_v48 = vld [vmem:[#allocation2 + $0xe40] ss:$48 sps:$4 sm:$0xff]  }
  0x71   :  { %4144 = vmatpush1.bf16.msra.mxu1 %v17414_v44  ;;  %3855 = vmatprep.subr.bf16.mxu0 %v17419_v45  ;;  %v17507_v44 = vld [vmem:[#allocation2 + $0xde0] ss:$48 sps:$4 sm:$0xff]   ;;  %v17510_v45 = vld [vmem:[#allocation2 + $0xd88] ss:$48 sps:$4 sm:$0xff]  }
  0x72   :  { %4145 = vmatprep.subr.bf16.mxu1 %v17422_v46  ;;  %4163 = vmatprep.mubr.bf16.mxu1 %v17474_v49  ;;  %v17515_v46 = vld [vmem:[#allocation2 + $0xe44] ss:$48 sps:$4 sm:$0xff]   ;;  %v17516_v49 = vld [vmem:[#allocation2 + $0xde8] ss:$48 sps:$4 sm:$0xff]  }
  0x74   :  { %3856 = vmatpush1.bf16.msra.mxu0 %v17417_v47  ;;  %v17518_v47 = vld [vmem:[#allocation2 + $0xdec] ss:$48 sps:$4 sm:$0xff]  }
  0x75   :  { %4146 = vmatpush1.bf16.msra.mxu1 %v17420_v50  ;;  %3857 = vmatprep.subr.bf16.mxu0 %v17425_v51  ;;  %v17569_v50 = vld [vmem:[%s25004_s0 + $0xb0] ss:$28 sps:$4 sm:$0xff]  }
  0x76   :  { %4147 = vmatprep.subr.bf16.mxu1 %v17428_v52  ;;  %v17521_v51 = vld [vmem:[#allocation2 + $0xea4] ss:$48 sps:$4 sm:$0xff]   ;;  %v17524_v52 = vld [vmem:[#allocation2 + $0xe4c] ss:$48 sps:$4 sm:$0xff]  }
  0x78   :  { %3858 = vmatpush1.bf16.msra.mxu0 %v17423_v53  ;;  %v17582_v53 = vld [vmem:[%s25004_s0 + $0x14] ss:$28 sps:$4 sm:$0xff]  }
  0x79   :  { %4148 = vmatpush1.bf16.msra.mxu1 %v17426_v54  ;;  %3859 = vmatprep.subr.bf16.mxu0 %v17433_v55  ;;  %v17519_v54 = vld [vmem:[#allocation2 + $0xea0] ss:$48 sps:$4 sm:$0xff]   ;;  %v17522_v55 = vld [vmem:[#allocation2 + $0xe48] ss:$48 sps:$4 sm:$0xff]  }
  0x7a   :  { %4149 = vmatprep.subr.bf16.mxu1 %v17436_v56  ;;  %v17527_v56 = vld [vmem:[#allocation2 + $0xf04] ss:$48 sps:$4 sm:$0xff]  }
  0x7c   :  { %3860 = vmatpush1.bf16.msra.mxu0 %v17431_v57  ;;  %v17530_v57 = vld [vmem:[#allocation2 + $0xeac] ss:$48 sps:$4 sm:$0xff]  }
  0x7d   :  { %4150 = vmatpush1.bf16.msra.mxu1 %v17434_v58  ;;  %3861 = vmatprep.subr.bf16.mxu0 %v17440_v59  ;;  %v17525_v58 = vld [vmem:[#allocation2 + $0xf00] ss:$48 sps:$4 sm:$0xff]   ;;  %v17528_v59 = vld [vmem:[#allocation2 + $0xea8] ss:$48 sps:$4 sm:$0xff]  }
  0x7e   :  { %4151 = vmatprep.subr.bf16.mxu1 %v17443_v60  ;;  %v17533_v60 = vld [vmem:[#allocation2 + $0xf64] ss:$48 sps:$4 sm:$0xff]  }
  0x80   :  { %3862 = vmatpush1.bf16.msra.mxu0 %v17438_v61  ;;  %v17536_v61 = vld [vmem:[#allocation2 + $0xf0c] ss:$48 sps:$4 sm:$0xff]  }
  0x81   :  { %4152 = vmatpush1.bf16.msra.mxu1 %v17441_v62  ;;  %3863 = vmatprep.subr.bf16.mxu0 %v17448_v63  ;;  %v17531_v62 = vld [vmem:[#allocation2 + $0xf60] ss:$48 sps:$4 sm:$0xff]   ;;  %v17534_v63 = vld [vmem:[#allocation2 + $0xf08] ss:$48 sps:$4 sm:$0xff]  }
  0x82   :  { %4153 = vmatprep.subr.bf16.mxu1 %v17451_v1  ;;  %v17542_v1 = vld [vmem:[#allocation2 + $0xfc4] ss:$48 sps:$4 sm:$0xff]  }
  0x84   :  { %3864 = vmatpush1.bf16.msra.mxu0 %v17446_v2  ;;  %v17545_v2 = vld [vmem:[#allocation2 + $0xf6c] ss:$48 sps:$4 sm:$0xff]  }
  0x85   :  { %4154 = vmatpush1.bf16.msra.mxu1 %v17449_v3  ;;  %3865 = vmatprep.subr.bf16.mxu0 %v17455_v4  ;;  %v17540_v3 = vld [vmem:[#allocation2 + $0xfc0] ss:$48 sps:$4 sm:$0xff]   ;;  %v17543_v4 = vld [vmem:[#allocation2 + $0xf68] ss:$48 sps:$4 sm:$0xff]  }
  0x86   :  { %4155 = vmatprep.subr.bf16.mxu1 %v17458_v5  ;;  %v17548_v5 = vld [vmem:[#allocation2 + $0x1024] ss:$48 sps:$4 sm:$0xff]  }
  0x88   :  { %3866 = vmatpush1.bf16.msra.mxu0 %v17453_v6  ;;  %v17551_v6 = vld [vmem:[#allocation2 + $0xfcc] ss:$48 sps:$4 sm:$0xff]  }
  0x89   :  { %4156 = vmatpush1.bf16.msra.mxu1 %v17456_v7  ;;  %3867 = vmatprep.subr.bf16.mxu0 %v17463_v8  ;;  %v17546_v7 = vld [vmem:[#allocation2 + $0x1020] ss:$48 sps:$4 sm:$0xff]   ;;  %v17549_v8 = vld [vmem:[#allocation2 + $0xfc8] ss:$48 sps:$4 sm:$0xff]  }
  0x8a   :  { %4157 = vmatprep.subr.bf16.mxu1 %v17466_v9  ;;  %v17557_v9 = vld [vmem:[#allocation2 + $0x1084] ss:$48 sps:$4 sm:$0xff]  }
  0x8c   :  { %3868 = vmatpush1.bf16.msra.mxu0 %v17461_v10  ;;  %v17560_v10 = vld [vmem:[#allocation2 + $0x102c] ss:$48 sps:$4 sm:$0xff]  }
  0x8d   :  { %4158 = vmatpush1.bf16.msra.mxu1 %v17464_v11  ;;  %3869 = vmatprep.subr.bf16.mxu0 %v17470_v12  ;;  %v17555_v11 = vld [vmem:[#allocation2 + $0x1080] ss:$48 sps:$4 sm:$0xff]   ;;  %v17558_v12 = vld [vmem:[#allocation2 + $0x1028] ss:$48 sps:$4 sm:$0xff]  }
  0x8e   :  { %4159 = vmatprep.subr.bf16.mxu1 %v17473_v13  ;;  %v17563_v13 = vld [vmem:[#allocation2 + $0x10e4] ss:$48 sps:$4 sm:$0xff]  }
  0x90   :  { %3870 = vmatpush1.bf16.msra.mxu0 %v17468_v14  ;;  %v17566_v14 = vld [vmem:[#allocation2 + $0x108c] ss:$48 sps:$4 sm:$0xff]  }
  0x91   :  { %4160 = vmatpush1.bf16.msra.mxu1 %v17471_v15  ;;  %3912 = vmatprep.subr.bf16.mxu0 %v17478_v16  ;;  %v17561_v15 = vld [vmem:[#allocation2 + $0x10e0] ss:$48 sps:$4 sm:$0xff]   ;;  %v17564_v16 = vld [vmem:[#allocation2 + $0x1088] ss:$48 sps:$4 sm:$0xff]  }
  0x92   :  { %4161 = vmatprep.subr.bf16.mxu1 %v17481_v17  ;;  %v17572_v17 = vld [vmem:[#allocation2 + $0x1144] ss:$48 sps:$4 sm:$0xff]  }
  0x93   :  { %3872 = vmatmul.mubr.bf16.vlgmr.msra.gmra.mrb[0].mxu0 %v17482_v20 }
  0x94   :  { %3913 = vmatpush1.bf16.msra.mxu0 %v17476_v18  ;;  %3881 = vmatprep.mubr.bf16.mxu0 %v17537_v23  ;;  %v17575_v18 = vld [vmem:[#allocation2 + $0x10ec] ss:$48 sps:$4 sm:$0xff]  }
  0x95   :  { %4162 = vmatpush1.bf16.msra.mxu1 %v17479_v19  ;;  %3914 = vmatprep.subr.bf16.mxu0 %v17485_v21  ;;  %v17570_v19 = vld [vmem:[#allocation2 + $0x1140] ss:$48 sps:$4 sm:$0xff]   ;;  %v17578_v21 = vld [vmem:[#allocation2 + $0x11a4] ss:$48 sps:$4 sm:$0xff]  }
  0x96   :  { %4204 = vmatprep.subr.bf16.mxu1 %v17488_v22  ;;  %v17581_v22 = vld [vmem:[#allocation2 + $0x114c] ss:$48 sps:$4 sm:$0xff]  }
  0x98   :  { %4164 = vmatmul.mubr.bf16.vlgmr.msra.gmra.mrb[16].mxu1 %v17482_v20  ;;  %3915 = vmatpush1.bf16.msra.mxu0 %v17483_v24  ;;  %v17573_v20 = vld [vmem:[#allocation2 + $0x10e8] ss:$48 sps:$4 sm:$0xff]  }
  0x99   :  { %4205 = vmatpush1.bf16.msra.mxu1 %v17486_v25  ;;  %3916 = vmatprep.subr.bf16.mxu0 %v17491_v26  ;;  %v17579_v24 = vld [vmem:[#allocation2 + $0x1148] ss:$48 sps:$4 sm:$0xff]   ;;  %v17587_v25 = vld [vmem:[#allocation2 + $0x11ac] ss:$48 sps:$4 sm:$0xff]   ;;  %v17590_v26 = vld [vmem:[#allocation2 + $0x14] ss:$48 sps:$4 sm:$0xff]  }
  0x9a   :  { %4206 = vmatprep.subr.bf16.mxu1 %v17494_v27  ;;  %4173 = vmatprep.mubr.bf16.mxu1 %v17537_v23  ;;  %v17576_v23 = vld [vmem:[#allocation2 + $0x11a0] ss:$48 sps:$4 sm:$0xff]   ;;  %v17584_v27 = vld [vmem:[%s25004_s0 + $0x10] ss:$28 sps:$4 sm:$0xff]  }
  0x9b   :  { %3882 = vmatmul.mubr.bf16.gmra.mrb[4].mxu0 %v17539_v30 }
  0x9c   :  { %3917 = vmatpush1.bf16.msra.mxu0 %v17489_v28  ;;  %3891 = vmatprep.mubr.bf16.mxu0 %v17552_v33  ;;  %v17585_v28 = vld [vmem:[#allocation2 + $0x11a8] ss:$48 sps:$4 sm:$0xff]  }
  0x9d   :  { %4207 = vmatpush1.bf16.msra.mxu1 %v17492_v29  ;;  %3918 = vmatprep.subr.bf16.mxu0 %v17497_v31  ;;  %v17588_v29 = vld [vmem:[#allocation2 + $0x10] ss:$48 sps:$4 sm:$0xff]   ;;  %v17596_v31 = vld [vmem:[#allocation2 + $0x74] ss:$48 sps:$4 sm:$0xff]  }
  0x9e   :  { %4208 = vmatprep.subr.bf16.mxu1 %v17500_v32  ;;  %v17597_v32 = vld [vmem:[%s25004_s0 + $0x4c] ss:$28 sps:$4 sm:$0xff]  }
  0xa0   :  { %4174 = vmatmul.mubr.bf16.gmra.mrb[20].mxu1 %v17539_v30  ;;  %3919 = vmatpush1.bf16.msra.mxu0 %v17495_v34  ;;  %v17593_v30 = vld [vmem:[#allocation2 + $0x120c] ss:$48 sps:$4 sm:$0xff]   ;;  %v17594_v34 = vld [vmem:[#allocation2 + $0x70] ss:$48 sps:$4 sm:$0xff]  }
  0xa1   :  { %4209 = vmatpush1.bf16.msra.mxu1 %v17498_v35  ;;  %3920 = vmatprep.subr.bf16.mxu0 %v17503_v36  ;;  %v17602_v35 = vld [vmem:[#allocation2 + $0xd4] ss:$48 sps:$4 sm:$0xff]   ;;  %v17629_v36 = vld [vmem:[#allocation2 + $0x1c] ss:$48 sps:$4 sm:$0xff]  }
  0xa2   :  { %4210 = vmatprep.subr.bf16.mxu1 %v17506_v37  ;;  %4183 = vmatprep.mubr.bf16.mxu1 %v17552_v33  ;;  %v17591_v33 = vld [vmem:[#allocation2 + $0x1208] ss:$48 sps:$4 sm:$0xff]   ;;  %v17599_v37 = vld [vmem:[%s25004_s0 + $0x48] ss:$28 sps:$4 sm:$0xff]  }
  0xa3   :  { %3892 = vmatmul.mubr.bf16.gmra.mrb[8].mxu0 %v17554_v40 }
  0xa4   :  { %3921 = vmatpush1.bf16.msra.mxu0 %v17501_v38  ;;  %3901 = vmatprep.mubr.bf16.mxu0 %v17567_v43  ;;  %v17600_v38 = vld [vmem:[#allocation2 + $0xd0] ss:$48 sps:$4 sm:$0xff]  }
  0xa5   :  { %4211 = vmatpush1.bf16.msra.mxu1 %v17504_v39  ;;  %3922 = vmatprep.subr.bf16.mxu0 %v17509_v41  ;;  %v17606_v39 = vld [vmem:[%s25004_s0 + $0x84] ss:$28 sps:$4 sm:$0xff]   ;;  %v17603_v41 = vld [vmem:[#allocation2 + $0x130] ss:$48 sps:$4 sm:$0xff]  }
  0xa6   :  { %4212 = vmatprep.subr.bf16.mxu1 %v17512_v42  ;;  %v17611_v42 = vld [vmem:[#allocation2 + $0x194] ss:$48 sps:$4 sm:$0xff]  }
  0xa8   :  { %4184 = vmatmul.mubr.bf16.gmra.mrb[24].mxu1 %v17554_v40  ;;  %3923 = vmatpush1.bf16.msra.mxu0 %v17507_v44  ;;  %v17605_v40 = vld [vmem:[#allocation2 + $0x134] ss:$48 sps:$4 sm:$0xff]   ;;  %v17609_v44 = vld [vmem:[#allocation2 + $0x190] ss:$48 sps:$4 sm:$0xff]  }
  0xa9   :  { %4213 = vmatpush1.bf16.msra.mxu1 %v17510_v45  ;;  %3924 = vmatprep.subr.bf16.mxu0 %v17515_v46  ;;  %v17615_v45 = vld [vmem:[%s25004_s0 + $0xbc] ss:$28 sps:$4 sm:$0xff]  }
  0xaa   :  { %4214 = vmatprep.subr.bf16.mxu1 %v17518_v47  ;;  %4193 = vmatprep.mubr.bf16.mxu1 %v17567_v43  ;;  %v17608_v43 = vld [vmem:[%s25004_s0 + $0x80] ss:$28 sps:$4 sm:$0xff]   ;;  %v17612_v47 = vld [vmem:[#allocation2 + $0x1f0] ss:$48 sps:$4 sm:$0xff]  }
  0xab   :  { %3902 = vmatmul.mubr.bf16.gmra.mrb[12].mxu0 %v17569_v50  ;;  %v17614_v46 = vld [vmem:[#allocation2 + $0x1f4] ss:$48 sps:$4 sm:$0xff]  }
  0xac   :  { %3925 = vmatpush1.bf16.msra.mxu0 %v17513_v48  ;;  %3944 = vmatprep.mubr.bf16.mxu0 %v17582_v53  ;;  %v17620_v48 = vld [vmem:[#allocation2 + $0x254] ss:$48 sps:$4 sm:$0xff]  }
  0xad   :  { %4215 = vmatpush1.bf16.msra.mxu1 %v17516_v49  ;;  %3926 = vmatprep.subr.bf16.mxu0 %v17521_v51  ;;  %v17617_v49 = vld [vmem:[%s25004_s0 + $0xb8] ss:$28 sps:$4 sm:$0xff]   ;;  %v17623_v51 = vld [vmem:[#allocation2 + $0x2b4] ss:$48 sps:$4 sm:$0xff]  }
  0xae   :  { %4216 = vmatprep.subr.bf16.mxu1 %v17524_v52 }
  0xb0   :  { %4194 = vmatmul.mubr.bf16.gmra.mrb[28].mxu1 %v17569_v50  ;;  %3927 = vmatpush1.bf16.msra.mxu0 %v17519_v54  ;;  %v17618_v50 = vld [vmem:[#allocation2 + $0x250] ss:$48 sps:$4 sm:$0xff]  }
  0xb1   :  { %4217 = vmatpush1.bf16.msra.mxu1 %v17522_v55  ;;  %3928 = vmatprep.subr.bf16.mxu0 %v17527_v56  ;;  %v17621_v55 = vld [vmem:[#allocation2 + $0x2b0] ss:$48 sps:$4 sm:$0xff]   ;;  %v20083_v56 = vld [vmem:[%s25004_s0 + $0x4] ss:$28 sps:$4 sm:$0xff]  }
  0xb2   :  { %4218 = vmatprep.subr.bf16.mxu1 %v17530_v57  ;;  %4236 = vmatprep.mubr.bf16.mxu1 %v17582_v53 }
  0xb4   :  { %3929 = vmatpush1.bf16.msra.mxu0 %v17525_v58  ;;  %v17626_v58 = vld [vmem:[#allocation2 + $0x314] ss:$48 sps:$4 sm:$0xff]  }
  0xb5   :  { %4219 = vmatpush1.bf16.msra.mxu1 %v17528_v59  ;;  %3930 = vmatprep.subr.bf16.mxu0 %v17533_v60  ;;  %v17624_v59 = vld [vmem:[#allocation2 + $0x310] ss:$48 sps:$4 sm:$0xff]   ;;  %v17632_v60 = vld [vmem:[#allocation2 + $0x374] ss:$48 sps:$4 sm:$0xff]  }
  0xb6   :  { %4220 = vmatprep.subr.bf16.mxu1 %v17536_v61  ;;  %v17627_v61 = vld [vmem:[#allocation2 + $0x18] ss:$48 sps:$4 sm:$0xff]  }
  0xb8   :  { %3931 = vmatpush1.bf16.msra.mxu0 %v17531_v62  ;;  %v17630_v62 = vld [vmem:[#allocation2 + $0x370] ss:$48 sps:$4 sm:$0xff]  }
  0xb9   :  { %4221 = vmatpush1.bf16.msra.mxu1 %v17534_v63  ;;  %3932 = vmatprep.subr.bf16.mxu0 %v17542_v1  ;;  %v17635_v63 = vld [vmem:[#allocation2 + $0x7c] ss:$48 sps:$4 sm:$0xff]   ;;  %v17638_v1 = vld [vmem:[#allocation2 + $0x3d4] ss:$48 sps:$4 sm:$0xff]  }
  0xba   :  { %4222 = vmatprep.subr.bf16.mxu1 %v17545_v2  ;;  %v19817_v2 = vld [vmem:[%s25004_s0 + $0x18] ss:$28 sps:$4 sm:$0xff]  }
  0xbc   :  { %3933 = vmatpush1.bf16.msra.mxu0 %v17540_v3  ;;  %v17633_v3 = vld [vmem:[#allocation2 + $0x78] ss:$48 sps:$4 sm:$0xff]  }
  0xbd   :  { %4223 = vmatpush1.bf16.msra.mxu1 %v17543_v4  ;;  %3934 = vmatprep.subr.bf16.mxu0 %v17548_v5  ;;  %v17636_v4 = vld [vmem:[#allocation2 + $0x3d0] ss:$48 sps:$4 sm:$0xff]   ;;  %v17641_v5 = vld [vmem:[#allocation2 + $0xdc] ss:$48 sps:$4 sm:$0xff]  }
  0xbe   :  { %4224 = vmatprep.subr.bf16.mxu1 %v17551_v6  ;;  %v17644_v6 = vld [vmem:[#allocation2 + $0x434] ss:$48 sps:$4 sm:$0xff]  }
  0xc0   :  { %3935 = vmatpush1.bf16.msra.mxu0 %v17546_v7  ;;  %v17639_v7 = vld [vmem:[#allocation2 + $0xd8] ss:$48 sps:$4 sm:$0xff]  }
  0xc1   :  { %4225 = vmatpush1.bf16.msra.mxu1 %v17549_v8  ;;  %3936 = vmatprep.subr.bf16.mxu0 %v17557_v9  ;;  %v17642_v8 = vld [vmem:[#allocation2 + $0x430] ss:$48 sps:$4 sm:$0xff]   ;;  %v17647_v9 = vld [vmem:[#allocation2 + $0x13c] ss:$48 sps:$4 sm:$0xff]  }
  0xc2   :  { %4226 = vmatprep.subr.bf16.mxu1 %v17560_v10  ;;  %v17650_v10 = vld [vmem:[#allocation2 + $0x494] ss:$48 sps:$4 sm:$0xff]  }
  0xc4   :  { %3937 = vmatpush1.bf16.msra.mxu0 %v17555_v11  ;;  %v19818_v11 = vld [vmem:[%s25004_s0 + $0x50] ss:$28 sps:$4 sm:$0xff]  }
  0xc5   :  { %4227 = vmatpush1.bf16.msra.mxu1 %v17558_v12  ;;  %3938 = vmatprep.subr.bf16.mxu0 %v17563_v13  ;;  %v17645_v12 = vld [vmem:[#allocation2 + $0x138] ss:$48 sps:$4 sm:$0xff]   ;;  %v17648_v13 = vld [vmem:[#allocation2 + $0x490] ss:$48 sps:$4 sm:$0xff]  }
  0xc6   :  { %4228 = vmatprep.subr.bf16.mxu1 %v17566_v14  ;;  %v17653_v14 = vld [vmem:[#allocation2 + $0x19c] ss:$48 sps:$4 sm:$0xff]  }
  0xc8   :  { %3939 = vmatpush1.bf16.msra.mxu0 %v17561_v15  ;;  %v17656_v15 = vld [vmem:[#allocation2 + $0x4f4] ss:$48 sps:$4 sm:$0xff]  }
  0xc9   :  { %4229 = vmatpush1.bf16.msra.mxu1 %v17564_v16  ;;  %3940 = vmatprep.subr.bf16.mxu0 %v17572_v17  ;;  %v17651_v16 = vld [vmem:[#allocation2 + $0x198] ss:$48 sps:$4 sm:$0xff]   ;;  %v17654_v17 = vld [vmem:[#allocation2 + $0x4f0] ss:$48 sps:$4 sm:$0xff]  }
  0xca   :  { %4230 = vmatprep.subr.bf16.mxu1 %v17575_v18  ;;  %v17659_v18 = vld [vmem:[#allocation2 + $0x1fc] ss:$48 sps:$4 sm:$0xff]  }
  0xcc   :  { %3941 = vmatpush1.bf16.msra.mxu0 %v17570_v19  ;;  %v17662_v19 = vld [vmem:[#allocation2 + $0x554] ss:$48 sps:$4 sm:$0xff]  }
  0xcd   :  { %4231 = vmatpush1.bf16.msra.mxu1 %v17573_v20  ;;  %3942 = vmatprep.subr.bf16.mxu0 %v17578_v21 }
  0xce   :  { %4232 = vmatprep.subr.bf16.mxu1 %v17581_v22  ;;  %v19819_v22 = vld [vmem:[%s25004_s0 + $0x88] ss:$28 sps:$4 sm:$0xff]  }
  0xd0   :  { %3943 = vmatpush1.bf16.msra.mxu0 %v17576_v23  ;;  %v17657_v23 = vld [vmem:[#allocation2 + $0x1f8] ss:$48 sps:$4 sm:$0xff]  }
  0xd1   :  { %4233 = vmatpush1.bf16.msra.mxu1 %v17579_v24  ;;  %4350 = vmatprep.subr.bf16.mxu0 %v17590_v26  ;;  %v17660_v24 = vld [vmem:[#allocation2 + $0x550] ss:$48 sps:$4 sm:$0xff]   ;;  %v17665_v26 = vld [vmem:[#allocation2 + $0x25c] ss:$48 sps:$4 sm:$0xff]  }
  0xd2   :  { %4234 = vmatprep.subr.bf16.mxu1 %v17587_v25 }
  0xd3   :  { %3945 = vmatmul.mubr.bf16.vlgmr.msra.gmra.mrb[0].mxu0 %v17584_v27 }
  0xd4   :  { %4351 = vmatpush1.bf16.msra.mxu0 %v17588_v29  ;;  %3954 = vmatprep.mubr.bf16.mxu0 %v17597_v32  ;;  %v17663_v29 = vld [vmem:[#allocation2 + $0x258] ss:$48 sps:$4 sm:$0xff]  }
  0xd5   :  { %4235 = vmatpush1.bf16.msra.mxu1 %v17585_v28  ;;  %4352 = vmatprep.subr.bf16.mxu0 %v17596_v31  ;;  %v17668_v28 = vld [vmem:[#allocation2 + $0x5b4] ss:$48 sps:$4 sm:$0xff]   ;;  %v17671_v31 = vld [vmem:[#allocation2 + $0x2bc] ss:$48 sps:$4 sm:$0xff]  }
  0xd6   :  { %4277 = vmatprep.subr.bf16.mxu1 %v17593_v30  ;;  %v17666_v30 = vld [vmem:[#allocation2 + $0x5b0] ss:$48 sps:$4 sm:$0xff]  }
  0xd8   :  { %4237 = vmatmul.mubr.bf16.vlgmr.msra.gmra.mrb[16].mxu1 %v17584_v27  ;;  %4353 = vmatpush1.bf16.msra.mxu0 %v17594_v34 }
  0xd9   :  { %4278 = vmatpush1.bf16.msra.mxu1 %v17591_v33  ;;  %4354 = vmatprep.subr.bf16.mxu0 %v17602_v35  ;;  %v19820_v35 = vld [vmem:[%s25004_s0 + $0xc0] ss:$28 sps:$4 sm:$0xff]  }
  0xda   :  { %4246 = vmatprep.mubr.bf16.mxu1 %v17597_v32  ;;  %4642 = vmatprep.subr.bf16.mxu1 %v17629_v36  ;;  %v17674_v32 = vld [vmem:[#allocation2 + $0x614] ss:$48 sps:$4 sm:$0xff]   ;;  %v17669_v36 = vld [vmem:[#allocation2 + $0x2b8] ss:$48 sps:$4 sm:$0xff]  }
  0xdb   :  { %3955 = vmatmul.mubr.bf16.gmra.mrb[4].mxu0 %v17599_v37 }
  0xdc   :  { %4355 = vmatpush1.bf16.msra.mxu0 %v17600_v38  ;;  %3964 = vmatprep.mubr.bf16.mxu0 %v17606_v39 }
  0xdd   :  { %4356 = vmatprep.subr.bf16.mxu0 %v17605_v40 }
  0xe0   :  { %4247 = vmatmul.mubr.bf16.gmra.mrb[20].mxu1 %v17599_v37  ;;  %4357 = vmatpush1.bf16.msra.mxu0 %v17603_v41  ;;  %v17672_v37 = vld [vmem:[#allocation2 + $0x610] ss:$48 sps:$4 sm:$0xff]   ;;  %v17680_v41 = vld [vmem:[#allocation2 + $0x674] ss:$48 sps:$4 sm:$0xff]  }
  0xe1   :  { %4256 = vmatprep.mubr.bf16.mxu1 %v17606_v39  ;;  %4358 = vmatprep.subr.bf16.mxu0 %v17611_v42  ;;  %v17677_v39 = vld [vmem:[#allocation2 + $0x31c] ss:$48 sps:$4 sm:$0xff]   ;;  %v20128_v42 = vld [vmem:[%s25004_s0] ss:$28 sps:$4 sm:$0xff]  }
  0xe3   :  { %3965 = vmatmul.mubr.bf16.gmra.mrb[8].mxu0 %v17608_v43 }
  0xe4   :  { %4359 = vmatpush1.bf16.msra.mxu0 %v17609_v44  ;;  %3974 = vmatprep.mubr.bf16.mxu0 %v17615_v45  ;;  %v17678_v44 = vld [vmem:[#allocation2 + $0x670] ss:$48 sps:$4 sm:$0xff]  }
  0xe5   :  { %4360 = vmatprep.subr.bf16.mxu0 %v17614_v46  ;;  %v17686_v46 = vld [vmem:[#allocation2 + $0x6d4] ss:$48 sps:$4 sm:$0xff]  }
  0xe8   :  { %4257 = vmatmul.mubr.bf16.gmra.mrb[24].mxu1 %v17608_v43  ;;  %4361 = vmatpush1.bf16.msra.mxu0 %v17612_v47  ;;  %v17675_v43 = vld [vmem:[#allocation2 + $0x318] ss:$48 sps:$4 sm:$0xff]  }
  0xe9   :  { %4266 = vmatprep.mubr.bf16.mxu1 %v17615_v45  ;;  %4362 = vmatprep.subr.bf16.mxu0 %v17620_v48  ;;  %v17683_v45 = vld [vmem:[#allocation2 + $0x37c] ss:$48 sps:$4 sm:$0xff]  }
  0xeb   :  { %v20074_v52 = vpop.f32.mrb[0].mxu1  ;;  %3975 = vmatmul.mubr.bf16.gmra.mrb[12].mxu0 %v17617_v49 }
  0xec   :  { %v20076_v53 = vpop.f32.mrb[1].mxu1  ;;  %4363 = vmatpush1.bf16.msra.mxu0 %v17618_v50  ;;  %4382 = vmatprep.mubr.bf16.mxu0 %v20083_v56  ;;  %v17681_v50 = vld [vmem:[#allocation2 + $0x378] ss:$48 sps:$4 sm:$0xff]  }
  0xed   :  { %v20078_v54 = vpop.f32.mrb[2].mxu1  ;;  %4364 = vmatprep.subr.bf16.mxu0 %v17623_v51  ;;  %v17684_v51 = vld [vmem:[#allocation2 + $0x6d0] ss:$48 sps:$4 sm:$0xff]  }
  0xee   :  { %v20086_v57 = vpop.f32.mrb[3].mxu1 }
  0xf0   :  { %4267 = vmatmul.mubr.bf16.gmra.mrb[28].mxu1 %v17617_v49  ;;  %4365 = vmatpush1.bf16.msra.mxu0 %v17621_v55  ;;  %v20138_v49 = vld [vmem:[%s25004_s0 + $0x3c] ss:$28 sps:$4 sm:$0xff]  }
  0xf1   :  { %4309 = vmatprep.mubr.bf16.mxu1 %v19906_v0  ;;  %4366 = vmatprep.subr.bf16.mxu0 %v17626_v58 }
  0xf3   :  { %v20099_v20 = vpop.f32.mrb[4].mxu1 }
  0xf4   :  { %4367 = vmatpush1.bf16.msra.mxu0 %v17624_v59  ;;  %v20101_v21 = vpop.f32.mrb[5].mxu1  ;;  %v17692_v59 = vld [vmem:[#allocation2 + $0x734] ss:$48 sps:$4 sm:$0xff]  }
  0xf5   :  { %4368 = vmatprep.subr.bf16.mxu0 %v17632_v60  ;;  %v20107_v25 = vpop.f32.mrb[6].mxu1  ;;  %v17687_v60 = vld [vmem:[#allocation2 + $0x3d8] ss:$48 sps:$4 sm:$0xff]  }
  0xf6   :  { %v20109_v27 = vpop.f32.mrb[7].mxu1 }
  0xf8   :  { %15333 = vmatmul.mubr.msk.bf16.vlgmr.msra.gmra.mrb[16].mxu1 %vm3753_vm0, %v19817_v2  ;;  %4369 = vmatpush1.bf16.msra.mxu0 %v17630_v62  ;;  %v20148_v62 = vld [vmem:[%s25004_s0 + $0x38] ss:$28 sps:$4 sm:$0xff]  }
  0xf9   :  { %4643 = vmatpush1.bf16.msra.mxu1 %v17627_v61  ;;  %4370 = vmatprep.subr.bf16.mxu0 %v17638_v1  ;;  %v17690_v61 = vld [vmem:[#allocation2 + $0x730] ss:$48 sps:$4 sm:$0xff]   ;;  %v17698_v1 = vld [vmem:[#allocation2 + $0x794] ss:$48 sps:$4 sm:$0xff]   ;;  %v20154_v2 = vld [vmem:[%s25004_s0 + $0x74] ss:$28 sps:$4 sm:$0xff]  }
  0xfa   :  { %4644 = vmatprep.subr.bf16.mxu1 %v17635_v63  ;;  %4319 = vmatprep.mubr.bf16.mxu1 %v19906_v0  ;;  %v17695_v63 = vld [vmem:[#allocation2 + $0x43c] ss:$48 sps:$4 sm:$0xff]  }
  0xfb   :  { %v20112_v33 = vpop.f32.mrb[8].mxu1 }
  0xfc   :  { %4371 = vmatpush1.bf16.msra.mxu0 %v17636_v4  ;;  %v20114_v34 = vpop.f32.mrb[9].mxu1  ;;  %v17696_v4 = vld [vmem:[#allocation2 + $0x790] ss:$48 sps:$4 sm:$0xff]  }
  0xfd   :  { %4645 = vmatpush1.bf16.msra.mxu1 %v17633_v3  ;;  %4372 = vmatprep.subr.bf16.mxu0 %v17644_v6  ;;  %v20120_v38 = vpop.f32.mrb[10].mxu1  ;;  %v17693_v3 = vld [vmem:[#allocation2 + $0x438] ss:$48 sps:$4 sm:$0xff]   ;;  %v17704_v6 = vld [vmem:[#allocation2 + $0x7f4] ss:$48 sps:$4 sm:$0xff]  }
  0xfe   :  { %4646 = vmatprep.subr.bf16.mxu1 %v17641_v5  ;;  %v20122_v40 = vpop.f32.mrb[11].mxu1  ;;  %v17701_v5 = vld [vmem:[#allocation2 + $0x49c] ss:$48 sps:$4 sm:$0xff]  }
 0x100   :  { %15334 = vmatmul.mubr.msk.bf16.gmra.mrb[20].mxu1 %vm3753_vm0, %v19818_v11  ;;  %4373 = vmatpush1.bf16.msra.mxu0 %v17642_v8  ;;  %v17702_v8 = vld [vmem:[#allocation2 + $0x7f0] ss:$48 sps:$4 sm:$0xff]   ;;  %v17710_v11 = vld [vmem:[#allocation2 + $0x854] ss:$48 sps:$4 sm:$0xff]  }
 0x101   :  { %4647 = vmatpush1.bf16.msra.mxu1 %v17639_v7  ;;  %4374 = vmatprep.subr.bf16.mxu0 %v17650_v10  ;;  %v17699_v7 = vld [vmem:[#allocation2 + $0x498] ss:$48 sps:$4 sm:$0xff]  }
 0x102   :  { %4648 = vmatprep.subr.bf16.mxu1 %v17647_v9  ;;  %4329 = vmatprep.mubr.bf16.mxu1 %v19906_v0  ;;  %v17707_v9 = vld [vmem:[#allocation2 + $0x4fc] ss:$48 sps:$4 sm:$0xff]   ;;  %v20160_v10 = vld [vmem:[%s25004_s0 + $0x70] ss:$28 sps:$4 sm:$0xff]  }
 0x103   :  { %v20131_v47 = vpop.f32.mrb[12].mxu1 }
 0x104   :  { %4375 = vmatpush1.bf16.msra.mxu0 %v17648_v13  ;;  %v20133_v48 = vpop.f32.mrb[13].mxu1  ;;  %v17708_v13 = vld [vmem:[#allocation2 + $0x850] ss:$48 sps:$4 sm:$0xff]  }
 0x105   :  { %4649 = vmatpush1.bf16.msra.mxu1 %v17645_v12  ;;  %4376 = vmatprep.subr.bf16.mxu0 %v17656_v15  ;;  %v20141_v55 = vpop.f32.mrb[14].mxu1  ;;  %v17705_v12 = vld [vmem:[#allocation2 + $0x4f8] ss:$48 sps:$4 sm:$0xff]   ;;  %v17713_v15 = vld [vmem:[#allocation2 + $0x55c] ss:$48 sps:$4 sm:$0xff]  }
 0x106   :  { %4650 = vmatprep.subr.bf16.mxu1 %v17653_v14  ;;  %v20143_v58 = vpop.f32.mrb[15].mxu1  ;;  %v20166_v14 = vld [vmem:[%s25004_s0 + $0xac] ss:$28 sps:$4 sm:$0xff]  }
 0x108   :  { %15335 = vmatmul.mubr.msk.bf16.gmra.mrb[24].mxu1 %vm3753_vm0, %v19819_v22  ;;  %4377 = vmatpush1.bf16.msra.mxu0 %v17654_v17  ;;  %v17711_v17 = vld [vmem:[#allocation2 + $0x558] ss:$48 sps:$4 sm:$0xff]   ;;  %v17719_v22 = vld [vmem:[#allocation2 + $0x5bc] ss:$48 sps:$4 sm:$0xff]  }
 0x109   :  { %4651 = vmatpush1.bf16.msra.mxu1 %v17651_v16  ;;  %4378 = vmatprep.subr.bf16.mxu0 %v17662_v19  ;;  %v17716_v16 = vld [vmem:[#allocation2 + $0x8b4] ss:$48 sps:$4 sm:$0xff]   ;;  %v20172_v19 = vld [vmem:[%s25004_s0 + $0xa8] ss:$28 sps:$4 sm:$0xff]  }
 0x10a   :  { %4652 = vmatprep.subr.bf16.mxu1 %v17659_v18  ;;  %4339 = vmatprep.mubr.bf16.mxu1 %v19906_v0  ;;  %v17714_v18 = vld [vmem:[#allocation2 + $0x8b0] ss:$48 sps:$4 sm:$0xff]  }
 0x10c   :  { %4379 = vmatpush1.bf16.msra.mxu0 %v17660_v24  ;;  %v17717_v24 = vld [vmem:[#allocation2 + $0x5b8] ss:$48 sps:$4 sm:$0xff]  }
 0x10d   :  { %4653 = vmatpush1.bf16.msra.mxu1 %v17657_v23  ;;  %4380 = vmatprep.subr.bf16.mxu0 %v17668_v28  ;;  %v17722_v23 = vld [vmem:[#allocation2 + $0x914] ss:$48 sps:$4 sm:$0xff]  }
 0x10e   :  { %4654 = vmatprep.subr.bf16.mxu1 %v17665_v26  ;;  %v17720_v26 = vld [vmem:[#allocation2 + $0x910] ss:$48 sps:$4 sm:$0xff]  }
 0x10f   :  { %v20178_v28 = vld [vmem:[%s25004_s0 + $0xc] ss:$28 sps:$4 sm:$0xff]  }
 0x110   :  { %15336 = vmatmul.mubr.msk.bf16.gmra.mrb[28].mxu1 %vm3753_vm0, %v19820_v35  ;;  %4381 = vmatpush1.bf16.msra.mxu0 %v17666_v30  ;;  %v17728_v30 = vld [vmem:[#allocation2 + $0x974] ss:$48 sps:$4 sm:$0xff]   ;;  %v17731_v35 = vld [vmem:[#allocation2 + $0x67c] ss:$48 sps:$4 sm:$0xff]  }
 0x111   :  { %4655 = vmatpush1.bf16.msra.mxu1 %v17663_v29  ;;  %4423 = vmatprep.subr.bf16.mxu0 %v17674_v32  ;;  %v17725_v29 = vld [vmem:[#allocation2 + $0x61c] ss:$48 sps:$4 sm:$0xff]   ;;  %v17726_v32 = vld [vmem:[#allocation2 + $0x970] ss:$48 sps:$4 sm:$0xff]  }
 0x112   :  { %4656 = vmatprep.subr.bf16.mxu1 %v17671_v31  ;;  %4674 = vmatprep.mubr.bf16.mxu1 %v20083_v56  ;;  %v17689_v56 = vld [vmem:[#allocation2 + $0x3dc] ss:$48 sps:$4 sm:$0xff]   ;;  %v17723_v31 = vld [vmem:[#allocation2 + $0x618] ss:$48 sps:$4 sm:$0xff]  }
 0x113   :  { %4383 = vmatmul.mubr.bf16.vlgmr.msra.gmra.mrb[16].mxu0 %v20128_v42 }
 0x114   :  { %4424 = vmatpush1.bf16.msra.mxu0 %v17672_v37  ;;  %4392 = vmatprep.mubr.bf16.mxu0 %v20138_v49  ;;  %v17729_v37 = vld [vmem:[#allocation2 + $0x678] ss:$48 sps:$4 sm:$0xff]  }
 0x115   :  { %4657 = vmatpush1.bf16.msra.mxu1 %v17669_v36  ;;  %4425 = vmatprep.subr.bf16.mxu0 %v17680_v41  ;;  %v17734_v36 = vld [vmem:[#allocation2 + $0x9d4] ss:$48 sps:$4 sm:$0xff]   ;;  %v17737_v41 = vld [vmem:[#allocation2 + $0x6dc] ss:$48 sps:$4 sm:$0xff]  }
 0x116   :  { %4658 = vmatprep.subr.bf16.mxu1 %v17677_v39  ;;  %v17732_v39 = vld [vmem:[#allocation2 + $0x9d0] ss:$48 sps:$4 sm:$0xff]  }
 0x118   :  { %4426 = vmatpush1.bf16.msra.mxu0 %v17678_v44  ;;  %v17735_v44 = vld [vmem:[#allocation2 + $0x6d8] ss:$48 sps:$4 sm:$0xff]  }
 0x119   :  { %4659 = vmatpush1.bf16.msra.mxu1 %v17675_v43  ;;  %4427 = vmatprep.subr.bf16.mxu0 %v17686_v46  ;;  %v17740_v43 = vld [vmem:[#allocation2 + $0xa34] ss:$48 sps:$4 sm:$0xff]   ;;  %v17743_v46 = vld [vmem:[#allocation2 + $0x73c] ss:$48 sps:$4 sm:$0xff]  }
 0x11a   :  { %4660 = vmatprep.subr.bf16.mxu1 %v17683_v45  ;;  %v17738_v45 = vld [vmem:[#allocation2 + $0xa30] ss:$48 sps:$4 sm:$0xff]  }
 0x11b   :  { %4393 = vmatmul.mubr.bf16.gmra.mrb[20].mxu0 %v20148_v62 }
 0x11c   :  { %4428 = vmatpush1.bf16.msra.mxu0 %v17684_v51  ;;  %4402 = vmatprep.mubr.bf16.mxu0 %v20154_v2  ;;  %v17741_v51 = vld [vmem:[#allocation2 + $0x738] ss:$48 sps:$4 sm:$0xff]  }
 0x11d   :  { %4661 = vmatpush1.bf16.msra.mxu1 %v17681_v50  ;;  %4429 = vmatprep.subr.bf16.mxu0 %v17692_v59  ;;  %v17746_v50 = vld [vmem:[#allocation2 + $0xa94] ss:$48 sps:$4 sm:$0xff]  }
 0x11e   :  { %4662 = vmatprep.subr.bf16.mxu1 %v17689_v56  ;;  %v17744_v56 = vld [vmem:[#allocation2 + $0xa90] ss:$48 sps:$4 sm:$0xff]   ;;  %v17752_v59 = vld [vmem:[#allocation2 + $0xaf4] ss:$48 sps:$4 sm:$0xff]  }
 0x120   :  { %4430 = vmatpush1.bf16.msra.mxu0 %v17690_v61  ;;  %v17750_v61 = vld [vmem:[#allocation2 + $0xaf0] ss:$48 sps:$4 sm:$0xff]  }
 0x121   :  { %4663 = vmatpush1.bf16.msra.mxu1 %v17687_v60  ;;  %4431 = vmatprep.subr.bf16.mxu0 %v17698_v1  ;;  %v17747_v60 = vld [vmem:[#allocation2 + $0x798] ss:$48 sps:$4 sm:$0xff]  }
 0x122   :  { %4664 = vmatprep.subr.bf16.mxu1 %v17695_v63  ;;  %v17758_v63 = vld [vmem:[#allocation2 + $0xb54] ss:$48 sps:$4 sm:$0xff]   ;;  %v17753_v1 = vld [vmem:[#allocation2 + $0x7f8] ss:$48 sps:$4 sm:$0xff]  }
 0x123   :  { %4403 = vmatmul.mubr.bf16.gmra.mrb[24].mxu0 %v20160_v10 }
 0x124   :  { %4432 = vmatpush1.bf16.msra.mxu0 %v17696_v4  ;;  %4412 = vmatprep.mubr.bf16.mxu0 %v20166_v14  ;;  %v17761_v4 = vld [vmem:[#allocation2 + $0x85c] ss:$48 sps:$4 sm:$0xff]  }
 0x125   :  { %4665 = vmatpush1.bf16.msra.mxu1 %v17693_v3  ;;  %4433 = vmatprep.subr.bf16.mxu0 %v17704_v6  ;;  %v17756_v3 = vld [vmem:[#allocation2 + $0xb50] ss:$48 sps:$4 sm:$0xff]  }
 0x126   :  { %4666 = vmatprep.subr.bf16.mxu1 %v17701_v5  ;;  %v17759_v5 = vld [vmem:[#allocation2 + $0x858] ss:$48 sps:$4 sm:$0xff]   ;;  %v17762_v6 = vld [vmem:[#allocation2 + $0xbb0] ss:$48 sps:$4 sm:$0xff]  }
 0x128   :  { %4434 = vmatpush1.bf16.msra.mxu0 %v17702_v8  ;;  %v17765_v8 = vld [vmem:[#allocation2 + $0x8b8] ss:$48 sps:$4 sm:$0xff]  }
 0x129   :  { %4667 = vmatpush1.bf16.msra.mxu1 %v17699_v7  ;;  %4435 = vmatprep.subr.bf16.mxu0 %v17710_v11  ;;  %v17770_v7 = vld [vmem:[#allocation2 + $0xc14] ss:$48 sps:$4 sm:$0xff]   ;;  %v17773_v11 = vld [vmem:[#allocation2 + $0x91c] ss:$48 sps:$4 sm:$0xff]  }
 0x12a   :  { %4668 = vmatprep.subr.bf16.mxu1 %v17707_v9  ;;  %v17768_v9 = vld [vmem:[#allocation2 + $0xc10] ss:$48 sps:$4 sm:$0xff]  }
 0x12b   :  { %4413 = vmatmul.mubr.bf16.gmra.mrb[28].mxu0 %v20172_v19 }
 0x12c   :  { %4436 = vmatpush1.bf16.msra.mxu0 %v17708_v13  ;;  %4455 = vmatprep.mubr.bf16.mxu0 %v20178_v28  ;;  %v20192_v13 = vld [vmem:[%s25004_s0 + $0x8] ss:$28 sps:$4 sm:$0xff]  }
 0x12d   :  { %4669 = vmatpush1.bf16.msra.mxu1 %v17705_v12  ;;  %4437 = vmatprep.subr.bf16.mxu0 %v17716_v16  ;;  %v17771_v12 = vld [vmem:[#allocation2 + $0x918] ss:$48 sps:$4 sm:$0xff]   ;;  %v17782_v16 = vld [vmem:[#allocation2 + $0xcd4] ss:$48 sps:$4 sm:$0xff]  }
 0x12e   :  { %4670 = vmatprep.subr.bf16.mxu1 %v17713_v15  ;;  %v17779_v15 = vld [vmem:[#allocation2 + $0x97c] ss:$48 sps:$4 sm:$0xff]  }
 0x130   :  { %4438 = vmatpush1.bf16.msra.mxu0 %v17714_v18  ;;  %v17780_v18 = vld [vmem:[#allocation2 + $0xcd0] ss:$48 sps:$4 sm:$0xff]  }
 0x131   :  { %4671 = vmatpush1.bf16.msra.mxu1 %v17711_v17  ;;  %4439 = vmatprep.subr.bf16.mxu0 %v17722_v23  ;;  %v17777_v17 = vld [vmem:[#allocation2 + $0x978] ss:$48 sps:$4 sm:$0xff]   ;;  %v17788_v23 = vld [vmem:[#allocation2 + $0xd34] ss:$48 sps:$4 sm:$0xff]  }
 0x132   :  { %4672 = vmatprep.subr.bf16.mxu1 %v17719_v22  ;;  %v17785_v22 = vld [vmem:[#allocation2 + $0x9dc] ss:$48 sps:$4 sm:$0xff]  }
 0x134   :  { %4440 = vmatpush1.bf16.msra.mxu0 %v17720_v26  ;;  %v17786_v26 = vld [vmem:[#allocation2 + $0xd30] ss:$48 sps:$4 sm:$0xff]  }
 0x135   :  { %4673 = vmatpush1.bf16.msra.mxu1 %v17717_v24  ;;  %4441 = vmatprep.subr.bf16.mxu0 %v17728_v30  ;;  %v17783_v24 = vld [vmem:[#allocation2 + $0x9d8] ss:$48 sps:$4 sm:$0xff]   ;;  %v17794_v30 = vld [vmem:[#allocation2 + $0xd94] ss:$48 sps:$4 sm:$0xff]  }
 0x136   :  { %4715 = vmatprep.subr.bf16.mxu1 %v17725_v29  ;;  %v17791_v29 = vld [vmem:[#allocation2 + $0xa3c] ss:$48 sps:$4 sm:$0xff]  }
 0x138   :  { %4675 = vmatmul.mubr.bf16.vlgmr.msra.gmra.mrb[32].mxu1 %v20128_v42  ;;  %4442 = vmatpush1.bf16.msra.mxu0 %v17726_v32  ;;  %v17749_v42 = vld [vmem:[#allocation2 + $0x79c] ss:$48 sps:$4 sm:$0xff]   ;;  %v20210_v32 = vld [vmem:[%s25004_s0 + $0x7c] ss:$28 sps:$4 sm:$0xff]  }
 0x139   :  { %4716 = vmatpush1.bf16.msra.mxu1 %v17723_v31  ;;  %4443 = vmatprep.subr.bf16.mxu0 %v17734_v36  ;;  %v17789_v31 = vld [vmem:[#allocation2 + $0xa38] ss:$48 sps:$4 sm:$0xff]   ;;  %v17797_v36 = vld [vmem:[#allocation2 + $0xa9c] ss:$48 sps:$4 sm:$0xff]  }
 0x13a   :  { %4717 = vmatprep.subr.bf16.mxu1 %v17731_v35  ;;  %4684 = vmatprep.mubr.bf16.mxu1 %v20138_v49  ;;  %v17755_v49 = vld [vmem:[#allocation2 + $0x7fc] ss:$48 sps:$4 sm:$0xff]   ;;  %v17792_v35 = vld [vmem:[#allocation2 + $0xd90] ss:$48 sps:$4 sm:$0xff]  }
 0x13c   :  { %4444 = vmatpush1.bf16.msra.mxu0 %v17732_v39  ;;  %v17795_v39 = vld [vmem:[#allocation2 + $0xa98] ss:$48 sps:$4 sm:$0xff]  }
 0x13d   :  { %4718 = vmatpush1.bf16.msra.mxu1 %v17729_v37  ;;  %4445 = vmatprep.subr.bf16.mxu0 %v17740_v43  ;;  %v17800_v37 = vld [vmem:[#allocation2 + $0xdf4] ss:$48 sps:$4 sm:$0xff]   ;;  %v17803_v43 = vld [vmem:[#allocation2 + $0xafc] ss:$48 sps:$4 sm:$0xff]  }
 0x13e   :  { %4719 = vmatprep.subr.bf16.mxu1 %v17737_v41  ;;  %v17798_v41 = vld [vmem:[#allocation2 + $0xdf0] ss:$48 sps:$4 sm:$0xff]  }
 0x140   :  { %4685 = vmatmul.mubr.bf16.gmra.mrb[36].mxu1 %v20148_v62  ;;  %4446 = vmatpush1.bf16.msra.mxu0 %v17738_v45  ;;  %v17764_v62 = vld [vmem:[#allocation2 + $0xbb4] ss:$48 sps:$4 sm:$0xff]  }
 0x141   :  { %4720 = vmatpush1.bf16.msra.mxu1 %v17735_v44  ;;  %4447 = vmatprep.subr.bf16.mxu0 %v17746_v50  ;;  %v20216_v44 = vld [vmem:[%s25004_s0 + $0x78] ss:$28 sps:$4 sm:$0xff]   ;;  %v17806_v45 = vld [vmem:[#allocation2 + $0xe54] ss:$48 sps:$4 sm:$0xff]  }
 0x142   :  { %4721 = vmatprep.subr.bf16.mxu1 %v17743_v46  ;;  %4694 = vmatprep.mubr.bf16.mxu1 %v20154_v2  ;;  %v17767_v2 = vld [vmem:[#allocation2 + $0x8bc] ss:$48 sps:$4 sm:$0xff]   ;;  %v17801_v46 = vld [vmem:[#allocation2 + $0xaf8] ss:$48 sps:$4 sm:$0xff]   ;;  %v17804_v50 = vld [vmem:[#allocation2 + $0xe50] ss:$48 sps:$4 sm:$0xff]  }
 0x144   :  { %4448 = vmatpush1.bf16.msra.mxu0 %v17744_v56  ;;  %v17809_v56 = vld [vmem:[#allocation2 + $0xb5c] ss:$48 sps:$4 sm:$0xff]  }
 0x145   :  { %4722 = vmatpush1.bf16.msra.mxu1 %v17741_v51  ;;  %4449 = vmatprep.subr.bf16.mxu0 %v17752_v59  ;;  %v20222_v51 = vld [vmem:[%s25004_s0 + $0xb4] ss:$28 sps:$4 sm:$0xff]  }
 0x146   :  { %4723 = vmatprep.subr.bf16.mxu1 %v17749_v42  ;;  %v17812_v42 = vld [vmem:[#allocation2 + $0xeb4] ss:$48 sps:$4 sm:$0xff]   ;;  %v17807_v59 = vld [vmem:[#allocation2 + $0xb58] ss:$48 sps:$4 sm:$0xff]  }
 0x148   :  { %4695 = vmatmul.mubr.bf16.gmra.mrb[40].mxu1 %v20160_v10  ;;  %4450 = vmatpush1.bf16.msra.mxu0 %v17750_v61  ;;  %v17776_v10 = vld [vmem:[#allocation2 + $0xc74] ss:$48 sps:$4 sm:$0xff]   ;;  %v17815_v61 = vld [vmem:[#allocation2 + $0xbbc] ss:$48 sps:$4 sm:$0xff]  }
 0x149   :  { %4724 = vmatpush1.bf16.msra.mxu1 %v17747_v60  ;;  %4451 = vmatprep.subr.bf16.mxu0 %v17758_v63  ;;  %v17810_v60 = vld [vmem:[#allocation2 + $0xeb0] ss:$48 sps:$4 sm:$0xff]   ;;  %v17818_v63 = vld [vmem:[#allocation2 + $0xf14] ss:$48 sps:$4 sm:$0xff]  }
 0x14a   :  { %4725 = vmatprep.subr.bf16.mxu1 %v17755_v49  ;;  %4704 = vmatprep.mubr.bf16.mxu1 %v20166_v14  ;;  %v17774_v14 = vld [vmem:[#allocation2 + $0xc70] ss:$48 sps:$4 sm:$0xff]   ;;  %v20228_v49 = vld [vmem:[%s25004_s0 + $0xb0] ss:$28 sps:$4 sm:$0xff]  }
 0x14c   :  { %4452 = vmatpush1.bf16.msra.mxu0 %v17756_v3  ;;  %v17813_v3 = vld [vmem:[#allocation2 + $0xbb8] ss:$48 sps:$4 sm:$0xff]  }
 0x14d   :  { %4726 = vmatpush1.bf16.msra.mxu1 %v17753_v1  ;;  %4453 = vmatprep.subr.bf16.mxu0 %v17764_v62  ;;  %v20234_v1 = vld [vmem:[%s25004_s0 + $0x14] ss:$28 sps:$4 sm:$0xff]  }
 0x14e   :  { %4727 = vmatprep.subr.bf16.mxu1 %v17761_v4  ;;  %v17816_v4 = vld [vmem:[#allocation2 + $0xf10] ss:$48 sps:$4 sm:$0xff]   ;;  %v17821_v62 = vld [vmem:[#allocation2 + $0xc1c] ss:$48 sps:$4 sm:$0xff]  }
 0x150   :  { %4705 = vmatmul.mubr.bf16.gmra.mrb[44].mxu1 %v20172_v19  ;;  %4454 = vmatpush1.bf16.msra.mxu0 %v17762_v6  ;;  %v20198_v19 = vld [vmem:[%s25004_s0 + $0x44] ss:$28 sps:$4 sm:$0xff]  }
 0x151   :  { %4728 = vmatpush1.bf16.msra.mxu1 %v17759_v5  ;;  %4496 = vmatprep.subr.bf16.mxu0 %v17770_v7  ;;  %v17824_v5 = vld [vmem:[#allocation2 + $0xf74] ss:$48 sps:$4 sm:$0xff]   ;;  %v17819_v6 = vld [vmem:[#allocation2 + $0xc18] ss:$48 sps:$4 sm:$0xff]   ;;  %v17827_v7 = vld [vmem:[#allocation2 + $0xc7c] ss:$48 sps:$4 sm:$0xff]  }
 0x152   :  { %4729 = vmatprep.subr.bf16.mxu1 %v17767_v2  ;;  %4747 = vmatprep.mubr.bf16.mxu1 %v20178_v28  ;;  %v20204_v28 = vld [vmem:[%s25004_s0 + $0x40] ss:$28 sps:$4 sm:$0xff]   ;;  %v17822_v2 = vld [vmem:[#allocation2 + $0xf70] ss:$48 sps:$4 sm:$0xff]  }
 0x153   :  { %4456 = vmatmul.mubr.bf16.vlgmr.msra.gmra.mrb[16].mxu0 %v20192_v13 }
 0x154   :  { %4497 = vmatpush1.bf16.msra.mxu0 %v17768_v9  ;;  %4465 = vmatprep.mubr.bf16.mxu0 %v20198_v19  ;;  %v17825_v9 = vld [vmem:[#allocation2 + $0xc78] ss:$48 sps:$4 sm:$0xff]  }
 0x155   :  { %4730 = vmatpush1.bf16.msra.mxu1 %v17765_v8  ;;  %4498 = vmatprep.subr.bf16.mxu0 %v17776_v10  ;;  %v17830_v8 = vld [vmem:[#allocation2 + $0xfd4] ss:$48 sps:$4 sm:$0xff]   ;;  %v17833_v10 = vld [vmem:[#allocation2 + $0xcdc] ss:$48 sps:$4 sm:$0xff]  }
 0x156   :  { %4731 = vmatprep.subr.bf16.mxu1 %v17773_v11  ;;  %v17828_v11 = vld [vmem:[#allocation2 + $0xfd0] ss:$48 sps:$4 sm:$0xff]  }
 0x158   :  { %4499 = vmatpush1.bf16.msra.mxu0 %v17774_v14  ;;  %v17831_v14 = vld [vmem:[#allocation2 + $0xcd8] ss:$48 sps:$4 sm:$0xff]  }
 0x159   :  { %4732 = vmatpush1.bf16.msra.mxu1 %v17771_v12  ;;  %4500 = vmatprep.subr.bf16.mxu0 %v17782_v16  ;;  %v17836_v12 = vld [vmem:[#allocation2 + $0x1034] ss:$48 sps:$4 sm:$0xff]   ;;  %v17839_v16 = vld [vmem:[#allocation2 + $0xd3c] ss:$48 sps:$4 sm:$0xff]  }
 0x15a   :  { %4733 = vmatprep.subr.bf16.mxu1 %v17779_v15  ;;  %v17834_v15 = vld [vmem:[#allocation2 + $0x1030] ss:$48 sps:$4 sm:$0xff]  }
 0x15b   :  { %4466 = vmatmul.mubr.bf16.gmra.mrb[20].mxu0 %v20204_v28 }
 0x15c   :  { %4501 = vmatpush1.bf16.msra.mxu0 %v17780_v18  ;;  %4475 = vmatprep.mubr.bf16.mxu0 %v20210_v32  ;;  %v17840_v18 = vld [vmem:[#allocation2 + $0x1090] ss:$48 sps:$4 sm:$0xff]  }
 0x15d   :  { %4734 = vmatpush1.bf16.msra.mxu1 %v17777_v17  ;;  %4502 = vmatprep.subr.bf16.mxu0 %v17788_v23  ;;  %v17842_v17 = vld [vmem:[#allocation2 + $0x1094] ss:$48 sps:$4 sm:$0xff]  }
 0x15e   :  { %4735 = vmatprep.subr.bf16.mxu1 %v17785_v22  ;;  %v17845_v22 = vld [vmem:[#allocation2 + $0xd9c] ss:$48 sps:$4 sm:$0xff]   ;;  %v17848_v23 = vld [vmem:[#allocation2 + $0x10f4] ss:$48 sps:$4 sm:$0xff]  }
 0x160   :  { %4503 = vmatpush1.bf16.msra.mxu0 %v17786_v26  ;;  %v17851_v26 = vld [vmem:[#allocation2 + $0xdfc] ss:$48 sps:$4 sm:$0xff]  }
 0x161   :  { %4736 = vmatpush1.bf16.msra.mxu1 %v17783_v24  ;;  %4504 = vmatprep.subr.bf16.mxu0 %v17794_v30  ;;  %v17846_v24 = vld [vmem:[#allocation2 + $0x10f0] ss:$48 sps:$4 sm:$0xff]  }
 0x162   :  { %4737 = vmatprep.subr.bf16.mxu1 %v17791_v29  ;;  %v17854_v29 = vld [vmem:[#allocation2 + $0x1154] ss:$48 sps:$4 sm:$0xff]   ;;  %v17852_v30 = vld [vmem:[#allocation2 + $0x1150] ss:$48 sps:$4 sm:$0xff]  }
 0x163   :  { %4476 = vmatmul.mubr.bf16.gmra.mrb[24].mxu0 %v20216_v44 }
 0x164   :  { %4505 = vmatpush1.bf16.msra.mxu0 %v17792_v35  ;;  %4485 = vmatprep.mubr.bf16.mxu0 %v20222_v51  ;;  %v17860_v35 = vld [vmem:[#allocation2 + $0x11b4] ss:$48 sps:$4 sm:$0xff]  }
 0x165   :  { %4738 = vmatpush1.bf16.msra.mxu1 %v17789_v31  ;;  %4506 = vmatprep.subr.bf16.mxu0 %v17800_v37  ;;  %v17857_v31 = vld [vmem:[#allocation2 + $0xe5c] ss:$48 sps:$4 sm:$0xff]  }
 0x166   :  { %4739 = vmatprep.subr.bf16.mxu1 %v17797_v36  ;;  %v17858_v36 = vld [vmem:[#allocation2 + $0x11b0] ss:$48 sps:$4 sm:$0xff]   ;;  %v17863_v37 = vld [vmem:[#allocation2 + $0xebc] ss:$48 sps:$4 sm:$0xff]  }
 0x168   :  { %4507 = vmatpush1.bf16.msra.mxu0 %v17798_v41  ;;  %v17861_v41 = vld [vmem:[#allocation2 + $0xeb8] ss:$48 sps:$4 sm:$0xff]  }
 0x169   :  { %4740 = vmatpush1.bf16.msra.mxu1 %v17795_v39  ;;  %4508 = vmatprep.subr.bf16.mxu0 %v17806_v45  ;;  %v17884_v39 = vld [vmem:[#allocation2 + $0x1214] ss:$48 sps:$4 sm:$0xff]  }
 0x16a   :  { %4741 = vmatprep.subr.bf16.mxu1 %v17803_v43  ;;  %v17866_v43 = vld [vmem:[#allocation2 + $0xf1c] ss:$48 sps:$4 sm:$0xff]   ;;  %v17893_v45 = vld [vmem:[#allocation2 + $0x24] ss:$48 sps:$4 sm:$0xff]  }
 0x16b   :  { %4486 = vmatmul.mubr.bf16.gmra.mrb[28].mxu0 %v20228_v49 }
 0x16c   :  { %4509 = vmatpush1.bf16.msra.mxu0 %v17804_v50  ;;  %4528 = vmatprep.mubr.bf16.mxu0 %v20234_v1  ;;  %v17864_v50 = vld [vmem:[#allocation2 + $0xf18] ss:$48 sps:$4 sm:$0xff]  }
 0x16d   :  { %4742 = vmatpush1.bf16.msra.mxu1 %v17801_v46  ;;  %4510 = vmatprep.subr.bf16.mxu0 %v17812_v42  ;;  %v20248_v46 = vld [vmem:[%s25004_s0 + $0x10] ss:$28 sps:$4 sm:$0xff]  }
 0x16e   :  { %4743 = vmatprep.subr.bf16.mxu1 %v17809_v56  ;;  %v17869_v56 = vld [vmem:[#allocation2 + $0xf7c] ss:$48 sps:$4 sm:$0xff]   ;;  %v17867_v42 = vld [vmem:[#allocation2 + $0xf78] ss:$48 sps:$4 sm:$0xff]  }
 0x170   :  { %4511 = vmatpush1.bf16.msra.mxu0 %v17810_v60  ;;  %v20260_v60 = vld [vmem:[%s25004_s0 + $0x48] ss:$28 sps:$4 sm:$0xff]  }
 0x171   :  { %4744 = vmatpush1.bf16.msra.mxu1 %v17807_v59  ;;  %4512 = vmatprep.subr.bf16.mxu0 %v17818_v63  ;;  %v17872_v59 = vld [vmem:[#allocation2 + $0xfdc] ss:$48 sps:$4 sm:$0xff]  }
 0x172   :  { %4745 = vmatprep.subr.bf16.mxu1 %v17815_v61  ;;  %v17870_v61 = vld [vmem:[#allocation2 + $0xfd8] ss:$48 sps:$4 sm:$0xff]   ;;  %v17875_v63 = vld [vmem:[#allocation2 + $0x103c] ss:$48 sps:$4 sm:$0xff]  }
 0x174   :  { %4513 = vmatpush1.bf16.msra.mxu0 %v17816_v4  ;;  %v20272_v4 = vld [vmem:[%s25004_s0 + $0x80] ss:$28 sps:$4 sm:$0xff]  }
 0x175   :  { %4746 = vmatpush1.bf16.msra.mxu1 %v17813_v3  ;;  %4514 = vmatprep.subr.bf16.mxu0 %v17824_v5  ;;  %v17878_v3 = vld [vmem:[#allocation2 + $0x109c] ss:$48 sps:$4 sm:$0xff]   ;;  %v20278_v5 = vld [vmem:[%s25004_s0 + $0xbc] ss:$28 sps:$4 sm:$0xff]  }
 0x176   :  { %4788 = vmatprep.subr.bf16.mxu1 %v17821_v62  ;;  %v17876_v62 = vld [vmem:[#allocation2 + $0x1098] ss:$48 sps:$4 sm:$0xff]  }
 0x178   :  { %4748 = vmatmul.mubr.bf16.vlgmr.msra.gmra.mrb[32].mxu1 %v20192_v13  ;;  %4515 = vmatpush1.bf16.msra.mxu0 %v17822_v2  ;;  %v17837_v13 = vld [vmem:[#allocation2 + $0xd38] ss:$48 sps:$4 sm:$0xff]  }
 0x179   :  { %4789 = vmatpush1.bf16.msra.mxu1 %v17819_v6  ;;  %4516 = vmatprep.subr.bf16.mxu0 %v17830_v8  ;;  %v17881_v6 = vld [vmem:[#allocation2 + $0x10fc] ss:$48 sps:$4 sm:$0xff]  }
 0x17a   :  { %4790 = vmatprep.subr.bf16.mxu1 %v17827_v7  ;;  %4757 = vmatprep.mubr.bf16.mxu1 %v20198_v19  ;;  %v17843_v19 = vld [vmem:[#allocation2 + $0xd98] ss:$48 sps:$4 sm:$0xff]  }
 0x17c   :  { %4517 = vmatpush1.bf16.msra.mxu0 %v17828_v11 }
 0x17d   :  { %4791 = vmatpush1.bf16.msra.mxu1 %v17825_v9  ;;  %4518 = vmatprep.subr.bf16.mxu0 %v17836_v12 }
 0x17e   :  { %4792 = vmatprep.subr.bf16.mxu1 %v17833_v10  ;;  %v17879_v10 = vld [vmem:[#allocation2 + $0x10f8] ss:$48 sps:$4 sm:$0xff]  }
 0x180   :  { %4758 = vmatmul.mubr.bf16.gmra.mrb[36].mxu1 %v20204_v28  ;;  %4519 = vmatpush1.bf16.msra.mxu0 %v17834_v15  ;;  %v17849_v28 = vld [vmem:[#allocation2 + $0xdf8] ss:$48 sps:$4 sm:$0xff]   ;;  %v17887_v15 = vld [vmem:[#allocation2 + $0x115c] ss:$48 sps:$4 sm:$0xff]  }
 0x181   :  { %4793 = vmatpush1.bf16.msra.mxu1 %v17831_v14  ;;  %4520 = vmatprep.subr.bf16.mxu0 %v17842_v17 }
 0x182   :  { %4794 = vmatprep.subr.bf16.mxu1 %v17839_v16  ;;  %4767 = vmatprep.mubr.bf16.mxu1 %v20210_v32  ;;  %v17855_v32 = vld [vmem:[#allocation2 + $0xe58] ss:$48 sps:$4 sm:$0xff]  }
 0x184   :  { %4521 = vmatpush1.bf16.msra.mxu0 %v17840_v18 }
 0x185   :  { %4795 = vmatpush1.bf16.msra.mxu1 %v17837_v13  ;;  %4522 = vmatprep.subr.bf16.mxu0 %v17848_v23  ;;  %v17888_v23 = vld [vmem:[#allocation2 + $0x11b8] ss:$48 sps:$4 sm:$0xff]  }
 0x186   :  { %4796 = vmatprep.subr.bf16.mxu1 %v17845_v22 }
 0x188   :  { %4768 = vmatmul.mubr.bf16.gmra.mrb[40].mxu1 %v20216_v44  ;;  %4523 = vmatpush1.bf16.msra.mxu0 %v17846_v24  ;;  %v17882_v44 = vld [vmem:[#allocation2 + $0x1210] ss:$48 sps:$4 sm:$0xff]  }
 0x189   :  { %4797 = vmatpush1.bf16.msra.mxu1 %v17843_v19  ;;  %4524 = vmatprep.subr.bf16.mxu0 %v17854_v29  ;;  %v17891_v19 = vld [vmem:[#allocation2 + $0x20] ss:$48 sps:$4 sm:$0xff]  }
 0x18a   :  { %4798 = vmatprep.subr.bf16.mxu1 %v17851_v26  ;;  %4777 = vmatprep.mubr.bf16.mxu1 %v20222_v51  ;;  %v20254_v51 = vld [vmem:[%s25004_s0 + $0x4c] ss:$28 sps:$4 sm:$0xff]  }
 0x18c   :  { %4525 = vmatpush1.bf16.msra.mxu0 %v17852_v30  ;;  %v17899_v30 = vld [vmem:[#allocation2 + $0x84] ss:$48 sps:$4 sm:$0xff]  }
 0x18d   :  { %4799 = vmatpush1.bf16.msra.mxu1 %v17849_v28  ;;  %4526 = vmatprep.subr.bf16.mxu0 %v17860_v35  ;;  %v17896_v28 = vld [vmem:[#allocation2 + $0x121c] ss:$48 sps:$4 sm:$0xff]  }
 0x18e   :  { %4800 = vmatprep.subr.bf16.mxu1 %v17857_v31  ;;  %v20321_v35 = vld [vmem:[%s25004_s0 + $0x18] ss:$28 sps:$4 sm:$0xff]  }
 0x190   :  { %4778 = vmatmul.mubr.bf16.gmra.mrb[44].mxu1 %v20228_v49  ;;  %4527 = vmatpush1.bf16.msra.mxu0 %v17858_v36  ;;  %v20266_v49 = vld [vmem:[%s25004_s0 + $0x84] ss:$28 sps:$4 sm:$0xff]   ;;  %v17897_v36 = vld [vmem:[#allocation2 + $0x80] ss:$48 sps:$4 sm:$0xff]  }
 0x191   :  { %4801 = vmatpush1.bf16.msra.mxu1 %v17855_v32  ;;  %4569 = vmatprep.subr.bf16.mxu0 %v17884_v39  ;;  %v17894_v32 = vld [vmem:[#allocation2 + $0x1218] ss:$48 sps:$4 sm:$0xff]   ;;  %v17923_v39 = vld [vmem:[#allocation2 + $0x2c] ss:$48 sps:$4 sm:$0xff]  }
 0x192   :  { %4802 = vmatprep.subr.bf16.mxu1 %v17863_v37  ;;  %4820 = vmatprep.mubr.bf16.mxu1 %v20234_v1  ;;  %v17873_v1 = vld [vmem:[#allocation2 + $0x1038] ss:$48 sps:$4 sm:$0xff]   ;;  %v5594_v37 = vlaneseq }
 0x193   :  { %4529 = vmatmul.mubr.bf16.vlgmr.msra.gmra.mrb[16].mxu0 %v20248_v46 }
 0x194   :  { %4538 = vmatprep.mubr.bf16.mxu0 %v20254_v51  ;;  %4570 = vmatpush1.bf16.msra.mxu0 %v17882_v44 }
 0x195   :  { %4803 = vmatpush1.bf16.msra.mxu1 %v17861_v41  ;;  %4934 = vmatprep.subr.bf16.mxu0 %v17893_v45 }
 0x196   :  { %4804 = vmatprep.subr.bf16.mxu1 %v17866_v43 }
 0x199   :  { %4805 = vmatpush1.bf16.msra.mxu1 %v17864_v50 }
 0x19a   :  { %4806 = vmatprep.subr.bf16.mxu1 %v17869_v56  ;;  %v17900_v56 = vld [vmem:[#allocation2 + $0xe0] ss:$48 sps:$4 sm:$0xff]  }
 0x19b   :  { %4539 = vmatmul.mubr.bf16.gmra.mrb[20].mxu0 %v20260_v60 }
 0x19c   :  { %4548 = vmatprep.mubr.bf16.mxu0 %v20266_v49 }
 0x19d   :  { %4807 = vmatpush1.bf16.msra.mxu1 %v17867_v42 }
 0x19e   :  { %4808 = vmatprep.subr.bf16.mxu1 %v17872_v59 }
 0x1a1   :  { %4809 = vmatpush1.bf16.msra.mxu1 %v17870_v61  ;;  %v20333_v61 = vshrl.u32 %v5594_v37, 7  ;;  %v17920_v37 = vld [vmem:[#allocation2 + $0x324] ss:$48 sps:$4 sm:$0xff]  }
 0x1a2   :  { %4810 = vmatprep.subr.bf16.mxu1 %v17875_v63  ;;  %v17905_v63 = vld [vmem:[#allocation2 + $0x144] ss:$48 sps:$4 sm:$0xff]  }
 0x1a3   :  { %4549 = vmatmul.mubr.bf16.gmra.mrb[24].mxu0 %v20272_v4 }
 0x1a4   :  { %4558 = vmatprep.mubr.bf16.mxu0 %v20278_v5 }
 0x1a5   :  { %4811 = vmatpush1.bf16.msra.mxu1 %v17873_v1 }
 0x1a6   :  { %4812 = vmatprep.subr.bf16.mxu1 %v17878_v3  ;;  %v3946_v2 = vpop.f32.mrb[0].mxu0  ;;  %v20353_v3 = vsub.s32 1, %v20333_v61 }
 0x1a7   :  { %v20282_v7 = vadd.f32 %v20074_v52, %v3946_v2  ;;  %v3948_v8 = vpop.f32.mrb[1].mxu0  ;;  %v20296_v52 = vld [vmem:[%s25004_s0 + $0xb8] ss:$28 sps:$4 sm:$0xff]  }
 0x1a8   :  { %v20285_v9 = vadd.f32 %v20076_v53, %v3948_v8  ;;  %v3950_v11 = vpop.f32.mrb[2].mxu0  ;;  %v17885_v53 = vld [vmem:[#allocation2 + $0x1158] ss:$48 sps:$4 sm:$0xff]  }
 0x1a9   :  { %4813 = vmatpush1.bf16.msra.mxu1 %v17876_v62  ;;  %v20288_v12 = vadd.f32 %v20078_v54, %v3950_v11  ;;  %v3952_v14 = vpop.f32.mrb[3].mxu0  ;;  %v17890_v54 = vld [vmem:[#allocation2 + $0x11bc] ss:$48 sps:$4 sm:$0xff]   ;;  %v17906_v11 = vld [vmem:[#allocation2 + $0x1a0] ss:$48 sps:$4 sm:$0xff]  }
 0x1aa   :  { %4814 = vmatprep.subr.bf16.mxu1 %v17881_v6  ;;  %v20291_v16 = vadd.f32 %v20086_v57, %v3952_v14 }
 0x1ab   :  { %4559 = vmatmul.mubr.bf16.gmra.mrb[28].mxu0 %v20296_v52 }
 0x1ac   :  { %4601 = vmatprep.mubr.bf16.mxu0 %v19906_v0 }
 0x1ad   :  { %4815 = vmatpush1.bf16.msra.mxu1 %v17879_v10 }
 0x1ae   :  { %4816 = vmatprep.subr.bf16.mxu1 %v17887_v15  ;;  %v3956_v17 = vpop.f32.mrb[4].mxu0 }
 0x1af   :  { %v20301_v13 = vadd.f32 %v20099_v20, %v3956_v17  ;;  %v3958_v18 = vpop.f32.mrb[5].mxu0 }
 0x1b0   :  { %v20304_v57 = vadd.f32 %v20101_v21, %v3958_v18  ;;  %v3960_v22 = vpop.f32.mrb[6].mxu0  ;;  %v20371_v18 = vld [vmem:[%s25004_s0 + $0x88] ss:$28 sps:$4 sm:$0xff]  }
 0x1b1   :  { %4817 = vmatpush1.bf16.msra.mxu1 %v17885_v53  ;;  %v5518_v24 = vmax.f32 %v20282_v7, %v20301_v13  ;;  %v20309_v26 = vadd.f32 %v20107_v25, %v3960_v22  ;;  %v3962_v29 = vpop.f32.mrb[7].mxu0 }
 0x1b2   :  { %4818 = vmatprep.subr.bf16.mxu1 %v17890_v54  ;;  %v5519_v20 = vmax.f32 %v20285_v9, %v20304_v57  ;;  %v20314_v21 = vadd.f32 %v20109_v27, %v3962_v29  ;;  %v17902_v27 = vld [vmem:[#allocation2 + $0xe4] ss:$48 sps:$4 sm:$0xff]   ;;  %v17912_v57 = vld [vmem:[#allocation2 + $0x260] ss:$48 sps:$4 sm:$0xff]  }
 0x1b3   :  { %v5530_v31 = vmax.f32 %v20288_v12, %v20309_v26  ;;  %15337 = vmatmul.mubr.msk.bf16.vlgmr.msra.gmra.mrb[16].mxu0 %vm3753_vm0, %v20321_v35  ;;  %v17911_v54 = vld [vmem:[#allocation2 + $0x204] ss:$48 sps:$4 sm:$0xff]  }
 0x1b4   :  { %v5531_v25 = vmax.f32 %v20291_v16, %v20314_v21  ;;  %4935 = vmatpush1.bf16.msra.mxu0 %v17891_v19  ;;  %4611 = vmatprep.mubr.bf16.mxu0 %v19906_v0  ;;  %v17917_v12 = vld [vmem:[#allocation2 + $0x2c4] ss:$48 sps:$4 sm:$0xff]  }
 0x1b5   :  { %4819 = vmatpush1.bf16.msra.mxu1 %v17888_v23  ;;  %4936 = vmatprep.subr.bf16.mxu0 %v17899_v30  ;;  %v17914_v23 = vld [vmem:[#allocation2 + $0x264] ss:$48 sps:$4 sm:$0xff]  }
 0x1b6   :  { %4861 = vmatprep.subr.bf16.mxu1 %v17896_v28  ;;  %v3966_v41 = vpop.f32.mrb[8].mxu0 }
 0x1b7   :  { %v16819_v43 = vadd.f32 %v20112_v33, %v3966_v41  ;;  %v3968_v44 = vpop.f32.mrb[9].mxu0  ;;  %v17926_v41 = vld [vmem:[#allocation2 + $0x384] ss:$48 sps:$4 sm:$0xff]  }
 0x1b8   :  { %4821 = vmatmul.mubr.bf16.vlgmr.msra.gmra.mrb[32].mxu1 %v20248_v46  ;;  %v16820_v45 = vadd.f32 %v20114_v34, %v3968_v44  ;;  %4937 = vmatpush1.bf16.msra.mxu0 %v17897_v36  ;;  %v3970_v50 = vpop.f32.mrb[10].mxu0  ;;  %v20339_v34 = vld [vmem:[%s25004_s0 + $0x50] ss:$28 sps:$4 sm:$0xff]   ;;  %v20347_v46 = vld [vmem:[%s25006_s2] sm:$0xff] }
 0x1b9   :  { %4862 = vmatpush1.bf16.msra.mxu1 %v17894_v32  ;;  %v16821_v42 = vadd.f32 %v20120_v38, %v3970_v50  ;;  %v3972_v59 = vpop.f32.mrb[11].mxu0  ;;  %4938 = vmatprep.subr.bf16.mxu0 %v17902_v27  ;;  %v17903_v38 = vld [vmem:[#allocation2 + $0x140] ss:$48 sps:$4 sm:$0xff]   ;;  %v20407_v36 = vld [vmem:[%s25004_s0 + $0x4] ss:$28 sps:$4 sm:$0xff]  }
 0x1ba   :  { %4830 = vmatprep.mubr.bf16.mxu1 %v20254_v51  ;;  %v16822_v33 = vadd.f32 %v20122_v40, %v3972_v59  ;;  %5226 = vmatprep.subr.bf16.mxu1 %v17923_v39  ;;  %v20350_v40 = vsub.s32 0, %v20333_v61  ;;  %v17908_v51 = vld [vmem:[#allocation2 + $0x1a4] ss:$48 sps:$4 sm:$0xff]   ;;  %v17918_v39 = vld [vmem:[#allocation2 + $0x320] ss:$48 sps:$4 sm:$0xff]  }
 0x1bb   :  { %15338 = vmatmul.mubr.msk.bf16.gmra.mrb[20].mxu0 %vm3753_vm0, %v20339_v34  ;;  %v17924_v59 = vld [vmem:[#allocation2 + $0x380] ss:$48 sps:$4 sm:$0xff]  }
 0x1bc   :  { %4939 = vmatpush1.bf16.msra.mxu0 %v17900_v56  ;;  %4621 = vmatprep.mubr.bf16.mxu0 %v19906_v0  ;;  %v5597_v14 = vrot.slane %v20347_v46, %v20350_v40 }
 0x1bd   :  { %4940 = vmatprep.subr.bf16.mxu0 %v17905_v63 }
 0x1be   :  { %v3976_v1 = vpop.f32.mrb[12].mxu0 }
 0x1bf   :  { %v16823_v62 = vadd.f32 %v20131_v47, %v3976_v1  ;;  %v3978_v6 = vpop.f32.mrb[13].mxu0  ;;  %v17927_v1 = vld [vmem:[#allocation2 + $0x88] ss:$48 sps:$4 sm:$0xff]  }
 0x1c0   :  { %4831 = vmatmul.mubr.bf16.gmra.mrb[36].mxu1 %v20260_v60  ;;  %v16824_v2 = vadd.f32 %v20133_v48, %v3978_v6  ;;  %4941 = vmatpush1.bf16.msra.mxu0 %v17903_v38  ;;  %v3980_v8 = vpop.f32.mrb[14].mxu0  ;;  %v5601_v60 = vrot.slane %v20347_v46, %v20353_v3  ;;  %v17932_v38 = vld [vmem:[#allocation2 + $0x3e4] ss:$48 sps:$4 sm:$0xff]   ;;  %v17935_v6 = vld [vmem:[#allocation2 + $0xec] ss:$48 sps:$4 sm:$0xff]  }
 0x1c1   :  { %4840 = vmatprep.mubr.bf16.mxu1 %v20266_v49  ;;  %v5542_v10 = vmax.f32 %v16819_v43, %v16823_v62  ;;  %v16825_v15 = vadd.f32 %v20141_v55, %v3980_v8  ;;  %v3982_v53 = vpop.f32.mrb[15].mxu0  ;;  %4942 = vmatprep.subr.bf16.mxu0 %v17908_v51  ;;  %v17930_v62 = vld [vmem:[#allocation2 + $0x3e0] ss:$48 sps:$4 sm:$0xff]  }
 0x1c2   :  { %v5543_v47 = vmax.f32 %v16820_v45, %v16824_v2  ;;  %v16826_v48 = vadd.f32 %v20143_v58, %v3982_v53  ;;  %v17909_v58 = vld [vmem:[#allocation2 + $0x200] ss:$48 sps:$4 sm:$0xff]   ;;  %v17938_v2 = vld [vmem:[#allocation2 + $0x444] ss:$48 sps:$4 sm:$0xff]  }
 0x1c3   :  { %v5566_v17 = vmax.f32 %v5518_v24, %v5542_v10  ;;  %v5554_v49 = vmax.f32 %v16821_v42, %v16825_v15  ;;  %15339 = vmatmul.mubr.msk.bf16.gmra.mrb[24].mxu0 %vm3753_vm0, %v20371_v18  ;;  %v17921_v42 = vld [vmem:[#allocation2 + $0x28] ss:$48 sps:$4 sm:$0xff]   ;;  %v17936_v15 = vld [vmem:[#allocation2 + $0x440] ss:$48 sps:$4 sm:$0xff]  }
 0x1c4   :  { %v5567_v55 = vmax.f32 %v5519_v20, %v5543_v47  ;;  %v5555_v22 = vmax.f32 %v16822_v33, %v16826_v48  ;;  %4943 = vmatpush1.bf16.msra.mxu0 %v17906_v11  ;;  %4631 = vmatprep.mubr.bf16.mxu0 %v19906_v0  ;;  %v17929_v33 = vld [vmem:[#allocation2 + $0x8c] ss:$48 sps:$4 sm:$0xff]   ;;  %v20433_v47 = vsub.s32 2, %v20333_v61  ;;  %v17942_v48 = vld [vmem:[#allocation2 + $0x4a0] ss:$48 sps:$4 sm:$0xff]  }
 0x1c5   :  { %v5654_v7 = vadd.f32 %v5597_v14, %v5566_v17  ;;  %v5578_v13 = vmax.f32 %v5530_v31, %v5554_v49  ;;  %4944 = vmatprep.subr.bf16.mxu0 %v17911_v54  ;;  %v17944_v54 = vld [vmem:[#allocation2 + $0x4a4] ss:$48 sps:$4 sm:$0xff]   ;;  %v20436_v17 = vsub.s32 3, %v20333_v61  ;;  %v17947_v49 = vld [vmem:[#allocation2 + $0x1ac] ss:$48 sps:$4 sm:$0xff]  }
 0x1c6   :  { %v5655_v19 = vadd.f32 %v5601_v60, %v5567_v55  ;;  %v5579_v24 = vmax.f32 %v5531_v25, %v5555_v22  ;;  %v17915_v25 = vld [vmem:[#allocation2 + $0x2c0] ss:$48 sps:$4 sm:$0xff]   ;;  %v17950_v55 = vld [vmem:[#allocation2 + $0x504] ss:$48 sps:$4 sm:$0xff]  }
 0x1c7   :  { %v5666_v29 = vadd.f32 %v5597_v14, %v5578_v13  ;;  %v5678_v28 = vmax.f32 %v5654_v7, 0.0  ;;  %v17933_v14 = vld [vmem:[#allocation2 + $0xe8] ss:$48 sps:$4 sm:$0xff]  }
 0x1c8   :  { %4841 = vmatmul.mubr.bf16.gmra.mrb[40].mxu1 %v20272_v4  ;;  %v5667_v9 = vadd.f32 %v5601_v60, %v5579_v24  ;;  %4945 = vmatpush1.bf16.msra.mxu0 %v17909_v58  ;;  %v5679_v26 = vmax.f32 %v5655_v19, 0.0  ;;  %v20396_v4 = vld [vmem:[%s25004_s0 + $0xc0] ss:$28 sps:$4 sm:$0xff]  }
 0x1c9   :  { %4850 = vmatprep.mubr.bf16.mxu1 %v20278_v5  ;;  %v5690_v30 = vmax.f32 %v5666_v29, 0.0  ;;  %4946 = vmatprep.subr.bf16.mxu0 %v17914_v23  ;;  %v17939_v60 = vld [vmem:[#allocation2 + $0x148] ss:$48 sps:$4 sm:$0xff]   ;;  %v5609_v23 = vrot.slane %v20347_v46, %v20436_v17  ;;  %v17948_v29 = vld [vmem:[#allocation2 + $0x500] ss:$48 sps:$4 sm:$0xff]  }
 0x1ca   :  { %v5691_v20 = vmax.f32 %v5667_v9, 0.0  ;;  %v17945_v24 = vld [vmem:[#allocation2 + $0x1a8] ss:$48 sps:$4 sm:$0xff]  }
 0x1cb   :  { %v20387_v31 = vpop.f32.mrb[16].mxu1  ;;  %v20389_v32 = vpack.c.bf16 %v5690_v30, %v5678_v28  ;;  %15340 = vmatmul.mubr.msk.bf16.gmra.mrb[28].mxu0 %vm3753_vm0, %v20396_v4  ;;  %v17953_v30 = vld [vmem:[#allocation2 + $0x20c] ss:$48 sps:$4 sm:$0xff]  }
 0x1cc   :  { %v20391_v16 = vpop.f32.mrb[17].mxu1  ;;  %v20400_v5 = vpack.c.bf16 %v5691_v20, %v5679_v26  ;;  %4947 = vmatpush1.bf16.msra.mxu0 %v17912_v57  ;;  %4966 = vmatprep.mubr.bf16.mxu0 %v20407_v36 }
 0x1cd   :  { %v20402_v21 = vpop.f32.mrb[18].mxu1  ;;  %4948 = vmatprep.subr.bf16.mxu0 %v17917_v12  ;;  %v17956_v12 = vld [vmem:[#allocation2 + $0x564] ss:$48 sps:$4 sm:$0xff]  }
 0x1ce   :  { %v20410_v27 = vpop.f32.mrb[19].mxu1 }
 0x1d0   :  { %4851 = vmatmul.mubr.bf16.gmra.mrb[44].mxu1 %v20296_v52  ;;  %4949 = vmatpush1.bf16.msra.mxu0 %v17915_v25 }
 0x1d1   :  { %4893 = vmatprep.mubr.bf16.mxu1 %v19906_v0  ;;  %4950 = vmatprep.subr.bf16.mxu0 %v17920_v37  ;;  %v17954_v37 = vld [vmem:[#allocation2 + $0x560] ss:$48 sps:$4 sm:$0xff]  }
 0x1d3   :  { %v4321_v43 = vpop.f32.mrb[20].mxu1 }
 0x1d4   :  { %v5520_v44 = vmax.f32 %v20387_v31, %v4321_v43  ;;  %v20415_v45 = vpop.f32.mrb[21].mxu1  ;;  %4951 = vmatpush1.bf16.msra.mxu0 %v17918_v39  ;;  %v17962_v43 = vld [vmem:[#allocation2 + $0x5c4] ss:$48 sps:$4 sm:$0xff]  }
 0x1d5   :  { %v5521_v50 = vmax.f32 %v20391_v16, %v20415_v45  ;;  %v20419_v56 = vpop.f32.mrb[22].mxu1  ;;  %4952 = vmatprep.subr.bf16.mxu0 %v17926_v41  ;;  %v17959_v41 = vld [vmem:[#allocation2 + $0x26c] ss:$48 sps:$4 sm:$0xff]   ;;  %v17957_v16 = vld [vmem:[#allocation2 + $0x268] ss:$48 sps:$4 sm:$0xff]  }
 0x1d6   :  { %v5532_v52 = vmax.f32 %v20402_v21, %v20419_v56  ;;  %v20423_v63 = vpop.f32.mrb[23].mxu1 }
 0x1d7   :  { %v5533_v51 = vmax.f32 %v20410_v27, %v20423_v63  ;;  %v17951_v27 = vld [vmem:[#allocation2 + $0x208] ss:$48 sps:$4 sm:$0xff]   ;;  %v17968_v63 = vld [vmem:[#allocation2 + $0x624] ss:$48 sps:$4 sm:$0xff]  }
 0x1d8   :  { %15341 = vmatmul.mubr.msk.bf16.vlgmr.msra.gmra.mrb[32].mxu1 %vm3753_vm0, %v20321_v35  ;;  %4953 = vmatpush1.bf16.msra.mxu0 %v17924_v59  ;;  %v17941_v35 = vld [vmem:[#allocation2 + $0x14c] ss:$48 sps:$4 sm:$0xff]  }
 0x1d9   :  { %5227 = vmatpush1.bf16.msra.mxu1 %v17921_v42  ;;  %4954 = vmatprep.subr.bf16.mxu0 %v17932_v38  ;;  %v17963_v38 = vld [vmem:[#allocation2 + $0x2c8] ss:$48 sps:$4 sm:$0xff]  }
 0x1da   :  { %5228 = vmatprep.subr.bf16.mxu1 %v17929_v33  ;;  %4903 = vmatprep.mubr.bf16.mxu1 %v19906_v0 }
 0x1db   :  { %v4331_v8 = vpop.f32.mrb[24].mxu1 }
 0x1dc   :  { %v4333_v11 = vpop.f32.mrb[25].mxu1  ;;  %4955 = vmatpush1.bf16.msra.mxu0 %v17930_v62  ;;  %v17974_v62 = vld [vmem:[#allocation2 + $0x684] ss:$48 sps:$4 sm:$0xff]  }
 0x1dd   :  { %5229 = vmatpush1.bf16.msra.mxu1 %v17927_v1  ;;  %v4335_v10 = vpop.f32.mrb[26].mxu1  ;;  %4956 = vmatprep.subr.bf16.mxu0 %v17938_v2  ;;  %v17971_v1 = vld [vmem:[#allocation2 + $0x32c] ss:$48 sps:$4 sm:$0xff]   ;;  %v17972_v2 = vld [vmem:[#allocation2 + $0x680] ss:$48 sps:$4 sm:$0xff]  }
 0x1de   :  { %v4337_v53 = vpop.f32.mrb[27].mxu1  ;;  %5230 = vmatprep.subr.bf16.mxu1 %v17935_v6  ;;  %v17969_v6 = vld [vmem:[#allocation2 + $0x328] ss:$48 sps:$4 sm:$0xff]  }
 0x1e0   :  { %15342 = vmatmul.mubr.msk.bf16.gmra.mrb[36].mxu1 %vm3753_vm0, %v20339_v34  ;;  %4957 = vmatpush1.bf16.msra.mxu0 %v17936_v15  ;;  %v5605_v34 = vrot.slane %v20347_v46, %v20433_v47  ;;  %v20465_v15 = vld [vmem:[%s25004_s0 + $0x3c] ss:$28 sps:$4 sm:$0xff]  }
 0x1e1   :  { %5231 = vmatpush1.bf16.msra.mxu1 %v17933_v14  ;;  %4958 = vmatprep.subr.bf16.mxu0 %v17944_v54  ;;  %v17978_v14 = vld [vmem:[#allocation2 + $0x6e0] ss:$48 sps:$4 sm:$0xff]  }
 0x1e2   :  { %5232 = vmatprep.subr.bf16.mxu1 %v17941_v35  ;;  %4913 = vmatprep.mubr.bf16.mxu1 %v19906_v0  ;;  %v17981_v35 = vld [vmem:[#allocation2 + $0x3e8] ss:$48 sps:$4 sm:$0xff]   ;;  %v17984_v54 = vld [vmem:[#allocation2 + $0x740] ss:$48 sps:$4 sm:$0xff]  }
 0x1e3   :  { %v4341_v22 = vpop.f32.mrb[28].mxu1 }
 0x1e4   :  { %v5544_v58 = vmax.f32 %v4331_v8, %v4341_v22  ;;  %v4343_v7 = vpop.f32.mrb[29].mxu1  ;;  %4959 = vmatpush1.bf16.msra.mxu0 %v17942_v48  ;;  %v20459_v8 = vld [vmem:[%s25004_s0] ss:$28 sps:$4 sm:$0xff]   ;;  %v17989_v48 = vld [vmem:[#allocation2 + $0x44c] ss:$48 sps:$4 sm:$0xff]  }
 0x1e5   :  { %5233 = vmatpush1.bf16.msra.mxu1 %v17939_v60  ;;  %v5545_v13 = vmax.f32 %v4333_v11, %v4343_v7  ;;  %v4345_v19 = vpop.f32.mrb[30].mxu1  ;;  %4960 = vmatprep.subr.bf16.mxu0 %v17950_v55  ;;  %v17980_v11 = vld [vmem:[#allocation2 + $0x6e4] ss:$48 sps:$4 sm:$0xff]   ;;  %v20471_v60 = vld [vmem:[%s25004_s0 + $0x38] ss:$28 sps:$4 sm:$0xff]  }
 0x1e6   :  { %v5568_v9 = vmax.f32 %v5520_v44, %v5544_v58  ;;  %v5556_v57 = vmax.f32 %v4335_v10, %v4345_v19  ;;  %v4347_v28 = vpop.f32.mrb[31].mxu1  ;;  %5234 = vmatprep.subr.bf16.mxu1 %v17947_v49  ;;  %v17975_v10 = vld [vmem:[#allocation2 + $0x388] ss:$48 sps:$4 sm:$0xff]   ;;  %v17992_v49 = vld [vmem:[#allocation2 + $0x7a4] ss:$48 sps:$4 sm:$0xff]  }
 0x1e7   :  { %v5569_v26 = vmax.f32 %v5521_v50, %v5545_v13  ;;  %v5557_v20 = vmax.f32 %v4337_v53, %v4347_v28  ;;  %v17986_v53 = vld [vmem:[#allocation2 + $0x744] ss:$48 sps:$4 sm:$0xff]   ;;  %v17987_v55 = vld [vmem:[#allocation2 + $0x448] ss:$48 sps:$4 sm:$0xff]   ;;  %v17990_v22 = vld [vmem:[#allocation2 + $0x7a0] ss:$48 sps:$4 sm:$0xff]  }
 0x1e8   :  { %v5656_v31 = vadd.f32 %v5605_v34, %v5568_v9  ;;  %v5580_v21 = vmax.f32 %v5532_v52, %v5556_v57  ;;  %15343 = vmatmul.mubr.msk.bf16.gmra.mrb[40].mxu1 %vm3753_vm0, %v20371_v18  ;;  %4961 = vmatpush1.bf16.msra.mxu0 %v17948_v29  ;;  %v17960_v18 = vld [vmem:[#allocation2 + $0x5c0] ss:$48 sps:$4 sm:$0xff]   ;;  %v17965_v52 = vld [vmem:[#allocation2 + $0x2cc] ss:$48 sps:$4 sm:$0xff]   ;;  %v17998_v7 = vld [vmem:[#allocation2 + $0x804] ss:$48 sps:$4 sm:$0xff]  }
 0x1e9   :  { %v5657_v46 = vadd.f32 %v5609_v23, %v5569_v26  ;;  %v5581_v25 = vmax.f32 %v5533_v51, %v5557_v20  ;;  %5235 = vmatpush1.bf16.msra.mxu1 %v17945_v24  ;;  %4962 = vmatprep.subr.bf16.mxu0 %v17956_v12  ;;  %v17966_v51 = vld [vmem:[#allocation2 + $0x620] ss:$48 sps:$4 sm:$0xff]   ;;  %v20477_v58 = vld [vmem:[%s25004_s0 + $0x74] ss:$28 sps:$4 sm:$0xff]   ;;  %v18004_v29 = vld [vmem:[#allocation2 + $0x864] ss:$48 sps:$4 sm:$0xff]  }
 0x1ea   :  { %v5668_v39 = vadd.f32 %v5605_v34, %v5580_v21  ;;  %5236 = vmatprep.subr.bf16.mxu1 %v17953_v30  ;;  %4923 = vmatprep.mubr.bf16.mxu1 %v19906_v0  ;;  %v5680_v45 = vmax.f32 %v5656_v31, 0.0  ;;  %v17995_v34 = vld [vmem:[#allocation2 + $0x4ac] ss:$48 sps:$4 sm:$0xff]   ;;  %v17993_v13 = vld [vmem:[#allocation2 + $0x4a8] ss:$48 sps:$4 sm:$0xff]  }
 0x1eb   :  { %v5669_v44 = vadd.f32 %v5609_v23, %v5581_v25  ;;  %v5681_v56 = vmax.f32 %v5657_v46, 0.0  ;;  %v17996_v23 = vld [vmem:[#allocation2 + $0x800] ss:$48 sps:$4 sm:$0xff]   ;;  %v20483_v19 = vld [vmem:[%s25004_s0 + $0x70] ss:$28 sps:$4 sm:$0xff]  }
 0x1ec   :  { %v5692_v50 = vmax.f32 %v5668_v39, 0.0  ;;  %4963 = vmatpush1.bf16.msra.mxu0 %v17954_v37  ;;  %v18001_v24 = vld [vmem:[#allocation2 + $0x50c] ss:$48 sps:$4 sm:$0xff]   ;;  %v17999_v9 = vld [vmem:[#allocation2 + $0x508] ss:$48 sps:$4 sm:$0xff]  }
 0x1ed   :  { %v5693_v42 = vmax.f32 %v5669_v44, 0.0  ;;  %5237 = vmatpush1.bf16.msra.mxu1 %v17951_v27  ;;  %4964 = vmatprep.subr.bf16.mxu0 %v17962_v43  ;;  %v18002_v57 = vld [vmem:[#allocation2 + $0x860] ss:$48 sps:$4 sm:$0xff]   ;;  %v18007_v30 = vld [vmem:[#allocation2 + $0x56c] ss:$48 sps:$4 sm:$0xff]  }
 0x1ee   :  { %v20449_v59 = vpack.c.bf16 %v5692_v50, %v5680_v45  ;;  %5238 = vmatprep.subr.bf16.mxu1 %v17959_v41  ;;  %v20489_v28 = vld [vmem:[%s25004_s0 + $0xac] ss:$28 sps:$4 sm:$0xff]   ;;  %v18005_v20 = vld [vmem:[#allocation2 + $0x568] ss:$48 sps:$4 sm:$0xff]   ;;  %v18013_v21 = vld [vmem:[#allocation2 + $0x5cc] ss:$48 sps:$4 sm:$0xff]  }
 0x1ef   :  { %v20451_v33 = vpack.c.bf16 %v5693_v42, %v5681_v56  ;;  %v18010_v12 = vld [vmem:[#allocation2 + $0x8c4] ss:$48 sps:$4 sm:$0xff]   ;;  %v20495_v26 = vld [vmem:[%s25004_s0 + $0xa8] ss:$28 sps:$4 sm:$0xff]   ;;  %v18011_v25 = vld [vmem:[#allocation2 + $0x5c8] ss:$48 sps:$4 sm:$0xff]  }
 0x1f0   :  { %15344 = vmatmul.mubr.msk.bf16.gmra.mrb[44].mxu1 %vm3753_vm0, %v20396_v4  ;;  %4965 = vmatpush1.bf16.msra.mxu0 %v17960_v18  ;;  %v17977_v4 = vld [vmem:[#allocation2 + $0x38c] ss:$48 sps:$4 sm:$0xff]   ;;  %v18008_v31 = vld [vmem:[#allocation2 + $0x8c0] ss:$48 sps:$4 sm:$0xff]   ;;  %v18016_v46 = vld [vmem:[#allocation2 + $0x924] ss:$48 sps:$4 sm:$0xff]  }
 0x1f1   :  { %5239 = vmatpush1.bf16.msra.mxu1 %v17957_v16  ;;  %5007 = vmatprep.subr.bf16.mxu0 %v17968_v63  ;;  %v18014_v27 = vld [vmem:[#allocation2 + $0x920] ss:$48 sps:$4 sm:$0xff]   ;;  %v18019_v39 = vld [vmem:[#allocation2 + $0x62c] ss:$48 sps:$4 sm:$0xff]   ;;  %v18022_v41 = vld [vmem:[#allocation2 + $0x984] ss:$48 sps:$4 sm:$0xff]  }
 0x1f2   :  { %5240 = vmatprep.subr.bf16.mxu1 %v17965_v52  ;;  %5258 = vmatprep.mubr.bf16.mxu1 %v20407_v36  ;;  %v17983_v36 = vld [vmem:[#allocation2 + $0x3ec] ss:$48 sps:$4 sm:$0xff]   ;;  %v20501_v37 = vld [vmem:[%s25004_s0 + $0xc] ss:$28 sps:$4 sm:$0xff]   ;;  %v18017_v43 = vld [vmem:[#allocation2 + $0x628] ss:$48 sps:$4 sm:$0xff]  }
 0x1f3   :  { %4967 = vmatmul.mubr.bf16.vlgmr.msra.gmra.mrb[32].mxu0 %v20459_v8  ;;  %v18020_v44 = vld [vmem:[#allocation2 + $0x980] ss:$48 sps:$4 sm:$0xff]   ;;  %v18025_v16 = vld [vmem:[#allocation2 + $0x68c] ss:$48 sps:$4 sm:$0xff]   ;;  %v18028_v45 = vld [vmem:[#allocation2 + $0x9e4] ss:$48 sps:$4 sm:$0xff]  }
 0x1f4   :  { %5008 = vmatpush1.bf16.msra.mxu0 %v17966_v51  ;;  %4976 = vmatprep.mubr.bf16.mxu0 %v20465_v15  ;;  %v18023_v50 = vld [vmem:[#allocation2 + $0x688] ss:$48 sps:$4 sm:$0xff]   ;;  %v18026_v56 = vld [vmem:[#allocation2 + $0x9e0] ss:$48 sps:$4 sm:$0xff]   ;;  %v18031_v42 = vld [vmem:[#allocation2 + $0x6ec] ss:$48 sps:$4 sm:$0xff]  }
 0x1f5   :  { %5241 = vmatpush1.bf16.msra.mxu1 %v17963_v38  ;;  %5009 = vmatprep.subr.bf16.mxu0 %v17974_v62  ;;  %v18034_v18 = vld [vmem:[#allocation2 + $0xa44] ss:$48 sps:$4 sm:$0xff]   ;;  %v18029_v52 = vld [vmem:[#allocation2 + $0x6e8] ss:$48 sps:$4 sm:$0xff]   ;;  %v18032_v63 = vld [vmem:[#allocation2 + $0xa40] ss:$48 sps:$4 sm:$0xff]  }
 0x1f6   :  { %5242 = vmatprep.subr.bf16.mxu1 %v17971_v1  ;;  %v18037_v38 = vld [vmem:[#allocation2 + $0x74c] ss:$48 sps:$4 sm:$0xff]   ;;  %v18040_v51 = vld [vmem:[#allocation2 + $0xaa4] ss:$48 sps:$4 sm:$0xff]   ;;  %v18035_v1 = vld [vmem:[#allocation2 + $0x748] ss:$48 sps:$4 sm:$0xff]  }
 0x1f7   :  { %v18038_v62 = vld [vmem:[#allocation2 + $0xaa0] ss:$48 sps:$4 sm:$0xff]  }
 0x1f8   :  { %5010 = vmatpush1.bf16.msra.mxu0 %v17972_v2  ;;  %v18046_v2 = vld [vmem:[#allocation2 + $0xb04] ss:$48 sps:$4 sm:$0xff]  }
 0x1f9   :  { %5243 = vmatpush1.bf16.msra.mxu1 %v17969_v6  ;;  %5011 = vmatprep.subr.bf16.mxu0 %v17980_v11  ;;  %v18043_v6 = vld [vmem:[#allocation2 + $0x7ac] ss:$48 sps:$4 sm:$0xff]  }
 0x1fa   :  { %5244 = vmatprep.subr.bf16.mxu1 %v17977_v4  ;;  %v18044_v4 = vld [vmem:[#allocation2 + $0xb00] ss:$48 sps:$4 sm:$0xff]   ;;  %v18049_v11 = vld [vmem:[#allocation2 + $0x80c] ss:$48 sps:$4 sm:$0xff]  }
 0x1fb   :  { %4977 = vmatmul.mubr.bf16.gmra.mrb[36].mxu0 %v20471_v60 }
 0x1fc   :  { %5012 = vmatpush1.bf16.msra.mxu0 %v17978_v14  ;;  %4986 = vmatprep.mubr.bf16.mxu0 %v20477_v58  ;;  %v18047_v14 = vld [vmem:[#allocation2 + $0x808] ss:$48 sps:$4 sm:$0xff]  }
 0x1fd   :  { %5245 = vmatpush1.bf16.msra.mxu1 %v17975_v10  ;;  %5013 = vmatprep.subr.bf16.mxu0 %v17986_v53  ;;  %v18052_v10 = vld [vmem:[#allocation2 + $0xb64] ss:$48 sps:$4 sm:$0xff]  }
 0x1fe   :  { %5246 = vmatprep.subr.bf16.mxu1 %v17983_v36  ;;  %v18055_v36 = vld [vmem:[#allocation2 + $0x86c] ss:$48 sps:$4 sm:$0xff]   ;;  %v18058_v53 = vld [vmem:[#allocation2 + $0xbc4] ss:$48 sps:$4 sm:$0xff]  }
 0x200   :  { %5014 = vmatpush1.bf16.msra.mxu0 %v17984_v54  ;;  %v18056_v54 = vld [vmem:[#allocation2 + $0xbc0] ss:$48 sps:$4 sm:$0xff]  }
 0x201   :  { %5247 = vmatpush1.bf16.msra.mxu1 %v17981_v35  ;;  %5015 = vmatprep.subr.bf16.mxu0 %v17992_v49  ;;  %v18053_v35 = vld [vmem:[#allocation2 + $0x868] ss:$48 sps:$4 sm:$0xff]  }
 0x202   :  { %5248 = vmatprep.subr.bf16.mxu1 %v17989_v48  ;;  %v18064_v48 = vld [vmem:[#allocation2 + $0xc24] ss:$48 sps:$4 sm:$0xff]   ;;  %v18059_v49 = vld [vmem:[#allocation2 + $0x8c8] ss:$48 sps:$4 sm:$0xff]  }
 0x203   :  { %4987 = vmatmul.mubr.bf16.gmra.mrb[40].mxu0 %v20483_v19 }
 0x204   :  { %5016 = vmatpush1.bf16.msra.mxu0 %v17990_v22  ;;  %4996 = vmatprep.mubr.bf16.mxu0 %v20489_v28  ;;  %v18067_v22 = vld [vmem:[#allocation2 + $0x92c] ss:$48 sps:$4 sm:$0xff]  }
 0x205   :  { %5249 = vmatpush1.bf16.msra.mxu1 %v17987_v55  ;;  %5017 = vmatprep.subr.bf16.mxu0 %v17998_v7  ;;  %v18062_v55 = vld [vmem:[#allocation2 + $0xc20] ss:$48 sps:$4 sm:$0xff]  }
 0x206   :  { %5250 = vmatprep.subr.bf16.mxu1 %v17995_v34  ;;  %v18065_v34 = vld [vmem:[#allocation2 + $0x928] ss:$48 sps:$4 sm:$0xff]   ;;  %v20515_v7 = vld [vmem:[%s25004_s0 + $0x8] ss:$28 sps:$4 sm:$0xff]  }
 0x208   :  { %5018 = vmatpush1.bf16.msra.mxu0 %v17996_v23  ;;  %v18073_v23 = vld [vmem:[#allocation2 + $0x98c] ss:$48 sps:$4 sm:$0xff]  }
 0x209   :  { %5251 = vmatpush1.bf16.msra.mxu1 %v17993_v13  ;;  %5019 = vmatprep.subr.bf16.mxu0 %v18004_v29  ;;  %v18068_v13 = vld [vmem:[#allocation2 + $0xc80] ss:$48 sps:$4 sm:$0xff]  }
 0x20a   :  { %5252 = vmatprep.subr.bf16.mxu1 %v18001_v24  ;;  %v18071_v24 = vld [vmem:[#allocation2 + $0x988] ss:$48 sps:$4 sm:$0xff]   ;;  %v18074_v29 = vld [vmem:[#allocation2 + $0xce0] ss:$48 sps:$4 sm:$0xff]  }
 0x20b   :  { %4997 = vmatmul.mubr.bf16.gmra.mrb[44].mxu0 %v20495_v26 }
 0x20c   :  { %5020 = vmatpush1.bf16.msra.mxu0 %v18002_v57  ;;  %5039 = vmatprep.mubr.bf16.mxu0 %v20501_v37  ;;  %v18079_v57 = vld [vmem:[#allocation2 + $0x9ec] ss:$48 sps:$4 sm:$0xff]  }
 0x20d   :  { %5253 = vmatpush1.bf16.msra.mxu1 %v17999_v9  ;;  %5021 = vmatprep.subr.bf16.mxu0 %v18010_v12  ;;  %v20521_v9 = vld [vmem:[%s25004_s0 + $0x44] ss:$28 sps:$4 sm:$0xff]   ;;  %v18080_v12 = vld [vmem:[#allocation2 + $0xd40] ss:$48 sps:$4 sm:$0xff]  }
 0x20e   :  { %5254 = vmatprep.subr.bf16.mxu1 %v18007_v30  ;;  %v18077_v30 = vld [vmem:[#allocation2 + $0x9e8] ss:$48 sps:$4 sm:$0xff]  }
 0x210   :  { %5022 = vmatpush1.bf16.msra.mxu0 %v18008_v31  ;;  %v18088_v31 = vld [vmem:[#allocation2 + $0xda4] ss:$48 sps:$4 sm:$0xff]  }
 0x211   :  { %5255 = vmatpush1.bf16.msra.mxu1 %v18005_v20  ;;  %5023 = vmatprep.subr.bf16.mxu0 %v18016_v46  ;;  %v18085_v20 = vld [vmem:[#allocation2 + $0xa4c] ss:$48 sps:$4 sm:$0xff]   ;;  %v20533_v46 = vld [vmem:[%s25004_s0 + $0x7c] ss:$28 sps:$4 sm:$0xff]  }
 0x212   :  { %5256 = vmatprep.subr.bf16.mxu1 %v18013_v21  ;;  %v18083_v21 = vld [vmem:[#allocation2 + $0xa48] ss:$48 sps:$4 sm:$0xff]  }
 0x214   :  { %5024 = vmatpush1.bf16.msra.mxu0 %v18014_v27  ;;  %v18091_v27 = vld [vmem:[#allocation2 + $0xaac] ss:$48 sps:$4 sm:$0xff]  }
 0x215   :  { %5257 = vmatpush1.bf16.msra.mxu1 %v18011_v25  ;;  %5025 = vmatprep.subr.bf16.mxu0 %v18022_v41  ;;  %v18086_v25 = vld [vmem:[#allocation2 + $0xda0] ss:$48 sps:$4 sm:$0xff]  }
 0x216   :  { %5299 = vmatprep.subr.bf16.mxu1 %v18019_v39  ;;  %v18089_v39 = vld [vmem:[#allocation2 + $0xaa8] ss:$48 sps:$4 sm:$0xff]   ;;  %v18092_v41 = vld [vmem:[#allocation2 + $0xe00] ss:$48 sps:$4 sm:$0xff]  }
 0x218   :  { %5259 = vmatmul.mubr.bf16.vlgmr.msra.gmra.mrb[48].mxu1 %v20459_v8  ;;  %5026 = vmatpush1.bf16.msra.mxu0 %v18020_v44  ;;  %v18041_v8 = vld [vmem:[#allocation2 + $0x7a8] ss:$48 sps:$4 sm:$0xff]   ;;  %v20539_v44 = vld [vmem:[%s25004_s0 + $0x78] ss:$28 sps:$4 sm:$0xff]  }
 0x219   :  { %5300 = vmatpush1.bf16.msra.mxu1 %v18017_v43  ;;  %5027 = vmatprep.subr.bf16.mxu0 %v18028_v45  ;;  %v18097_v43 = vld [vmem:[#allocation2 + $0xb0c] ss:$48 sps:$4 sm:$0xff]   ;;  %v18095_v45 = vld [vmem:[#allocation2 + $0xb08] ss:$48 sps:$4 sm:$0xff]  }
 0x21a   :  { %5301 = vmatprep.subr.bf16.mxu1 %v18025_v16  ;;  %5268 = vmatprep.mubr.bf16.mxu1 %v20465_v15  ;;  %v18050_v15 = vld [vmem:[#allocation2 + $0xb60] ss:$48 sps:$4 sm:$0xff]   ;;  %v18100_v16 = vld [vmem:[#allocation2 + $0xe64] ss:$48 sps:$4 sm:$0xff]  }
 0x21c   :  { %5028 = vmatpush1.bf16.msra.mxu0 %v18026_v56  ;;  %v20545_v56 = vld [vmem:[%s25004_s0 + $0xb4] ss:$28 sps:$4 sm:$0xff]  }
 0x21d   :  { %5302 = vmatpush1.bf16.msra.mxu1 %v18023_v50  ;;  %5029 = vmatprep.subr.bf16.mxu0 %v18034_v18  ;;  %v18098_v50 = vld [vmem:[#allocation2 + $0xe60] ss:$48 sps:$4 sm:$0xff]   ;;  %v18106_v18 = vld [vmem:[#allocation2 + $0xec4] ss:$48 sps:$4 sm:$0xff]  }
 0x21e   :  { %5303 = vmatprep.subr.bf16.mxu1 %v18031_v42  ;;  %v18103_v42 = vld [vmem:[#allocation2 + $0xb6c] ss:$48 sps:$4 sm:$0xff]  }
 0x220   :  { %5269 = vmatmul.mubr.bf16.gmra.mrb[52].mxu1 %v20471_v60  ;;  %5030 = vmatpush1.bf16.msra.mxu0 %v18032_v63  ;;  %v18061_v60 = vld [vmem:[#allocation2 + $0x8cc] ss:$48 sps:$4 sm:$0xff]   ;;  %v18104_v63 = vld [vmem:[#allocation2 + $0xec0] ss:$48 sps:$4 sm:$0xff]  }
 0x221   :  { %5304 = vmatpush1.bf16.msra.mxu1 %v18029_v52  ;;  %5031 = vmatprep.subr.bf16.mxu0 %v18040_v51  ;;  %v18101_v52 = vld [vmem:[#allocation2 + $0xb68] ss:$48 sps:$4 sm:$0xff]  }
 0x222   :  { %5305 = vmatprep.subr.bf16.mxu1 %v18037_v38  ;;  %5278 = vmatprep.mubr.bf16.mxu1 %v20477_v58  ;;  %v18070_v58 = vld [vmem:[#allocation2 + $0xc84] ss:$48 sps:$4 sm:$0xff]   ;;  %v18109_v38 = vld [vmem:[#allocation2 + $0xbcc] ss:$48 sps:$4 sm:$0xff]  }
 0x223   :  { %v20551_v51 = vld [vmem:[%s25004_s0 + $0xb0] ss:$28 sps:$4 sm:$0xff]  }
 0x224   :  { %5032 = vmatpush1.bf16.msra.mxu0 %v18038_v62  ;;  %v18107_v62 = vld [vmem:[#allocation2 + $0xbc8] ss:$48 sps:$4 sm:$0xff]  }
 0x225   :  { %5306 = vmatpush1.bf16.msra.mxu1 %v18035_v1  ;;  %5033 = vmatprep.subr.bf16.mxu0 %v18046_v2  ;;  %v18112_v1 = vld [vmem:[#allocation2 + $0xf24] ss:$48 sps:$4 sm:$0xff]   ;;  %v18110_v2 = vld [vmem:[#allocation2 + $0xf20] ss:$48 sps:$4 sm:$0xff]  }
 0x226   :  { %5307 = vmatprep.subr.bf16.mxu1 %v18043_v6  ;;  %v20557_v6 = vld [vmem:[%s25004_s0 + $0x14] ss:$28 sps:$4 sm:$0xff]  }
 0x228   :  { %5279 = vmatmul.mubr.bf16.gmra.mrb[56].mxu1 %v20483_v19  ;;  %5034 = vmatpush1.bf16.msra.mxu0 %v18044_v4  ;;  %v18076_v19 = vld [vmem:[#allocation2 + $0xce4] ss:$48 sps:$4 sm:$0xff]  }
 0x229   :  { %5308 = vmatpush1.bf16.msra.mxu1 %v18041_v8  ;;  %5035 = vmatprep.subr.bf16.mxu0 %v18052_v10  ;;  %v18115_v8 = vld [vmem:[#allocation2 + $0xc2c] ss:$48 sps:$4 sm:$0xff]   ;;  %v18118_v4 = vld [vmem:[#allocation2 + $0xf84] ss:$48 sps:$4 sm:$0xff]   ;;  %v18116_v10 = vld [vmem:[#allocation2 + $0xf80] ss:$48 sps:$4 sm:$0xff]  }
 0x22a   :  { %5309 = vmatprep.subr.bf16.mxu1 %v18049_v11  ;;  %5288 = vmatprep.mubr.bf16.mxu1 %v20489_v28  ;;  %v18082_v28 = vld [vmem:[#allocation2 + $0xd44] ss:$48 sps:$4 sm:$0xff]   ;;  %v18113_v11 = vld [vmem:[#allocation2 + $0xc28] ss:$48 sps:$4 sm:$0xff]  }
 0x22c   :  { %5036 = vmatpush1.bf16.msra.mxu0 %v18050_v15  ;;  %v18124_v15 = vld [vmem:[#allocation2 + $0xfe4] ss:$48 sps:$4 sm:$0xff]  }
 0x22d   :  { %5310 = vmatpush1.bf16.msra.mxu1 %v18047_v14  ;;  %5037 = vmatprep.subr.bf16.mxu0 %v18058_v53  ;;  %v18121_v14 = vld [vmem:[#allocation2 + $0xc8c] ss:$48 sps:$4 sm:$0xff]   ;;  %v18122_v53 = vld [vmem:[#allocation2 + $0xfe0] ss:$48 sps:$4 sm:$0xff]  }
 0x22e   :  { %5311 = vmatprep.subr.bf16.mxu1 %v18055_v36  ;;  %v18119_v36 = vld [vmem:[#allocation2 + $0xc88] ss:$48 sps:$4 sm:$0xff]  }
 0x230   :  { %5289 = vmatmul.mubr.bf16.gmra.mrb[60].mxu1 %v20495_v26  ;;  %5038 = vmatpush1.bf16.msra.mxu0 %v18056_v54  ;;  %v20527_v26 = vld [vmem:[%s25004_s0 + $0x40] ss:$28 sps:$4 sm:$0xff]  }
 0x231   :  { %5312 = vmatpush1.bf16.msra.mxu1 %v18053_v35  ;;  %5080 = vmatprep.subr.bf16.mxu0 %v18064_v48  ;;  %v18127_v35 = vld [vmem:[#allocation2 + $0xcec] ss:$48 sps:$4 sm:$0xff]   ;;  %v18130_v54 = vld [vmem:[#allocation2 + $0x1044] ss:$48 sps:$4 sm:$0xff]   ;;  %v18128_v48 = vld [vmem:[#allocation2 + $0x1040] ss:$48 sps:$4 sm:$0xff]  }
 0x232   :  { %5313 = vmatprep.subr.bf16.mxu1 %v18061_v60  ;;  %5331 = vmatprep.mubr.bf16.mxu1 %v20501_v37  ;;  %v18094_v37 = vld [vmem:[#allocation2 + $0xe04] ss:$48 sps:$4 sm:$0xff]   ;;  %v18125_v60 = vld [vmem:[#allocation2 + $0xce8] ss:$48 sps:$4 sm:$0xff]  }
 0x233   :  { %5040 = vmatmul.mubr.bf16.vlgmr.msra.gmra.mrb[32].mxu0 %v20515_v7 }
 0x234   :  { %5081 = vmatpush1.bf16.msra.mxu0 %v18062_v55  ;;  %5049 = vmatprep.mubr.bf16.mxu0 %v20521_v9  ;;  %v18136_v55 = vld [vmem:[#allocation2 + $0x10a4] ss:$48 sps:$4 sm:$0xff]  }
 0x235   :  { %5314 = vmatpush1.bf16.msra.mxu1 %v18059_v49  ;;  %5082 = vmatprep.subr.bf16.mxu0 %v18070_v58  ;;  %v18133_v49 = vld [vmem:[#allocation2 + $0xd4c] ss:$48 sps:$4 sm:$0xff]   ;;  %v18134_v58 = vld [vmem:[#allocation2 + $0x10a0] ss:$48 sps:$4 sm:$0xff]  }
 0x236   :  { %5315 = vmatprep.subr.bf16.mxu1 %v18067_v22  ;;  %v18131_v22 = vld [vmem:[#allocation2 + $0xd48] ss:$48 sps:$4 sm:$0xff]  }
 0x238   :  { %5083 = vmatpush1.bf16.msra.mxu0 %v18068_v13  ;;  %v18137_v13 = vld [vmem:[#allocation2 + $0xda8] ss:$48 sps:$4 sm:$0xff]  }
 0x239   :  { %5316 = vmatpush1.bf16.msra.mxu1 %v18065_v34  ;;  %5084 = vmatprep.subr.bf16.mxu0 %v18076_v19  ;;  %v18139_v34 = vld [vmem:[#allocation2 + $0xdac] ss:$48 sps:$4 sm:$0xff]  }
 0x23a   :  { %5317 = vmatprep.subr.bf16.mxu1 %v18073_v23  ;;  %v18140_v23 = vld [vmem:[#allocation2 + $0x1100] ss:$48 sps:$4 sm:$0xff]   ;;  %v18145_v19 = vld [vmem:[#allocation2 + $0xe0c] ss:$48 sps:$4 sm:$0xff]  }
 0x23b   :  { %5050 = vmatmul.mubr.bf16.gmra.mrb[36].mxu0 %v20527_v26 }
 0x23c   :  { %5085 = vmatpush1.bf16.msra.mxu0 %v18074_v29  ;;  %5059 = vmatprep.mubr.bf16.mxu0 %v20533_v46  ;;  %v18143_v29 = vld [vmem:[#allocation2 + $0xe08] ss:$48 sps:$4 sm:$0xff]  }
 0x23d   :  { %5318 = vmatpush1.bf16.msra.mxu1 %v18071_v24  ;;  %5086 = vmatprep.subr.bf16.mxu0 %v18082_v28  ;;  %v18148_v24 = vld [vmem:[#allocation2 + $0x1164] ss:$48 sps:$4 sm:$0xff]  }
 0x23e   :  { %5319 = vmatprep.subr.bf16.mxu1 %v18079_v57  ;;  %v18151_v57 = vld [vmem:[#allocation2 + $0xe6c] ss:$48 sps:$4 sm:$0xff]   ;;  %v18154_v28 = vld [vmem:[#allocation2 + $0x11c4] ss:$48 sps:$4 sm:$0xff]  }
 0x240   :  { %5087 = vmatpush1.bf16.msra.mxu0 %v18080_v12  ;;  %v18152_v12 = vld [vmem:[#allocation2 + $0x11c0] ss:$48 sps:$4 sm:$0xff]  }
 0x241   :  { %5320 = vmatpush1.bf16.msra.mxu1 %v18077_v30  ;;  %5088 = vmatprep.subr.bf16.mxu0 %v18088_v31  ;;  %v18149_v30 = vld [vmem:[#allocation2 + $0xe68] ss:$48 sps:$4 sm:$0xff]  }
 0x242   :  { %5321 = vmatprep.subr.bf16.mxu1 %v18085_v20  ;;  %v18178_v20 = vld [vmem:[#allocation2 + $0x1224] ss:$48 sps:$4 sm:$0xff]   ;;  %v18155_v31 = vld [vmem:[#allocation2 + $0xec8] ss:$48 sps:$4 sm:$0xff]  }
 0x243   :  { %5060 = vmatmul.mubr.bf16.gmra.mrb[40].mxu0 %v20539_v44 }
 0x244   :  { %5089 = vmatpush1.bf16.msra.mxu0 %v18086_v25  ;;  %5069 = vmatprep.mubr.bf16.mxu0 %v20545_v56  ;;  %v18187_v25 = vld [vmem:[%s25007_s3 + $0x4] ss:$48 sps:$4 sm:$0xff]  }
 0x245   :  { %5322 = vmatpush1.bf16.msra.mxu1 %v18083_v21  ;;  %5090 = vmatprep.subr.bf16.mxu0 %v18094_v37  ;;  %v18160_v21 = vld [vmem:[#allocation2 + $0xf2c] ss:$48 sps:$4 sm:$0xff]   ;;  %v20574_v37 = vld [vmem:[%s25004_s0 + $0x10] ss:$28 sps:$4 sm:$0xff]  }
 0x246   :  { %5323 = vmatprep.subr.bf16.mxu1 %v18091_v27  ;;  %v18158_v27 = vld [vmem:[#allocation2 + $0xf28] ss:$48 sps:$4 sm:$0xff]  }
 0x248   :  { %5091 = vmatpush1.bf16.msra.mxu0 %v18092_v41  ;;  %v18163_v41 = vld [vmem:[#allocation2 + $0xf8c] ss:$48 sps:$4 sm:$0xff]  }
 0x249   :  { %5324 = vmatpush1.bf16.msra.mxu1 %v18089_v39  ;;  %5092 = vmatprep.subr.bf16.mxu0 %v18100_v16  ;;  %v20580_v39 = vld [vmem:[%s25004_s0 + $0x4c] ss:$28 sps:$4 sm:$0xff]   ;;  %v18164_v16 = vld [vmem:[#allocation2 + $0xfe8] ss:$48 sps:$4 sm:$0xff]  }
 0x24a   :  { %5325 = vmatprep.subr.bf16.mxu1 %v18097_v43  ;;  %v18161_v43 = vld [vmem:[#allocation2 + $0xf88] ss:$48 sps:$4 sm:$0xff]  }
 0x24b   :  { %5070 = vmatmul.mubr.bf16.gmra.mrb[44].mxu0 %v20551_v51 }
 0x24c   :  { %5093 = vmatpush1.bf16.msra.mxu0 %v18098_v50  ;;  %5112 = vmatprep.mubr.bf16.mxu0 %v20557_v6  ;;  %v20592_v50 = vld [vmem:[%s25004_s0 + $0x84] ss:$28 sps:$4 sm:$0xff]  }
 0x24d   :  { %5326 = vmatpush1.bf16.msra.mxu1 %v18095_v45  ;;  %5094 = vmatprep.subr.bf16.mxu0 %v18106_v18  ;;  %v20586_v45 = vld [vmem:[%s25004_s0 + $0x48] ss:$28 sps:$4 sm:$0xff]  }
 0x24e   :  { %5327 = vmatprep.subr.bf16.mxu1 %v18103_v42  ;;  %v18167_v42 = vld [vmem:[#allocation2 + $0x1048] ss:$48 sps:$4 sm:$0xff]   ;;  %v18172_v18 = vld [vmem:[#allocation2 + $0x10ac] ss:$48 sps:$4 sm:$0xff]  }
 0x250   :  { %5095 = vmatpush1.bf16.msra.mxu0 %v18104_v63  ;;  %v20598_v63 = vld [vmem:[%s25004_s0 + $0x80] ss:$28 sps:$4 sm:$0xff]  }
 0x251   :  { %5328 = vmatpush1.bf16.msra.mxu1 %v18101_v52  ;;  %5096 = vmatprep.subr.bf16.mxu0 %v18112_v1  ;;  %v18170_v52 = vld [vmem:[#allocation2 + $0x10a8] ss:$48 sps:$4 sm:$0xff]  }
 0x252   :  { %5329 = vmatprep.subr.bf16.mxu1 %v18109_v38  ;;  %v20604_v38 = vld [vmem:[%s25004_s0 + $0xbc] ss:$28 sps:$4 sm:$0xff]  }
 0x254   :  { %5097 = vmatpush1.bf16.msra.mxu0 %v18110_v2 }
 0x255   :  { %5330 = vmatpush1.bf16.msra.mxu1 %v18107_v62  ;;  %5098 = vmatprep.subr.bf16.mxu0 %v18118_v4  ;;  %v18173_v62 = vld [vmem:[#allocation2 + $0x1108] ss:$48 sps:$4 sm:$0xff]   ;;  %v18181_v4 = vld [vmem:[#allocation2 + $0x116c] ss:$48 sps:$4 sm:$0xff]  }
 0x256   :  { %5372 = vmatprep.subr.bf16.mxu1 %v18115_v8 }
 0x258   :  { %5332 = vmatmul.mubr.bf16.vlgmr.msra.gmra.mrb[48].mxu1 %v20515_v7  ;;  %5099 = vmatpush1.bf16.msra.mxu0 %v18116_v10  ;;  %v18142_v7 = vld [vmem:[#allocation2 + $0x1104] ss:$48 sps:$4 sm:$0xff]   ;;  %v20618_v10 = vld [vmem:[%s25004_s0 + $0xb8] ss:$28 sps:$4 sm:$0xff]  }
 0x259   :  { %5373 = vmatpush1.bf16.msra.mxu1 %v18113_v11  ;;  %5100 = vmatprep.subr.bf16.mxu0 %v18124_v15  ;;  %v18179_v11 = vld [vmem:[#allocation2 + $0x1168] ss:$48 sps:$4 sm:$0xff]  }
 0x25a   :  { %5374 = vmatprep.subr.bf16.mxu1 %v18121_v14  ;;  %5341 = vmatprep.mubr.bf16.mxu1 %v20521_v9  ;;  %v18146_v9 = vld [vmem:[#allocation2 + $0x1160] ss:$48 sps:$4 sm:$0xff]   ;;  %v18184_v14 = vld [vmem:[#allocation2 + $0x11cc] ss:$48 sps:$4 sm:$0xff]  }
 0x25c   :  { %5101 = vmatpush1.bf16.msra.mxu0 %v18122_v53  ;;  %v18185_v53 = vld [vmem:[%s25007_s3] ss:$48 sps:$4 sm:$0xff]  }
 0x25d   :  { %5375 = vmatpush1.bf16.msra.mxu1 %v18119_v36  ;;  %5102 = vmatprep.subr.bf16.mxu0 %v18130_v54  ;;  %v18182_v36 = vld [vmem:[#allocation2 + $0x11c8] ss:$48 sps:$4 sm:$0xff]  }
 0x25e   :  { %5376 = vmatprep.subr.bf16.mxu1 %v18127_v35 }
 0x260   :  { %5342 = vmatmul.mubr.bf16.gmra.mrb[52].mxu1 %v20527_v26  ;;  %5103 = vmatpush1.bf16.msra.mxu0 %v18128_v48  ;;  %v18157_v26 = vld [vmem:[#allocation2 + $0xecc] ss:$48 sps:$4 sm:$0xff]  }
 0x261   :  { %5377 = vmatpush1.bf16.msra.mxu1 %v18125_v60  ;;  %5104 = vmatprep.subr.bf16.mxu0 %v18136_v55 }
 0x262   :  { %5378 = vmatprep.subr.bf16.mxu1 %v18133_v49  ;;  %5351 = vmatprep.mubr.bf16.mxu1 %v20533_v46  ;;  %v18176_v46 = vld [vmem:[#allocation2 + $0x1220] ss:$48 sps:$4 sm:$0xff]  }
 0x264   :  { %5105 = vmatpush1.bf16.msra.mxu0 %v18134_v58  ;;  %v18193_v58 = vld [vmem:[%s25007_s3 + $0x64] ss:$48 sps:$4 sm:$0xff]  }
 0x265   :  { %5379 = vmatpush1.bf16.msra.mxu1 %v18131_v22  ;;  %5106 = vmatprep.subr.bf16.mxu0 %v18142_v7  ;;  %v18190_v22 = vld [vmem:[#allocation2 + $0x122c] ss:$48 sps:$4 sm:$0xff]   ;;  %v18191_v7 = vld [vmem:[%s25007_s3 + $0x60] ss:$48 sps:$4 sm:$0xff]  }
 0x266   :  { %5380 = vmatprep.subr.bf16.mxu1 %v18139_v34 }
 0x268   :  { %5352 = vmatmul.mubr.bf16.gmra.mrb[56].mxu1 %v20539_v44  ;;  %5107 = vmatpush1.bf16.msra.mxu0 %v18140_v23  ;;  %v18166_v44 = vld [vmem:[#allocation2 + $0xfec] ss:$48 sps:$4 sm:$0xff]   ;;  %v18188_v23 = vld [vmem:[#allocation2 + $0x1228] ss:$48 sps:$4 sm:$0xff]  }
 0x269   :  { %5381 = vmatpush1.bf16.msra.mxu1 %v18137_v13  ;;  %5108 = vmatprep.subr.bf16.mxu0 %v18148_v24  ;;  %v20641_v13 = vld [vmem:[%s25004_s0 + $0x18] ss:$28 sps:$4 sm:$0xff]  }
 0x26a   :  { %5382 = vmatprep.subr.bf16.mxu1 %v18145_v19  ;;  %5361 = vmatprep.mubr.bf16.mxu1 %v20545_v56  ;;  %v18169_v56 = vld [vmem:[#allocation2 + $0x104c] ss:$48 sps:$4 sm:$0xff]  }
 0x26b   :  { %v18196_v19 = vld [vmem:[%s25007_s3 + $0xc4] ss:$48 sps:$4 sm:$0xff]  }
 0x26c   :  { %5109 = vmatpush1.bf16.msra.mxu0 %v18146_v9  ;;  %v18217_v9 = vld [vmem:[%s25007_s3 + $0xc] ss:$48 sps:$4 sm:$0xff]  }
 0x26d   :  { %5383 = vmatpush1.bf16.msra.mxu1 %v18143_v29  ;;  %5110 = vmatprep.subr.bf16.mxu0 %v18154_v28  ;;  %v18194_v29 = vld [vmem:[%s25007_s3 + $0xc0] ss:$48 sps:$4 sm:$0xff]  }
 0x26e   :  { %5384 = vmatprep.subr.bf16.mxu1 %v18151_v57 }
 0x270   :  { %5362 = vmatmul.mubr.bf16.gmra.mrb[60].mxu1 %v20551_v51  ;;  %5111 = vmatpush1.bf16.msra.mxu0 %v18152_v12  ;;  %v18175_v51 = vld [vmem:[#allocation2 + $0x110c] ss:$48 sps:$4 sm:$0xff]  }
 0x271   :  { %5385 = vmatpush1.bf16.msra.mxu1 %v18149_v30  ;;  %5153 = vmatprep.subr.bf16.mxu0 %v18178_v20  ;;  %v18199_v12 = vld [vmem:[%s25007_s3 + $0x124] ss:$48 sps:$4 sm:$0xff]   ;;  %v20666_v20 = vld [vmem:[%s25004_s0 + $0x50] ss:$28 sps:$4 sm:$0xff]  }
 0x272   :  { %5386 = vmatprep.subr.bf16.mxu1 %v18157_v26  ;;  %5404 = vmatprep.mubr.bf16.mxu1 %v20557_v6  ;;  %v18197_v26 = vld [vmem:[%s25007_s3 + $0x120] ss:$48 sps:$4 sm:$0xff]  }
 0x273   :  { %5113 = vmatmul.mubr.bf16.vlgmr.msra.gmra.mrb[32].mxu0 %v20574_v37 }
 0x274   :  { %5122 = vmatprep.mubr.bf16.mxu0 %v20580_v39  ;;  %5154 = vmatpush1.bf16.msra.mxu0 %v18176_v46  ;;  %v18202_v46 = vld [vmem:[%s25007_s3 + $0x184] ss:$48 sps:$4 sm:$0xff]  }
 0x275   :  { %5387 = vmatpush1.bf16.msra.mxu1 %v18155_v31  ;;  %12262 = vmatprep.subr.bf16.mxu0 %v18187_v25  ;;  %v5612_v31 = vsub.s32 4, %v20333_v61 }
 0x276   :  { %5388 = vmatprep.subr.bf16.mxu1 %v18160_v21  ;;  %v5616_v21 = vsub.s32 5, %v20333_v61 }
 0x279   :  { %5389 = vmatpush1.bf16.msra.mxu1 %v18158_v27  ;;  %v18200_v27 = vld [vmem:[%s25007_s3 + $0x180] ss:$48 sps:$4 sm:$0xff]  }
 0x27a   :  { %5390 = vmatprep.subr.bf16.mxu1 %v18163_v41 }
 0x27b   :  { %5123 = vmatmul.mubr.bf16.gmra.mrb[36].mxu0 %v20586_v45 }
 0x27c   :  { %5132 = vmatprep.mubr.bf16.mxu0 %v20592_v50 }
 0x27d   :  { %5391 = vmatpush1.bf16.msra.mxu1 %v18161_v43 }
 0x27e   :  { %5392 = vmatprep.subr.bf16.mxu1 %v18166_v44 }
 0x281   :  { %5393 = vmatpush1.bf16.msra.mxu1 %v18164_v16 }
 0x282   :  { %5394 = vmatprep.subr.bf16.mxu1 %v18169_v56 }
 0x283   :  { %5133 = vmatmul.mubr.bf16.gmra.mrb[40].mxu0 %v20598_v63 }
 0x284   :  { %5142 = vmatprep.mubr.bf16.mxu0 %v20604_v38 }
 0x285   :  { %5395 = vmatpush1.bf16.msra.mxu1 %v18167_v42 }
 0x286   :  { %5396 = vmatprep.subr.bf16.mxu1 %v18172_v18  ;;  %v20607_v1 = vpop.f32.mrb[16].mxu0 }
 0x287   :  { %v20609_v6 = vpop.f32.mrb[17].mxu0 }
 0x288   :  { %v20611_v2 = vpop.f32.mrb[18].mxu0 }
 0x289   :  { %5397 = vmatpush1.bf16.msra.mxu1 %v18170_v52  ;;  %v20613_v8 = vpop.f32.mrb[19].mxu0  ;;  %v18205_v52 = vld [vmem:[%s25007_s3 + $0x1e4] ss:$48 sps:$4 sm:$0xff]  }
 0x28a   :  { %5398 = vmatprep.subr.bf16.mxu1 %v18175_v51 }
 0x28b   :  { %5143 = vmatmul.mubr.bf16.gmra.mrb[44].mxu0 %v20618_v10 }
 0x28c   :  { %5185 = vmatprep.mubr.bf16.mxu0 %v19906_v0 }
 0x28d   :  { %5399 = vmatpush1.bf16.msra.mxu1 %v18173_v62  ;;  %v18203_v62 = vld [vmem:[%s25007_s3 + $0x1e0] ss:$48 sps:$4 sm:$0xff]  }
 0x28e   :  { %5400 = vmatprep.subr.bf16.mxu1 %v18181_v4  ;;  %v4613_v15 = vpop.f32.mrb[20].mxu0 }
 0x28f   :  { %v5522_v35 = vmax.f32 %v20607_v1, %v4613_v15  ;;  %v4615_v54 = vpop.f32.mrb[21].mxu0 }
 0x290   :  { %v5523_v60 = vmax.f32 %v20609_v6, %v4615_v54  ;;  %v4617_v48 = vpop.f32.mrb[22].mxu0 }
 0x291   :  { %5401 = vmatpush1.bf16.msra.mxu1 %v18179_v11  ;;  %v5534_v49 = vmax.f32 %v20611_v2, %v4617_v48  ;;  %v20628_v55 = vpop.f32.mrb[23].mxu0 }
 0x292   :  { %5402 = vmatprep.subr.bf16.mxu1 %v18184_v14  ;;  %v5535_v34 = vmax.f32 %v20613_v8, %v20628_v55  ;;  %v18208_v14 = vld [vmem:[%s25007_s3 + $0x244] ss:$48 sps:$4 sm:$0xff]  }
 0x293   :  { %15345 = vmatmul.mubr.msk.bf16.vlgmr.msra.gmra.mrb[32].mxu0 %vm3753_vm0, %v20641_v13 }
 0x294   :  { %12263 = vmatpush1.bf16.msra.mxu0 %v18185_v53  ;;  %5195 = vmatprep.mubr.bf16.mxu0 %v19906_v0 }
 0x295   :  { %5403 = vmatpush1.bf16.msra.mxu1 %v18182_v36  ;;  %12264 = vmatprep.subr.bf16.mxu0 %v18193_v58  ;;  %v18206_v36 = vld [vmem:[%s25007_s3 + $0x240] ss:$48 sps:$4 sm:$0xff]  }
 0x296   :  { %5445 = vmatprep.subr.bf16.mxu1 %v18190_v22  ;;  %v4623_v24 = vpop.f32.mrb[24].mxu0 }
 0x297   :  { %v4625_v57 = vpop.f32.mrb[25].mxu0 }
 0x298   :  { %5405 = vmatmul.mubr.bf16.vlgmr.msra.gmra.mrb[48].mxu1 %v20574_v37  ;;  %12265 = vmatpush1.bf16.msra.mxu0 %v18191_v7  ;;  %v4627_v28 = vpop.f32.mrb[26].mxu0 }
 0x299   :  { %5446 = vmatpush1.bf16.msra.mxu1 %v18188_v23  ;;  %v4629_v30 = vpop.f32.mrb[27].mxu0  ;;  %12266 = vmatprep.subr.bf16.mxu0 %v18196_v19  ;;  %v18214_v23 = vld [vmem:[%s25007_s3 + $0x304] ss:$48 sps:$4 sm:$0xff]   ;;  %v18212_v19 = vld [vmem:[%s25007_s3 + $0x300] ss:$48 sps:$4 sm:$0xff]  }
 0x29a   :  { %5414 = vmatprep.mubr.bf16.mxu1 %v20580_v39  ;;  %12520 = vmatprep.subr.bf16.mxu1 %v18217_v9  ;;  %v20683_v39 = vld [vmem:[%s25006_s2] sm:$0xff]  ;;  %v18215_v9 = vld [vmem:[%s25007_s3 + $0x8] ss:$48 sps:$4 sm:$0xff]  }
 0x29b   :  { %15346 = vmatmul.mubr.msk.bf16.gmra.mrb[36].mxu0 %vm3753_vm0, %v20666_v20  ;;  %v5613_v41 = vrot.slane %v20683_v39, %v5612_v31  ;;  %v5617_v16 = vrot.slane %v20683_v39, %v5616_v21 }
 0x29c   :  { %12267 = vmatpush1.bf16.msra.mxu0 %v18194_v29  ;;  %5205 = vmatprep.mubr.bf16.mxu0 %v19906_v0 }
 0x29d   :  { %12268 = vmatprep.subr.bf16.mxu0 %v18199_v12 }
 0x29e   :  { %v4633_v25 = vpop.f32.mrb[28].mxu0 }
 0x29f   :  { %v5546_v37 = vmax.f32 %v4623_v24, %v4633_v25  ;;  %v4635_v43 = vpop.f32.mrb[29].mxu0  ;;  %v18220_v24 = vld [vmem:[%s25007_s3 + $0x364] ss:$48 sps:$4 sm:$0xff]  }
 0x2a0   :  { %5415 = vmatmul.mubr.bf16.gmra.mrb[52].mxu1 %v20586_v45  ;;  %12269 = vmatpush1.bf16.msra.mxu0 %v18197_v26  ;;  %v5547_v44 = vmax.f32 %v4625_v57, %v4635_v43  ;;  %v4637_v56 = vpop.f32.mrb[30].mxu0  ;;  %v18218_v57 = vld [vmem:[%s25007_s3 + $0x360] ss:$48 sps:$4 sm:$0xff]  }
 0x2a1   :  { %5424 = vmatprep.mubr.bf16.mxu1 %v20592_v50  ;;  %v5570_v45 = vmax.f32 %v5522_v35, %v5546_v37  ;;  %v5558_v42 = vmax.f32 %v4627_v28, %v4637_v56  ;;  %v4639_v18 = vpop.f32.mrb[31].mxu0  ;;  %12270 = vmatprep.subr.bf16.mxu0 %v18202_v46  ;;  %v20701_v50 = vld [vmem:[%s25004_s0 + $0x88] ss:$28 sps:$4 sm:$0xff]   ;;  %v18224_v43 = vld [vmem:[%s25007_s3 + $0x3c0] ss:$48 sps:$4 sm:$0xff]  }
 0x2a2   :  { %v5571_v51 = vmax.f32 %v5523_v60, %v5547_v44  ;;  %v5559_v1 = vmax.f32 %v4629_v30, %v4639_v18  ;;  %v18223_v30 = vld [vmem:[%s25007_s3 + $0x6c] ss:$48 sps:$4 sm:$0xff]  }
 0x2a3   :  { %v5658_v6 = vadd.f32 %v5613_v41, %v5570_v45  ;;  %v5582_v2 = vmax.f32 %v5534_v49, %v5558_v42  ;;  %15347 = vmatmul.mubr.msk.bf16.gmra.mrb[40].mxu0 %vm3753_vm0, %v20701_v50  ;;  %v18211_v49 = vld [vmem:[%s25007_s3 + $0x2a4] ss:$48 sps:$4 sm:$0xff]   ;;  %v18229_v44 = vld [vmem:[%s25007_s3 + $0xcc] ss:$48 sps:$4 sm:$0xff]   ;;  %v18230_v45 = vld [vmem:[%s25007_s3 + $0x420] ss:$48 sps:$4 sm:$0xff]  }
 0x2a4   :  { %v5659_v8 = vadd.f32 %v5617_v16, %v5571_v51  ;;  %v5583_v4 = vmax.f32 %v5535_v34, %v5559_v1  ;;  %12271 = vmatpush1.bf16.msra.mxu0 %v18200_v27  ;;  %5215 = vmatprep.mubr.bf16.mxu0 %v19906_v0  ;;  %v18226_v27 = vld [vmem:[%s25007_s3 + $0x3c4] ss:$48 sps:$4 sm:$0xff]   ;;  %v18235_v51 = vld [vmem:[%s25007_s3 + $0x12c] ss:$48 sps:$4 sm:$0xff]  }
 0x2a5   :  { %v5670_v11 = vadd.f32 %v5613_v41, %v5582_v2  ;;  %12272 = vmatprep.subr.bf16.mxu0 %v18205_v52  ;;  %v5682_v53 = vmax.f32 %v5658_v6, 0.0  ;;  %v18221_v41 = vld [vmem:[%s25007_s3 + $0x68] ss:$48 sps:$4 sm:$0xff]   ;;  %v18238_v1 = vld [vmem:[%s25007_s3 + $0x484] ss:$48 sps:$4 sm:$0xff]   ;;  %v5620_v2 = vsub.s32 6, %v20333_v61 }
 0x2a6   :  { %v5671_v15 = vadd.f32 %v5617_v16, %v5583_v4  ;;  %v5683_v54 = vmax.f32 %v5659_v8, 0.0  ;;  %v18232_v16 = vld [vmem:[%s25007_s3 + $0x424] ss:$48 sps:$4 sm:$0xff]   ;;  %v18236_v6 = vld [vmem:[%s25007_s3 + $0x480] ss:$48 sps:$4 sm:$0xff]   ;;  %v5624_v8 = vsub.s32 7, %v20333_v61 }
 0x2a7   :  { %v5694_v35 = vmax.f32 %v5670_v11, 0.0  ;;  %v18241_v4 = vld [vmem:[%s25007_s3 + $0x18c] ss:$48 sps:$4 sm:$0xff]   ;;  %v18244_v11 = vld [vmem:[%s25007_s3 + $0x4e4] ss:$48 sps:$4 sm:$0xff]  }
 0x2a8   :  { %5425 = vmatmul.mubr.bf16.gmra.mrb[56].mxu1 %v20598_v63  ;;  %v5695_v60 = vmax.f32 %v5671_v15, 0.0  ;;  %12273 = vmatpush1.bf16.msra.mxu0 %v18203_v62  ;;  %v18209_v63 = vld [vmem:[%s25007_s3 + $0x2a0] ss:$48 sps:$4 sm:$0xff]   ;;  %v18233_v62 = vld [vmem:[%s25007_s3 + $0x128] ss:$48 sps:$4 sm:$0xff]  }
 0x2a9   :  { %5434 = vmatprep.mubr.bf16.mxu1 %v20604_v38  ;;  %v20714_v48 = vpack.c.bf16 %v5694_v35, %v5682_v53  ;;  %12274 = vmatprep.subr.bf16.mxu0 %v18208_v14  ;;  %v20731_v38 = vld [vmem:[%s25004_s0 + $0xc0] ss:$28 sps:$4 sm:$0xff]   ;;  %v5621_v53 = vrot.slane %v20683_v39, %v5620_v2 }
 0x2aa   :  { %v20719_v55 = vpack.c.bf16 %v5695_v60, %v5683_v54  ;;  %v18242_v15 = vld [vmem:[%s25007_s3 + $0x4e0] ss:$48 sps:$4 sm:$0xff]   ;;  %v5625_v60 = vrot.slane %v20683_v39, %v5624_v8  ;;  %v18245_v39 = vld [vmem:[%s25007_s3 + $0x1e8] ss:$48 sps:$4 sm:$0xff]  }
 0x2ab   :  { %v20721_v22 = vpop.f32.mrb[32].mxu1  ;;  %15348 = vmatmul.mubr.msk.bf16.gmra.mrb[44].mxu0 %vm3753_vm0, %v20731_v38 }
 0x2ac   :  { %v20726_v58 = vpop.f32.mrb[33].mxu1  ;;  %12275 = vmatpush1.bf16.msra.mxu0 %v18206_v36  ;;  %12294 = vmatprep.mubr.bf16.mxu0 %v20400_v5 }
 0x2ad   :  { %v20735_v34 = vpop.f32.mrb[34].mxu1  ;;  %12276 = vmatprep.subr.bf16.mxu0 %v18211_v49 }
 0x2ae   :  { %v20738_v7 = vpop.f32.mrb[35].mxu1 }
 0x2b0   :  { %5435 = vmatmul.mubr.bf16.gmra.mrb[60].mxu1 %v20618_v10  ;;  %12277 = vmatpush1.bf16.msra.mxu0 %v18209_v63 }
 0x2b1   :  { %5477 = vmatprep.mubr.bf16.mxu1 %v19906_v0  ;;  %12278 = vmatprep.subr.bf16.mxu0 %v18214_v23 }
 0x2b3   :  { %v4905_v29 = vpop.f32.mrb[36].mxu1 }
 0x2b4   :  { %v5524_v28 = vmax.f32 %v20721_v22, %v4905_v29  ;;  %v20758_v10 = vpop.f32.mrb[37].mxu1  ;;  %12279 = vmatpush1.bf16.msra.mxu0 %v18212_v19 }
 0x2b5   :  { %v5525_v12 = vmax.f32 %v20726_v58, %v20758_v10  ;;  %v20765_v26 = vpop.f32.mrb[38].mxu1  ;;  %12280 = vmatprep.subr.bf16.mxu0 %v18220_v24  ;;  %v18248_v24 = vld [vmem:[%s25007_s3 + $0x540] ss:$48 sps:$4 sm:$0xff]  }
 0x2b6   :  { %v5536_v46 = vmax.f32 %v20735_v34, %v20765_v26  ;;  %v20769_v25 = vpop.f32.mrb[39].mxu1  ;;  %v18247_v34 = vld [vmem:[%s25007_s3 + $0x1ec] ss:$48 sps:$4 sm:$0xff]  }
 0x2b7   :  { %v5537_v37 = vmax.f32 %v20738_v7, %v20769_v25  ;;  %v18250_v7 = vld [vmem:[%s25007_s3 + $0x544] ss:$48 sps:$4 sm:$0xff]  }
 0x2b8   :  { %15349 = vmatmul.mubr.msk.bf16.vlgmr.msra.gmra.mrb[48].mxu1 %vm3753_vm0, %v20641_v13  ;;  %12281 = vmatpush1.bf16.msra.mxu0 %v18218_v57  ;;  %v18227_v13 = vld [vmem:[%s25007_s3 + $0xc8] ss:$48 sps:$4 sm:$0xff]  }
 0x2b9   :  { %12521 = vmatpush1.bf16.msra.mxu1 %v18215_v9  ;;  %12282 = vmatprep.subr.bf16.mxu0 %v18226_v27 }
 0x2ba   :  { %12522 = vmatprep.subr.bf16.mxu1 %v18223_v30  ;;  %5487 = vmatprep.mubr.bf16.mxu1 %v19906_v0  ;;  %v18253_v30 = vld [vmem:[%s25007_s3 + $0x24c] ss:$48 sps:$4 sm:$0xff]  }
 0x2bb   :  { %v4915_v56 = vpop.f32.mrb[40].mxu1 }
 0x2bc   :  { %v4917_v42 = vpop.f32.mrb[41].mxu1  ;;  %12283 = vmatpush1.bf16.msra.mxu0 %v18224_v43 }
 0x2bd   :  { %12523 = vmatpush1.bf16.msra.mxu1 %v18221_v41  ;;  %v4919_v18 = vpop.f32.mrb[42].mxu1  ;;  %12284 = vmatprep.subr.bf16.mxu0 %v18232_v16 }
 0x2be   :  { %v4921_v52 = vpop.f32.mrb[43].mxu1  ;;  %12524 = vmatprep.subr.bf16.mxu1 %v18229_v44  ;;  %v18262_v44 = vld [vmem:[%s25007_s3 + $0x604] ss:$48 sps:$4 sm:$0xff]  }
 0x2c0   :  { %15350 = vmatmul.mubr.msk.bf16.gmra.mrb[52].mxu1 %vm3753_vm0, %v20666_v20  ;;  %12285 = vmatpush1.bf16.msra.mxu0 %v18230_v45  ;;  %v18239_v20 = vld [vmem:[%s25007_s3 + $0x188] ss:$48 sps:$4 sm:$0xff]   ;;  %v18265_v45 = vld [vmem:[%s25007_s3 + $0x30c] ss:$48 sps:$4 sm:$0xff]  }
 0x2c1   :  { %12525 = vmatpush1.bf16.msra.mxu1 %v18227_v13  ;;  %12286 = vmatprep.subr.bf16.mxu0 %v18238_v1  ;;  %v18260_v13 = vld [vmem:[%s25007_s3 + $0x600] ss:$48 sps:$4 sm:$0xff]   ;;  %v18269_v1 = vld [vmem:[%s25007_s3 + $0x368] ss:$48 sps:$4 sm:$0xff]  }
 0x2c2   :  { %12526 = vmatprep.subr.bf16.mxu1 %v18235_v51  ;;  %5497 = vmatprep.mubr.bf16.mxu1 %v19906_v0  ;;  %v18274_v51 = vld [vmem:[%s25007_s3 + $0x6c4] ss:$48 sps:$4 sm:$0xff]  }
 0x2c3   :  { %v4925_v14 = vpop.f32.mrb[44].mxu1 }
 0x2c4   :  { %v5548_v36 = vmax.f32 %v4915_v56, %v4925_v14  ;;  %v4927_v35 = vpop.f32.mrb[45].mxu1  ;;  %12287 = vmatpush1.bf16.msra.mxu0 %v18236_v6  ;;  %v18257_v56 = vld [vmem:[%s25007_s3 + $0x2a8] ss:$48 sps:$4 sm:$0xff]   ;;  %v18277_v6 = vld [vmem:[%s25007_s3 + $0x3cc] ss:$48 sps:$4 sm:$0xff]  }
 0x2c5   :  { %12527 = vmatpush1.bf16.msra.mxu1 %v18233_v62  ;;  %v5549_v54 = vmax.f32 %v4917_v42, %v4927_v35  ;;  %v4929_v49 = vpop.f32.mrb[46].mxu1  ;;  %12288 = vmatprep.subr.bf16.mxu0 %v18244_v11  ;;  %v18263_v42 = vld [vmem:[%s25007_s3 + $0x308] ss:$48 sps:$4 sm:$0xff]   ;;  %v18272_v62 = vld [vmem:[%s25007_s3 + $0x6c0] ss:$48 sps:$4 sm:$0xff]  }
 0x2c6   :  { %v5572_v22 = vmax.f32 %v5524_v28, %v5548_v36  ;;  %v5560_v63 = vmax.f32 %v4919_v18, %v4929_v49  ;;  %v4931_v58 = vpop.f32.mrb[47].mxu1  ;;  %12528 = vmatprep.subr.bf16.mxu1 %v18241_v4  ;;  %v18268_v18 = vld [vmem:[%s25007_s3 + $0x664] ss:$48 sps:$4 sm:$0xff]   ;;  %v18275_v11 = vld [vmem:[%s25007_s3 + $0x3c8] ss:$48 sps:$4 sm:$0xff]  }
 0x2c7   :  { %v5573_v23 = vmax.f32 %v5525_v12, %v5549_v54  ;;  %v5561_v19 = vmax.f32 %v4921_v52, %v4931_v58  ;;  %v18256_v12 = vld [vmem:[%s25007_s3 + $0x5a4] ss:$48 sps:$4 sm:$0xff]   ;;  %v18271_v52 = vld [vmem:[%s25007_s3 + $0x36c] ss:$48 sps:$4 sm:$0xff]   ;;  %v18278_v14 = vld [vmem:[%s25007_s3 + $0x720] ss:$48 sps:$4 sm:$0xff]  }
 0x2c8   :  { %v5660_v29 = vadd.f32 %v5621_v53, %v5572_v22  ;;  %v5584_v9 = vmax.f32 %v5536_v46, %v5560_v63  ;;  %15351 = vmatmul.mubr.msk.bf16.gmra.mrb[56].mxu1 %vm3753_vm0, %v20701_v50  ;;  %12289 = vmatpush1.bf16.msra.mxu0 %v18242_v15  ;;  %v18251_v50 = vld [vmem:[%s25007_s3 + $0x248] ss:$48 sps:$4 sm:$0xff]   ;;  %v18254_v46 = vld [vmem:[%s25007_s3 + $0x5a0] ss:$48 sps:$4 sm:$0xff]   ;;  %v18280_v4 = vld [vmem:[%s25007_s3 + $0x724] ss:$48 sps:$4 sm:$0xff]  }
 0x2c9   :  { %v5661_v57 = vadd.f32 %v5625_v60, %v5573_v23  ;;  %v5585_v28 = vmax.f32 %v5537_v37, %v5561_v19  ;;  %12529 = vmatpush1.bf16.msra.mxu1 %v18239_v20  ;;  %12290 = vmatprep.subr.bf16.mxu0 %v18250_v7  ;;  %v18283_v20 = vld [vmem:[%s25007_s3 + $0x42c] ss:$48 sps:$4 sm:$0xff]   ;;  %v18286_v15 = vld [vmem:[%s25007_s3 + $0x784] ss:$48 sps:$4 sm:$0xff]   ;;  %v18281_v36 = vld [vmem:[%s25007_s3 + $0x428] ss:$48 sps:$4 sm:$0xff]  }
 0x2ca   :  { %v5672_v10 = vadd.f32 %v5621_v53, %v5584_v9  ;;  %12530 = vmatprep.subr.bf16.mxu1 %v18247_v34  ;;  %5507 = vmatprep.mubr.bf16.mxu1 %v19906_v0  ;;  %v5684_v25 = vmax.f32 %v5660_v29, 0.0  ;;  %v18259_v0 = vld [vmem:[%s25007_s3 + $0x2ac] ss:$48 sps:$4 sm:$0xff]   ;;  %v18284_v53 = vld [vmem:[%s25007_s3 + $0x780] ss:$48 sps:$4 sm:$0xff]  }
 0x2cb   :  { %v5673_v26 = vadd.f32 %v5625_v60, %v5585_v28  ;;  %v5685_v37 = vmax.f32 %v5661_v57, 0.0  ;;  %v18289_v35 = vld [vmem:[%s25007_s3 + $0x48c] ss:$48 sps:$4 sm:$0xff]   ;;  %v18292_v54 = vld [vmem:[%s25007_s3 + $0x7e4] ss:$48 sps:$4 sm:$0xff]  }
 0x2cc   :  { %v5696_v27 = vmax.f32 %v5672_v10, 0.0  ;;  %12291 = vmatpush1.bf16.msra.mxu0 %v18248_v24  ;;  %v18287_v60 = vld [vmem:[%s25007_s3 + $0x488] ss:$48 sps:$4 sm:$0xff]   ;;  %v18290_v49 = vld [vmem:[%s25007_s3 + $0x7e0] ss:$48 sps:$4 sm:$0xff]  }
 0x2cd   :  { %v5697_v41 = vmax.f32 %v5673_v26, 0.0  ;;  %12531 = vmatpush1.bf16.msra.mxu1 %v18245_v39  ;;  %12292 = vmatprep.subr.bf16.mxu0 %v18256_v12  ;;  %v18295_v22 = vld [vmem:[%s25007_s3 + $0x4ec] ss:$48 sps:$4 sm:$0xff]   ;;  %v18298_v63 = vld [vmem:[%s25007_s3 + $0x844] ss:$48 sps:$4 sm:$0xff]  }
 0x2ce   :  { %v20859_v43 = vpack.c.bf16 %v5696_v27, %v5684_v25  ;;  %12532 = vmatprep.subr.bf16.mxu1 %v18253_v30  ;;  %v18293_v58 = vld [vmem:[%s25007_s3 + $0x4e8] ss:$48 sps:$4 sm:$0xff]   ;;  %v18296_v34 = vld [vmem:[%s25007_s3 + $0x840] ss:$48 sps:$4 sm:$0xff]   ;;  %v18301_v7 = vld [vmem:[%s25007_s3 + $0x54c] ss:$48 sps:$4 sm:$0xff]  }
 0x2cf   :  { %v20867_v16 = vpack.c.bf16 %v5697_v41, %v5685_v37  ;;  %v18304_v23 = vld [vmem:[%s25007_s3 + $0x8a4] ss:$48 sps:$4 sm:$0xff]   ;;  %v18299_v19 = vld [vmem:[%s25007_s3 + $0x548] ss:$48 sps:$4 sm:$0xff]   ;;  %v18302_v39 = vld [vmem:[%s25007_s3 + $0x8a0] ss:$48 sps:$4 sm:$0xff]  }
 0x2d0   :  { %15352 = vmatmul.mubr.msk.bf16.gmra.mrb[60].mxu1 %vm3753_vm0, %v20731_v38  ;;  %12293 = vmatpush1.bf16.msra.mxu0 %v18254_v46  ;;  %v18266_v38 = vld [vmem:[%s25007_s3 + $0x660] ss:$48 sps:$4 sm:$0xff]   ;;  %v18307_v24 = vld [vmem:[%s25007_s3 + $0x5ac] ss:$48 sps:$4 sm:$0xff]   ;;  %v18310_v29 = vld [vmem:[%s25007_s3 + $0x904] ss:$48 sps:$4 sm:$0xff]  }
 0x2d1   :  { %12533 = vmatpush1.bf16.msra.mxu1 %v18251_v50  ;;  %12552 = vmatprep.mubr.bf16.mxu1 %v20400_v5  ;;  %v18305_v9 = vld [vmem:[%s25007_s3 + $0x5a8] ss:$48 sps:$4 sm:$0xff]   ;;  %v18308_v57 = vld [vmem:[%s25007_s3 + $0x900] ss:$48 sps:$4 sm:$0xff]   ;;  %v18313_v28 = vld [vmem:[%s25007_s3 + $0x60c] ss:$48 sps:$4 sm:$0xff]  }
 0x2d2   :  { %12534 = vmatprep.subr.bf16.mxu1 %v18259_v0  ;;  %12305 = vmatprep.subr.bf16.mxu0 %v18262_v44  ;;  %v18316_v10 = vld [vmem:[%s25007_s3 + $0x964] ss:$48 sps:$4 sm:$0xff]   ;;  %v18311_v30 = vld [vmem:[%s25007_s3 + $0x608] ss:$48 sps:$4 sm:$0xff]   ;;  %v18314_v12 = vld [vmem:[%s25007_s3 + $0x960] ss:$48 sps:$4 sm:$0xff]  }
 0x2d3   :  { %12295 = vmatmul.mubr.bf16.vlgmr.msra.gmra.mrb[48].mxu0 %v20389_v32  ;;  %v18319_v26 = vld [vmem:[%s25007_s3 + $0x66c] ss:$48 sps:$4 sm:$0xff]   ;;  %v18322_v50 = vld [vmem:[%s25007_s3 + $0x9c4] ss:$48 sps:$4 sm:$0xff]   ;;  %v18317_v46 = vld [vmem:[%s25007_s3 + $0x668] ss:$48 sps:$4 sm:$0xff]  }
 0x2d4   :  { %12306 = vmatpush1.bf16.msra.mxu0 %v18260_v13  ;;  %12337 = vmatprep.mubr.bf16.mxu0 %v20451_v33  ;;  %v18320_v25 = vld [vmem:[%s25007_s3 + $0x9c0] ss:$48 sps:$4 sm:$0xff]   ;;  %v18325_v27 = vld [vmem:[%s25007_s3 + $0x6cc] ss:$48 sps:$4 sm:$0xff]   ;;  %v18323_v37 = vld [vmem:[%s25007_s3 + $0x6c8] ss:$48 sps:$4 sm:$0xff]  }
 0x2d5   :  { %12535 = vmatpush1.bf16.msra.mxu1 %v18257_v56  ;;  %12307 = vmatprep.subr.bf16.mxu0 %v18268_v18  ;;  %v18328_v41 = vld [vmem:[%s25007_s3 + $0xa24] ss:$48 sps:$4 sm:$0xff]   ;;  %v18326_v0 = vld [vmem:[%s25007_s3 + $0xa20] ss:$48 sps:$4 sm:$0xff]   ;;  %v18331_v44 = vld [vmem:[%s25007_s3 + $0x72c] ss:$48 sps:$4 sm:$0xff]  }
 0x2d6   :  { %12536 = vmatprep.subr.bf16.mxu1 %v18265_v45  ;;  %v18334_v56 = vld [vmem:[%s25007_s3 + $0xa84] ss:$48 sps:$4 sm:$0xff]   ;;  %v18329_v13 = vld [vmem:[%s25007_s3 + $0x728] ss:$48 sps:$4 sm:$0xff]   ;;  %v18332_v45 = vld [vmem:[%s25007_s3 + $0xa80] ss:$48 sps:$4 sm:$0xff]  }
 0x2d7   :  { %v18335_v18 = vld [vmem:[%s25007_s3 + $0x788] ss:$48 sps:$4 sm:$0xff]  }
 0x2d8   :  { %12308 = vmatpush1.bf16.msra.mxu0 %v18266_v38  ;;  %v18340_v38 = vld [vmem:[%s25007_s3 + $0xae4] ss:$48 sps:$4 sm:$0xff]  }
 0x2d9   :  { %12537 = vmatpush1.bf16.msra.mxu1 %v18263_v42  ;;  %12309 = vmatprep.subr.bf16.mxu0 %v18274_v51  ;;  %v18337_v42 = vld [vmem:[%s25007_s3 + $0x78c] ss:$48 sps:$4 sm:$0xff]  }
 0x2da   :  { %12538 = vmatprep.subr.bf16.mxu1 %v18271_v52  ;;  %v18338_v52 = vld [vmem:[%s25007_s3 + $0xae0] ss:$48 sps:$4 sm:$0xff]   ;;  %v18343_v51 = vld [vmem:[%s25007_s3 + $0x7ec] ss:$48 sps:$4 sm:$0xff]  }
 0x2dc   :  { %12310 = vmatpush1.bf16.msra.mxu0 %v18272_v62  ;;  %v18346_v62 = vld [vmem:[%s25007_s3 + $0xb44] ss:$48 sps:$4 sm:$0xff]  }
 0x2dd   :  { %12539 = vmatpush1.bf16.msra.mxu1 %v18269_v1  ;;  %12311 = vmatprep.subr.bf16.mxu0 %v18280_v4  ;;  %v18341_v1 = vld [vmem:[%s25007_s3 + $0x7e8] ss:$48 sps:$4 sm:$0xff]   ;;  %v18349_v4 = vld [vmem:[%s25007_s3 + $0x84c] ss:$48 sps:$4 sm:$0xff]  }
 0x2de   :  { %12540 = vmatprep.subr.bf16.mxu1 %v18277_v6  ;;  %v18344_v6 = vld [vmem:[%s25007_s3 + $0xb40] ss:$48 sps:$4 sm:$0xff]  }
 0x2e0   :  { %12312 = vmatpush1.bf16.msra.mxu0 %v18278_v14  ;;  %v18347_v14 = vld [vmem:[%s25007_s3 + $0x848] ss:$48 sps:$4 sm:$0xff]  }
 0x2e1   :  { %12541 = vmatpush1.bf16.msra.mxu1 %v18275_v11  ;;  %12313 = vmatprep.subr.bf16.mxu0 %v18286_v15  ;;  %v18352_v11 = vld [vmem:[%s25007_s3 + $0xba4] ss:$48 sps:$4 sm:$0xff]   ;;  %v18355_v15 = vld [vmem:[%s25007_s3 + $0x8ac] ss:$48 sps:$4 sm:$0xff]  }
 0x2e2   :  { %12542 = vmatprep.subr.bf16.mxu1 %v18283_v20  ;;  %v18350_v20 = vld [vmem:[%s25007_s3 + $0xba0] ss:$48 sps:$4 sm:$0xff]  }
 0x2e4   :  { %12314 = vmatpush1.bf16.msra.mxu0 %v18284_v53  ;;  %v18358_v53 = vld [vmem:[%s25007_s3 + $0xc04] ss:$48 sps:$4 sm:$0xff]  }
 0x2e5   :  { %12543 = vmatpush1.bf16.msra.mxu1 %v18281_v36  ;;  %12315 = vmatprep.subr.bf16.mxu0 %v18292_v54  ;;  %v18353_v36 = vld [vmem:[%s25007_s3 + $0x8a8] ss:$48 sps:$4 sm:$0xff]  }
 0x2e6   :  { %12544 = vmatprep.subr.bf16.mxu1 %v18289_v35  ;;  %v18356_v35 = vld [vmem:[%s25007_s3 + $0xc00] ss:$48 sps:$4 sm:$0xff]   ;;  %v18359_v54 = vld [vmem:[%s25007_s3 + $0x908] ss:$48 sps:$4 sm:$0xff]  }
 0x2e8   :  { %12316 = vmatpush1.bf16.msra.mxu0 %v18290_v49  ;;  %v18364_v49 = vld [vmem:[%s25007_s3 + $0xc64] ss:$48 sps:$4 sm:$0xff]  }
 0x2e9   :  { %12545 = vmatpush1.bf16.msra.mxu1 %v18287_v60  ;;  %12317 = vmatprep.subr.bf16.mxu0 %v18298_v63  ;;  %v18361_v60 = vld [vmem:[%s25007_s3 + $0x90c] ss:$48 sps:$4 sm:$0xff]  }
 0x2ea   :  { %12546 = vmatprep.subr.bf16.mxu1 %v18295_v22  ;;  %v18362_v22 = vld [vmem:[%s25007_s3 + $0xc60] ss:$48 sps:$4 sm:$0xff]   ;;  %v18367_v63 = vld [vmem:[%s25007_s3 + $0x96c] ss:$48 sps:$4 sm:$0xff]  }
 0x2ec   :  { %12318 = vmatpush1.bf16.msra.mxu0 %v18296_v34  ;;  %v18370_v34 = vld [vmem:[%s25007_s3 + $0xcc4] ss:$48 sps:$4 sm:$0xff]  }
 0x2ed   :  { %12547 = vmatpush1.bf16.msra.mxu1 %v18293_v58  ;;  %12319 = vmatprep.subr.bf16.mxu0 %v18304_v23  ;;  %v18365_v58 = vld [vmem:[%s25007_s3 + $0x968] ss:$48 sps:$4 sm:$0xff]   ;;  %v18373_v23 = vld [vmem:[%s25007_s3 + $0x9cc] ss:$48 sps:$4 sm:$0xff]  }
 0x2ee   :  { %12548 = vmatprep.subr.bf16.mxu1 %v18301_v7  ;;  %v18368_v7 = vld [vmem:[%s25007_s3 + $0xcc0] ss:$48 sps:$4 sm:$0xff]  }
 0x2f0   :  { %12320 = vmatpush1.bf16.msra.mxu0 %v18302_v39  ;;  %v18371_v39 = vld [vmem:[%s25007_s3 + $0x9c8] ss:$48 sps:$4 sm:$0xff]  }
 0x2f1   :  { %12549 = vmatpush1.bf16.msra.mxu1 %v18299_v19  ;;  %12321 = vmatprep.subr.bf16.mxu0 %v18310_v29  ;;  %v18376_v19 = vld [vmem:[%s25007_s3 + $0xd24] ss:$48 sps:$4 sm:$0xff]   ;;  %v18379_v29 = vld [vmem:[%s25007_s3 + $0xa2c] ss:$48 sps:$4 sm:$0xff]  }
 0x2f2   :  { %12550 = vmatprep.subr.bf16.mxu1 %v18307_v24  ;;  %v18374_v24 = vld [vmem:[%s25007_s3 + $0xd20] ss:$48 sps:$4 sm:$0xff]  }
 0x2f4   :  { %12322 = vmatpush1.bf16.msra.mxu0 %v18308_v57  ;;  %v18382_v57 = vld [vmem:[%s25007_s3 + $0xd84] ss:$48 sps:$4 sm:$0xff]  }
 0x2f5   :  { %12551 = vmatpush1.bf16.msra.mxu1 %v18305_v9  ;;  %12323 = vmatprep.subr.bf16.mxu0 %v18316_v10  ;;  %v18377_v9 = vld [vmem:[%s25007_s3 + $0xa28] ss:$48 sps:$4 sm:$0xff]   ;;  %v18385_v10 = vld [vmem:[%s25007_s3 + $0xa8c] ss:$48 sps:$4 sm:$0xff]  }
 0x2f6   :  { %12563 = vmatprep.subr.bf16.mxu1 %v18313_v28  ;;  %v18380_v28 = vld [vmem:[%s25007_s3 + $0xd80] ss:$48 sps:$4 sm:$0xff]  }
 0x2f8   :  { %12553 = vmatmul.mubr.bf16.vlgmr.msra.gmra.mrb[64].mxu1 %v20389_v32  ;;  %12324 = vmatpush1.bf16.msra.mxu0 %v18314_v12  ;;  %v18388_v12 = vld [vmem:[%s25007_s3 + $0xde4] ss:$48 sps:$4 sm:$0xff]  }
 0x2f9   :  { %12564 = vmatpush1.bf16.msra.mxu1 %v18311_v30  ;;  %12595 = vmatprep.mubr.bf16.mxu1 %v20451_v33  ;;  %v18383_v30 = vld [vmem:[%s25007_s3 + $0xa88] ss:$48 sps:$4 sm:$0xff]  }
 0x2fa   :  { %12565 = vmatprep.subr.bf16.mxu1 %v18319_v26  ;;  %12325 = vmatprep.subr.bf16.mxu0 %v18322_v50  ;;  %v18386_v26 = vld [vmem:[%s25007_s3 + $0xde0] ss:$48 sps:$4 sm:$0xff]   ;;  %v18391_v50 = vld [vmem:[%s25007_s3 + $0xaec] ss:$48 sps:$4 sm:$0xff]  }
 0x2fc   :  { %12326 = vmatpush1.bf16.msra.mxu0 %v18320_v25  ;;  %v18394_v25 = vld [vmem:[%s25007_s3 + $0xe44] ss:$48 sps:$4 sm:$0xff]  }
 0x2fd   :  { %12566 = vmatpush1.bf16.msra.mxu1 %v18317_v46  ;;  %12327 = vmatprep.subr.bf16.mxu0 %v18328_v41  ;;  %v18389_v46 = vld [vmem:[%s25007_s3 + $0xae8] ss:$48 sps:$4 sm:$0xff]  }
 0x2fe   :  { %12567 = vmatprep.subr.bf16.mxu1 %v18325_v27  ;;  %v18392_v27 = vld [vmem:[%s25007_s3 + $0xe40] ss:$48 sps:$4 sm:$0xff]   ;;  %v18395_v41 = vld [vmem:[%s25007_s3 + $0xb48] ss:$48 sps:$4 sm:$0xff]  }
 0x300   :  { %12328 = vmatpush1.bf16.msra.mxu0 %v18326_v0  ;;  %v18400_v0 = vld [vmem:[%s25007_s3 + $0xea4] ss:$48 sps:$4 sm:$0xff]  }
 0x301   :  { %12568 = vmatpush1.bf16.msra.mxu1 %v18323_v37  ;;  %12329 = vmatprep.subr.bf16.mxu0 %v18334_v56  ;;  %v18397_v37 = vld [vmem:[%s25007_s3 + $0xb4c] ss:$48 sps:$4 sm:$0xff]  }
 0x302   :  { %12569 = vmatprep.subr.bf16.mxu1 %v18331_v44  ;;  %v18398_v44 = vld [vmem:[%s25007_s3 + $0xea0] ss:$48 sps:$4 sm:$0xff]   ;;  %v18403_v56 = vld [vmem:[%s25007_s3 + $0xbac] ss:$48 sps:$4 sm:$0xff]  }
 0x304   :  { %12330 = vmatpush1.bf16.msra.mxu0 %v18332_v45  ;;  %v18406_v45 = vld [vmem:[%s25007_s3 + $0xf04] ss:$48 sps:$4 sm:$0xff]  }
 0x305   :  { %12570 = vmatpush1.bf16.msra.mxu1 %v18329_v13  ;;  %12331 = vmatprep.subr.bf16.mxu0 %v18340_v38  ;;  %v18401_v13 = vld [vmem:[%s25007_s3 + $0xba8] ss:$48 sps:$4 sm:$0xff]  }
 0x306   :  { %12571 = vmatprep.subr.bf16.mxu1 %v18337_v42  ;;  %v18404_v42 = vld [vmem:[%s25007_s3 + $0xf00] ss:$48 sps:$4 sm:$0xff]   ;;  %v18407_v38 = vld [vmem:[%s25007_s3 + $0xc08] ss:$48 sps:$4 sm:$0xff]  }
 0x308   :  { %12332 = vmatpush1.bf16.msra.mxu0 %v18338_v52  ;;  %v18412_v52 = vld [vmem:[%s25007_s3 + $0xf64] ss:$48 sps:$4 sm:$0xff]  }
 0x309   :  { %12572 = vmatpush1.bf16.msra.mxu1 %v18335_v18  ;;  %12333 = vmatprep.subr.bf16.mxu0 %v18346_v62  ;;  %v18409_v18 = vld [vmem:[%s25007_s3 + $0xc0c] ss:$48 sps:$4 sm:$0xff]   ;;  %v18418_v62 = vld [vmem:[%s25007_s3 + $0xfc4] ss:$48 sps:$4 sm:$0xff]  }
 0x30a   :  { %12573 = vmatprep.subr.bf16.mxu1 %v18343_v51  ;;  %v18410_v51 = vld [vmem:[%s25007_s3 + $0xf60] ss:$48 sps:$4 sm:$0xff]  }
 0x30c   :  { %12334 = vmatpush1.bf16.msra.mxu0 %v18344_v6  ;;  %v18413_v6 = vld [vmem:[%s25007_s3 + $0xc68] ss:$48 sps:$4 sm:$0xff]  }
 0x30d   :  { %12574 = vmatpush1.bf16.msra.mxu1 %v18341_v1  ;;  %12335 = vmatprep.subr.bf16.mxu0 %v18352_v11  ;;  %v18415_v1 = vld [vmem:[%s25007_s3 + $0xc6c] ss:$48 sps:$4 sm:$0xff]  }
 0x30e   :  { %12575 = vmatprep.subr.bf16.mxu1 %v18349_v4  ;;  %v18416_v4 = vld [vmem:[%s25007_s3 + $0xfc0] ss:$48 sps:$4 sm:$0xff]   ;;  %v18421_v11 = vld [vmem:[%s25007_s3 + $0xccc] ss:$48 sps:$4 sm:$0xff]  }
 0x310   :  { %12336 = vmatpush1.bf16.msra.mxu0 %v18350_v20  ;;  %v18424_v20 = vld [vmem:[%s25007_s3 + $0x1024] ss:$48 sps:$4 sm:$0xff]  }
 0x311   :  { %12576 = vmatpush1.bf16.msra.mxu1 %v18347_v14  ;;  %12348 = vmatprep.subr.bf16.mxu0 %v18358_v53  ;;  %v18419_v14 = vld [vmem:[%s25007_s3 + $0xcc8] ss:$48 sps:$4 sm:$0xff]  }
 0x312   :  { %12577 = vmatprep.subr.bf16.mxu1 %v18355_v15  ;;  %v18422_v15 = vld [vmem:[%s25007_s3 + $0x1020] ss:$48 sps:$4 sm:$0xff]   ;;  %v18425_v53 = vld [vmem:[%s25007_s3 + $0xd28] ss:$48 sps:$4 sm:$0xff]  }
 0x313   :  { %12338 = vmatmul.mubr.bf16.vlgmr.msra.gmra.mrb[48].mxu0 %v20449_v59 }
 0x314   :  { %12349 = vmatpush1.bf16.msra.mxu0 %v18356_v35  ;;  %12380 = vmatprep.mubr.bf16.mxu0 %v20719_v55  ;;  %v18430_v35 = vld [vmem:[%s25007_s3 + $0x1084] ss:$48 sps:$4 sm:$0xff]  }
 0x315   :  { %12578 = vmatpush1.bf16.msra.mxu1 %v18353_v36  ;;  %12350 = vmatprep.subr.bf16.mxu0 %v18364_v49  ;;  %v18427_v36 = vld [vmem:[%s25007_s3 + $0xd2c] ss:$48 sps:$4 sm:$0xff]   ;;  %v18431_v49 = vld [vmem:[%s25007_s3 + $0xd88] ss:$48 sps:$4 sm:$0xff]  }
 0x316   :  { %12579 = vmatprep.subr.bf16.mxu1 %v18361_v60  ;;  %v18433_v60 = vld [vmem:[%s25007_s3 + $0xd8c] ss:$48 sps:$4 sm:$0xff]  }
 0x318   :  { %12351 = vmatpush1.bf16.msra.mxu0 %v18362_v22  ;;  %v18436_v22 = vld [vmem:[%s25007_s3 + $0x10e4] ss:$48 sps:$4 sm:$0xff]  }
 0x319   :  { %12580 = vmatpush1.bf16.msra.mxu1 %v18359_v54  ;;  %12352 = vmatprep.subr.bf16.mxu0 %v18370_v34  ;;  %v18428_v54 = vld [vmem:[%s25007_s3 + $0x1080] ss:$48 sps:$4 sm:$0xff]   ;;  %v18437_v34 = vld [vmem:[%s25007_s3 + $0xde8] ss:$48 sps:$4 sm:$0xff]  }
 0x31a   :  { %12581 = vmatprep.subr.bf16.mxu1 %v18367_v63  ;;  %v18434_v63 = vld [vmem:[%s25007_s3 + $0x10e0] ss:$48 sps:$4 sm:$0xff]  }
 0x31c   :  { %12353 = vmatpush1.bf16.msra.mxu0 %v18368_v7  ;;  %v18442_v7 = vld [vmem:[%s25007_s3 + $0x1144] ss:$48 sps:$4 sm:$0xff]  }
 0x31d   :  { %12582 = vmatpush1.bf16.msra.mxu1 %v18365_v58  ;;  %12354 = vmatprep.subr.bf16.mxu0 %v18376_v19  ;;  %v18439_v58 = vld [vmem:[%s25007_s3 + $0xdec] ss:$48 sps:$4 sm:$0xff]  }
 0x31e   :  { %12583 = vmatprep.subr.bf16.mxu1 %v18373_v23  ;;  %v18440_v23 = vld [vmem:[%s25007_s3 + $0x1140] ss:$48 sps:$4 sm:$0xff]   ;;  %v18445_v19 = vld [vmem:[%s25007_s3 + $0xe4c] ss:$48 sps:$4 sm:$0xff]  }
 0x320   :  { %12355 = vmatpush1.bf16.msra.mxu0 %v18374_v24  ;;  %v18448_v24 = vld [vmem:[%s25007_s3 + $0x11a4] ss:$48 sps:$4 sm:$0xff]  }
 0x321   :  { %12584 = vmatpush1.bf16.msra.mxu1 %v18371_v39  ;;  %12356 = vmatprep.subr.bf16.mxu0 %v18382_v57  ;;  %v18443_v39 = vld [vmem:[%s25007_s3 + $0xe48] ss:$48 sps:$4 sm:$0xff]  }
 0x322   :  { %12585 = vmatprep.subr.bf16.mxu1 %v18379_v29  ;;  %v18446_v29 = vld [vmem:[%s25007_s3 + $0x11a0] ss:$48 sps:$4 sm:$0xff]   ;;  %v18449_v57 = vld [vmem:[%s25007_s3 + $0xea8] ss:$48 sps:$4 sm:$0xff]  }
 0x324   :  { %12357 = vmatpush1.bf16.msra.mxu0 %v18380_v28  ;;  %v18454_v28 = vld [vmem:[%s25007_s3 + $0x1204] ss:$48 sps:$4 sm:$0xff]  }
 0x325   :  { %12586 = vmatpush1.bf16.msra.mxu1 %v18377_v9  ;;  %12358 = vmatprep.subr.bf16.mxu0 %v18388_v12  ;;  %v18451_v9 = vld [vmem:[%s25007_s3 + $0xeac] ss:$48 sps:$4 sm:$0xff]   ;;  %v18460_v12 = vld [vmem:[%s25007_s3 + $0x1264] ss:$48 sps:$4 sm:$0xff]  }
 0x326   :  { %12587 = vmatprep.subr.bf16.mxu1 %v18385_v10  ;;  %v18452_v10 = vld [vmem:[%s25007_s3 + $0x1200] ss:$48 sps:$4 sm:$0xff]  }
 0x328   :  { %12359 = vmatpush1.bf16.msra.mxu0 %v18386_v26  ;;  %v18455_v26 = vld [vmem:[%s25007_s3 + $0xf08] ss:$48 sps:$4 sm:$0xff]  }
 0x329   :  { %12588 = vmatpush1.bf16.msra.mxu1 %v18383_v30  ;;  %12360 = vmatprep.subr.bf16.mxu0 %v18394_v25  ;;  %v18457_v30 = vld [vmem:[%s25007_s3 + $0xf0c] ss:$48 sps:$4 sm:$0xff]   ;;  %v18461_v25 = vld [vmem:[%s25007_s3 + $0xf68] ss:$48 sps:$4 sm:$0xff]  }
 0x32a   :  { %12589 = vmatprep.subr.bf16.mxu1 %v18391_v50  ;;  %v18458_v50 = vld [vmem:[%s25007_s3 + $0x1260] ss:$48 sps:$4 sm:$0xff]  }
 0x32c   :  { %12361 = vmatpush1.bf16.msra.mxu0 %v18392_v27  ;;  %v18466_v27 = vld [vmem:[%s25007_s3 + $0x12c4] ss:$48 sps:$4 sm:$0xff]  }
 0x32d   :  { %12590 = vmatpush1.bf16.msra.mxu1 %v18389_v46  ;;  %12362 = vmatprep.subr.bf16.mxu0 %v18400_v0  ;;  %v18463_v46 = vld [vmem:[%s25007_s3 + $0xf6c] ss:$48 sps:$4 sm:$0xff]   ;;  %v18467_v0 = vld [vmem:[%s25007_s3 + $0xfc8] ss:$48 sps:$4 sm:$0xff]  }
 0x32e   :  { %12591 = vmatprep.subr.bf16.mxu1 %v18397_v37  ;;  %v18464_v37 = vld [vmem:[%s25007_s3 + $0x12c0] ss:$48 sps:$4 sm:$0xff]  }
 0x330   :  { %12363 = vmatpush1.bf16.msra.mxu0 %v18398_v44  ;;  %v18472_v44 = vld [vmem:[%s25007_s3 + $0x1324] ss:$48 sps:$4 sm:$0xff]  }
 0x331   :  { %12592 = vmatpush1.bf16.msra.mxu1 %v18395_v41  ;;  %12364 = vmatprep.subr.bf16.mxu0 %v18406_v45  ;;  %v18469_v41 = vld [vmem:[%s25007_s3 + $0xfcc] ss:$48 sps:$4 sm:$0xff]   ;;  %v18473_v45 = vld [vmem:[%s25007_s3 + $0x1028] ss:$48 sps:$4 sm:$0xff]  }
 0x332   :  { %12593 = vmatprep.subr.bf16.mxu1 %v18403_v56  ;;  %v18470_v56 = vld [vmem:[%s25007_s3 + $0x1320] ss:$48 sps:$4 sm:$0xff]  }
 0x334   :  { %12365 = vmatpush1.bf16.msra.mxu0 %v18404_v42  ;;  %v18478_v42 = vld [vmem:[%s25007_s3 + $0x1384] ss:$48 sps:$4 sm:$0xff]  }
 0x335   :  { %12594 = vmatpush1.bf16.msra.mxu1 %v18401_v13  ;;  %12366 = vmatprep.subr.bf16.mxu0 %v18412_v52  ;;  %v18475_v13 = vld [vmem:[%s25007_s3 + $0x102c] ss:$48 sps:$4 sm:$0xff]   ;;  %v18479_v52 = vld [vmem:[%s25007_s3 + $0x1088] ss:$48 sps:$4 sm:$0xff]  }
 0x336   :  { %12606 = vmatprep.subr.bf16.mxu1 %v18409_v18  ;;  %v18476_v18 = vld [vmem:[%s25007_s3 + $0x1380] ss:$48 sps:$4 sm:$0xff]  }
 0x338   :  { %12596 = vmatmul.mubr.bf16.vlgmr.msra.gmra.mrb[64].mxu1 %v20449_v59  ;;  %12367 = vmatpush1.bf16.msra.mxu0 %v18410_v51  ;;  %v18484_v51 = vld [vmem:[%s25007_s3 + $0x13e4] ss:$48 sps:$4 sm:$0xff]  }
 0x339   :  { %12607 = vmatpush1.bf16.msra.mxu1 %v18407_v38  ;;  %12638 = vmatprep.mubr.bf16.mxu1 %v20719_v55  ;;  %v18481_v38 = vld [vmem:[%s25007_s3 + $0x108c] ss:$48 sps:$4 sm:$0xff]  }
 0x33a   :  { %12608 = vmatprep.subr.bf16.mxu1 %v18415_v1  ;;  %12368 = vmatprep.subr.bf16.mxu0 %v18418_v62  ;;  %v18482_v1 = vld [vmem:[%s25007_s3 + $0x13e0] ss:$48 sps:$4 sm:$0xff]   ;;  %v18487_v62 = vld [vmem:[%s25007_s3 + $0x10ec] ss:$48 sps:$4 sm:$0xff]  }
 0x33c   :  { %12369 = vmatpush1.bf16.msra.mxu0 %v18416_v4  ;;  %v18485_v4 = vld [vmem:[%s25007_s3 + $0x10e8] ss:$48 sps:$4 sm:$0xff]  }
 0x33d   :  { %12609 = vmatpush1.bf16.msra.mxu1 %v18413_v6  ;;  %12370 = vmatprep.subr.bf16.mxu0 %v18424_v20 }
 0x33e   :  { %12610 = vmatprep.subr.bf16.mxu1 %v18421_v11  ;;  %v18490_v11 = vld [vmem:[%s25007_s3 + $0x1444] ss:$48 sps:$4 sm:$0xff]  }
 0x340   :  { %12371 = vmatpush1.bf16.msra.mxu0 %v18422_v15 }
 0x341   :  { %12611 = vmatpush1.bf16.msra.mxu1 %v18419_v14  ;;  %12372 = vmatprep.subr.bf16.mxu0 %v18430_v35  ;;  %v18491_v35 = vld [vmem:[%s25007_s3 + $0x1148] ss:$48 sps:$4 sm:$0xff]  }
 0x342   :  { %12612 = vmatprep.subr.bf16.mxu1 %v18427_v36  ;;  %v18488_v36 = vld [vmem:[%s25007_s3 + $0x1440] ss:$48 sps:$4 sm:$0xff]  }
 0x344   :  { %12373 = vmatpush1.bf16.msra.mxu0 %v18428_v54  ;;  %v18496_v54 = vld [vmem:[%s25007_s3 + $0x14a4] ss:$48 sps:$4 sm:$0xff]  }
 0x345   :  { %12613 = vmatpush1.bf16.msra.mxu1 %v18425_v53  ;;  %12374 = vmatprep.subr.bf16.mxu0 %v18436_v22  ;;  %v18493_v53 = vld [vmem:[%s25007_s3 + $0x114c] ss:$48 sps:$4 sm:$0xff]  }
 0x346   :  { %12614 = vmatprep.subr.bf16.mxu1 %v18433_v60  ;;  %v18494_v60 = vld [vmem:[%s25007_s3 + $0x14a0] ss:$48 sps:$4 sm:$0xff]  }
 0x348   :  { %12375 = vmatpush1.bf16.msra.mxu0 %v18434_v63  ;;  %v18497_v63 = vld [vmem:[%s25007_s3 + $0x11a8] ss:$48 sps:$4 sm:$0xff]  }
 0x349   :  { %12615 = vmatpush1.bf16.msra.mxu1 %v18431_v49  ;;  %12376 = vmatprep.subr.bf16.mxu0 %v18442_v7  ;;  %v18499_v49 = vld [vmem:[%s25007_s3 + $0x11ac] ss:$48 sps:$4 sm:$0xff]  }
 0x34a   :  { %12616 = vmatprep.subr.bf16.mxu1 %v18439_v58  ;;  %v18502_v58 = vld [vmem:[%s25007_s3 + $0x1504] ss:$48 sps:$4 sm:$0xff]  }
 0x34c   :  { %12377 = vmatpush1.bf16.msra.mxu0 %v18440_v23 }
 0x34d   :  { %12617 = vmatpush1.bf16.msra.mxu1 %v18437_v34  ;;  %12378 = vmatprep.subr.bf16.mxu0 %v18448_v24 }
 0x34e   :  { %12618 = vmatprep.subr.bf16.mxu1 %v18445_v19 }
 0x350   :  { %12379 = vmatpush1.bf16.msra.mxu0 %v18446_v29  ;;  %v18500_v29 = vld [vmem:[%s25007_s3 + $0x1500] ss:$48 sps:$4 sm:$0xff]  }
 0x351   :  { %12619 = vmatpush1.bf16.msra.mxu1 %v18443_v39  ;;  %12391 = vmatprep.subr.bf16.mxu0 %v18454_v28  ;;  %v18503_v28 = vld [vmem:[%s25007_s3 + $0x1208] ss:$48 sps:$4 sm:$0xff]  }
 0x352   :  { %12620 = vmatprep.subr.bf16.mxu1 %v18451_v9  ;;  %v18505_v9 = vld [vmem:[%s25007_s3 + $0x120c] ss:$48 sps:$4 sm:$0xff]  }
 0x353   :  { %12381 = vmatmul.mubr.bf16.vlgmr.msra.gmra.mrb[48].mxu0 %v20714_v48 }
 0x354   :  { %12392 = vmatpush1.bf16.msra.mxu0 %v18452_v10  ;;  %12423 = vmatprep.mubr.bf16.mxu0 %v20867_v16  ;;  %v18508_v10 = vld [vmem:[%s25007_s3 + $0x1564] ss:$48 sps:$4 sm:$0xff]  }
 0x355   :  { %12621 = vmatpush1.bf16.msra.mxu1 %v18449_v57  ;;  %12393 = vmatprep.subr.bf16.mxu0 %v18460_v12  ;;  %v18511_v12 = vld [vmem:[%s25007_s3 + $0x126c] ss:$48 sps:$4 sm:$0xff]  }
 0x356   :  { %12622 = vmatprep.subr.bf16.mxu1 %v18457_v30  ;;  %v18506_v30 = vld [vmem:[%s25007_s3 + $0x1560] ss:$48 sps:$4 sm:$0xff]  }
 0x358   :  { %12394 = vmatpush1.bf16.msra.mxu0 %v18458_v50  ;;  %v18514_v50 = vld [vmem:[%s25007_s3 + $0x15c4] ss:$48 sps:$4 sm:$0xff]  }
 0x359   :  { %12623 = vmatpush1.bf16.msra.mxu1 %v18455_v26  ;;  %12395 = vmatprep.subr.bf16.mxu0 %v18466_v27 }
 0x35a   :  { %12624 = vmatprep.subr.bf16.mxu1 %v18463_v46 }
 0x35c   :  { %12396 = vmatpush1.bf16.msra.mxu0 %v18464_v37 }
 0x35d   :  { %12625 = vmatpush1.bf16.msra.mxu1 %v18461_v25  ;;  %12397 = vmatprep.subr.bf16.mxu0 %v18472_v44  ;;  %v18509_v25 = vld [vmem:[%s25007_s3 + $0x1268] ss:$48 sps:$4 sm:$0xff]  }
 0x35e   :  { %12626 = vmatprep.subr.bf16.mxu1 %v18469_v41  ;;  %v18512_v41 = vld [vmem:[%s25007_s3 + $0x15c0] ss:$48 sps:$4 sm:$0xff]   ;;  %v18515_v44 = vld [vmem:[%s25007_s3 + $0x12c8] ss:$48 sps:$4 sm:$0xff]  }
 0x360   :  { %12398 = vmatpush1.bf16.msra.mxu0 %v18470_v56  ;;  %v18520_v56 = vld [vmem:[%s25007_s3 + $0x1624] ss:$48 sps:$4 sm:$0xff]  }
 0x361   :  { %12627 = vmatpush1.bf16.msra.mxu1 %v18467_v0  ;;  %12399 = vmatprep.subr.bf16.mxu0 %v18478_v42  ;;  %v18517_v0 = vld [vmem:[%s25007_s3 + $0x12cc] ss:$48 sps:$4 sm:$0xff]  }
 0x362   :  { %12628 = vmatprep.subr.bf16.mxu1 %v18475_v13  ;;  %v21424_v13 = vld [vmem:[%s25006_s2 + $0x8] sm:$0xf]  ;;  %v18523_v42 = vld [vmem:[%s25007_s3 + $0x132c] ss:$48 sps:$4 sm:$0xff]  }
 0x364   :  { %12400 = vmatpush1.bf16.msra.mxu0 %v18476_v18 }
 0x365   :  { %12629 = vmatpush1.bf16.msra.mxu1 %v18473_v45  ;;  %12401 = vmatprep.subr.bf16.mxu0 %v18484_v51  ;;  %v18518_v45 = vld [vmem:[%s25007_s3 + $0x1620] ss:$48 sps:$4 sm:$0xff]   ;;  %v5629_v51 = vrot.slane %v21424_v13, %v20350_v40 }
 0x366   :  { %12630 = vmatprep.subr.bf16.mxu1 %v18481_v38  ;;  %v21335_v6 = vpop.f32.mrb[32].mxu0  ;;  %v18526_v38 = vld [vmem:[%s25007_s3 + $0x1684] ss:$48 sps:$4 sm:$0xff]  }
 0x367   :  { %v21343_v14 = vpop.f32.mrb[33].mxu0 }
 0x368   :  { %v21345_v20 = vpop.f32.mrb[34].mxu0  ;;  %12402 = vmatpush1.bf16.msra.mxu0 %v18482_v1 }
 0x369   :  { %12631 = vmatpush1.bf16.msra.mxu1 %v18479_v52  ;;  %v21347_v15 = vpop.f32.mrb[35].mxu0  ;;  %12403 = vmatprep.subr.bf16.mxu0 %v18490_v11 }
 0x36a   :  { %12632 = vmatprep.subr.bf16.mxu1 %v18487_v62  ;;  %v18521_v62 = vld [vmem:[%s25007_s3 + $0x1328] ss:$48 sps:$4 sm:$0xff]  }
 0x36c   :  { %12404 = vmatpush1.bf16.msra.mxu0 %v18488_v36  ;;  %v18524_v36 = vld [vmem:[%s25007_s3 + $0x1680] ss:$48 sps:$4 sm:$0xff]  }
 0x36d   :  { %12633 = vmatpush1.bf16.msra.mxu1 %v18485_v4  ;;  %12405 = vmatprep.subr.bf16.mxu0 %v18496_v54  ;;  %v5633_v4 = vrot.slane %v21424_v13, %v20353_v3 }
 0x36e   :  { %12634 = vmatprep.subr.bf16.mxu1 %v18493_v53  ;;  %v5197_v22 = vpop.f32.mrb[36].mxu0  ;;  %v18529_v53 = vld [vmem:[%s25007_s3 + $0x138c] ss:$48 sps:$4 sm:$0xff]  }
 0x36f   :  { %v5526_v34 = vmax.f32 %v21335_v6, %v5197_v22  ;;  %v5199_v7 = vpop.f32.mrb[37].mxu0 }
 0x370   :  { %v5527_v23 = vmax.f32 %v21343_v14, %v5199_v7  ;;  %v21375_v19 = vpop.f32.mrb[38].mxu0  ;;  %12406 = vmatpush1.bf16.msra.mxu0 %v18494_v60  ;;  %v18532_v60 = vld [vmem:[%s25007_s3 + $0x16e4] ss:$48 sps:$4 sm:$0xff]  }
 0x371   :  { %12635 = vmatpush1.bf16.msra.mxu1 %v18491_v35  ;;  %v5538_v39 = vmax.f32 %v21345_v20, %v21375_v19  ;;  %v21379_v24 = vpop.f32.mrb[39].mxu0  ;;  %12407 = vmatprep.subr.bf16.mxu0 %v18502_v58  ;;  %v18535_v19 = vld [vmem:[%s25007_s3 + $0x13ec] ss:$48 sps:$4 sm:$0xff]  }
 0x372   :  { %12636 = vmatprep.subr.bf16.mxu1 %v18499_v49  ;;  %v5539_v57 = vmax.f32 %v21347_v15, %v21379_v24 }
 0x374   :  { %12408 = vmatpush1.bf16.msra.mxu0 %v18500_v29 }
 0x375   :  { %12637 = vmatpush1.bf16.msra.mxu1 %v18497_v63  ;;  %12409 = vmatprep.subr.bf16.mxu0 %v18508_v10  ;;  %v18527_v63 = vld [vmem:[%s25007_s3 + $0x1388] ss:$48 sps:$4 sm:$0xff]  }
 0x376   :  { %12649 = vmatprep.subr.bf16.mxu1 %v18505_v9  ;;  %v5207_v26 = vpop.f32.mrb[40].mxu0 }
 0x377   :  { %v5209_v46 = vpop.f32.mrb[41].mxu0 }
 0x378   :  { %12639 = vmatmul.mubr.bf16.vlgmr.msra.gmra.mrb[64].mxu1 %v20714_v48  ;;  %v5211_v27 = vpop.f32.mrb[42].mxu0  ;;  %12410 = vmatpush1.bf16.msra.mxu0 %v18506_v30 }
 0x379   :  { %12650 = vmatpush1.bf16.msra.mxu1 %v18503_v28  ;;  %12681 = vmatprep.mubr.bf16.mxu1 %v20867_v16  ;;  %v5213_v37 = vpop.f32.mrb[43].mxu0 }
 0x37a   :  { %12651 = vmatprep.subr.bf16.mxu1 %v18511_v12  ;;  %12411 = vmatprep.subr.bf16.mxu0 %v18514_v50  ;;  %v18536_v12 = vld [vmem:[%s25007_s3 + $0x1740] ss:$48 sps:$4 sm:$0xff]  }
 0x37c   :  { %12412 = vmatpush1.bf16.msra.mxu0 %v18512_v41 }
 0x37d   :  { %12652 = vmatpush1.bf16.msra.mxu1 %v18509_v25  ;;  %12413 = vmatprep.subr.bf16.mxu0 %v18520_v56  ;;  %v18544_v25 = vld [vmem:[%s25007_s3 + $0x17a4] ss:$48 sps:$4 sm:$0xff]   ;;  %v18547_v56 = vld [vmem:[%s25007_s3 + $0x14ac] ss:$48 sps:$4 sm:$0xff]  }
 0x37e   :  { %12653 = vmatprep.subr.bf16.mxu1 %v18517_v0  ;;  %v5217_v18 = vpop.f32.mrb[44].mxu0 }
 0x37f   :  { %v5550_v52 = vmax.f32 %v5207_v26, %v5217_v18  ;;  %v5219_v1 = vpop.f32.mrb[45].mxu0  ;;  %v18541_v26 = vld [vmem:[%s25007_s3 + $0x144c] ss:$48 sps:$4 sm:$0xff]   ;;  %v18548_v18 = vld [vmem:[%s25007_s3 + $0x1800] ss:$48 sps:$4 sm:$0xff]  }
 0x380   :  { %v5551_v6 = vmax.f32 %v5209_v46, %v5219_v1  ;;  %v5221_v11 = vpop.f32.mrb[46].mxu0  ;;  %12414 = vmatpush1.bf16.msra.mxu0 %v18518_v45  ;;  %v18550_v45 = vld [vmem:[%s25007_s3 + $0x1804] ss:$48 sps:$4 sm:$0xff]  }
 0x381   :  { %12654 = vmatpush1.bf16.msra.mxu1 %v18515_v44  ;;  %v5574_v14 = vmax.f32 %v5526_v34, %v5550_v52  ;;  %v5562_v20 = vmax.f32 %v5211_v27, %v5221_v11  ;;  %v5223_v15 = vpop.f32.mrb[47].mxu0  ;;  %12415 = vmatprep.subr.bf16.mxu0 %v18526_v38  ;;  %v18542_v44 = vld [vmem:[%s25007_s3 + $0x17a0] ss:$48 sps:$4 sm:$0xff]   ;;  %v18553_v52 = vld [vmem:[%s25007_s3 + $0x150c] ss:$48 sps:$4 sm:$0xff]  }
 0x382   :  { %12655 = vmatprep.subr.bf16.mxu1 %v18523_v42  ;;  %v5575_v35 = vmax.f32 %v5527_v23, %v5551_v6  ;;  %v5563_v54 = vmax.f32 %v5213_v37, %v5223_v15  ;;  %v18530_v23 = vld [vmem:[%s25007_s3 + $0x16e0] ss:$48 sps:$4 sm:$0xff]   ;;  %v18539_v37 = vld [vmem:[%s25007_s3 + $0x1448] ss:$48 sps:$4 sm:$0xff]  }
 0x383   :  { %v5662_v49 = vadd.f32 %v5629_v51, %v5574_v14  ;;  %v5586_v22 = vmax.f32 %v5538_v39, %v5562_v20  ;;  %v18538_v39 = vld [vmem:[%s25007_s3 + $0x1744] ss:$48 sps:$4 sm:$0xff]   ;;  %v18545_v42 = vld [vmem:[%s25007_s3 + $0x14a8] ss:$48 sps:$4 sm:$0xff]   ;;  %v18554_v15 = vld [vmem:[%s25007_s3 + $0x1860] ss:$48 sps:$4 sm:$0xff]  }
 0x384   :  { %v5663_v58 = vadd.f32 %v5633_v4, %v5575_v35  ;;  %v5587_v34 = vmax.f32 %v5539_v57, %v5563_v54  ;;  %12416 = vmatpush1.bf16.msra.mxu0 %v18524_v36  ;;  %v18533_v57 = vld [vmem:[%s25007_s3 + $0x13e8] ss:$48 sps:$4 sm:$0xff]   ;;  %v18559_v36 = vld [vmem:[%s25007_s3 + $0x156c] ss:$48 sps:$4 sm:$0xff]   ;;  %v18562_v35 = vld [vmem:[%s25007_s3 + $0x18c4] ss:$48 sps:$4 sm:$0xff]  }
 0x385   :  { %12656 = vmatpush1.bf16.msra.mxu1 %v18521_v62  ;;  %v5674_v7 = vadd.f32 %v5629_v51, %v5586_v22  ;;  %12417 = vmatprep.subr.bf16.mxu0 %v18532_v60  ;;  %v5686_v29 = vmax.f32 %v5662_v49, 0.0  ;;  %v18556_v51 = vld [vmem:[%s25007_s3 + $0x1864] ss:$48 sps:$4 sm:$0xff]   ;;  %v18551_v11 = vld [vmem:[%s25007_s3 + $0x1508] ss:$48 sps:$4 sm:$0xff]  }
 0x386   :  { %12657 = vmatprep.subr.bf16.mxu1 %v18529_v53  ;;  %v5675_v24 = vadd.f32 %v5633_v4, %v5587_v34  ;;  %v5687_v28 = vmax.f32 %v5663_v58, 0.0  ;;  %v18557_v54 = vld [vmem:[%s25007_s3 + $0x1568] ss:$48 sps:$4 sm:$0xff]   ;;  %v18560_v60 = vld [vmem:[%s25007_s3 + $0x18c0] ss:$48 sps:$4 sm:$0xff]  }
 0x387   :  { %v5698_v9 = vmax.f32 %v5674_v7, 0.0  ;;  %v18565_v49 = vld [vmem:[%s25007_s3 + $0x15cc] ss:$48 sps:$4 sm:$0xff]   ;;  %v18563_v7 = vld [vmem:[%s25007_s3 + $0x15c8] ss:$48 sps:$4 sm:$0xff]  }
 0x388   :  { %v5699_v10 = vmax.f32 %v5675_v24, 0.0  ;;  %12418 = vmatpush1.bf16.msra.mxu0 %v18530_v23  ;;  %v18571_v24 = vld [vmem:[%s25007_s3 + $0x162c] ss:$48 sps:$4 sm:$0xff]  }
 0x389   :  { %12658 = vmatpush1.bf16.msra.mxu1 %v18527_v63  ;;  %v21466_v30 = vpack.c.bf16 %v5698_v9, %v5686_v29  ;;  %12419 = vmatprep.subr.bf16.mxu0 %v18538_v39  ;;  %v18568_v63 = vld [vmem:[%s25007_s3 + $0x1924] ss:$48 sps:$4 sm:$0xff]   ;;  %v18569_v29 = vld [vmem:[%s25007_s3 + $0x1628] ss:$48 sps:$4 sm:$0xff]   ;;  %v18572_v9 = vld [vmem:[%s25007_s3 + $0x1980] ss:$48 sps:$4 sm:$0xff]  }
 0x38a   :  { %12659 = vmatprep.subr.bf16.mxu1 %v18535_v19  ;;  %v21474_v50 = vpack.c.bf16 %v5699_v10, %v5687_v28  ;;  %v18566_v19 = vld [vmem:[%s25007_s3 + $0x1920] ss:$48 sps:$4 sm:$0xff]   ;;  %v18574_v39 = vld [vmem:[%s25007_s3 + $0x1984] ss:$48 sps:$4 sm:$0xff]  }
 0x38b   :  { %v21476_v46 = vpop.f32.mrb[48].mxu1  ;;  %v18580_v10 = vld [vmem:[%s25007_s3 + $0x19e4] ss:$48 sps:$4 sm:$0xff]  }
 0x38c   :  { %v21481_v27 = vpop.f32.mrb[49].mxu1  ;;  %12420 = vmatpush1.bf16.msra.mxu0 %v18536_v12 }
 0x38d   :  { %12660 = vmatpush1.bf16.msra.mxu1 %v18533_v57  ;;  %v21486_v41 = vpop.f32.mrb[50].mxu1  ;;  %12421 = vmatprep.subr.bf16.mxu0 %v18544_v25  ;;  %v18577_v57 = vld [vmem:[%s25007_s3 + $0x168c] ss:$48 sps:$4 sm:$0xff]  }
 0x38e   :  { %v21488_v0 = vpop.f32.mrb[51].mxu1  ;;  %12661 = vmatprep.subr.bf16.mxu1 %v18541_v26  ;;  %v5637_v26 = vrot.slane %v21424_v13, %v20433_v47 }
 0x390   :  { %12422 = vmatpush1.bf16.msra.mxu0 %v18542_v44 }
 0x391   :  { %12662 = vmatpush1.bf16.msra.mxu1 %v18539_v37  ;;  %12434 = vmatprep.subr.bf16.mxu0 %v18550_v45  ;;  %v18578_v45 = vld [vmem:[%s25007_s3 + $0x19e0] ss:$48 sps:$4 sm:$0xff]  }
 0x392   :  { %12663 = vmatprep.subr.bf16.mxu1 %v18547_v56 }
 0x393   :  { %v5489_v38 = vpop.f32.mrb[52].mxu1  ;;  %12424 = vmatmul.mubr.bf16.vlgmr.msra.gmra.mrb[48].mxu0 %v20859_v43 }
 0x394   :  { %v5528_v1 = vmax.f32 %v21476_v46, %v5489_v38  ;;  %v5491_v62 = vpop.f32.mrb[53].mxu1  ;;  %12435 = vmatpush1.bf16.msra.mxu0 %v18548_v18  ;;  %12466 = vmatprep.mubr.bf16.mxu0 %v21474_v50  ;;  %v18586_v38 = vld [vmem:[%s25007_s3 + $0x1a44] ss:$48 sps:$4 sm:$0xff]  }
 0x395   :  { %v5529_v6 = vmax.f32 %v21481_v27, %v5491_v62  ;;  %12664 = vmatpush1.bf16.msra.mxu1 %v18545_v42  ;;  %v5493_v4 = vpop.f32.mrb[54].mxu1  ;;  %12436 = vmatprep.subr.bf16.mxu0 %v18556_v51  ;;  %v5641_v27 = vrot.slane %v21424_v13, %v20436_v17  ;;  %v18583_v42 = vld [vmem:[%s25007_s3 + $0x16ec] ss:$48 sps:$4 sm:$0xff]  }
 0x396   :  { %v5540_v14 = vmax.f32 %v21486_v41, %v5493_v4  ;;  %v5495_v20 = vpop.f32.mrb[55].mxu1  ;;  %12665 = vmatprep.subr.bf16.mxu1 %v18553_v52  ;;  %v18575_v41 = vld [vmem:[%s25007_s3 + $0x1688] ss:$48 sps:$4 sm:$0xff]  }
 0x397   :  { %v5541_v53 = vmax.f32 %v21488_v0, %v5495_v20  ;;  %v18581_v4 = vld [vmem:[%s25007_s3 + $0x16e8] ss:$48 sps:$4 sm:$0xff]   ;;  %v18589_v20 = vld [vmem:[%s25007_s3 + $0x174c] ss:$48 sps:$4 sm:$0xff]  }
 0x398   :  { %12437 = vmatpush1.bf16.msra.mxu0 %v18554_v15 }
 0x399   :  { %12666 = vmatpush1.bf16.msra.mxu1 %v18551_v11  ;;  %12438 = vmatprep.subr.bf16.mxu0 %v18562_v35 }
 0x39a   :  { %12667 = vmatprep.subr.bf16.mxu1 %v18559_v36 }
 0x39b   :  { %v5499_v22 = vpop.f32.mrb[56].mxu1 }
 0x39c   :  { %v5501_v58 = vpop.f32.mrb[57].mxu1  ;;  %12439 = vmatpush1.bf16.msra.mxu0 %v18560_v60  ;;  %v18587_v60 = vld [vmem:[%s25007_s3 + $0x1748] ss:$48 sps:$4 sm:$0xff]  }
 0x39d   :  { %12668 = vmatpush1.bf16.msra.mxu1 %v18557_v54  ;;  %v5503_v34 = vpop.f32.mrb[58].mxu1  ;;  %12440 = vmatprep.subr.bf16.mxu0 %v18568_v63  ;;  %v18595_v63 = vld [vmem:[%s25007_s3 + $0x17ac] ss:$48 sps:$4 sm:$0xff]  }
 0x39e   :  { %v5505_v23 = vpop.f32.mrb[59].mxu1  ;;  %12669 = vmatprep.subr.bf16.mxu1 %v18565_v49 }
 0x3a0   :  { %12441 = vmatpush1.bf16.msra.mxu0 %v18566_v19  ;;  %v18601_v19 = vld [vmem:[%s25007_s3 + $0x180c] ss:$48 sps:$4 sm:$0xff]  }
 0x3a1   :  { %12670 = vmatpush1.bf16.msra.mxu1 %v18563_v7  ;;  %12442 = vmatprep.subr.bf16.mxu0 %v18574_v39  ;;  %v18593_v7 = vld [vmem:[%s25007_s3 + $0x17a8] ss:$48 sps:$4 sm:$0xff]  }
 0x3a2   :  { %12671 = vmatprep.subr.bf16.mxu1 %v18571_v24  ;;  %v18604_v24 = vld [vmem:[%s25007_s3 + $0x1b64] ss:$48 sps:$4 sm:$0xff]   ;;  %v18599_v39 = vld [vmem:[%s25007_s3 + $0x1808] ss:$48 sps:$4 sm:$0xff]  }
 0x3a3   :  { %v5509_v28 = vpop.f32.mrb[60].mxu1 }
 0x3a4   :  { %v5552_v12 = vmax.f32 %v5499_v22, %v5509_v28  ;;  %v5511_v46 = vpop.f32.mrb[61].mxu1  ;;  %12443 = vmatpush1.bf16.msra.mxu0 %v18572_v9  ;;  %v18590_v22 = vld [vmem:[%s25007_s3 + $0x1aa0] ss:$48 sps:$4 sm:$0xff]   ;;  %v18607_v9 = vld [vmem:[%s25007_s3 + $0x186c] ss:$48 sps:$4 sm:$0xff]  }
 0x3a5   :  { %v5553_v25 = vmax.f32 %v5501_v58, %v5511_v46  ;;  %12672 = vmatpush1.bf16.msra.mxu1 %v18569_v29  ;;  %v5513_v37 = vpop.f32.mrb[62].mxu1  ;;  %12444 = vmatprep.subr.bf16.mxu0 %v18580_v10  ;;  %v18602_v29 = vld [vmem:[%s25007_s3 + $0x1b60] ss:$48 sps:$4 sm:$0xff]   ;;  %v18605_v28 = vld [vmem:[%s25007_s3 + $0x1868] ss:$48 sps:$4 sm:$0xff]  }
 0x3a6   :  { %v5576_v0 = vmax.f32 %v5528_v1, %v5552_v12  ;;  %v5564_v44 = vmax.f32 %v5503_v34, %v5513_v37  ;;  %v5515_v56 = vpop.f32.mrb[63].mxu1  ;;  %12673 = vmatprep.subr.bf16.mxu1 %v18577_v57  ;;  %v18598_v34 = vld [vmem:[%s25007_s3 + $0x1b04] ss:$48 sps:$4 sm:$0xff]   ;;  %v18608_v10 = vld [vmem:[%s25007_s3 + $0x1bc0] ss:$48 sps:$4 sm:$0xff]  }
 0x3a7   :  { %v5577_v13 = vmax.f32 %v5529_v6, %v5553_v25  ;;  %v5565_v18 = vmax.f32 %v5505_v23, %v5515_v56  ;;  %v18584_v6 = vld [vmem:[%s25007_s3 + $0x1a40] ss:$48 sps:$4 sm:$0xff]   ;;  %v18610_v57 = vld [vmem:[%s25007_s3 + $0x1bc4] ss:$48 sps:$4 sm:$0xff]   ;;  %v18613_v12 = vld [vmem:[%s25007_s3 + $0x18cc] ss:$48 sps:$4 sm:$0xff]  }
 0x3a8   :  { %v5664_v52 = vadd.f32 %v5637_v26, %v5576_v0  ;;  %v5588_v51 = vmax.f32 %v5540_v14, %v5564_v44  ;;  %12445 = vmatpush1.bf16.msra.mxu0 %v18578_v45  ;;  %v18592_v14 = vld [vmem:[%s25007_s3 + $0x1aa4] ss:$48 sps:$4 sm:$0xff]   ;;  %v18596_v23 = vld [vmem:[%s25007_s3 + $0x1b00] ss:$48 sps:$4 sm:$0xff]   ;;  %v18611_v46 = vld [vmem:[%s25007_s3 + $0x18c8] ss:$48 sps:$4 sm:$0xff]  }
 0x3a9   :  { %v5665_v1 = vadd.f32 %v5641_v27, %v5577_v13  ;;  %v5589_v62 = vmax.f32 %v5541_v53, %v5565_v18  ;;  %12674 = vmatpush1.bf16.msra.mxu1 %v18575_v41  ;;  %12446 = vmatprep.subr.bf16.mxu0 %v18586_v38  ;;  %v18614_v25 = vld [vmem:[%s25007_s3 + $0x1c20] ss:$48 sps:$4 sm:$0xff]   ;;  %v18622_v37 = vld [vmem:[%s25007_s3 + $0x1c84] ss:$48 sps:$4 sm:$0xff]   ;;  %v18617_v41 = vld [vmem:[%s25007_s3 + $0x1928] ss:$48 sps:$4 sm:$0xff]  }
 0x3aa   :  { %v5676_v11 = vadd.f32 %v5637_v26, %v5588_v51  ;;  %12675 = vmatprep.subr.bf16.mxu1 %v18583_v42  ;;  %v5688_v36 = vmax.f32 %v5664_v52, 0.0  ;;  %v18616_v26 = vld [vmem:[%s25007_s3 + $0x1c24] ss:$48 sps:$4 sm:$0xff]   ;;  %v18620_v0 = vld [vmem:[%s25007_s3 + $0x1c80] ss:$48 sps:$4 sm:$0xff]  }
 0x3ab   :  { %v5677_v15 = vadd.f32 %v5641_v27, %v5589_v62  ;;  %v5689_v35 = vmax.f32 %v5665_v1, 0.0  ;;  %v18619_v27 = vld [vmem:[%s25007_s3 + $0x192c] ss:$48 sps:$4 sm:$0xff]   ;;  %v18628_v56 = vld [vmem:[%s25007_s3 + $0x1ce4] ss:$48 sps:$4 sm:$0xff]  }
 0x3ac   :  { %v5700_v53 = vmax.f32 %v5676_v11, 0.0  ;;  %12447 = vmatpush1.bf16.msra.mxu0 %v18584_v6  ;;  %v18625_v44 = vld [vmem:[%s25007_s3 + $0x198c] ss:$48 sps:$4 sm:$0xff]   ;;  %v18623_v45 = vld [vmem:[%s25007_s3 + $0x1988] ss:$48 sps:$4 sm:$0xff]  }
 0x3ad   :  { %v5701_v54 = vmax.f32 %v5677_v15, 0.0  ;;  %12676 = vmatpush1.bf16.msra.mxu1 %v18581_v4  ;;  %12448 = vmatprep.subr.bf16.mxu0 %v18592_v14  ;;  %v18626_v42 = vld [vmem:[%s25007_s3 + $0x1ce0] ss:$48 sps:$4 sm:$0xff]   ;;  %v18631_v13 = vld [vmem:[%s25007_s3 + $0x19ec] ss:$48 sps:$4 sm:$0xff]  }
 0x3ae   :  { %v21596_v49 = vpack.c.bf16 %v5700_v53, %v5688_v36  ;;  %12677 = vmatprep.subr.bf16.mxu1 %v18589_v20  ;;  %v18634_v18 = vld [vmem:[%s25007_s3 + $0x1d44] ss:$48 sps:$4 sm:$0xff]   ;;  %v18629_v38 = vld [vmem:[%s25007_s3 + $0x19e8] ss:$48 sps:$4 sm:$0xff]   ;;  %v18632_v52 = vld [vmem:[%s25007_s3 + $0x1d40] ss:$48 sps:$4 sm:$0xff]  }
 0x3af   :  { %v21604_v58 = vpack.c.bf16 %v5701_v54, %v5689_v35  ;;  %v18637_v51 = vld [vmem:[%s25007_s3 + $0x1a4c] ss:$48 sps:$4 sm:$0xff]   ;;  %v18640_v1 = vld [vmem:[%s25007_s3 + $0x1da4] ss:$48 sps:$4 sm:$0xff]   ;;  %v18635_v62 = vld [vmem:[%s25007_s3 + $0x1a48] ss:$48 sps:$4 sm:$0xff]  }
 0x3b0   :  { %12449 = vmatpush1.bf16.msra.mxu0 %v18590_v22  ;;  %v18638_v4 = vld [vmem:[%s25007_s3 + $0x1da0] ss:$48 sps:$4 sm:$0xff]   ;;  %v18643_v11 = vld [vmem:[%s25007_s3 + $0x1aac] ss:$48 sps:$4 sm:$0xff]   ;;  %v18646_v6 = vld [vmem:[%s25007_s3 + $0x1e04] ss:$48 sps:$4 sm:$0xff]  }
 0x3b1   :  { %12678 = vmatpush1.bf16.msra.mxu1 %v18587_v60  ;;  %12450 = vmatprep.subr.bf16.mxu0 %v18598_v34  ;;  %v18641_v20 = vld [vmem:[%s25007_s3 + $0x1aa8] ss:$48 sps:$4 sm:$0xff]   ;;  %v18644_v15 = vld [vmem:[%s25007_s3 + $0x1e00] ss:$48 sps:$4 sm:$0xff]   ;;  %v18649_v14 = vld [vmem:[%s25007_s3 + $0x1b0c] ss:$48 sps:$4 sm:$0xff]  }
 0x3b2   :  { %12679 = vmatprep.subr.bf16.mxu1 %v18595_v63  ;;  %v18652_v36 = vld [vmem:[%s25007_s3 + $0x1e64] ss:$48 sps:$4 sm:$0xff]   ;;  %v18647_v53 = vld [vmem:[%s25007_s3 + $0x1b08] ss:$48 sps:$4 sm:$0xff]   ;;  %v18650_v35 = vld [vmem:[%s25007_s3 + $0x1e60] ss:$48 sps:$4 sm:$0xff]  }
 0x3b3   :  { %v18655_v54 = vld [vmem:[%s25007_s3 + $0x1b6c] ss:$48 sps:$4 sm:$0xff]   ;;  %v18658_v60 = vld [vmem:[%s25007_s3 + $0x1ec4] ss:$48 sps:$4 sm:$0xff]   ;;  %v18653_v22 = vld [vmem:[%s25007_s3 + $0x1b68] ss:$48 sps:$4 sm:$0xff]  }
 0x3b4   :  { %12451 = vmatpush1.bf16.msra.mxu0 %v18596_v23  ;;  %v18656_v63 = vld [vmem:[%s25007_s3 + $0x1ec0] ss:$48 sps:$4 sm:$0xff]   ;;  %v18661_v34 = vld [vmem:[%s25007_s3 + $0x1bcc] ss:$48 sps:$4 sm:$0xff]   ;;  %v18659_v23 = vld [vmem:[%s25007_s3 + $0x1bc8] ss:$48 sps:$4 sm:$0xff]  }
 0x3b5   :  { %12680 = vmatpush1.bf16.msra.mxu1 %v18593_v7  ;;  %12452 = vmatprep.subr.bf16.mxu0 %v18604_v24  ;;  %v18664_v7 = vld [vmem:[%s25007_s3 + $0x1f24] ss:$48 sps:$4 sm:$0xff]   ;;  %v18667_v24 = vld [vmem:[%s25007_s3 + $0x1c2c] ss:$48 sps:$4 sm:$0xff]  }
 0x3b6   :  { %12692 = vmatprep.subr.bf16.mxu1 %v18601_v19  ;;  %v18662_v19 = vld [vmem:[%s25007_s3 + $0x1f20] ss:$48 sps:$4 sm:$0xff]  }
 0x3b8   :  { %12682 = vmatmul.mubr.bf16.vlgmr.msra.gmra.mrb[64].mxu1 %v20859_v43  ;;  %12453 = vmatpush1.bf16.msra.mxu0 %v18602_v29  ;;  %v18665_v29 = vld [vmem:[%s25007_s3 + $0x1c28] ss:$48 sps:$4 sm:$0xff]  }
 0x3b9   :  { %12693 = vmatpush1.bf16.msra.mxu1 %v18599_v39  ;;  %12724 = vmatprep.mubr.bf16.mxu1 %v21474_v50  ;;  %v18670_v39 = vld [vmem:[%s25007_s3 + $0x1f84] ss:$48 sps:$4 sm:$0xff]  }
 0x3ba   :  { %12694 = vmatprep.subr.bf16.mxu1 %v18607_v9  ;;  %12454 = vmatprep.subr.bf16.mxu0 %v18610_v57  ;;  %v18668_v9 = vld [vmem:[%s25007_s3 + $0x1f80] ss:$48 sps:$4 sm:$0xff]   ;;  %v18673_v57 = vld [vmem:[%s25007_s3 + $0x1c8c] ss:$48 sps:$4 sm:$0xff]  }
 0x3bc   :  { %12455 = vmatpush1.bf16.msra.mxu0 %v18608_v10  ;;  %v18671_v10 = vld [vmem:[%s25007_s3 + $0x1c88] ss:$48 sps:$4 sm:$0xff]  }
 0x3bd   :  { %12695 = vmatpush1.bf16.msra.mxu1 %v18605_v28  ;;  %12456 = vmatprep.subr.bf16.mxu0 %v18616_v26  ;;  %v18676_v28 = vld [vmem:[%s25007_s3 + $0x1fe4] ss:$48 sps:$4 sm:$0xff]   ;;  %v18679_v26 = vld [vmem:[%s25007_s3 + $0x1cec] ss:$48 sps:$4 sm:$0xff]  }
 0x3be   :  { %12696 = vmatprep.subr.bf16.mxu1 %v18613_v12  ;;  %v18674_v12 = vld [vmem:[%s25007_s3 + $0x1fe0] ss:$48 sps:$4 sm:$0xff]  }
 0x3c0   :  { %12457 = vmatpush1.bf16.msra.mxu0 %v18614_v25  ;;  %v18677_v25 = vld [vmem:[%s25007_s3 + $0x1ce8] ss:$48 sps:$4 sm:$0xff]  }
 0x3c1   :  { %12697 = vmatpush1.bf16.msra.mxu1 %v18611_v46  ;;  %12458 = vmatprep.subr.bf16.mxu0 %v18622_v37  ;;  %v18682_v46 = vld [vmem:[%s25007_s3 + $0x2044] ss:$48 sps:$4 sm:$0xff]   ;;  %v18685_v37 = vld [vmem:[%s25007_s3 + $0x1d4c] ss:$48 sps:$4 sm:$0xff]  }
 0x3c2   :  { %12698 = vmatprep.subr.bf16.mxu1 %v18619_v27  ;;  %v18680_v27 = vld [vmem:[%s25007_s3 + $0x2040] ss:$48 sps:$4 sm:$0xff]  }
 0x3c4   :  { %12459 = vmatpush1.bf16.msra.mxu0 %v18620_v0  ;;  %v18683_v0 = vld [vmem:[%s25007_s3 + $0x1d48] ss:$48 sps:$4 sm:$0xff]  }
 0x3c5   :  { %12699 = vmatpush1.bf16.msra.mxu1 %v18617_v41  ;;  %12460 = vmatprep.subr.bf16.mxu0 %v18628_v56  ;;  %v18688_v41 = vld [vmem:[%s25007_s3 + $0x20a4] ss:$48 sps:$4 sm:$0xff]   ;;  %v18691_v56 = vld [vmem:[%s25007_s3 + $0x1dac] ss:$48 sps:$4 sm:$0xff]  }
 0x3c6   :  { %12700 = vmatprep.subr.bf16.mxu1 %v18625_v44  ;;  %v18686_v44 = vld [vmem:[%s25007_s3 + $0x20a0] ss:$48 sps:$4 sm:$0xff]  }
 0x3c8   :  { %12461 = vmatpush1.bf16.msra.mxu0 %v18626_v42  ;;  %v18689_v42 = vld [vmem:[%s25007_s3 + $0x1da8] ss:$48 sps:$4 sm:$0xff]  }
 0x3c9   :  { %12701 = vmatpush1.bf16.msra.mxu1 %v18623_v45  ;;  %12462 = vmatprep.subr.bf16.mxu0 %v18634_v18  ;;  %v18694_v45 = vld [vmem:[%s25007_s3 + $0x2104] ss:$48 sps:$4 sm:$0xff]   ;;  %v18697_v18 = vld [vmem:[%s25007_s3 + $0x1e0c] ss:$48 sps:$4 sm:$0xff]  }
 0x3ca   :  { %12702 = vmatprep.subr.bf16.mxu1 %v18631_v13  ;;  %v18692_v13 = vld [vmem:[%s25007_s3 + $0x2100] ss:$48 sps:$4 sm:$0xff]  }
 0x3cc   :  { %12463 = vmatpush1.bf16.msra.mxu0 %v18632_v52  ;;  %v18695_v52 = vld [vmem:[%s25007_s3 + $0x1e08] ss:$48 sps:$4 sm:$0xff]  }
 0x3cd   :  { %12703 = vmatpush1.bf16.msra.mxu1 %v18629_v38  ;;  %12464 = vmatprep.subr.bf16.mxu0 %v18640_v1  ;;  %v18700_v38 = vld [vmem:[%s25007_s3 + $0x2164] ss:$48 sps:$4 sm:$0xff]   ;;  %v18703_v1 = vld [vmem:[%s25007_s3 + $0x1e6c] ss:$48 sps:$4 sm:$0xff]  }
 0x3ce   :  { %12704 = vmatprep.subr.bf16.mxu1 %v18637_v51  ;;  %v18698_v51 = vld [vmem:[%s25007_s3 + $0x2160] ss:$48 sps:$4 sm:$0xff]  }
 0x3d0   :  { %12465 = vmatpush1.bf16.msra.mxu0 %v18638_v4  ;;  %v18701_v4 = vld [vmem:[%s25007_s3 + $0x1e68] ss:$48 sps:$4 sm:$0xff]  }
 0x3d1   :  { %12705 = vmatpush1.bf16.msra.mxu1 %v18635_v62  ;;  %12477 = vmatprep.subr.bf16.mxu0 %v18646_v6  ;;  %v18706_v62 = vld [vmem:[%s25007_s3 + $0x14] ss:$48 sps:$4 sm:$0xff]   ;;  %v18709_v6 = vld [vmem:[%s25007_s3 + $0x1ecc] ss:$48 sps:$4 sm:$0xff]  }
 0x3d2   :  { %12706 = vmatprep.subr.bf16.mxu1 %v18643_v11  ;;  %v18704_v11 = vld [vmem:[%s25007_s3 + $0x10] ss:$48 sps:$4 sm:$0xff]  }
 0x3d3   :  { %12467 = vmatmul.mubr.bf16.vlgmr.msra.gmra.mrb[48].mxu0 %v21466_v30 }
 0x3d4   :  { %12478 = vmatpush1.bf16.msra.mxu0 %v18644_v15  ;;  %16433 = vmatprep.mubr.msk.bf16.mxu0 %vm12258_vm1, %v21604_v58  ;;  %v18707_v15 = vld [vmem:[%s25007_s3 + $0x1ec8] ss:$48 sps:$4 sm:$0xff]  }
 0x3d5   :  { %12707 = vmatpush1.bf16.msra.mxu1 %v18641_v20  ;;  %12479 = vmatprep.subr.bf16.mxu0 %v18652_v36  ;;  %v18712_v20 = vld [vmem:[%s25007_s3 + $0x74] ss:$48 sps:$4 sm:$0xff]   ;;  %v18715_v36 = vld [vmem:[%s25007_s3 + $0x1f2c] ss:$48 sps:$4 sm:$0xff]  }
 0x3d6   :  { %12708 = vmatprep.subr.bf16.mxu1 %v18649_v14  ;;  %v18710_v14 = vld [vmem:[%s25007_s3 + $0x70] ss:$48 sps:$4 sm:$0xff]  }
 0x3d8   :  { %12480 = vmatpush1.bf16.msra.mxu0 %v18650_v35  ;;  %v18713_v35 = vld [vmem:[%s25007_s3 + $0x1f28] ss:$48 sps:$4 sm:$0xff]  }
 0x3d9   :  { %12709 = vmatpush1.bf16.msra.mxu1 %v18647_v53  ;;  %12481 = vmatprep.subr.bf16.mxu0 %v18658_v60  ;;  %v18718_v53 = vld [vmem:[%s25007_s3 + $0xd4] ss:$48 sps:$4 sm:$0xff]   ;;  %v18721_v60 = vld [vmem:[%s25007_s3 + $0x1f8c] ss:$48 sps:$4 sm:$0xff]  }
 0x3da   :  { %12710 = vmatprep.subr.bf16.mxu1 %v18655_v54  ;;  %v18716_v54 = vld [vmem:[%s25007_s3 + $0xd0] ss:$48 sps:$4 sm:$0xff]  }
 0x3dc   :  { %12482 = vmatpush1.bf16.msra.mxu0 %v18656_v63  ;;  %v18719_v63 = vld [vmem:[%s25007_s3 + $0x1f88] ss:$48 sps:$4 sm:$0xff]  }
 0x3dd   :  { %12711 = vmatpush1.bf16.msra.mxu1 %v18653_v22  ;;  %12483 = vmatprep.subr.bf16.mxu0 %v18664_v7  ;;  %v18724_v22 = vld [vmem:[%s25007_s3 + $0x134] ss:$48 sps:$4 sm:$0xff]   ;;  %v18727_v7 = vld [vmem:[%s25007_s3 + $0x1fec] ss:$48 sps:$4 sm:$0xff]  }
 0x3de   :  { %12712 = vmatprep.subr.bf16.mxu1 %v18661_v34  ;;  %v18722_v34 = vld [vmem:[%s25007_s3 + $0x130] ss:$48 sps:$4 sm:$0xff]  }
 0x3e0   :  { %12484 = vmatpush1.bf16.msra.mxu0 %v18662_v19  ;;  %v18725_v19 = vld [vmem:[%s25007_s3 + $0x1fe8] ss:$48 sps:$4 sm:$0xff]  }
 0x3e1   :  { %12713 = vmatpush1.bf16.msra.mxu1 %v18659_v23  ;;  %12485 = vmatprep.subr.bf16.mxu0 %v18670_v39  ;;  %v18730_v23 = vld [vmem:[%s25007_s3 + $0x194] ss:$48 sps:$4 sm:$0xff]   ;;  %v18733_v39 = vld [vmem:[%s25007_s3 + $0x204c] ss:$48 sps:$4 sm:$0xff]  }
 0x3e2   :  { %12714 = vmatprep.subr.bf16.mxu1 %v18667_v24  ;;  %v18728_v24 = vld [vmem:[%s25007_s3 + $0x190] ss:$48 sps:$4 sm:$0xff]  }
 0x3e4   :  { %12486 = vmatpush1.bf16.msra.mxu0 %v18668_v9  ;;  %v18731_v9 = vld [vmem:[%s25007_s3 + $0x2048] ss:$48 sps:$4 sm:$0xff]  }
 0x3e5   :  { %12715 = vmatpush1.bf16.msra.mxu1 %v18665_v29  ;;  %12487 = vmatprep.subr.bf16.mxu0 %v18676_v28  ;;  %v18736_v29 = vld [vmem:[%s25007_s3 + $0x1f4] ss:$48 sps:$4 sm:$0xff]   ;;  %v18739_v28 = vld [vmem:[%s25007_s3 + $0x20ac] ss:$48 sps:$4 sm:$0xff]  }
 0x3e6   :  { %12716 = vmatprep.subr.bf16.mxu1 %v18673_v57  ;;  %v18734_v57 = vld [vmem:[%s25007_s3 + $0x1f0] ss:$48 sps:$4 sm:$0xff]  }
 0x3e8   :  { %12488 = vmatpush1.bf16.msra.mxu0 %v18674_v12  ;;  %v18737_v12 = vld [vmem:[%s25007_s3 + $0x20a8] ss:$48 sps:$4 sm:$0xff]  }
 0x3e9   :  { %12717 = vmatpush1.bf16.msra.mxu1 %v18671_v10  ;;  %12489 = vmatprep.subr.bf16.mxu0 %v18682_v46  ;;  %v18742_v10 = vld [vmem:[%s25007_s3 + $0x254] ss:$48 sps:$4 sm:$0xff]   ;;  %v18745_v46 = vld [vmem:[%s25007_s3 + $0x210c] ss:$48 sps:$4 sm:$0xff]  }
 0x3ea   :  { %12718 = vmatprep.subr.bf16.mxu1 %v18679_v26  ;;  %v18740_v26 = vld [vmem:[%s25007_s3 + $0x250] ss:$48 sps:$4 sm:$0xff]  }
 0x3ec   :  { %12490 = vmatpush1.bf16.msra.mxu0 %v18680_v27  ;;  %v18743_v27 = vld [vmem:[%s25007_s3 + $0x2108] ss:$48 sps:$4 sm:$0xff]  }
 0x3ed   :  { %12719 = vmatpush1.bf16.msra.mxu1 %v18677_v25  ;;  %12491 = vmatprep.subr.bf16.mxu0 %v18688_v41  ;;  %v18748_v25 = vld [vmem:[%s25007_s3 + $0x2b4] ss:$48 sps:$4 sm:$0xff]   ;;  %v18751_v41 = vld [vmem:[%s25007_s3 + $0x216c] ss:$48 sps:$4 sm:$0xff]  }
 0x3ee   :  { %12720 = vmatprep.subr.bf16.mxu1 %v18685_v37  ;;  %v18746_v37 = vld [vmem:[%s25007_s3 + $0x2b0] ss:$48 sps:$4 sm:$0xff]  }
 0x3f0   :  { %12492 = vmatpush1.bf16.msra.mxu0 %v18686_v44  ;;  %v18749_v44 = vld [vmem:[%s25007_s3 + $0x2168] ss:$48 sps:$4 sm:$0xff]  }
 0x3f1   :  { %12721 = vmatpush1.bf16.msra.mxu1 %v18683_v0  ;;  %12493 = vmatprep.subr.bf16.mxu0 %v18694_v45  ;;  %v18754_v0 = vld [vmem:[%s25007_s3 + $0x314] ss:$48 sps:$4 sm:$0xff]   ;;  %v18757_v45 = vld [vmem:[%s25007_s3 + $0x1c] ss:$48 sps:$4 sm:$0xff]  }
 0x3f2   :  { %12722 = vmatprep.subr.bf16.mxu1 %v18691_v56  ;;  %v18752_v56 = vld [vmem:[%s25007_s3 + $0x310] ss:$48 sps:$4 sm:$0xff]  }
 0x3f4   :  { %12494 = vmatpush1.bf16.msra.mxu0 %v18692_v13  ;;  %v18755_v13 = vld [vmem:[%s25007_s3 + $0x18] ss:$48 sps:$4 sm:$0xff]  }
 0x3f5   :  { %12723 = vmatpush1.bf16.msra.mxu1 %v18689_v42  ;;  %12495 = vmatprep.subr.bf16.mxu0 %v18700_v38  ;;  %v18760_v42 = vld [vmem:[%s25007_s3 + $0x374] ss:$48 sps:$4 sm:$0xff]   ;;  %v18763_v38 = vld [vmem:[%s25007_s3 + $0x7c] ss:$48 sps:$4 sm:$0xff]  }
 0x3f6   :  { %12735 = vmatprep.subr.bf16.mxu1 %v18697_v18  ;;  %v18758_v18 = vld [vmem:[%s25007_s3 + $0x370] ss:$48 sps:$4 sm:$0xff]  }
 0x3f8   :  { %12725 = vmatmul.mubr.bf16.vlgmr.msra.gmra.mrb[64].mxu1 %v21466_v30  ;;  %12496 = vmatpush1.bf16.msra.mxu0 %v18698_v51  ;;  %v18761_v51 = vld [vmem:[%s25007_s3 + $0x78] ss:$48 sps:$4 sm:$0xff]  }
 0x3f9   :  { %12736 = vmatpush1.bf16.msra.mxu1 %v18695_v52  ;;  %16434 = vmatprep.mubr.msk.bf16.mxu1 %vm12258_vm1, %v21604_v58  ;;  %v18766_v52 = vld [vmem:[%s25007_s3 + $0x3d4] ss:$48 sps:$4 sm:$0xff]  }
 0x3fa   :  { %12737 = vmatprep.subr.bf16.mxu1 %v18703_v1  ;;  %12778 = vmatprep.subr.bf16.mxu0 %v18706_v62  ;;  %v18764_v1 = vld [vmem:[%s25007_s3 + $0x3d0] ss:$48 sps:$4 sm:$0xff]   ;;  %v18769_v62 = vld [vmem:[%s25007_s3 + $0xdc] ss:$48 sps:$4 sm:$0xff]  }
 0x3fb   :  { %12510 = vmatmul.mubr.bf16.vlgmr.msra.gmra.mrb[48].mxu0 %v21596_v49 }
 0x3fc   :  { %12779 = vmatpush1.bf16.msra.mxu0 %v18704_v11  ;;  %12810 = vmatprep.mubr.bf16.mxu0 %v20400_v5  ;;  %v18767_v11 = vld [vmem:[%s25007_s3 + $0xd8] ss:$48 sps:$4 sm:$0xff]  }
 0x3fd   :  { %12738 = vmatpush1.bf16.msra.mxu1 %v18701_v4  ;;  %12780 = vmatprep.subr.bf16.mxu0 %v18712_v20  ;;  %v18772_v4 = vld [vmem:[%s25007_s3 + $0x434] ss:$48 sps:$4 sm:$0xff]   ;;  %v18775_v20 = vld [vmem:[%s25007_s3 + $0x13c] ss:$48 sps:$4 sm:$0xff]  }
 0x3fe   :  { %12739 = vmatprep.subr.bf16.mxu1 %v18709_v6  ;;  %v18770_v6 = vld [vmem:[%s25007_s3 + $0x430] ss:$48 sps:$4 sm:$0xff]  }
 0x400   :  { %12781 = vmatpush1.bf16.msra.mxu0 %v18710_v14  ;;  %v18773_v14 = vld [vmem:[%s25007_s3 + $0x138] ss:$48 sps:$4 sm:$0xff]  }
 0x401   :  { %12740 = vmatpush1.bf16.msra.mxu1 %v18707_v15  ;;  %12782 = vmatprep.subr.bf16.mxu0 %v18718_v53  ;;  %v18778_v15 = vld [vmem:[%s25007_s3 + $0x494] ss:$48 sps:$4 sm:$0xff]   ;;  %v18781_v53 = vld [vmem:[%s25007_s3 + $0x19c] ss:$48 sps:$4 sm:$0xff]  }
 0x402   :  { %12741 = vmatprep.subr.bf16.mxu1 %v18715_v36  ;;  %v18776_v36 = vld [vmem:[%s25007_s3 + $0x490] ss:$48 sps:$4 sm:$0xff]  }
 0x404   :  { %12783 = vmatpush1.bf16.msra.mxu0 %v18716_v54  ;;  %v18779_v54 = vld [vmem:[%s25007_s3 + $0x198] ss:$48 sps:$4 sm:$0xff]  }
 0x405   :  { %12742 = vmatpush1.bf16.msra.mxu1 %v18713_v35  ;;  %12784 = vmatprep.subr.bf16.mxu0 %v18724_v22  ;;  %v18784_v35 = vld [vmem:[%s25007_s3 + $0x4f4] ss:$48 sps:$4 sm:$0xff]   ;;  %v18787_v22 = vld [vmem:[%s25007_s3 + $0x1fc] ss:$48 sps:$4 sm:$0xff]  }
 0x406   :  { %12743 = vmatprep.subr.bf16.mxu1 %v18721_v60  ;;  %v18782_v60 = vld [vmem:[%s25007_s3 + $0x4f0] ss:$48 sps:$4 sm:$0xff]  }
 0x408   :  { %12785 = vmatpush1.bf16.msra.mxu0 %v18722_v34  ;;  %v18785_v34 = vld [vmem:[%s25007_s3 + $0x1f8] ss:$48 sps:$4 sm:$0xff]  }
 0x409   :  { %12744 = vmatpush1.bf16.msra.mxu1 %v18719_v63  ;;  %12786 = vmatprep.subr.bf16.mxu0 %v18730_v23  ;;  %v18790_v63 = vld [vmem:[%s25007_s3 + $0x554] ss:$48 sps:$4 sm:$0xff]   ;;  %v18793_v23 = vld [vmem:[%s25007_s3 + $0x25c] ss:$48 sps:$4 sm:$0xff]  }
 0x40a   :  { %12745 = vmatprep.subr.bf16.mxu1 %v18727_v7  ;;  %v18788_v7 = vld [vmem:[%s25007_s3 + $0x550] ss:$48 sps:$4 sm:$0xff]  }
 0x40c   :  { %12787 = vmatpush1.bf16.msra.mxu0 %v18728_v24  ;;  %v18791_v24 = vld [vmem:[%s25007_s3 + $0x258] ss:$48 sps:$4 sm:$0xff]  }
 0x40d   :  { %12746 = vmatpush1.bf16.msra.mxu1 %v18725_v19  ;;  %12788 = vmatprep.subr.bf16.mxu0 %v18736_v29  ;;  %v18796_v19 = vld [vmem:[%s25007_s3 + $0x5b4] ss:$48 sps:$4 sm:$0xff]   ;;  %v18799_v29 = vld [vmem:[%s25007_s3 + $0x2bc] ss:$48 sps:$4 sm:$0xff]  }
 0x40e   :  { %12747 = vmatprep.subr.bf16.mxu1 %v18733_v39  ;;  %v18794_v39 = vld [vmem:[%s25007_s3 + $0x5b0] ss:$48 sps:$4 sm:$0xff]  }
 0x410   :  { %12789 = vmatpush1.bf16.msra.mxu0 %v18734_v57  ;;  %v18797_v57 = vld [vmem:[%s25007_s3 + $0x2b8] ss:$48 sps:$4 sm:$0xff]  }
 0x411   :  { %12748 = vmatpush1.bf16.msra.mxu1 %v18731_v9  ;;  %12790 = vmatprep.subr.bf16.mxu0 %v18742_v10  ;;  %v18802_v9 = vld [vmem:[%s25007_s3 + $0x614] ss:$48 sps:$4 sm:$0xff]   ;;  %v18805_v10 = vld [vmem:[%s25007_s3 + $0x31c] ss:$48 sps:$4 sm:$0xff]  }
 0x412   :  { %12749 = vmatprep.subr.bf16.mxu1 %v18739_v28  ;;  %v18800_v28 = vld [vmem:[%s25007_s3 + $0x610] ss:$48 sps:$4 sm:$0xff]  }
 0x414   :  { %12791 = vmatpush1.bf16.msra.mxu0 %v18740_v26  ;;  %v18803_v26 = vld [vmem:[%s25007_s3 + $0x318] ss:$48 sps:$4 sm:$0xff]  }
 0x415   :  { %12750 = vmatpush1.bf16.msra.mxu1 %v18737_v12  ;;  %12792 = vmatprep.subr.bf16.mxu0 %v18748_v25  ;;  %v18808_v12 = vld [vmem:[%s25007_s3 + $0x674] ss:$48 sps:$4 sm:$0xff]   ;;  %v18811_v25 = vld [vmem:[%s25007_s3 + $0x37c] ss:$48 sps:$4 sm:$0xff]  }
 0x416   :  { %12751 = vmatprep.subr.bf16.mxu1 %v18745_v46  ;;  %v18806_v46 = vld [vmem:[%s25007_s3 + $0x670] ss:$48 sps:$4 sm:$0xff]  }
 0x418   :  { %12793 = vmatpush1.bf16.msra.mxu0 %v18746_v37  ;;  %v18809_v37 = vld [vmem:[%s25007_s3 + $0x378] ss:$48 sps:$4 sm:$0xff]  }
 0x419   :  { %12752 = vmatpush1.bf16.msra.mxu1 %v18743_v27  ;;  %12794 = vmatprep.subr.bf16.mxu0 %v18754_v0  ;;  %v18814_v27 = vld [vmem:[%s25007_s3 + $0x6d4] ss:$48 sps:$4 sm:$0xff]   ;;  %v18817_v0 = vld [vmem:[%s25007_s3 + $0x3dc] ss:$48 sps:$4 sm:$0xff]  }
 0x41a   :  { %12753 = vmatprep.subr.bf16.mxu1 %v18751_v41  ;;  %v18812_v41 = vld [vmem:[%s25007_s3 + $0x6d0] ss:$48 sps:$4 sm:$0xff]  }
 0x41c   :  { %12795 = vmatpush1.bf16.msra.mxu0 %v18752_v56  ;;  %v18815_v56 = vld [vmem:[%s25007_s3 + $0x3d8] ss:$48 sps:$4 sm:$0xff]  }
 0x41d   :  { %12754 = vmatpush1.bf16.msra.mxu1 %v18749_v44  ;;  %12796 = vmatprep.subr.bf16.mxu0 %v18760_v42  ;;  %v18820_v44 = vld [vmem:[%s25007_s3 + $0x734] ss:$48 sps:$4 sm:$0xff]   ;;  %v18823_v42 = vld [vmem:[%s25007_s3 + $0x43c] ss:$48 sps:$4 sm:$0xff]  }
 0x41e   :  { %13036 = vmatprep.subr.bf16.mxu1 %v18757_v45  ;;  %v18818_v45 = vld [vmem:[%s25007_s3 + $0x730] ss:$48 sps:$4 sm:$0xff]  }
 0x420   :  { %12768 = vmatmul.mubr.bf16.vlgmr.msra.gmra.mrb[64].mxu1 %v21596_v49  ;;  %12797 = vmatpush1.bf16.msra.mxu0 %v18758_v18  ;;  %v18821_v18 = vld [vmem:[%s25007_s3 + $0x438] ss:$48 sps:$4 sm:$0xff]  }
 0x421   :  { %13037 = vmatpush1.bf16.msra.mxu1 %v18755_v13  ;;  %13068 = vmatprep.mubr.bf16.mxu1 %v20400_v5  ;;  %v18826_v13 = vld [vmem:[%s25007_s3 + $0x794] ss:$48 sps:$4 sm:$0xff]  }
 0x422   :  { %13038 = vmatprep.subr.bf16.mxu1 %v18763_v38  ;;  %12798 = vmatprep.subr.bf16.mxu0 %v18766_v52  ;;  %v18824_v38 = vld [vmem:[%s25007_s3 + $0x790] ss:$48 sps:$4 sm:$0xff]   ;;  %v18829_v52 = vld [vmem:[%s25007_s3 + $0x49c] ss:$48 sps:$4 sm:$0xff]  }
 0x424   :  { %12799 = vmatpush1.bf16.msra.mxu0 %v18764_v1  ;;  %v18827_v1 = vld [vmem:[%s25007_s3 + $0x498] ss:$48 sps:$4 sm:$0xff]  }
 0x425   :  { %13039 = vmatpush1.bf16.msra.mxu1 %v18761_v51  ;;  %12800 = vmatprep.subr.bf16.mxu0 %v18772_v4  ;;  %v18832_v51 = vld [vmem:[%s25007_s3 + $0x7f4] ss:$48 sps:$4 sm:$0xff]   ;;  %v18835_v4 = vld [vmem:[%s25007_s3 + $0x4fc] ss:$48 sps:$4 sm:$0xff]  }
 0x426   :  { %13040 = vmatprep.subr.bf16.mxu1 %v18769_v62  ;;  %v18830_v62 = vld [vmem:[%s25007_s3 + $0x7f0] ss:$48 sps:$4 sm:$0xff]  }
 0x428   :  { %12801 = vmatpush1.bf16.msra.mxu0 %v18770_v6  ;;  %v18833_v6 = vld [vmem:[%s25007_s3 + $0x4f8] ss:$48 sps:$4 sm:$0xff]  }
 0x429   :  { %13041 = vmatpush1.bf16.msra.mxu1 %v18767_v11  ;;  %12802 = vmatprep.subr.bf16.mxu0 %v18778_v15  ;;  %v18838_v11 = vld [vmem:[%s25007_s3 + $0x854] ss:$48 sps:$4 sm:$0xff]   ;;  %v18841_v15 = vld [vmem:[%s25007_s3 + $0x55c] ss:$48 sps:$4 sm:$0xff]  }
 0x42a   :  { %13042 = vmatprep.subr.bf16.mxu1 %v18775_v20  ;;  %v18836_v20 = vld [vmem:[%s25007_s3 + $0x850] ss:$48 sps:$4 sm:$0xff]  }
 0x42c   :  { %12803 = vmatpush1.bf16.msra.mxu0 %v18776_v36  ;;  %v18839_v36 = vld [vmem:[%s25007_s3 + $0x558] ss:$48 sps:$4 sm:$0xff]  }
 0x42d   :  { %13043 = vmatpush1.bf16.msra.mxu1 %v18773_v14  ;;  %12804 = vmatprep.subr.bf16.mxu0 %v18784_v35  ;;  %v18844_v14 = vld [vmem:[%s25007_s3 + $0x8b4] ss:$48 sps:$4 sm:$0xff]   ;;  %v18847_v35 = vld [vmem:[%s25007_s3 + $0x5bc] ss:$48 sps:$4 sm:$0xff]  }
 0x42e   :  { %13044 = vmatprep.subr.bf16.mxu1 %v18781_v53  ;;  %v18842_v53 = vld [vmem:[%s25007_s3 + $0x8b0] ss:$48 sps:$4 sm:$0xff]  }
 0x430   :  { %12805 = vmatpush1.bf16.msra.mxu0 %v18782_v60  ;;  %v18845_v60 = vld [vmem:[%s25007_s3 + $0x5b8] ss:$48 sps:$4 sm:$0xff]  }
 0x431   :  { %13045 = vmatpush1.bf16.msra.mxu1 %v18779_v54  ;;  %12806 = vmatprep.subr.bf16.mxu0 %v18790_v63  ;;  %v18850_v54 = vld [vmem:[%s25007_s3 + $0x914] ss:$48 sps:$4 sm:$0xff]   ;;  %v18853_v63 = vld [vmem:[%s25007_s3 + $0x61c] ss:$48 sps:$4 sm:$0xff]  }
 0x432   :  { %13046 = vmatprep.subr.bf16.mxu1 %v18787_v22  ;;  %v18848_v22 = vld [vmem:[%s25007_s3 + $0x910] ss:$48 sps:$4 sm:$0xff]  }
 0x434   :  { %12807 = vmatpush1.bf16.msra.mxu0 %v18788_v7  ;;  %v18851_v7 = vld [vmem:[%s25007_s3 + $0x618] ss:$48 sps:$4 sm:$0xff]  }
 0x435   :  { %13047 = vmatpush1.bf16.msra.mxu1 %v18785_v34  ;;  %12808 = vmatprep.subr.bf16.mxu0 %v18796_v19  ;;  %v18856_v34 = vld [vmem:[%s25007_s3 + $0x974] ss:$48 sps:$4 sm:$0xff]   ;;  %v18859_v19 = vld [vmem:[%s25007_s3 + $0x67c] ss:$48 sps:$4 sm:$0xff]  }
 0x436   :  { %13048 = vmatprep.subr.bf16.mxu1 %v18793_v23  ;;  %v18854_v23 = vld [vmem:[%s25007_s3 + $0x970] ss:$48 sps:$4 sm:$0xff]  }
 0x438   :  { %12809 = vmatpush1.bf16.msra.mxu0 %v18794_v39  ;;  %v18857_v39 = vld [vmem:[%s25007_s3 + $0x678] ss:$48 sps:$4 sm:$0xff]  }
 0x439   :  { %13049 = vmatpush1.bf16.msra.mxu1 %v18791_v24  ;;  %12821 = vmatprep.subr.bf16.mxu0 %v18802_v9  ;;  %v18862_v24 = vld [vmem:[%s25007_s3 + $0x9d4] ss:$48 sps:$4 sm:$0xff]   ;;  %v18865_v9 = vld [vmem:[%s25007_s3 + $0x6dc] ss:$48 sps:$4 sm:$0xff]  }
 0x43a   :  { %13050 = vmatprep.subr.bf16.mxu1 %v18799_v29  ;;  %v18860_v29 = vld [vmem:[%s25007_s3 + $0x9d0] ss:$48 sps:$4 sm:$0xff]  }
 0x43b   :  { %12811 = vmatmul.mubr.bf16.vlgmr.msra.gmra.mrb[52].mxu0 %v20389_v32 }
 0x43c   :  { %12822 = vmatpush1.bf16.msra.mxu0 %v18800_v28  ;;  %12853 = vmatprep.mubr.bf16.mxu0 %v20451_v33  ;;  %v18863_v28 = vld [vmem:[%s25007_s3 + $0x6d8] ss:$48 sps:$4 sm:$0xff]  }
 0x43d   :  { %13051 = vmatpush1.bf16.msra.mxu1 %v18797_v57  ;;  %12823 = vmatprep.subr.bf16.mxu0 %v18808_v12  ;;  %v18868_v57 = vld [vmem:[%s25007_s3 + $0xa34] ss:$48 sps:$4 sm:$0xff]   ;;  %v18871_v12 = vld [vmem:[%s25007_s3 + $0x73c] ss:$48 sps:$4 sm:$0xff]  }
 0x43e   :  { %13052 = vmatprep.subr.bf16.mxu1 %v18805_v10  ;;  %v18866_v10 = vld [vmem:[%s25007_s3 + $0xa30] ss:$48 sps:$4 sm:$0xff]  }
 0x440   :  { %12824 = vmatpush1.bf16.msra.mxu0 %v18806_v46  ;;  %v18869_v46 = vld [vmem:[%s25007_s3 + $0x738] ss:$48 sps:$4 sm:$0xff]  }
 0x441   :  { %13053 = vmatpush1.bf16.msra.mxu1 %v18803_v26  ;;  %12825 = vmatprep.subr.bf16.mxu0 %v18814_v27  ;;  %v18874_v26 = vld [vmem:[%s25007_s3 + $0xa94] ss:$48 sps:$4 sm:$0xff]   ;;  %v18877_v27 = vld [vmem:[%s25007_s3 + $0x79c] ss:$48 sps:$4 sm:$0xff]  }
 0x442   :  { %13054 = vmatprep.subr.bf16.mxu1 %v18811_v25  ;;  %v18872_v25 = vld [vmem:[%s25007_s3 + $0xa90] ss:$48 sps:$4 sm:$0xff]  }
 0x444   :  { %12826 = vmatpush1.bf16.msra.mxu0 %v18812_v41  ;;  %v18875_v41 = vld [vmem:[%s25007_s3 + $0x798] ss:$48 sps:$4 sm:$0xff]  }
 0x445   :  { %13055 = vmatpush1.bf16.msra.mxu1 %v18809_v37  ;;  %12827 = vmatprep.subr.bf16.mxu0 %v18820_v44  ;;  %v18880_v37 = vld [vmem:[%s25007_s3 + $0xaf4] ss:$48 sps:$4 sm:$0xff]   ;;  %v18883_v44 = vld [vmem:[%s25007_s3 + $0x7fc] ss:$48 sps:$4 sm:$0xff]  }
 0x446   :  { %13056 = vmatprep.subr.bf16.mxu1 %v18817_v0  ;;  %v18878_v0 = vld [vmem:[%s25007_s3 + $0xaf0] ss:$48 sps:$4 sm:$0xff]  }
 0x448   :  { %12828 = vmatpush1.bf16.msra.mxu0 %v18818_v45  ;;  %v18881_v45 = vld [vmem:[%s25007_s3 + $0x7f8] ss:$48 sps:$4 sm:$0xff]  }
 0x449   :  { %13057 = vmatpush1.bf16.msra.mxu1 %v18815_v56  ;;  %12829 = vmatprep.subr.bf16.mxu0 %v18826_v13  ;;  %v18886_v56 = vld [vmem:[%s25007_s3 + $0xb54] ss:$48 sps:$4 sm:$0xff]   ;;  %v18889_v13 = vld [vmem:[%s25007_s3 + $0x85c] ss:$48 sps:$4 sm:$0xff]  }
 0x44a   :  { %13058 = vmatprep.subr.bf16.mxu1 %v18823_v42  ;;  %v18884_v42 = vld [vmem:[%s25007_s3 + $0xb50] ss:$48 sps:$4 sm:$0xff]  }
 0x44c   :  { %12830 = vmatpush1.bf16.msra.mxu0 %v18824_v38  ;;  %v18887_v38 = vld [vmem:[%s25007_s3 + $0x858] ss:$48 sps:$4 sm:$0xff]  }
 0x44d   :  { %13059 = vmatpush1.bf16.msra.mxu1 %v18821_v18  ;;  %12831 = vmatprep.subr.bf16.mxu0 %v18832_v51  ;;  %v18892_v18 = vld [vmem:[%s25007_s3 + $0xbb4] ss:$48 sps:$4 sm:$0xff]   ;;  %v18895_v51 = vld [vmem:[%s25007_s3 + $0x8bc] ss:$48 sps:$4 sm:$0xff]  }
 0x44e   :  { %13060 = vmatprep.subr.bf16.mxu1 %v18829_v52  ;;  %v18890_v52 = vld [vmem:[%s25007_s3 + $0xbb0] ss:$48 sps:$4 sm:$0xff]  }
 0x450   :  { %12832 = vmatpush1.bf16.msra.mxu0 %v18830_v62  ;;  %v18893_v62 = vld [vmem:[%s25007_s3 + $0x8b8] ss:$48 sps:$4 sm:$0xff]  }
 0x451   :  { %13061 = vmatpush1.bf16.msra.mxu1 %v18827_v1  ;;  %12833 = vmatprep.subr.bf16.mxu0 %v18838_v11  ;;  %v18898_v1 = vld [vmem:[%s25007_s3 + $0xc14] ss:$48 sps:$4 sm:$0xff]   ;;  %v18901_v11 = vld [vmem:[%s25007_s3 + $0x91c] ss:$48 sps:$4 sm:$0xff]  }
 0x452   :  { %13062 = vmatprep.subr.bf16.mxu1 %v18835_v4  ;;  %v18896_v4 = vld [vmem:[%s25007_s3 + $0xc10] ss:$48 sps:$4 sm:$0xff]  }
 0x454   :  { %12834 = vmatpush1.bf16.msra.mxu0 %v18836_v20  ;;  %v18899_v20 = vld [vmem:[%s25007_s3 + $0x918] ss:$48 sps:$4 sm:$0xff]  }
 0x455   :  { %13063 = vmatpush1.bf16.msra.mxu1 %v18833_v6  ;;  %12835 = vmatprep.subr.bf16.mxu0 %v18844_v14  ;;  %v18904_v6 = vld [vmem:[%s25007_s3 + $0xc74] ss:$48 sps:$4 sm:$0xff]   ;;  %v18907_v14 = vld [vmem:[%s25007_s3 + $0x97c] ss:$48 sps:$4 sm:$0xff]  }
 0x456   :  { %13064 = vmatprep.subr.bf16.mxu1 %v18841_v15  ;;  %v18902_v15 = vld [vmem:[%s25007_s3 + $0xc70] ss:$48 sps:$4 sm:$0xff]  }
 0x458   :  { %12836 = vmatpush1.bf16.msra.mxu0 %v18842_v53  ;;  %v18905_v53 = vld [vmem:[%s25007_s3 + $0x978] ss:$48 sps:$4 sm:$0xff]  }
 0x459   :  { %13065 = vmatpush1.bf16.msra.mxu1 %v18839_v36  ;;  %12837 = vmatprep.subr.bf16.mxu0 %v18850_v54  ;;  %v18910_v36 = vld [vmem:[%s25007_s3 + $0xcd4] ss:$48 sps:$4 sm:$0xff]   ;;  %v18913_v54 = vld [vmem:[%s25007_s3 + $0x9dc] ss:$48 sps:$4 sm:$0xff]  }
 0x45a   :  { %13066 = vmatprep.subr.bf16.mxu1 %v18847_v35  ;;  %v18908_v35 = vld [vmem:[%s25007_s3 + $0xcd0] ss:$48 sps:$4 sm:$0xff]  }
 0x45c   :  { %12838 = vmatpush1.bf16.msra.mxu0 %v18848_v22  ;;  %v18911_v22 = vld [vmem:[%s25007_s3 + $0x9d8] ss:$48 sps:$4 sm:$0xff]  }
 0x45d   :  { %13067 = vmatpush1.bf16.msra.mxu1 %v18845_v60  ;;  %12839 = vmatprep.subr.bf16.mxu0 %v18856_v34  ;;  %v18916_v60 = vld [vmem:[%s25007_s3 + $0xd34] ss:$48 sps:$4 sm:$0xff]   ;;  %v18919_v34 = vld [vmem:[%s25007_s3 + $0xa3c] ss:$48 sps:$4 sm:$0xff]  }
 0x45e   :  { %13079 = vmatprep.subr.bf16.mxu1 %v18853_v63  ;;  %v18914_v63 = vld [vmem:[%s25007_s3 + $0xd30] ss:$48 sps:$4 sm:$0xff]  }
 0x460   :  { %13069 = vmatmul.mubr.bf16.vlgmr.msra.gmra.mrb[68].mxu1 %v20389_v32  ;;  %12840 = vmatpush1.bf16.msra.mxu0 %v18854_v23  ;;  %v18917_v23 = vld [vmem:[%s25007_s3 + $0xa38] ss:$48 sps:$4 sm:$0xff]  }
 0x461   :  { %13080 = vmatpush1.bf16.msra.mxu1 %v18851_v7  ;;  %13111 = vmatprep.mubr.bf16.mxu1 %v20451_v33  ;;  %v18922_v7 = vld [vmem:[%s25007_s3 + $0xd94] ss:$48 sps:$4 sm:$0xff]  }
 0x462   :  { %13081 = vmatprep.subr.bf16.mxu1 %v18859_v19  ;;  %12841 = vmatprep.subr.bf16.mxu0 %v18862_v24  ;;  %v18920_v19 = vld [vmem:[%s25007_s3 + $0xd90] ss:$48 sps:$4 sm:$0xff]   ;;  %v18925_v24 = vld [vmem:[%s25007_s3 + $0xa9c] ss:$48 sps:$4 sm:$0xff]  }
 0x464   :  { %12842 = vmatpush1.bf16.msra.mxu0 %v18860_v29  ;;  %v18923_v29 = vld [vmem:[%s25007_s3 + $0xa98] ss:$48 sps:$4 sm:$0xff]  }
 0x465   :  { %13082 = vmatpush1.bf16.msra.mxu1 %v18857_v39  ;;  %12843 = vmatprep.subr.bf16.mxu0 %v18868_v57  ;;  %v18928_v39 = vld [vmem:[%s25007_s3 + $0xdf4] ss:$48 sps:$4 sm:$0xff]   ;;  %v18931_v57 = vld [vmem:[%s25007_s3 + $0xafc] ss:$48 sps:$4 sm:$0xff]  }
 0x466   :  { %13083 = vmatprep.subr.bf16.mxu1 %v18865_v9  ;;  %v18926_v9 = vld [vmem:[%s25007_s3 + $0xdf0] ss:$48 sps:$4 sm:$0xff]  }
 0x468   :  { %12844 = vmatpush1.bf16.msra.mxu0 %v18866_v10  ;;  %v18929_v10 = vld [vmem:[%s25007_s3 + $0xaf8] ss:$48 sps:$4 sm:$0xff]  }
 0x469   :  { %13084 = vmatpush1.bf16.msra.mxu1 %v18863_v28  ;;  %12845 = vmatprep.subr.bf16.mxu0 %v18874_v26  ;;  %v18934_v28 = vld [vmem:[%s25007_s3 + $0xe54] ss:$48 sps:$4 sm:$0xff]   ;;  %v18937_v26 = vld [vmem:[%s25007_s3 + $0xb5c] ss:$48 sps:$4 sm:$0xff]  }
 0x46a   :  { %13085 = vmatprep.subr.bf16.mxu1 %v18871_v12  ;;  %v18932_v12 = vld [vmem:[%s25007_s3 + $0xe50] ss:$48 sps:$4 sm:$0xff]  }
 0x46c   :  { %12846 = vmatpush1.bf16.msra.mxu0 %v18872_v25  ;;  %v18935_v25 = vld [vmem:[%s25007_s3 + $0xb58] ss:$48 sps:$4 sm:$0xff]  }
 0x46d   :  { %13086 = vmatpush1.bf16.msra.mxu1 %v18869_v46  ;;  %12847 = vmatprep.subr.bf16.mxu0 %v18880_v37  ;;  %v18940_v46 = vld [vmem:[%s25007_s3 + $0xeb4] ss:$48 sps:$4 sm:$0xff]   ;;  %v18943_v37 = vld [vmem:[%s25007_s3 + $0xbbc] ss:$48 sps:$4 sm:$0xff]  }
 0x46e   :  { %13087 = vmatprep.subr.bf16.mxu1 %v18877_v27  ;;  %v18938_v27 = vld [vmem:[%s25007_s3 + $0xeb0] ss:$48 sps:$4 sm:$0xff]  }
 0x470   :  { %12848 = vmatpush1.bf16.msra.mxu0 %v18878_v0  ;;  %v18941_v0 = vld [vmem:[%s25007_s3 + $0xbb8] ss:$48 sps:$4 sm:$0xff]  }
 0x471   :  { %13088 = vmatpush1.bf16.msra.mxu1 %v18875_v41  ;;  %12849 = vmatprep.subr.bf16.mxu0 %v18886_v56  ;;  %v18946_v41 = vld [vmem:[%s25007_s3 + $0xf14] ss:$48 sps:$4 sm:$0xff]   ;;  %v18949_v56 = vld [vmem:[%s25007_s3 + $0xc1c] ss:$48 sps:$4 sm:$0xff]  }
 0x472   :  { %13089 = vmatprep.subr.bf16.mxu1 %v18883_v44  ;;  %v18944_v44 = vld [vmem:[%s25007_s3 + $0xf10] ss:$48 sps:$4 sm:$0xff]  }
 0x474   :  { %12850 = vmatpush1.bf16.msra.mxu0 %v18884_v42  ;;  %v18947_v42 = vld [vmem:[%s25007_s3 + $0xc18] ss:$48 sps:$4 sm:$0xff]  }
 0x475   :  { %13090 = vmatpush1.bf16.msra.mxu1 %v18881_v45  ;;  %12851 = vmatprep.subr.bf16.mxu0 %v18892_v18  ;;  %v18952_v45 = vld [vmem:[%s25007_s3 + $0xf74] ss:$48 sps:$4 sm:$0xff]   ;;  %v18955_v18 = vld [vmem:[%s25007_s3 + $0xc7c] ss:$48 sps:$4 sm:$0xff]  }
 0x476   :  { %13091 = vmatprep.subr.bf16.mxu1 %v18889_v13  ;;  %v18950_v13 = vld [vmem:[%s25007_s3 + $0xf70] ss:$48 sps:$4 sm:$0xff]  }
 0x478   :  { %12852 = vmatpush1.bf16.msra.mxu0 %v18890_v52  ;;  %v18953_v52 = vld [vmem:[%s25007_s3 + $0xc78] ss:$48 sps:$4 sm:$0xff]  }
 0x479   :  { %13092 = vmatpush1.bf16.msra.mxu1 %v18887_v38  ;;  %12864 = vmatprep.subr.bf16.mxu0 %v18898_v1  ;;  %v18958_v38 = vld [vmem:[%s25007_s3 + $0xfd4] ss:$48 sps:$4 sm:$0xff]   ;;  %v18961_v1 = vld [vmem:[%s25007_s3 + $0xcdc] ss:$48 sps:$4 sm:$0xff]  }
 0x47a   :  { %13093 = vmatprep.subr.bf16.mxu1 %v18895_v51  ;;  %v18956_v51 = vld [vmem:[%s25007_s3 + $0xfd0] ss:$48 sps:$4 sm:$0xff]  }
 0x47b   :  { %12854 = vmatmul.mubr.bf16.vlgmr.msra.gmra.mrb[52].mxu0 %v20449_v59 }
 0x47c   :  { %12865 = vmatpush1.bf16.msra.mxu0 %v18896_v4  ;;  %12896 = vmatprep.mubr.bf16.mxu0 %v20719_v55  ;;  %v18959_v4 = vld [vmem:[%s25007_s3 + $0xcd8] ss:$48 sps:$4 sm:$0xff]  }
 0x47d   :  { %13094 = vmatpush1.bf16.msra.mxu1 %v18893_v62  ;;  %12866 = vmatprep.subr.bf16.mxu0 %v18904_v6  ;;  %v18964_v62 = vld [vmem:[%s25007_s3 + $0x1034] ss:$48 sps:$4 sm:$0xff]   ;;  %v18967_v6 = vld [vmem:[%s25007_s3 + $0xd3c] ss:$48 sps:$4 sm:$0xff]  }
 0x47e   :  { %13095 = vmatprep.subr.bf16.mxu1 %v18901_v11  ;;  %v18962_v11 = vld [vmem:[%s25007_s3 + $0x1030] ss:$48 sps:$4 sm:$0xff]  }
 0x480   :  { %12867 = vmatpush1.bf16.msra.mxu0 %v18902_v15  ;;  %v18965_v15 = vld [vmem:[%s25007_s3 + $0xd38] ss:$48 sps:$4 sm:$0xff]  }
 0x481   :  { %13096 = vmatpush1.bf16.msra.mxu1 %v18899_v20  ;;  %12868 = vmatprep.subr.bf16.mxu0 %v18910_v36  ;;  %v18970_v20 = vld [vmem:[%s25007_s3 + $0x1094] ss:$48 sps:$4 sm:$0xff]   ;;  %v18973_v36 = vld [vmem:[%s25007_s3 + $0xd9c] ss:$48 sps:$4 sm:$0xff]  }
 0x482   :  { %13097 = vmatprep.subr.bf16.mxu1 %v18907_v14  ;;  %v18968_v14 = vld [vmem:[%s25007_s3 + $0x1090] ss:$48 sps:$4 sm:$0xff]  }
 0x484   :  { %12869 = vmatpush1.bf16.msra.mxu0 %v18908_v35  ;;  %v18971_v35 = vld [vmem:[%s25007_s3 + $0xd98] ss:$48 sps:$4 sm:$0xff]  }
 0x485   :  { %13098 = vmatpush1.bf16.msra.mxu1 %v18905_v53  ;;  %12870 = vmatprep.subr.bf16.mxu0 %v18916_v60  ;;  %v18976_v53 = vld [vmem:[%s25007_s3 + $0x10f4] ss:$48 sps:$4 sm:$0xff]   ;;  %v18979_v60 = vld [vmem:[%s25007_s3 + $0xdfc] ss:$48 sps:$4 sm:$0xff]  }
 0x486   :  { %13099 = vmatprep.subr.bf16.mxu1 %v18913_v54  ;;  %v18974_v54 = vld [vmem:[%s25007_s3 + $0x10f0] ss:$48 sps:$4 sm:$0xff]  }
 0x488   :  { %12871 = vmatpush1.bf16.msra.mxu0 %v18914_v63  ;;  %v18977_v63 = vld [vmem:[%s25007_s3 + $0xdf8] ss:$48 sps:$4 sm:$0xff]  }
 0x489   :  { %13100 = vmatpush1.bf16.msra.mxu1 %v18911_v22  ;;  %12872 = vmatprep.subr.bf16.mxu0 %v18922_v7  ;;  %v18982_v22 = vld [vmem:[%s25007_s3 + $0x1154] ss:$48 sps:$4 sm:$0xff]   ;;  %v18985_v7 = vld [vmem:[%s25007_s3 + $0xe5c] ss:$48 sps:$4 sm:$0xff]  }
 0x48a   :  { %13101 = vmatprep.subr.bf16.mxu1 %v18919_v34  ;;  %v18980_v34 = vld [vmem:[%s25007_s3 + $0x1150] ss:$48 sps:$4 sm:$0xff]  }
 0x48c   :  { %12873 = vmatpush1.bf16.msra.mxu0 %v18920_v19  ;;  %v18983_v19 = vld [vmem:[%s25007_s3 + $0xe58] ss:$48 sps:$4 sm:$0xff]  }
 0x48d   :  { %13102 = vmatpush1.bf16.msra.mxu1 %v18917_v23  ;;  %12874 = vmatprep.subr.bf16.mxu0 %v18928_v39  ;;  %v18988_v23 = vld [vmem:[%s25007_s3 + $0x11b4] ss:$48 sps:$4 sm:$0xff]   ;;  %v18991_v39 = vld [vmem:[%s25007_s3 + $0xebc] ss:$48 sps:$4 sm:$0xff]  }
 0x48e   :  { %13103 = vmatprep.subr.bf16.mxu1 %v18925_v24  ;;  %v18986_v24 = vld [vmem:[%s25007_s3 + $0x11b0] ss:$48 sps:$4 sm:$0xff]  }
 0x490   :  { %12875 = vmatpush1.bf16.msra.mxu0 %v18926_v9  ;;  %v18989_v9 = vld [vmem:[%s25007_s3 + $0xeb8] ss:$48 sps:$4 sm:$0xff]  }
 0x491   :  { %13104 = vmatpush1.bf16.msra.mxu1 %v18923_v29  ;;  %12876 = vmatprep.subr.bf16.mxu0 %v18934_v28  ;;  %v18994_v29 = vld [vmem:[%s25007_s3 + $0x1214] ss:$48 sps:$4 sm:$0xff]   ;;  %v18997_v28 = vld [vmem:[%s25007_s3 + $0xf1c] ss:$48 sps:$4 sm:$0xff]  }
 0x492   :  { %13105 = vmatprep.subr.bf16.mxu1 %v18931_v57  ;;  %v18992_v57 = vld [vmem:[%s25007_s3 + $0x1210] ss:$48 sps:$4 sm:$0xff]  }
 0x494   :  { %12877 = vmatpush1.bf16.msra.mxu0 %v18932_v12  ;;  %v18995_v12 = vld [vmem:[%s25007_s3 + $0xf18] ss:$48 sps:$4 sm:$0xff]  }
 0x495   :  { %13106 = vmatpush1.bf16.msra.mxu1 %v18929_v10  ;;  %12878 = vmatprep.subr.bf16.mxu0 %v18940_v46  ;;  %v19000_v10 = vld [vmem:[%s25007_s3 + $0x1274] ss:$48 sps:$4 sm:$0xff]   ;;  %v19003_v46 = vld [vmem:[%s25007_s3 + $0xf7c] ss:$48 sps:$4 sm:$0xff]  }
 0x496   :  { %13107 = vmatprep.subr.bf16.mxu1 %v18937_v26  ;;  %v18998_v26 = vld [vmem:[%s25007_s3 + $0x1270] ss:$48 sps:$4 sm:$0xff]  }
 0x498   :  { %12879 = vmatpush1.bf16.msra.mxu0 %v18938_v27  ;;  %v19001_v27 = vld [vmem:[%s25007_s3 + $0xf78] ss:$48 sps:$4 sm:$0xff]  }
 0x499   :  { %13108 = vmatpush1.bf16.msra.mxu1 %v18935_v25  ;;  %12880 = vmatprep.subr.bf16.mxu0 %v18946_v41  ;;  %v19006_v25 = vld [vmem:[%s25007_s3 + $0x12d4] ss:$48 sps:$4 sm:$0xff]   ;;  %v19009_v41 = vld [vmem:[%s25007_s3 + $0xfdc] ss:$48 sps:$4 sm:$0xff]  }
 0x49a   :  { %13109 = vmatprep.subr.bf16.mxu1 %v18943_v37  ;;  %v19004_v37 = vld [vmem:[%s25007_s3 + $0x12d0] ss:$48 sps:$4 sm:$0xff]  }
 0x49c   :  { %12881 = vmatpush1.bf16.msra.mxu0 %v18944_v44  ;;  %v19007_v44 = vld [vmem:[%s25007_s3 + $0xfd8] ss:$48 sps:$4 sm:$0xff]  }
 0x49d   :  { %13110 = vmatpush1.bf16.msra.mxu1 %v18941_v0  ;;  %12882 = vmatprep.subr.bf16.mxu0 %v18952_v45  ;;  %v19012_v0 = vld [vmem:[%s25007_s3 + $0x1334] ss:$48 sps:$4 sm:$0xff]   ;;  %v19015_v45 = vld [vmem:[%s25007_s3 + $0x103c] ss:$48 sps:$4 sm:$0xff]  }
 0x49e   :  { %13122 = vmatprep.subr.bf16.mxu1 %v18949_v56  ;;  %v19010_v56 = vld [vmem:[%s25007_s3 + $0x1330] ss:$48 sps:$4 sm:$0xff]  }
 0x4a0   :  { %13112 = vmatmul.mubr.bf16.vlgmr.msra.gmra.mrb[68].mxu1 %v20449_v59  ;;  %12883 = vmatpush1.bf16.msra.mxu0 %v18950_v13  ;;  %v19013_v13 = vld [vmem:[%s25007_s3 + $0x1038] ss:$48 sps:$4 sm:$0xff]  }
 0x4a1   :  { %13123 = vmatpush1.bf16.msra.mxu1 %v18947_v42  ;;  %13154 = vmatprep.mubr.bf16.mxu1 %v20719_v55  ;;  %v19018_v42 = vld [vmem:[%s25007_s3 + $0x1394] ss:$48 sps:$4 sm:$0xff]  }
 0x4a2   :  { %13124 = vmatprep.subr.bf16.mxu1 %v18955_v18  ;;  %12884 = vmatprep.subr.bf16.mxu0 %v18958_v38  ;;  %v19016_v18 = vld [vmem:[%s25007_s3 + $0x1390] ss:$48 sps:$4 sm:$0xff]   ;;  %v19021_v38 = vld [vmem:[%s25007_s3 + $0x109c] ss:$48 sps:$4 sm:$0xff]  }
 0x4a4   :  { %12885 = vmatpush1.bf16.msra.mxu0 %v18956_v51  ;;  %v19019_v51 = vld [vmem:[%s25007_s3 + $0x1098] ss:$48 sps:$4 sm:$0xff]  }
 0x4a5   :  { %13125 = vmatpush1.bf16.msra.mxu1 %v18953_v52  ;;  %12886 = vmatprep.subr.bf16.mxu0 %v18964_v62  ;;  %v19024_v52 = vld [vmem:[%s25007_s3 + $0x13f4] ss:$48 sps:$4 sm:$0xff]   ;;  %v19027_v62 = vld [vmem:[%s25007_s3 + $0x10fc] ss:$48 sps:$4 sm:$0xff]  }
 0x4a6   :  { %13126 = vmatprep.subr.bf16.mxu1 %v18961_v1  ;;  %v19022_v1 = vld [vmem:[%s25007_s3 + $0x13f0] ss:$48 sps:$4 sm:$0xff]  }
 0x4a8   :  { %12887 = vmatpush1.bf16.msra.mxu0 %v18962_v11 }
 0x4a9   :  { %13127 = vmatpush1.bf16.msra.mxu1 %v18959_v4  ;;  %12888 = vmatprep.subr.bf16.mxu0 %v18970_v20  ;;  %v19030_v4 = vld [vmem:[%s25007_s3 + $0x1454] ss:$48 sps:$4 sm:$0xff]   ;;  %v19025_v20 = vld [vmem:[%s25007_s3 + $0x10f8] ss:$48 sps:$4 sm:$0xff]  }
 0x4aa   :  { %13128 = vmatprep.subr.bf16.mxu1 %v18967_v6 }
 0x4ac   :  { %12889 = vmatpush1.bf16.msra.mxu0 %v18968_v14  ;;  %v19028_v14 = vld [vmem:[%s25007_s3 + $0x1450] ss:$48 sps:$4 sm:$0xff]  }
 0x4ad   :  { %13129 = vmatpush1.bf16.msra.mxu1 %v18965_v15  ;;  %12890 = vmatprep.subr.bf16.mxu0 %v18976_v53 }
 0x4ae   :  { %13130 = vmatprep.subr.bf16.mxu1 %v18973_v36  ;;  %v19033_v36 = vld [vmem:[%s25007_s3 + $0x115c] ss:$48 sps:$4 sm:$0xff]  }
 0x4b0   :  { %12891 = vmatpush1.bf16.msra.mxu0 %v18974_v54  ;;  %v19031_v54 = vld [vmem:[%s25007_s3 + $0x1158] ss:$48 sps:$4 sm:$0xff]  }
 0x4b1   :  { %13131 = vmatpush1.bf16.msra.mxu1 %v18971_v35  ;;  %12892 = vmatprep.subr.bf16.mxu0 %v18982_v22  ;;  %v19036_v35 = vld [vmem:[%s25007_s3 + $0x14b4] ss:$48 sps:$4 sm:$0xff]   ;;  %v19039_v22 = vld [vmem:[%s25007_s3 + $0x11bc] ss:$48 sps:$4 sm:$0xff]  }
 0x4b2   :  { %13132 = vmatprep.subr.bf16.mxu1 %v18979_v60  ;;  %v19034_v60 = vld [vmem:[%s25007_s3 + $0x14b0] ss:$48 sps:$4 sm:$0xff]  }
 0x4b4   :  { %12893 = vmatpush1.bf16.msra.mxu0 %v18980_v34  ;;  %v19037_v34 = vld [vmem:[%s25007_s3 + $0x11b8] ss:$48 sps:$4 sm:$0xff]  }
 0x4b5   :  { %13133 = vmatpush1.bf16.msra.mxu1 %v18977_v63  ;;  %12894 = vmatprep.subr.bf16.mxu0 %v18988_v23  ;;  %v19042_v63 = vld [vmem:[%s25007_s3 + $0x1514] ss:$48 sps:$4 sm:$0xff]   ;;  %v19045_v23 = vld [vmem:[%s25007_s3 + $0x121c] ss:$48 sps:$4 sm:$0xff]  }
 0x4b6   :  { %13134 = vmatprep.subr.bf16.mxu1 %v18985_v7  ;;  %v19040_v7 = vld [vmem:[%s25007_s3 + $0x1510] ss:$48 sps:$4 sm:$0xff]  }
 0x4b8   :  { %12895 = vmatpush1.bf16.msra.mxu0 %v18986_v24  ;;  %v19043_v24 = vld [vmem:[%s25007_s3 + $0x1218] ss:$48 sps:$4 sm:$0xff]  }
 0x4b9   :  { %13135 = vmatpush1.bf16.msra.mxu1 %v18983_v19  ;;  %12907 = vmatprep.subr.bf16.mxu0 %v18994_v29  ;;  %v19048_v19 = vld [vmem:[%s25007_s3 + $0x1574] ss:$48 sps:$4 sm:$0xff]   ;;  %v19051_v29 = vld [vmem:[%s25007_s3 + $0x127c] ss:$48 sps:$4 sm:$0xff]  }
 0x4ba   :  { %13136 = vmatprep.subr.bf16.mxu1 %v18991_v39  ;;  %v19046_v39 = vld [vmem:[%s25007_s3 + $0x1570] ss:$48 sps:$4 sm:$0xff]  }
 0x4bb   :  { %12897 = vmatmul.mubr.bf16.vlgmr.msra.gmra.mrb[52].mxu0 %v20714_v48 }
 0x4bc   :  { %12908 = vmatpush1.bf16.msra.mxu0 %v18992_v57  ;;  %12939 = vmatprep.mubr.bf16.mxu0 %v20867_v16  ;;  %v19049_v57 = vld [vmem:[%s25007_s3 + $0x1278] ss:$48 sps:$4 sm:$0xff]  }
 0x4bd   :  { %13137 = vmatpush1.bf16.msra.mxu1 %v18989_v9  ;;  %12909 = vmatprep.subr.bf16.mxu0 %v19000_v10  ;;  %v19054_v9 = vld [vmem:[%s25007_s3 + $0x15d4] ss:$48 sps:$4 sm:$0xff]   ;;  %v19057_v10 = vld [vmem:[%s25007_s3 + $0x12dc] ss:$48 sps:$4 sm:$0xff]  }
 0x4be   :  { %13138 = vmatprep.subr.bf16.mxu1 %v18997_v28  ;;  %v19052_v28 = vld [vmem:[%s25007_s3 + $0x15d0] ss:$48 sps:$4 sm:$0xff]  }
 0x4c0   :  { %12910 = vmatpush1.bf16.msra.mxu0 %v18998_v26  ;;  %v19055_v26 = vld [vmem:[%s25007_s3 + $0x12d8] ss:$48 sps:$4 sm:$0xff]  }
 0x4c1   :  { %13139 = vmatpush1.bf16.msra.mxu1 %v18995_v12  ;;  %12911 = vmatprep.subr.bf16.mxu0 %v19006_v25  ;;  %v19060_v12 = vld [vmem:[%s25007_s3 + $0x1634] ss:$48 sps:$4 sm:$0xff]   ;;  %v19063_v25 = vld [vmem:[%s25007_s3 + $0x133c] ss:$48 sps:$4 sm:$0xff]  }
 0x4c2   :  { %13140 = vmatprep.subr.bf16.mxu1 %v19003_v46  ;;  %v19058_v46 = vld [vmem:[%s25007_s3 + $0x1630] ss:$48 sps:$4 sm:$0xff]  }
 0x4c4   :  { %12912 = vmatpush1.bf16.msra.mxu0 %v19004_v37  ;;  %v19061_v37 = vld [vmem:[%s25007_s3 + $0x1338] ss:$48 sps:$4 sm:$0xff]  }
 0x4c5   :  { %13141 = vmatpush1.bf16.msra.mxu1 %v19001_v27  ;;  %12913 = vmatprep.subr.bf16.mxu0 %v19012_v0  ;;  %v19066_v27 = vld [vmem:[%s25007_s3 + $0x1694] ss:$48 sps:$4 sm:$0xff]   ;;  %v19069_v0 = vld [vmem:[%s25007_s3 + $0x139c] ss:$48 sps:$4 sm:$0xff]  }
 0x4c6   :  { %13142 = vmatprep.subr.bf16.mxu1 %v19009_v41  ;;  %v19064_v41 = vld [vmem:[%s25007_s3 + $0x1690] ss:$48 sps:$4 sm:$0xff]  }
 0x4c8   :  { %12914 = vmatpush1.bf16.msra.mxu0 %v19010_v56  ;;  %v19067_v56 = vld [vmem:[%s25007_s3 + $0x1398] ss:$48 sps:$4 sm:$0xff]  }
 0x4c9   :  { %13143 = vmatpush1.bf16.msra.mxu1 %v19007_v44  ;;  %12915 = vmatprep.subr.bf16.mxu0 %v19018_v42  ;;  %v19072_v44 = vld [vmem:[%s25007_s3 + $0x16f4] ss:$48 sps:$4 sm:$0xff]   ;;  %v19070_v42 = vld [vmem:[%s25007_s3 + $0x16f0] ss:$48 sps:$4 sm:$0xff]  }
 0x4ca   :  { %13144 = vmatprep.subr.bf16.mxu1 %v19015_v45  ;;  %v6794_v45 = vld [vmem:[%s25008_s4] sm:$0xff] }
 0x4cc   :  { %12916 = vmatpush1.bf16.msra.mxu0 %v19016_v18  ;;  %v19078_v18 = vld [vmem:[%s25007_s3 + $0x1754] ss:$48 sps:$4 sm:$0xff]  }
 0x4cd   :  { %13145 = vmatpush1.bf16.msra.mxu1 %v19013_v13  ;;  %12917 = vmatprep.subr.bf16.mxu0 %v19024_v52  ;;  %v19075_v13 = vld [vmem:[%s25007_s3 + $0x13fc] ss:$48 sps:$4 sm:$0xff]   ;;  %v6813_v52 = vrot.slane %v6794_v45, %v20436_v17 }
 0x4ce   :  { %13146 = vmatprep.subr.bf16.mxu1 %v19021_v38  ;;  %v22495_v11 = vpop.f32.mrb[48].mxu0  ;;  %v6801_v38 = vrot.slane %v6794_v45, %v20350_v40  ;;  %v19112_v45 = vld [vmem:[%s25007_s3 + $0x1990] ss:$48 sps:$4 sm:$0xff]  }
 0x4cf   :  { %v22497_v6 = vpop.f32.mrb[49].mxu0 }
 0x4d0   :  { %v22502_v15 = vpop.f32.mrb[50].mxu0  ;;  %12918 = vmatpush1.bf16.msra.mxu0 %v19022_v1  ;;  %v19076_v1 = vld [vmem:[%s25007_s3 + $0x1750] ss:$48 sps:$4 sm:$0xff]  }
 0x4d1   :  { %13147 = vmatpush1.bf16.msra.mxu1 %v19019_v51  ;;  %v22510_v53 = vpop.f32.mrb[51].mxu0  ;;  %12919 = vmatprep.subr.bf16.mxu0 %v19030_v4  ;;  %v19073_v51 = vld [vmem:[%s25007_s3 + $0x13f8] ss:$48 sps:$4 sm:$0xff]  }
 0x4d2   :  { %13148 = vmatprep.subr.bf16.mxu1 %v19027_v62  ;;  %v19081_v62 = vld [vmem:[%s25007_s3 + $0x145c] ss:$48 sps:$4 sm:$0xff]  }
 0x4d4   :  { %12920 = vmatpush1.bf16.msra.mxu0 %v19028_v14 }
 0x4d5   :  { %13149 = vmatpush1.bf16.msra.mxu1 %v19025_v20  ;;  %12921 = vmatprep.subr.bf16.mxu0 %v19036_v35  ;;  %v19084_v20 = vld [vmem:[%s25007_s3 + $0x17b4] ss:$48 sps:$4 sm:$0xff]  }
 0x4d6   :  { %13150 = vmatprep.subr.bf16.mxu1 %v19033_v36  ;;  %v22621_v36 = vadd.f32 %v22495_v11, %v6801_v38  ;;  %v19087_v11 = vld [vmem:[%s25007_s3 + $0x14bc] ss:$48 sps:$4 sm:$0xff]  }
 0x4d8   :  { %12922 = vmatpush1.bf16.msra.mxu0 %v19034_v60  ;;  %v19079_v60 = vld [vmem:[%s25007_s3 + $0x1458] ss:$48 sps:$4 sm:$0xff]  }
 0x4d9   :  { %13151 = vmatpush1.bf16.msra.mxu1 %v19031_v54  ;;  %12923 = vmatprep.subr.bf16.mxu0 %v19042_v63  ;;  %v19082_v63 = vld [vmem:[%s25007_s3 + $0x17b0] ss:$48 sps:$4 sm:$0xff]  }
 0x4da   :  { %13152 = vmatprep.subr.bf16.mxu1 %v19039_v22 }
 0x4dc   :  { %12924 = vmatpush1.bf16.msra.mxu0 %v19040_v7 }
 0x4dd   :  { %13153 = vmatpush1.bf16.msra.mxu1 %v19037_v34  ;;  %12925 = vmatprep.subr.bf16.mxu0 %v19048_v19  ;;  %v22637_v34 = vadd.f32 %v22502_v15, %v6801_v38  ;;  %v19090_v19 = vld [vmem:[%s25007_s3 + $0x1814] ss:$48 sps:$4 sm:$0xff]   ;;  %v19088_v15 = vld [vmem:[%s25007_s3 + $0x1810] ss:$48 sps:$4 sm:$0xff]  }
 0x4de   :  { %13165 = vmatprep.subr.bf16.mxu1 %v19045_v23  ;;  %v19118_v38 = vld [vmem:[%s25007_s3 + $0x19f0] ss:$48 sps:$4 sm:$0xff]  }
 0x4e0   :  { %13155 = vmatmul.mubr.bf16.vlgmr.msra.gmra.mrb[68].mxu1 %v20714_v48  ;;  %12926 = vmatpush1.bf16.msra.mxu0 %v19046_v39  ;;  %v19085_v39 = vld [vmem:[%s25007_s3 + $0x14b8] ss:$48 sps:$4 sm:$0xff]  }
 0x4e1   :  { %13166 = vmatpush1.bf16.msra.mxu1 %v19043_v24  ;;  %13197 = vmatprep.mubr.bf16.mxu1 %v20867_v16 }
 0x4e2   :  { %13167 = vmatprep.subr.bf16.mxu1 %v19051_v29  ;;  %12927 = vmatprep.subr.bf16.mxu0 %v19054_v9  ;;  %v19093_v29 = vld [vmem:[%s25007_s3 + $0x151c] ss:$48 sps:$4 sm:$0xff]   ;;  %v19096_v9 = vld [vmem:[%s25007_s3 + $0x1874] ss:$48 sps:$4 sm:$0xff]  }
 0x4e4   :  { %12928 = vmatpush1.bf16.msra.mxu0 %v19052_v28  ;;  %v19094_v28 = vld [vmem:[%s25007_s3 + $0x1870] ss:$48 sps:$4 sm:$0xff]  }
 0x4e5   :  { %13168 = vmatpush1.bf16.msra.mxu1 %v19049_v57  ;;  %12929 = vmatprep.subr.bf16.mxu0 %v19060_v12  ;;  %v19091_v57 = vld [vmem:[%s25007_s3 + $0x1518] ss:$48 sps:$4 sm:$0xff]   ;;  %v19102_v12 = vld [vmem:[%s25007_s3 + $0x18d4] ss:$48 sps:$4 sm:$0xff]  }
 0x4e6   :  { %13169 = vmatprep.subr.bf16.mxu1 %v19057_v10  ;;  %v19099_v10 = vld [vmem:[%s25007_s3 + $0x157c] ss:$48 sps:$4 sm:$0xff]  }
 0x4e8   :  { %12930 = vmatpush1.bf16.msra.mxu0 %v19058_v46  ;;  %v19100_v46 = vld [vmem:[%s25007_s3 + $0x18d0] ss:$48 sps:$4 sm:$0xff]  }
 0x4e9   :  { %13170 = vmatpush1.bf16.msra.mxu1 %v19055_v26  ;;  %12931 = vmatprep.subr.bf16.mxu0 %v19066_v27  ;;  %v19097_v26 = vld [vmem:[%s25007_s3 + $0x1578] ss:$48 sps:$4 sm:$0xff]   ;;  %v19108_v27 = vld [vmem:[%s25007_s3 + $0x1934] ss:$48 sps:$4 sm:$0xff]  }
 0x4ea   :  { %13171 = vmatprep.subr.bf16.mxu1 %v19063_v25  ;;  %v19105_v25 = vld [vmem:[%s25007_s3 + $0x15dc] ss:$48 sps:$4 sm:$0xff]  }
 0x4ec   :  { %12932 = vmatpush1.bf16.msra.mxu0 %v19064_v41  ;;  %v19106_v41 = vld [vmem:[%s25007_s3 + $0x1930] ss:$48 sps:$4 sm:$0xff]  }
 0x4ed   :  { %13172 = vmatpush1.bf16.msra.mxu1 %v19061_v37  ;;  %12933 = vmatprep.subr.bf16.mxu0 %v19072_v44  ;;  %v19103_v37 = vld [vmem:[%s25007_s3 + $0x15d8] ss:$48 sps:$4 sm:$0xff]   ;;  %v19114_v44 = vld [vmem:[%s25007_s3 + $0x1994] ss:$48 sps:$4 sm:$0xff]  }
 0x4ee   :  { %13173 = vmatprep.subr.bf16.mxu1 %v19069_v0  ;;  %v19111_v0 = vld [vmem:[%s25007_s3 + $0x163c] ss:$48 sps:$4 sm:$0xff]  }
 0x4f0   :  { %12934 = vmatpush1.bf16.msra.mxu0 %v19070_v42  ;;  %v19117_v42 = vld [vmem:[%s25007_s3 + $0x169c] ss:$48 sps:$4 sm:$0xff]  }
 0x4f1   :  { %13174 = vmatpush1.bf16.msra.mxu1 %v19067_v56  ;;  %12935 = vmatprep.subr.bf16.mxu0 %v19078_v18  ;;  %v19109_v56 = vld [vmem:[%s25007_s3 + $0x1638] ss:$48 sps:$4 sm:$0xff]  }
 0x4f2   :  { %13175 = vmatprep.subr.bf16.mxu1 %v19075_v13  ;;  %v19120_v13 = vld [vmem:[%s25007_s3 + $0x19f4] ss:$48 sps:$4 sm:$0xff]   ;;  %v19115_v18 = vld [vmem:[%s25007_s3 + $0x1698] ss:$48 sps:$4 sm:$0xff]  }
 0x4f3   :  { %v22615_v4 = vpop.f32.mrb[64].mxu1 }
 0x4f4   :  { %v12771_v14 = vpop.f32.mrb[65].mxu1  ;;  %12936 = vmatpush1.bf16.msra.mxu0 %v19076_v1  ;;  %v19121_v1 = vld [vmem:[%s25007_s3 + $0x16f8] ss:$48 sps:$4 sm:$0xff]  }
 0x4f5   :  { %v22623_v35 = vadd.f32 %v12771_v14, %v6813_v52  ;;  %v22625_v54 = vpop.f32.mrb[66].mxu1  ;;  %13176 = vmatpush1.bf16.msra.mxu1 %v19073_v51  ;;  %12937 = vmatprep.subr.bf16.mxu0 %v19084_v20  ;;  %v19126_v51 = vld [vmem:[%s25007_s3 + $0x1a54] ss:$48 sps:$4 sm:$0xff]   ;;  %v19129_v20 = vld [vmem:[%s25007_s3 + $0x175c] ss:$48 sps:$4 sm:$0xff]  }
 0x4f6   :  { %v12775_v22 = vpop.f32.mrb[67].mxu1  ;;  %13177 = vmatprep.subr.bf16.mxu1 %v19081_v62  ;;  %v19124_v62 = vld [vmem:[%s25007_s3 + $0x1a50] ss:$48 sps:$4 sm:$0xff]   ;;  %v19132_v14 = vld [vmem:[%s25007_s3 + $0x1ab4] ss:$48 sps:$4 sm:$0xff]  }
 0x4f7   :  { %v13810_v7 = vmax.f32 %v22621_v36, %v22623_v35  ;;  %v22641_v23 = vadd.f32 %v12775_v22, %v6813_v52  ;;  %v19123_v52 = vld [vmem:[%s25007_s3 + $0x16fc] ss:$48 sps:$4 sm:$0xff]   ;;  %v19130_v22 = vld [vmem:[%s25007_s3 + $0x1ab0] ss:$48 sps:$4 sm:$0xff]  }
 0x4f8   :  { %12938 = vmatpush1.bf16.msra.mxu0 %v19082_v63  ;;  %v19135_v63 = vld [vmem:[%s25007_s3 + $0x17bc] ss:$48 sps:$4 sm:$0xff]  }
 0x4f9   :  { %v13813_v24 = vmax.f32 %v22637_v34, %v22641_v23  ;;  %13178 = vmatpush1.bf16.msra.mxu1 %v19079_v60  ;;  %12950 = vmatprep.subr.bf16.mxu0 %v19090_v19  ;;  %v19127_v60 = vld [vmem:[%s25007_s3 + $0x1758] ss:$48 sps:$4 sm:$0xff]  }
 0x4fa   :  { %13179 = vmatprep.subr.bf16.mxu1 %v19087_v11  ;;  %v19138_v11 = vld [vmem:[%s25007_s3 + $0x1b14] ss:$48 sps:$4 sm:$0xff]   ;;  %v19133_v19 = vld [vmem:[%s25007_s3 + $0x17b8] ss:$48 sps:$4 sm:$0xff]  }
 0x4fb   :  { %12940 = vmatmul.mubr.bf16.vlgmr.msra.gmra.mrb[52].mxu0 %v20859_v43 }
 0x4fc   :  { %12951 = vmatpush1.bf16.msra.mxu0 %v19088_v15  ;;  %12982 = vmatprep.mubr.bf16.mxu0 %v21474_v50  ;;  %v19141_v15 = vld [vmem:[%s25007_s3 + $0x181c] ss:$48 sps:$4 sm:$0xff]  }
 0x4fd   :  { %13180 = vmatpush1.bf16.msra.mxu1 %v19085_v39  ;;  %12952 = vmatprep.subr.bf16.mxu0 %v19096_v9  ;;  %v19136_v39 = vld [vmem:[%s25007_s3 + $0x1b10] ss:$48 sps:$4 sm:$0xff]   ;;  %v19139_v9 = vld [vmem:[%s25007_s3 + $0x1818] ss:$48 sps:$4 sm:$0xff]  }
 0x4fe   :  { %13181 = vmatprep.subr.bf16.mxu1 %v19093_v29  ;;  %v19144_v29 = vld [vmem:[%s25007_s3 + $0x1b74] ss:$48 sps:$4 sm:$0xff]  }
 0x500   :  { %12953 = vmatpush1.bf16.msra.mxu0 %v19094_v28  ;;  %v19147_v28 = vld [vmem:[%s25007_s3 + $0x187c] ss:$48 sps:$4 sm:$0xff]  }
 0x501   :  { %13182 = vmatpush1.bf16.msra.mxu1 %v19091_v57  ;;  %12954 = vmatprep.subr.bf16.mxu0 %v19102_v12  ;;  %v19142_v57 = vld [vmem:[%s25007_s3 + $0x1b70] ss:$48 sps:$4 sm:$0xff]   ;;  %v19145_v12 = vld [vmem:[%s25007_s3 + $0x1878] ss:$48 sps:$4 sm:$0xff]  }
 0x502   :  { %13183 = vmatprep.subr.bf16.mxu1 %v19099_v10  ;;  %v19150_v10 = vld [vmem:[%s25007_s3 + $0x1bd4] ss:$48 sps:$4 sm:$0xff]  }
 0x504   :  { %12955 = vmatpush1.bf16.msra.mxu0 %v19100_v46  ;;  %v19153_v46 = vld [vmem:[%s25007_s3 + $0x18dc] ss:$48 sps:$4 sm:$0xff]  }
 0x505   :  { %13184 = vmatpush1.bf16.msra.mxu1 %v19097_v26  ;;  %12956 = vmatprep.subr.bf16.mxu0 %v19108_v27  ;;  %v19148_v26 = vld [vmem:[%s25007_s3 + $0x1bd0] ss:$48 sps:$4 sm:$0xff]   ;;  %v19151_v27 = vld [vmem:[%s25007_s3 + $0x18d8] ss:$48 sps:$4 sm:$0xff]  }
 0x506   :  { %13185 = vmatprep.subr.bf16.mxu1 %v19105_v25  ;;  %v19156_v25 = vld [vmem:[%s25007_s3 + $0x1c34] ss:$48 sps:$4 sm:$0xff]  }
 0x508   :  { %12957 = vmatpush1.bf16.msra.mxu0 %v19106_v41  ;;  %v19159_v41 = vld [vmem:[%s25007_s3 + $0x193c] ss:$48 sps:$4 sm:$0xff]  }
 0x509   :  { %13186 = vmatpush1.bf16.msra.mxu1 %v19103_v37  ;;  %12958 = vmatprep.subr.bf16.mxu0 %v19114_v44  ;;  %v19154_v37 = vld [vmem:[%s25007_s3 + $0x1c30] ss:$48 sps:$4 sm:$0xff]   ;;  %v19157_v44 = vld [vmem:[%s25007_s3 + $0x1938] ss:$48 sps:$4 sm:$0xff]  }
 0x50a   :  { %13187 = vmatprep.subr.bf16.mxu1 %v19111_v0  ;;  %v19162_v0 = vld [vmem:[%s25007_s3 + $0x1c94] ss:$48 sps:$4 sm:$0xff]  }
 0x50c   :  { %12959 = vmatpush1.bf16.msra.mxu0 %v19112_v45  ;;  %v19165_v45 = vld [vmem:[%s25007_s3 + $0x199c] ss:$48 sps:$4 sm:$0xff]  }
 0x50d   :  { %13188 = vmatpush1.bf16.msra.mxu1 %v19109_v56  ;;  %12960 = vmatprep.subr.bf16.mxu0 %v19120_v13  ;;  %v19160_v56 = vld [vmem:[%s25007_s3 + $0x1c90] ss:$48 sps:$4 sm:$0xff]   ;;  %v19163_v13 = vld [vmem:[%s25007_s3 + $0x1998] ss:$48 sps:$4 sm:$0xff]  }
 0x50e   :  { %13189 = vmatprep.subr.bf16.mxu1 %v19117_v42  ;;  %v19168_v42 = vld [vmem:[%s25007_s3 + $0x1cf4] ss:$48 sps:$4 sm:$0xff]  }
 0x510   :  { %12961 = vmatpush1.bf16.msra.mxu0 %v19118_v38  ;;  %v19171_v38 = vld [vmem:[%s25007_s3 + $0x19fc] ss:$48 sps:$4 sm:$0xff]  }
 0x511   :  { %13190 = vmatpush1.bf16.msra.mxu1 %v19115_v18  ;;  %12962 = vmatprep.subr.bf16.mxu0 %v19126_v51  ;;  %v19166_v18 = vld [vmem:[%s25007_s3 + $0x1cf0] ss:$48 sps:$4 sm:$0xff]   ;;  %v19169_v51 = vld [vmem:[%s25007_s3 + $0x19f8] ss:$48 sps:$4 sm:$0xff]  }
 0x512   :  { %13191 = vmatprep.subr.bf16.mxu1 %v19123_v52  ;;  %v19174_v52 = vld [vmem:[%s25007_s3 + $0x1d54] ss:$48 sps:$4 sm:$0xff]  }
 0x514   :  { %12963 = vmatpush1.bf16.msra.mxu0 %v19124_v62  ;;  %v19177_v62 = vld [vmem:[%s25007_s3 + $0x1a5c] ss:$48 sps:$4 sm:$0xff]  }
 0x515   :  { %13192 = vmatpush1.bf16.msra.mxu1 %v19121_v1  ;;  %12964 = vmatprep.subr.bf16.mxu0 %v19132_v14  ;;  %v19172_v1 = vld [vmem:[%s25007_s3 + $0x1d50] ss:$48 sps:$4 sm:$0xff]   ;;  %v19175_v14 = vld [vmem:[%s25007_s3 + $0x1a58] ss:$48 sps:$4 sm:$0xff]  }
 0x516   :  { %13193 = vmatprep.subr.bf16.mxu1 %v19129_v20  ;;  %v19180_v20 = vld [vmem:[%s25007_s3 + $0x1db4] ss:$48 sps:$4 sm:$0xff]  }
 0x518   :  { %12965 = vmatpush1.bf16.msra.mxu0 %v19130_v22  ;;  %v19183_v22 = vld [vmem:[%s25007_s3 + $0x1abc] ss:$48 sps:$4 sm:$0xff]  }
 0x519   :  { %13194 = vmatpush1.bf16.msra.mxu1 %v19127_v60  ;;  %12966 = vmatprep.subr.bf16.mxu0 %v19138_v11  ;;  %v19178_v60 = vld [vmem:[%s25007_s3 + $0x1db0] ss:$48 sps:$4 sm:$0xff]   ;;  %v19181_v11 = vld [vmem:[%s25007_s3 + $0x1ab8] ss:$48 sps:$4 sm:$0xff]  }
 0x51a   :  { %13195 = vmatprep.subr.bf16.mxu1 %v19135_v63  ;;  %v19186_v63 = vld [vmem:[%s25007_s3 + $0x1e14] ss:$48 sps:$4 sm:$0xff]  }
 0x51c   :  { %12967 = vmatpush1.bf16.msra.mxu0 %v19136_v39  ;;  %v19189_v39 = vld [vmem:[%s25007_s3 + $0x1b1c] ss:$48 sps:$4 sm:$0xff]  }
 0x51d   :  { %13196 = vmatpush1.bf16.msra.mxu1 %v19133_v19  ;;  %12968 = vmatprep.subr.bf16.mxu0 %v19144_v29  ;;  %v19184_v19 = vld [vmem:[%s25007_s3 + $0x1e10] ss:$48 sps:$4 sm:$0xff]   ;;  %v19187_v29 = vld [vmem:[%s25007_s3 + $0x1b18] ss:$48 sps:$4 sm:$0xff]  }
 0x51e   :  { %13208 = vmatprep.subr.bf16.mxu1 %v19141_v15  ;;  %v19192_v15 = vld [vmem:[%s25007_s3 + $0x1e74] ss:$48 sps:$4 sm:$0xff]  }
 0x520   :  { %13198 = vmatmul.mubr.bf16.vlgmr.msra.gmra.mrb[68].mxu1 %v20859_v43  ;;  %12969 = vmatpush1.bf16.msra.mxu0 %v19142_v57  ;;  %v19195_v57 = vld [vmem:[%s25007_s3 + $0x1b7c] ss:$48 sps:$4 sm:$0xff]  }
 0x521   :  { %13209 = vmatpush1.bf16.msra.mxu1 %v19139_v9  ;;  %13240 = vmatprep.mubr.bf16.mxu1 %v21474_v50  ;;  %v19190_v9 = vld [vmem:[%s25007_s3 + $0x1e70] ss:$48 sps:$4 sm:$0xff]  }
 0x522   :  { %13210 = vmatprep.subr.bf16.mxu1 %v19147_v28  ;;  %12970 = vmatprep.subr.bf16.mxu0 %v19150_v10  ;;  %v19198_v28 = vld [vmem:[%s25007_s3 + $0x1ed4] ss:$48 sps:$4 sm:$0xff]   ;;  %v19193_v10 = vld [vmem:[%s25007_s3 + $0x1b78] ss:$48 sps:$4 sm:$0xff]  }
 0x524   :  { %12971 = vmatpush1.bf16.msra.mxu0 %v19148_v26  ;;  %v19201_v26 = vld [vmem:[%s25007_s3 + $0x1bdc] ss:$48 sps:$4 sm:$0xff]  }
 0x525   :  { %13211 = vmatpush1.bf16.msra.mxu1 %v19145_v12  ;;  %12972 = vmatprep.subr.bf16.mxu0 %v19156_v25  ;;  %v19196_v12 = vld [vmem:[%s25007_s3 + $0x1ed0] ss:$48 sps:$4 sm:$0xff]   ;;  %v19199_v25 = vld [vmem:[%s25007_s3 + $0x1bd8] ss:$48 sps:$4 sm:$0xff]  }
 0x526   :  { %13212 = vmatprep.subr.bf16.mxu1 %v19153_v46  ;;  %v19204_v46 = vld [vmem:[%s25007_s3 + $0x1f34] ss:$48 sps:$4 sm:$0xff]  }
 0x528   :  { %12973 = vmatpush1.bf16.msra.mxu0 %v19154_v37  ;;  %v19207_v37 = vld [vmem:[%s25007_s3 + $0x1c3c] ss:$48 sps:$4 sm:$0xff]  }
 0x529   :  { %13213 = vmatpush1.bf16.msra.mxu1 %v19151_v27  ;;  %12974 = vmatprep.subr.bf16.mxu0 %v19162_v0  ;;  %v19202_v27 = vld [vmem:[%s25007_s3 + $0x1f30] ss:$48 sps:$4 sm:$0xff]   ;;  %v19205_v0 = vld [vmem:[%s25007_s3 + $0x1c38] ss:$48 sps:$4 sm:$0xff]  }
 0x52a   :  { %13214 = vmatprep.subr.bf16.mxu1 %v19159_v41  ;;  %v19210_v41 = vld [vmem:[%s25007_s3 + $0x1f94] ss:$48 sps:$4 sm:$0xff]  }
 0x52c   :  { %12975 = vmatpush1.bf16.msra.mxu0 %v19160_v56  ;;  %v19213_v56 = vld [vmem:[%s25007_s3 + $0x1c9c] ss:$48 sps:$4 sm:$0xff]  }
 0x52d   :  { %13215 = vmatpush1.bf16.msra.mxu1 %v19157_v44  ;;  %12976 = vmatprep.subr.bf16.mxu0 %v19168_v42  ;;  %v19208_v44 = vld [vmem:[%s25007_s3 + $0x1f90] ss:$48 sps:$4 sm:$0xff]   ;;  %v19211_v42 = vld [vmem:[%s25007_s3 + $0x1c98] ss:$48 sps:$4 sm:$0xff]  }
 0x52e   :  { %13216 = vmatprep.subr.bf16.mxu1 %v19165_v45  ;;  %v19216_v45 = vld [vmem:[%s25007_s3 + $0x1ff4] ss:$48 sps:$4 sm:$0xff]  }
 0x530   :  { %12977 = vmatpush1.bf16.msra.mxu0 %v19166_v18  ;;  %v19219_v18 = vld [vmem:[%s25007_s3 + $0x1cfc] ss:$48 sps:$4 sm:$0xff]  }
 0x531   :  { %13217 = vmatpush1.bf16.msra.mxu1 %v19163_v13  ;;  %12978 = vmatprep.subr.bf16.mxu0 %v19174_v52  ;;  %v19214_v13 = vld [vmem:[%s25007_s3 + $0x1ff0] ss:$48 sps:$4 sm:$0xff]   ;;  %v19217_v52 = vld [vmem:[%s25007_s3 + $0x1cf8] ss:$48 sps:$4 sm:$0xff]  }
 0x532   :  { %13218 = vmatprep.subr.bf16.mxu1 %v19171_v38  ;;  %v19222_v38 = vld [vmem:[%s25007_s3 + $0x2054] ss:$48 sps:$4 sm:$0xff]  }
 0x534   :  { %12979 = vmatpush1.bf16.msra.mxu0 %v19172_v1  ;;  %v19225_v1 = vld [vmem:[%s25007_s3 + $0x1d5c] ss:$48 sps:$4 sm:$0xff]  }
 0x535   :  { %13219 = vmatpush1.bf16.msra.mxu1 %v19169_v51  ;;  %12980 = vmatprep.subr.bf16.mxu0 %v19180_v20  ;;  %v19220_v51 = vld [vmem:[%s25007_s3 + $0x2050] ss:$48 sps:$4 sm:$0xff]   ;;  %v19223_v20 = vld [vmem:[%s25007_s3 + $0x1d58] ss:$48 sps:$4 sm:$0xff]  }
 0x536   :  { %13220 = vmatprep.subr.bf16.mxu1 %v19177_v62  ;;  %v19228_v62 = vld [vmem:[%s25007_s3 + $0x20b4] ss:$48 sps:$4 sm:$0xff]  }
 0x538   :  { %12981 = vmatpush1.bf16.msra.mxu0 %v19178_v60  ;;  %v19231_v60 = vld [vmem:[%s25007_s3 + $0x1dbc] ss:$48 sps:$4 sm:$0xff]  }
 0x539   :  { %13221 = vmatpush1.bf16.msra.mxu1 %v19175_v14  ;;  %12993 = vmatprep.subr.bf16.mxu0 %v19186_v63  ;;  %v19226_v14 = vld [vmem:[%s25007_s3 + $0x20b0] ss:$48 sps:$4 sm:$0xff]   ;;  %v19229_v63 = vld [vmem:[%s25007_s3 + $0x1db8] ss:$48 sps:$4 sm:$0xff]  }
 0x53a   :  { %13222 = vmatprep.subr.bf16.mxu1 %v19183_v22  ;;  %v19234_v22 = vld [vmem:[%s25007_s3 + $0x2114] ss:$48 sps:$4 sm:$0xff]  }
 0x53b   :  { %12983 = vmatmul.mubr.bf16.vlgmr.msra.gmra.mrb[52].mxu0 %v21466_v30 }
 0x53c   :  { %12994 = vmatpush1.bf16.msra.mxu0 %v19184_v19  ;;  %16435 = vmatprep.mubr.msk.bf16.mxu0 %vm12258_vm1, %v21604_v58  ;;  %v19237_v19 = vld [vmem:[%s25007_s3 + $0x1e1c] ss:$48 sps:$4 sm:$0xff]  }
 0x53d   :  { %13223 = vmatpush1.bf16.msra.mxu1 %v19181_v11  ;;  %12995 = vmatprep.subr.bf16.mxu0 %v19192_v15  ;;  %v19232_v11 = vld [vmem:[%s25007_s3 + $0x2110] ss:$48 sps:$4 sm:$0xff]   ;;  %v19235_v15 = vld [vmem:[%s25007_s3 + $0x1e18] ss:$48 sps:$4 sm:$0xff]  }
 0x53e   :  { %13224 = vmatprep.subr.bf16.mxu1 %v19189_v39  ;;  %v19240_v39 = vld [vmem:[%s25007_s3 + $0x2174] ss:$48 sps:$4 sm:$0xff]  }
 0x540   :  { %12996 = vmatpush1.bf16.msra.mxu0 %v19190_v9  ;;  %v19243_v9 = vld [vmem:[%s25007_s3 + $0x1e7c] ss:$48 sps:$4 sm:$0xff]  }
 0x541   :  { %13225 = vmatpush1.bf16.msra.mxu1 %v19187_v29  ;;  %12997 = vmatprep.subr.bf16.mxu0 %v19198_v28  ;;  %v19238_v29 = vld [vmem:[%s25007_s3 + $0x2170] ss:$48 sps:$4 sm:$0xff]   ;;  %v19241_v28 = vld [vmem:[%s25007_s3 + $0x1e78] ss:$48 sps:$4 sm:$0xff]  }
 0x542   :  { %13226 = vmatprep.subr.bf16.mxu1 %v19195_v57  ;;  %v19246_v57 = vld [vmem:[%s25007_s3 + $0x24] ss:$48 sps:$4 sm:$0xff]  }
 0x544   :  { %12998 = vmatpush1.bf16.msra.mxu0 %v19196_v12  ;;  %v19249_v12 = vld [vmem:[%s25007_s3 + $0x1edc] ss:$48 sps:$4 sm:$0xff]  }
 0x545   :  { %13227 = vmatpush1.bf16.msra.mxu1 %v19193_v10  ;;  %12999 = vmatprep.subr.bf16.mxu0 %v19204_v46  ;;  %v19244_v10 = vld [vmem:[%s25007_s3 + $0x20] ss:$48 sps:$4 sm:$0xff]   ;;  %v19247_v46 = vld [vmem:[%s25007_s3 + $0x1ed8] ss:$48 sps:$4 sm:$0xff]  }
 0x546   :  { %13228 = vmatprep.subr.bf16.mxu1 %v19201_v26  ;;  %v19252_v26 = vld [vmem:[%s25007_s3 + $0x84] ss:$48 sps:$4 sm:$0xff]  }
 0x548   :  { %13000 = vmatpush1.bf16.msra.mxu0 %v19202_v27  ;;  %v19255_v27 = vld [vmem:[%s25007_s3 + $0x1f3c] ss:$48 sps:$4 sm:$0xff]  }
 0x549   :  { %13229 = vmatpush1.bf16.msra.mxu1 %v19199_v25  ;;  %13001 = vmatprep.subr.bf16.mxu0 %v19210_v41  ;;  %v19250_v25 = vld [vmem:[%s25007_s3 + $0x80] ss:$48 sps:$4 sm:$0xff]   ;;  %v19253_v41 = vld [vmem:[%s25007_s3 + $0x1f38] ss:$48 sps:$4 sm:$0xff]  }
 0x54a   :  { %13230 = vmatprep.subr.bf16.mxu1 %v19207_v37  ;;  %v19258_v37 = vld [vmem:[%s25007_s3 + $0xe4] ss:$48 sps:$4 sm:$0xff]  }
 0x54c   :  { %13002 = vmatpush1.bf16.msra.mxu0 %v19208_v44  ;;  %v19261_v44 = vld [vmem:[%s25007_s3 + $0x1f9c] ss:$48 sps:$4 sm:$0xff]  }
 0x54d   :  { %13231 = vmatpush1.bf16.msra.mxu1 %v19205_v0  ;;  %13003 = vmatprep.subr.bf16.mxu0 %v19216_v45  ;;  %v19256_v0 = vld [vmem:[%s25007_s3 + $0xe0] ss:$48 sps:$4 sm:$0xff]   ;;  %v19259_v45 = vld [vmem:[%s25007_s3 + $0x1f98] ss:$48 sps:$4 sm:$0xff]  }
 0x54e   :  { %13232 = vmatprep.subr.bf16.mxu1 %v19213_v56  ;;  %v19264_v56 = vld [vmem:[%s25007_s3 + $0x144] ss:$48 sps:$4 sm:$0xff]  }
 0x550   :  { %13004 = vmatpush1.bf16.msra.mxu0 %v19214_v13  ;;  %v19267_v13 = vld [vmem:[%s25007_s3 + $0x1ffc] ss:$48 sps:$4 sm:$0xff]  }
 0x551   :  { %13233 = vmatpush1.bf16.msra.mxu1 %v19211_v42  ;;  %13005 = vmatprep.subr.bf16.mxu0 %v19222_v38  ;;  %v19262_v42 = vld [vmem:[%s25007_s3 + $0x140] ss:$48 sps:$4 sm:$0xff]   ;;  %v19265_v38 = vld [vmem:[%s25007_s3 + $0x1ff8] ss:$48 sps:$4 sm:$0xff]  }
 0x552   :  { %13234 = vmatprep.subr.bf16.mxu1 %v19219_v18  ;;  %v19270_v18 = vld [vmem:[%s25007_s3 + $0x1a4] ss:$48 sps:$4 sm:$0xff]  }
 0x554   :  { %13006 = vmatpush1.bf16.msra.mxu0 %v19220_v51  ;;  %v19273_v51 = vld [vmem:[%s25007_s3 + $0x205c] ss:$48 sps:$4 sm:$0xff]  }
 0x555   :  { %13235 = vmatpush1.bf16.msra.mxu1 %v19217_v52  ;;  %13007 = vmatprep.subr.bf16.mxu0 %v19228_v62  ;;  %v19268_v52 = vld [vmem:[%s25007_s3 + $0x1a0] ss:$48 sps:$4 sm:$0xff]   ;;  %v19271_v62 = vld [vmem:[%s25007_s3 + $0x2058] ss:$48 sps:$4 sm:$0xff]  }
 0x556   :  { %13236 = vmatprep.subr.bf16.mxu1 %v19225_v1  ;;  %v19276_v1 = vld [vmem:[%s25007_s3 + $0x204] ss:$48 sps:$4 sm:$0xff]  }
 0x558   :  { %13008 = vmatpush1.bf16.msra.mxu0 %v19226_v14  ;;  %v19279_v14 = vld [vmem:[%s25007_s3 + $0x20bc] ss:$48 sps:$4 sm:$0xff]  }
 0x559   :  { %13237 = vmatpush1.bf16.msra.mxu1 %v19223_v20  ;;  %13009 = vmatprep.subr.bf16.mxu0 %v19234_v22  ;;  %v19274_v20 = vld [vmem:[%s25007_s3 + $0x200] ss:$48 sps:$4 sm:$0xff]   ;;  %v19277_v22 = vld [vmem:[%s25007_s3 + $0x20b8] ss:$48 sps:$4 sm:$0xff]  }
 0x55a   :  { %13238 = vmatprep.subr.bf16.mxu1 %v19231_v60  ;;  %v19282_v60 = vld [vmem:[%s25007_s3 + $0x264] ss:$48 sps:$4 sm:$0xff]  }
 0x55c   :  { %13010 = vmatpush1.bf16.msra.mxu0 %v19232_v11  ;;  %v19285_v11 = vld [vmem:[%s25007_s3 + $0x211c] ss:$48 sps:$4 sm:$0xff]  }
 0x55d   :  { %13239 = vmatpush1.bf16.msra.mxu1 %v19229_v63  ;;  %13011 = vmatprep.subr.bf16.mxu0 %v19240_v39  ;;  %v19280_v63 = vld [vmem:[%s25007_s3 + $0x260] ss:$48 sps:$4 sm:$0xff]   ;;  %v19283_v39 = vld [vmem:[%s25007_s3 + $0x2118] ss:$48 sps:$4 sm:$0xff]  }
 0x55e   :  { %13251 = vmatprep.subr.bf16.mxu1 %v19237_v19  ;;  %v19288_v19 = vld [vmem:[%s25007_s3 + $0x2c4] ss:$48 sps:$4 sm:$0xff]  }
 0x560   :  { %13241 = vmatmul.mubr.bf16.vlgmr.msra.gmra.mrb[68].mxu1 %v21466_v30  ;;  %13012 = vmatpush1.bf16.msra.mxu0 %v19238_v29  ;;  %v19291_v29 = vld [vmem:[%s25007_s3 + $0x217c] ss:$48 sps:$4 sm:$0xff]  }
 0x561   :  { %13252 = vmatpush1.bf16.msra.mxu1 %v19235_v15  ;;  %16436 = vmatprep.mubr.msk.bf16.mxu1 %vm12258_vm1, %v21604_v58  ;;  %v19286_v15 = vld [vmem:[%s25007_s3 + $0x2c0] ss:$48 sps:$4 sm:$0xff]  }
 0x562   :  { %13253 = vmatprep.subr.bf16.mxu1 %v19243_v9  ;;  %13294 = vmatprep.subr.bf16.mxu0 %v19246_v57  ;;  %v19294_v9 = vld [vmem:[%s25007_s3 + $0x324] ss:$48 sps:$4 sm:$0xff]   ;;  %v19289_v57 = vld [vmem:[%s25007_s3 + $0x2178] ss:$48 sps:$4 sm:$0xff]  }
 0x563   :  { %13026 = vmatmul.mubr.bf16.vlgmr.msra.gmra.mrb[52].mxu0 %v21596_v49 }
 0x564   :  { %13295 = vmatpush1.bf16.msra.mxu0 %v19244_v10  ;;  %13326 = vmatprep.mubr.bf16.mxu0 %v20400_v5  ;;  %v19297_v10 = vld [vmem:[%s25007_s3 + $0x2c] ss:$48 sps:$4 sm:$0xff]  }
 0x565   :  { %13254 = vmatpush1.bf16.msra.mxu1 %v19241_v28  ;;  %13296 = vmatprep.subr.bf16.mxu0 %v19252_v26  ;;  %v19292_v28 = vld [vmem:[%s25007_s3 + $0x320] ss:$48 sps:$4 sm:$0xff]   ;;  %v19295_v26 = vld [vmem:[%s25007_s3 + $0x28] ss:$48 sps:$4 sm:$0xff]  }
 0x566   :  { %13255 = vmatprep.subr.bf16.mxu1 %v19249_v12  ;;  %v19300_v12 = vld [vmem:[%s25007_s3 + $0x384] ss:$48 sps:$4 sm:$0xff]  }
 0x568   :  { %13297 = vmatpush1.bf16.msra.mxu0 %v19250_v25  ;;  %v19303_v25 = vld [vmem:[%s25007_s3 + $0x8c] ss:$48 sps:$4 sm:$0xff]  }
 0x569   :  { %13256 = vmatpush1.bf16.msra.mxu1 %v19247_v46  ;;  %13298 = vmatprep.subr.bf16.mxu0 %v19258_v37  ;;  %v19298_v46 = vld [vmem:[%s25007_s3 + $0x380] ss:$48 sps:$4 sm:$0xff]   ;;  %v19301_v37 = vld [vmem:[%s25007_s3 + $0x88] ss:$48 sps:$4 sm:$0xff]  }
 0x56a   :  { %13257 = vmatprep.subr.bf16.mxu1 %v19255_v27  ;;  %v19306_v27 = vld [vmem:[%s25007_s3 + $0x3e4] ss:$48 sps:$4 sm:$0xff]  }
 0x56c   :  { %13299 = vmatpush1.bf16.msra.mxu0 %v19256_v0  ;;  %v19309_v0 = vld [vmem:[%s25007_s3 + $0xec] ss:$48 sps:$4 sm:$0xff]  }
 0x56d   :  { %13258 = vmatpush1.bf16.msra.mxu1 %v19253_v41  ;;  %13300 = vmatprep.subr.bf16.mxu0 %v19264_v56  ;;  %v19304_v41 = vld [vmem:[%s25007_s3 + $0x3e0] ss:$48 sps:$4 sm:$0xff]  }
 0x56e   :  { %13259 = vmatprep.subr.bf16.mxu1 %v19261_v44  ;;  %v19312_v44 = vld [vmem:[%s25007_s3 + $0x444] ss:$48 sps:$4 sm:$0xff]   ;;  %v19310_v56 = vld [vmem:[%s25007_s3 + $0x440] ss:$48 sps:$4 sm:$0xff]  }
 0x570   :  { %13301 = vmatpush1.bf16.msra.mxu0 %v19262_v42  ;;  %v19318_v42 = vld [vmem:[%s25007_s3 + $0x4a4] ss:$48 sps:$4 sm:$0xff]  }
 0x571   :  { %13260 = vmatpush1.bf16.msra.mxu1 %v19259_v45  ;;  %13302 = vmatprep.subr.bf16.mxu0 %v19270_v18  ;;  %v19315_v45 = vld [vmem:[%s25007_s3 + $0x14c] ss:$48 sps:$4 sm:$0xff]   ;;  %v19316_v18 = vld [vmem:[%s25007_s3 + $0x4a0] ss:$48 sps:$4 sm:$0xff]  }
 0x572   :  { %13261 = vmatprep.subr.bf16.mxu1 %v19267_v13  ;;  %v19313_v13 = vld [vmem:[%s25007_s3 + $0x148] ss:$48 sps:$4 sm:$0xff]  }
 0x574   :  { %13303 = vmatpush1.bf16.msra.mxu0 %v19268_v52  ;;  %v19324_v52 = vld [vmem:[%s25007_s3 + $0x504] ss:$48 sps:$4 sm:$0xff]  }
 0x575   :  { %13262 = vmatpush1.bf16.msra.mxu1 %v19265_v38  ;;  %13304 = vmatprep.subr.bf16.mxu0 %v19276_v1  ;;  %v19321_v38 = vld [vmem:[%s25007_s3 + $0x1ac] ss:$48 sps:$4 sm:$0xff]   ;;  %v19322_v1 = vld [vmem:[%s25007_s3 + $0x500] ss:$48 sps:$4 sm:$0xff]  }
 0x576   :  { %13263 = vmatprep.subr.bf16.mxu1 %v19273_v51  ;;  %v19319_v51 = vld [vmem:[%s25007_s3 + $0x1a8] ss:$48 sps:$4 sm:$0xff]  }
 0x578   :  { %13305 = vmatpush1.bf16.msra.mxu0 %v19274_v20  ;;  %v19330_v20 = vld [vmem:[%s25007_s3 + $0x564] ss:$48 sps:$4 sm:$0xff]  }
 0x579   :  { %13264 = vmatpush1.bf16.msra.mxu1 %v19271_v62  ;;  %13306 = vmatprep.subr.bf16.mxu0 %v19282_v60  ;;  %v19327_v62 = vld [vmem:[%s25007_s3 + $0x20c] ss:$48 sps:$4 sm:$0xff]   ;;  %v19328_v60 = vld [vmem:[%s25007_s3 + $0x560] ss:$48 sps:$4 sm:$0xff]  }
 0x57a   :  { %13265 = vmatprep.subr.bf16.mxu1 %v19279_v14  ;;  %v19325_v14 = vld [vmem:[%s25007_s3 + $0x208] ss:$48 sps:$4 sm:$0xff]  }
 0x57c   :  { %13307 = vmatpush1.bf16.msra.mxu0 %v19280_v63  ;;  %v19336_v63 = vld [vmem:[%s25007_s3 + $0x5c4] ss:$48 sps:$4 sm:$0xff]  }
 0x57d   :  { %13266 = vmatpush1.bf16.msra.mxu1 %v19277_v22  ;;  %13308 = vmatprep.subr.bf16.mxu0 %v19288_v19  ;;  %v19333_v22 = vld [vmem:[%s25007_s3 + $0x26c] ss:$48 sps:$4 sm:$0xff]   ;;  %v19334_v19 = vld [vmem:[%s25007_s3 + $0x5c0] ss:$48 sps:$4 sm:$0xff]  }
 0x57e   :  { %13267 = vmatprep.subr.bf16.mxu1 %v19285_v11  ;;  %v19331_v11 = vld [vmem:[%s25007_s3 + $0x268] ss:$48 sps:$4 sm:$0xff]  }
 0x580   :  { %13309 = vmatpush1.bf16.msra.mxu0 %v19286_v15  ;;  %v19342_v15 = vld [vmem:[%s25007_s3 + $0x624] ss:$48 sps:$4 sm:$0xff]  }
 0x581   :  { %13268 = vmatpush1.bf16.msra.mxu1 %v19283_v39  ;;  %13310 = vmatprep.subr.bf16.mxu0 %v19294_v9  ;;  %v19339_v39 = vld [vmem:[%s25007_s3 + $0x2cc] ss:$48 sps:$4 sm:$0xff]   ;;  %v19340_v9 = vld [vmem:[%s25007_s3 + $0x620] ss:$48 sps:$4 sm:$0xff]  }
 0x582   :  { %13269 = vmatprep.subr.bf16.mxu1 %v19291_v29  ;;  %v19337_v29 = vld [vmem:[%s25007_s3 + $0x2c8] ss:$48 sps:$4 sm:$0xff]  }
 0x584   :  { %13311 = vmatpush1.bf16.msra.mxu0 %v19292_v28  ;;  %v19348_v28 = vld [vmem:[%s25007_s3 + $0x684] ss:$48 sps:$4 sm:$0xff]  }
 0x585   :  { %13270 = vmatpush1.bf16.msra.mxu1 %v19289_v57  ;;  %13312 = vmatprep.subr.bf16.mxu0 %v19300_v12  ;;  %v19345_v57 = vld [vmem:[%s25007_s3 + $0x32c] ss:$48 sps:$4 sm:$0xff]   ;;  %v19346_v12 = vld [vmem:[%s25007_s3 + $0x680] ss:$48 sps:$4 sm:$0xff]  }
 0x586   :  { %13552 = vmatprep.subr.bf16.mxu1 %v19297_v10  ;;  %v19343_v10 = vld [vmem:[%s25007_s3 + $0x328] ss:$48 sps:$4 sm:$0xff]  }
 0x588   :  { %13284 = vmatmul.mubr.bf16.vlgmr.msra.gmra.mrb[68].mxu1 %v21596_v49  ;;  %13313 = vmatpush1.bf16.msra.mxu0 %v19298_v46  ;;  %v19354_v46 = vld [vmem:[%s25007_s3 + $0x6e4] ss:$48 sps:$4 sm:$0xff]  }
 0x589   :  { %13553 = vmatpush1.bf16.msra.mxu1 %v19295_v26  ;;  %13584 = vmatprep.mubr.bf16.mxu1 %v20400_v5  ;;  %v19307_v5 = vld [vmem:[%s25007_s3 + $0xe8] ss:$48 sps:$4 sm:$0xff]   ;;  %v19351_v26 = vld [vmem:[%s25007_s3 + $0x38c] ss:$48 sps:$4 sm:$0xff]  }
 0x58a   :  { %13554 = vmatprep.subr.bf16.mxu1 %v19303_v25  ;;  %13314 = vmatprep.subr.bf16.mxu0 %v19306_v27  ;;  %v19349_v25 = vld [vmem:[%s25007_s3 + $0x388] ss:$48 sps:$4 sm:$0xff]   ;;  %v19352_v27 = vld [vmem:[%s25007_s3 + $0x6e0] ss:$48 sps:$4 sm:$0xff]  }
 0x58c   :  { %13315 = vmatpush1.bf16.msra.mxu0 %v19304_v41  ;;  %v19360_v41 = vld [vmem:[%s25007_s3 + $0x744] ss:$48 sps:$4 sm:$0xff]  }
 0x58d   :  { %13555 = vmatpush1.bf16.msra.mxu1 %v19301_v37  ;;  %13316 = vmatprep.subr.bf16.mxu0 %v19312_v44  ;;  %v19357_v37 = vld [vmem:[%s25007_s3 + $0x3ec] ss:$48 sps:$4 sm:$0xff]   ;;  %v19358_v44 = vld [vmem:[%s25007_s3 + $0x740] ss:$48 sps:$4 sm:$0xff]  }
 0x58e   :  { %13556 = vmatprep.subr.bf16.mxu1 %v19309_v0  ;;  %v19355_v0 = vld [vmem:[%s25007_s3 + $0x3e8] ss:$48 sps:$4 sm:$0xff]  }
 0x590   :  { %13317 = vmatpush1.bf16.msra.mxu0 %v19310_v56  ;;  %v19366_v56 = vld [vmem:[%s25007_s3 + $0x7a4] ss:$48 sps:$4 sm:$0xff]  }
 0x591   :  { %13557 = vmatpush1.bf16.msra.mxu1 %v19307_v5  ;;  %13318 = vmatprep.subr.bf16.mxu0 %v19318_v42  ;;  %v19363_v5 = vld [vmem:[%s25007_s3 + $0x44c] ss:$48 sps:$4 sm:$0xff]   ;;  %v19364_v42 = vld [vmem:[%s25007_s3 + $0x7a0] ss:$48 sps:$4 sm:$0xff]  }
 0x592   :  { %13558 = vmatprep.subr.bf16.mxu1 %v19315_v45  ;;  %v19361_v45 = vld [vmem:[%s25007_s3 + $0x448] ss:$48 sps:$4 sm:$0xff]  }
 0x594   :  { %13319 = vmatpush1.bf16.msra.mxu0 %v19316_v18  ;;  %v19372_v18 = vld [vmem:[%s25007_s3 + $0x804] ss:$48 sps:$4 sm:$0xff]  }
 0x595   :  { %13559 = vmatpush1.bf16.msra.mxu1 %v19313_v13  ;;  %13320 = vmatprep.subr.bf16.mxu0 %v19324_v52  ;;  %v19369_v13 = vld [vmem:[%s25007_s3 + $0x4ac] ss:$48 sps:$4 sm:$0xff]   ;;  %v19370_v52 = vld [vmem:[%s25007_s3 + $0x800] ss:$48 sps:$4 sm:$0xff]  }
 0x596   :  { %13560 = vmatprep.subr.bf16.mxu1 %v19321_v38  ;;  %v19367_v38 = vld [vmem:[%s25007_s3 + $0x4a8] ss:$48 sps:$4 sm:$0xff]  }
 0x598   :  { %13321 = vmatpush1.bf16.msra.mxu0 %v19322_v1  ;;  %v19378_v1 = vld [vmem:[%s25007_s3 + $0x864] ss:$48 sps:$4 sm:$0xff]  }
 0x599   :  { %13561 = vmatpush1.bf16.msra.mxu1 %v19319_v51  ;;  %13322 = vmatprep.subr.bf16.mxu0 %v19330_v20  ;;  %v19375_v51 = vld [vmem:[%s25007_s3 + $0x50c] ss:$48 sps:$4 sm:$0xff]   ;;  %v19376_v20 = vld [vmem:[%s25007_s3 + $0x860] ss:$48 sps:$4 sm:$0xff]  }
 0x59a   :  { %13562 = vmatprep.subr.bf16.mxu1 %v19327_v62  ;;  %v19373_v62 = vld [vmem:[%s25007_s3 + $0x508] ss:$48 sps:$4 sm:$0xff]  }
 0x59c   :  { %13323 = vmatpush1.bf16.msra.mxu0 %v19328_v60  ;;  %v19384_v60 = vld [vmem:[%s25007_s3 + $0x8c4] ss:$48 sps:$4 sm:$0xff]  }
 0x59d   :  { %13563 = vmatpush1.bf16.msra.mxu1 %v19325_v14  ;;  %13324 = vmatprep.subr.bf16.mxu0 %v19336_v63  ;;  %v19381_v14 = vld [vmem:[%s25007_s3 + $0x56c] ss:$48 sps:$4 sm:$0xff]   ;;  %v19382_v63 = vld [vmem:[%s25007_s3 + $0x8c0] ss:$48 sps:$4 sm:$0xff]  }
 0x59e   :  { %13564 = vmatprep.subr.bf16.mxu1 %v19333_v22  ;;  %v19379_v22 = vld [vmem:[%s25007_s3 + $0x568] ss:$48 sps:$4 sm:$0xff]  }
 0x5a0   :  { %13325 = vmatpush1.bf16.msra.mxu0 %v19334_v19  ;;  %v19390_v19 = vld [vmem:[%s25007_s3 + $0x924] ss:$48 sps:$4 sm:$0xff]  }
 0x5a1   :  { %13565 = vmatpush1.bf16.msra.mxu1 %v19331_v11  ;;  %13337 = vmatprep.subr.bf16.mxu0 %v19342_v15  ;;  %v19387_v11 = vld [vmem:[%s25007_s3 + $0x5cc] ss:$48 sps:$4 sm:$0xff]   ;;  %v19388_v15 = vld [vmem:[%s25007_s3 + $0x920] ss:$48 sps:$4 sm:$0xff]  }
 0x5a2   :  { %13566 = vmatprep.subr.bf16.mxu1 %v19339_v39  ;;  %v19385_v39 = vld [vmem:[%s25007_s3 + $0x5c8] ss:$48 sps:$4 sm:$0xff]  }
 0x5a3   :  { %13327 = vmatmul.mubr.bf16.vlgmr.msra.gmra.mrb[56].mxu0 %v20389_v32 }
 0x5a4   :  { %13338 = vmatpush1.bf16.msra.mxu0 %v19340_v9  ;;  %13369 = vmatprep.mubr.bf16.mxu0 %v20451_v33  ;;  %v19396_v9 = vld [vmem:[%s25007_s3 + $0x984] ss:$48 sps:$4 sm:$0xff]  }
 0x5a5   :  { %13567 = vmatpush1.bf16.msra.mxu1 %v19337_v29  ;;  %13339 = vmatprep.subr.bf16.mxu0 %v19348_v28  ;;  %v19393_v29 = vld [vmem:[%s25007_s3 + $0x62c] ss:$48 sps:$4 sm:$0xff]   ;;  %v19394_v28 = vld [vmem:[%s25007_s3 + $0x980] ss:$48 sps:$4 sm:$0xff]  }
 0x5a6   :  { %13568 = vmatprep.subr.bf16.mxu1 %v19345_v57  ;;  %v19391_v57 = vld [vmem:[%s25007_s3 + $0x628] ss:$48 sps:$4 sm:$0xff]  }
 0x5a8   :  { %13340 = vmatpush1.bf16.msra.mxu0 %v19346_v12  ;;  %v19402_v12 = vld [vmem:[%s25007_s3 + $0x9e4] ss:$48 sps:$4 sm:$0xff]  }
 0x5a9   :  { %13569 = vmatpush1.bf16.msra.mxu1 %v19343_v10  ;;  %13341 = vmatprep.subr.bf16.mxu0 %v19354_v46  ;;  %v19399_v10 = vld [vmem:[%s25007_s3 + $0x68c] ss:$48 sps:$4 sm:$0xff]   ;;  %v19400_v46 = vld [vmem:[%s25007_s3 + $0x9e0] ss:$48 sps:$4 sm:$0xff]  }
 0x5aa   :  { %13570 = vmatprep.subr.bf16.mxu1 %v19351_v26  ;;  %v19397_v26 = vld [vmem:[%s25007_s3 + $0x688] ss:$48 sps:$4 sm:$0xff]  }
 0x5ac   :  { %13342 = vmatpush1.bf16.msra.mxu0 %v19352_v27  ;;  %v19406_v27 = vld [vmem:[%s25007_s3 + $0xa40] ss:$48 sps:$4 sm:$0xff]  }
 0x5ad   :  { %13571 = vmatpush1.bf16.msra.mxu1 %v19349_v25  ;;  %13343 = vmatprep.subr.bf16.mxu0 %v19360_v41  ;;  %v19405_v25 = vld [vmem:[%s25007_s3 + $0x6ec] ss:$48 sps:$4 sm:$0xff]   ;;  %v19414_v41 = vld [vmem:[%s25007_s3 + $0xaa4] ss:$48 sps:$4 sm:$0xff]  }
 0x5ae   :  { %13572 = vmatprep.subr.bf16.mxu1 %v19357_v37  ;;  %v19411_v37 = vld [vmem:[%s25007_s3 + $0x74c] ss:$48 sps:$4 sm:$0xff]  }
 0x5b0   :  { %13344 = vmatpush1.bf16.msra.mxu0 %v19358_v44  ;;  %v19412_v44 = vld [vmem:[%s25007_s3 + $0xaa0] ss:$48 sps:$4 sm:$0xff]  }
 0x5b1   :  { %13573 = vmatpush1.bf16.msra.mxu1 %v19355_v0  ;;  %13345 = vmatprep.subr.bf16.mxu0 %v19366_v56  ;;  %v19409_v0 = vld [vmem:[%s25007_s3 + $0x748] ss:$48 sps:$4 sm:$0xff]   ;;  %v19420_v56 = vld [vmem:[%s25007_s3 + $0xb04] ss:$48 sps:$4 sm:$0xff]  }
 0x5b2   :  { %13574 = vmatprep.subr.bf16.mxu1 %v19363_v5  ;;  %v19417_v5 = vld [vmem:[%s25007_s3 + $0x7ac] ss:$48 sps:$4 sm:$0xff]  }
 0x5b4   :  { %13346 = vmatpush1.bf16.msra.mxu0 %v19364_v42  ;;  %v19418_v42 = vld [vmem:[%s25007_s3 + $0xb00] ss:$48 sps:$4 sm:$0xff]  }
 0x5b5   :  { %13575 = vmatpush1.bf16.msra.mxu1 %v19361_v45  ;;  %13347 = vmatprep.subr.bf16.mxu0 %v19372_v18  ;;  %v19415_v45 = vld [vmem:[%s25007_s3 + $0x7a8] ss:$48 sps:$4 sm:$0xff]   ;;  %v19426_v18 = vld [vmem:[%s25007_s3 + $0xb64] ss:$48 sps:$4 sm:$0xff]  }
 0x5b6   :  { %13576 = vmatprep.subr.bf16.mxu1 %v19369_v13  ;;  %v19423_v13 = vld [vmem:[%s25007_s3 + $0x80c] ss:$48 sps:$4 sm:$0xff]  }
 0x5b8   :  { %13348 = vmatpush1.bf16.msra.mxu0 %v19370_v52  ;;  %v19424_v52 = vld [vmem:[%s25007_s3 + $0xb60] ss:$48 sps:$4 sm:$0xff]  }
 0x5b9   :  { %13577 = vmatpush1.bf16.msra.mxu1 %v19367_v38  ;;  %13349 = vmatprep.subr.bf16.mxu0 %v19378_v1  ;;  %v19421_v38 = vld [vmem:[%s25007_s3 + $0x808] ss:$48 sps:$4 sm:$0xff]   ;;  %v19432_v1 = vld [vmem:[%s25007_s3 + $0xbc4] ss:$48 sps:$4 sm:$0xff]  }
 0x5ba   :  { %13578 = vmatprep.subr.bf16.mxu1 %v19375_v51  ;;  %v19429_v51 = vld [vmem:[%s25007_s3 + $0x86c] ss:$48 sps:$4 sm:$0xff]  }
 0x5bc   :  { %13350 = vmatpush1.bf16.msra.mxu0 %v19376_v20  ;;  %v19430_v20 = vld [vmem:[%s25007_s3 + $0xbc0] ss:$48 sps:$4 sm:$0xff]  }
 0x5bd   :  { %13579 = vmatpush1.bf16.msra.mxu1 %v19373_v62  ;;  %13351 = vmatprep.subr.bf16.mxu0 %v19384_v60  ;;  %v19427_v62 = vld [vmem:[%s25007_s3 + $0x868] ss:$48 sps:$4 sm:$0xff]   ;;  %v19438_v60 = vld [vmem:[%s25007_s3 + $0xc24] ss:$48 sps:$4 sm:$0xff]  }
 0x5be   :  { %13580 = vmatprep.subr.bf16.mxu1 %v19381_v14  ;;  %v19435_v14 = vld [vmem:[%s25007_s3 + $0x8cc] ss:$48 sps:$4 sm:$0xff]  }
 0x5c0   :  { %13352 = vmatpush1.bf16.msra.mxu0 %v19382_v63  ;;  %v19436_v63 = vld [vmem:[%s25007_s3 + $0xc20] ss:$48 sps:$4 sm:$0xff]  }
 0x5c1   :  { %13581 = vmatpush1.bf16.msra.mxu1 %v19379_v22  ;;  %13353 = vmatprep.subr.bf16.mxu0 %v19390_v19  ;;  %v19433_v22 = vld [vmem:[%s25007_s3 + $0x8c8] ss:$48 sps:$4 sm:$0xff]   ;;  %v19444_v19 = vld [vmem:[%s25007_s3 + $0xc84] ss:$48 sps:$4 sm:$0xff]  }
 0x5c2   :  { %13582 = vmatprep.subr.bf16.mxu1 %v19387_v11  ;;  %v19441_v11 = vld [vmem:[%s25007_s3 + $0x92c] ss:$48 sps:$4 sm:$0xff]  }
 0x5c4   :  { %13354 = vmatpush1.bf16.msra.mxu0 %v19388_v15  ;;  %v19442_v15 = vld [vmem:[%s25007_s3 + $0xc80] ss:$48 sps:$4 sm:$0xff]  }
 0x5c5   :  { %13583 = vmatpush1.bf16.msra.mxu1 %v19385_v39  ;;  %13355 = vmatprep.subr.bf16.mxu0 %v19396_v9  ;;  %v19439_v39 = vld [vmem:[%s25007_s3 + $0x928] ss:$48 sps:$4 sm:$0xff]   ;;  %v19450_v9 = vld [vmem:[%s25007_s3 + $0xce4] ss:$48 sps:$4 sm:$0xff]  }
 0x5c6   :  { %13595 = vmatprep.subr.bf16.mxu1 %v19393_v29  ;;  %v19447_v29 = vld [vmem:[%s25007_s3 + $0x98c] ss:$48 sps:$4 sm:$0xff]  }
 0x5c8   :  { %13585 = vmatmul.mubr.bf16.vlgmr.msra.gmra.mrb[72].mxu1 %v20389_v32  ;;  %13356 = vmatpush1.bf16.msra.mxu0 %v19394_v28  ;;  %v19408_v32 = vld [vmem:[%s25007_s3 + $0xa44] ss:$48 sps:$4 sm:$0xff]   ;;  %v19448_v28 = vld [vmem:[%s25007_s3 + $0xce0] ss:$48 sps:$4 sm:$0xff]  }
 0x5c9   :  { %13596 = vmatpush1.bf16.msra.mxu1 %v19391_v57  ;;  %13627 = vmatprep.mubr.bf16.mxu1 %v20451_v33  ;;  %v19403_v33 = vld [vmem:[%s25007_s3 + $0x6e8] ss:$48 sps:$4 sm:$0xff]  }
 0x5ca   :  { %13597 = vmatprep.subr.bf16.mxu1 %v19399_v10  ;;  %13357 = vmatprep.subr.bf16.mxu0 %v19402_v12  ;;  %v19445_v57 = vld [vmem:[%s25007_s3 + $0x988] ss:$48 sps:$4 sm:$0xff]   ;;  %v19453_v10 = vld [vmem:[%s25007_s3 + $0x9ec] ss:$48 sps:$4 sm:$0xff]   ;;  %v19456_v12 = vld [vmem:[%s25007_s3 + $0xd44] ss:$48 sps:$4 sm:$0xff]  }
 0x5cc   :  { %13358 = vmatpush1.bf16.msra.mxu0 %v19400_v46  ;;  %v19454_v46 = vld [vmem:[%s25007_s3 + $0xd40] ss:$48 sps:$4 sm:$0xff]  }
 0x5cd   :  { %13598 = vmatpush1.bf16.msra.mxu1 %v19397_v26  ;;  %13359 = vmatprep.subr.bf16.mxu0 %v19408_v32  ;;  %v19451_v26 = vld [vmem:[%s25007_s3 + $0x9e8] ss:$48 sps:$4 sm:$0xff]   ;;  %v19462_v32 = vld [vmem:[%s25007_s3 + $0xda4] ss:$48 sps:$4 sm:$0xff]  }
 0x5ce   :  { %13599 = vmatprep.subr.bf16.mxu1 %v19405_v25  ;;  %v19459_v25 = vld [vmem:[%s25007_s3 + $0xa4c] ss:$48 sps:$4 sm:$0xff]  }
 0x5d0   :  { %13360 = vmatpush1.bf16.msra.mxu0 %v19406_v27  ;;  %v19460_v27 = vld [vmem:[%s25007_s3 + $0xda0] ss:$48 sps:$4 sm:$0xff]  }
 0x5d1   :  { %13600 = vmatpush1.bf16.msra.mxu1 %v19403_v33  ;;  %13361 = vmatprep.subr.bf16.mxu0 %v19414_v41  ;;  %v19457_v33 = vld [vmem:[%s25007_s3 + $0xa48] ss:$48 sps:$4 sm:$0xff]   ;;  %v19468_v41 = vld [vmem:[%s25007_s3 + $0xe04] ss:$48 sps:$4 sm:$0xff]  }
 0x5d2   :  { %13601 = vmatprep.subr.bf16.mxu1 %v19411_v37  ;;  %v19465_v37 = vld [vmem:[%s25007_s3 + $0xaac] ss:$48 sps:$4 sm:$0xff]  }
 0x5d4   :  { %13362 = vmatpush1.bf16.msra.mxu0 %v19412_v44  ;;  %v19466_v44 = vld [vmem:[%s25007_s3 + $0xe00] ss:$48 sps:$4 sm:$0xff]  }
 0x5d5   :  { %13602 = vmatpush1.bf16.msra.mxu1 %v19409_v0  ;;  %13363 = vmatprep.subr.bf16.mxu0 %v19420_v56  ;;  %v19463_v0 = vld [vmem:[%s25007_s3 + $0xaa8] ss:$48 sps:$4 sm:$0xff]   ;;  %v19474_v56 = vld [vmem:[%s25007_s3 + $0xe64] ss:$48 sps:$4 sm:$0xff]  }
 0x5d6   :  { %13603 = vmatprep.subr.bf16.mxu1 %v19417_v5  ;;  %v19471_v5 = vld [vmem:[%s25007_s3 + $0xb0c] ss:$48 sps:$4 sm:$0xff]  }
 0x5d8   :  { %13364 = vmatpush1.bf16.msra.mxu0 %v19418_v42  ;;  %v19472_v42 = vld [vmem:[%s25007_s3 + $0xe60] ss:$48 sps:$4 sm:$0xff]  }
 0x5d9   :  { %13604 = vmatpush1.bf16.msra.mxu1 %v19415_v45  ;;  %13365 = vmatprep.subr.bf16.mxu0 %v19426_v18  ;;  %v19469_v45 = vld [vmem:[%s25007_s3 + $0xb08] ss:$48 sps:$4 sm:$0xff]   ;;  %v19480_v18 = vld [vmem:[%s25007_s3 + $0xec4] ss:$48 sps:$4 sm:$0xff]  }
 0x5da   :  { %13605 = vmatprep.subr.bf16.mxu1 %v19423_v13  ;;  %v19477_v13 = vld [vmem:[%s25007_s3 + $0xb6c] ss:$48 sps:$4 sm:$0xff]  }
 0x5dc   :  { %13366 = vmatpush1.bf16.msra.mxu0 %v19424_v52  ;;  %v19478_v52 = vld [vmem:[%s25007_s3 + $0xec0] ss:$48 sps:$4 sm:$0xff]  }
 0x5dd   :  { %13606 = vmatpush1.bf16.msra.mxu1 %v19421_v38  ;;  %13367 = vmatprep.subr.bf16.mxu0 %v19432_v1  ;;  %v19475_v38 = vld [vmem:[%s25007_s3 + $0xb68] ss:$48 sps:$4 sm:$0xff]   ;;  %v19486_v1 = vld [vmem:[%s25007_s3 + $0xf24] ss:$48 sps:$4 sm:$0xff]  }
 0x5de   :  { %13607 = vmatprep.subr.bf16.mxu1 %v19429_v51  ;;  %v19483_v51 = vld [vmem:[%s25007_s3 + $0xbcc] ss:$48 sps:$4 sm:$0xff]  }
 0x5e0   :  { %13368 = vmatpush1.bf16.msra.mxu0 %v19430_v20  ;;  %v19484_v20 = vld [vmem:[%s25007_s3 + $0xf20] ss:$48 sps:$4 sm:$0xff]  }
 0x5e1   :  { %13608 = vmatpush1.bf16.msra.mxu1 %v19427_v62  ;;  %13380 = vmatprep.subr.bf16.mxu0 %v19438_v60  ;;  %v19481_v62 = vld [vmem:[%s25007_s3 + $0xbc8] ss:$48 sps:$4 sm:$0xff]   ;;  %v19492_v60 = vld [vmem:[%s25007_s3 + $0xf84] ss:$48 sps:$4 sm:$0xff]  }
 0x5e2   :  { %13609 = vmatprep.subr.bf16.mxu1 %v19435_v14  ;;  %v19489_v14 = vld [vmem:[%s25007_s3 + $0xc2c] ss:$48 sps:$4 sm:$0xff]  }
 0x5e3   :  { %13370 = vmatmul.mubr.bf16.vlgmr.msra.gmra.mrb[56].mxu0 %v20449_v59 }
 0x5e4   :  { %13381 = vmatpush1.bf16.msra.mxu0 %v19436_v63  ;;  %13412 = vmatprep.mubr.bf16.mxu0 %v20719_v55  ;;  %v19490_v63 = vld [vmem:[%s25007_s3 + $0xf80] ss:$48 sps:$4 sm:$0xff]  }
 0x5e5   :  { %13610 = vmatpush1.bf16.msra.mxu1 %v19433_v22  ;;  %13382 = vmatprep.subr.bf16.mxu0 %v19444_v19  ;;  %v19487_v22 = vld [vmem:[%s25007_s3 + $0xc28] ss:$48 sps:$4 sm:$0xff]   ;;  %v19498_v19 = vld [vmem:[%s25007_s3 + $0xfe4] ss:$48 sps:$4 sm:$0xff]  }
 0x5e6   :  { %13611 = vmatprep.subr.bf16.mxu1 %v19441_v11  ;;  %v19495_v11 = vld [vmem:[%s25007_s3 + $0xc8c] ss:$48 sps:$4 sm:$0xff]  }
 0x5e8   :  { %13383 = vmatpush1.bf16.msra.mxu0 %v19442_v15  ;;  %v19496_v15 = vld [vmem:[%s25007_s3 + $0xfe0] ss:$48 sps:$4 sm:$0xff]  }
 0x5e9   :  { %13612 = vmatpush1.bf16.msra.mxu1 %v19439_v39  ;;  %13384 = vmatprep.subr.bf16.mxu0 %v19450_v9  ;;  %v19493_v39 = vld [vmem:[%s25007_s3 + $0xc88] ss:$48 sps:$4 sm:$0xff]   ;;  %v19502_v9 = vld [vmem:[%s25007_s3 + $0x1040] ss:$48 sps:$4 sm:$0xff]  }
 0x5ea   :  { %13613 = vmatprep.subr.bf16.mxu1 %v19447_v29  ;;  %v19501_v29 = vld [vmem:[%s25007_s3 + $0xcec] ss:$48 sps:$4 sm:$0xff]  }
 0x5ec   :  { %13385 = vmatpush1.bf16.msra.mxu0 %v19448_v28  ;;  %v19510_v28 = vld [vmem:[%s25007_s3 + $0x10a4] ss:$48 sps:$4 sm:$0xff]  }
 0x5ed   :  { %13614 = vmatpush1.bf16.msra.mxu1 %v19445_v57  ;;  %13386 = vmatprep.subr.bf16.mxu0 %v19456_v12  ;;  %v19507_v57 = vld [vmem:[%s25007_s3 + $0xd4c] ss:$48 sps:$4 sm:$0xff]   ;;  %v19508_v12 = vld [vmem:[%s25007_s3 + $0x10a0] ss:$48 sps:$4 sm:$0xff]  }
 0x5ee   :  { %13615 = vmatprep.subr.bf16.mxu1 %v19453_v10  ;;  %v19505_v10 = vld [vmem:[%s25007_s3 + $0xd48] ss:$48 sps:$4 sm:$0xff]  }
 0x5f0   :  { %13387 = vmatpush1.bf16.msra.mxu0 %v19454_v46  ;;  %v19516_v46 = vld [vmem:[%s25007_s3 + $0x1104] ss:$48 sps:$4 sm:$0xff]  }
 0x5f1   :  { %13616 = vmatpush1.bf16.msra.mxu1 %v19451_v26  ;;  %13388 = vmatprep.subr.bf16.mxu0 %v19462_v32  ;;  %v19513_v26 = vld [vmem:[%s25007_s3 + $0xdac] ss:$48 sps:$4 sm:$0xff]   ;;  %v19514_v32 = vld [vmem:[%s25007_s3 + $0x1100] ss:$48 sps:$4 sm:$0xff]  }
 0x5f2   :  { %13617 = vmatprep.subr.bf16.mxu1 %v19459_v25  ;;  %v19511_v25 = vld [vmem:[%s25007_s3 + $0xda8] ss:$48 sps:$4 sm:$0xff]  }
 0x5f4   :  { %13389 = vmatpush1.bf16.msra.mxu0 %v19460_v27  ;;  %v19522_v27 = vld [vmem:[%s25007_s3 + $0x1164] ss:$48 sps:$4 sm:$0xff]  }
 0x5f5   :  { %13618 = vmatpush1.bf16.msra.mxu1 %v19457_v33  ;;  %13390 = vmatprep.subr.bf16.mxu0 %v19468_v41  ;;  %v19519_v33 = vld [vmem:[%s25007_s3 + $0xe0c] ss:$48 sps:$4 sm:$0xff]   ;;  %v19520_v41 = vld [vmem:[%s25007_s3 + $0x1160] ss:$48 sps:$4 sm:$0xff]  }
 0x5f6   :  { %13619 = vmatprep.subr.bf16.mxu1 %v19465_v37  ;;  %v19517_v37 = vld [vmem:[%s25007_s3 + $0xe08] ss:$48 sps:$4 sm:$0xff]  }
 0x5f8   :  { %13391 = vmatpush1.bf16.msra.mxu0 %v19466_v44  ;;  %v19528_v44 = vld [vmem:[%s25007_s3 + $0x11c4] ss:$48 sps:$4 sm:$0xff]  }
 0x5f9   :  { %13620 = vmatpush1.bf16.msra.mxu1 %v19463_v0  ;;  %13392 = vmatprep.subr.bf16.mxu0 %v19474_v56  ;;  %v19525_v0 = vld [vmem:[%s25007_s3 + $0xe6c] ss:$48 sps:$4 sm:$0xff]   ;;  %v19526_v56 = vld [vmem:[%s25007_s3 + $0x11c0] ss:$48 sps:$4 sm:$0xff]  }
 0x5fa   :  { %13621 = vmatprep.subr.bf16.mxu1 %v19471_v5  ;;  %v19523_v5 = vld [vmem:[%s25007_s3 + $0xe68] ss:$48 sps:$4 sm:$0xff]  }
 0x5fc   :  { %13393 = vmatpush1.bf16.msra.mxu0 %v19472_v42  ;;  %v19534_v42 = vld [vmem:[%s25007_s3 + $0x1224] ss:$48 sps:$4 sm:$0xff]  }
 0x5fd   :  { %13622 = vmatpush1.bf16.msra.mxu1 %v19469_v45  ;;  %13394 = vmatprep.subr.bf16.mxu0 %v19480_v18  ;;  %v19531_v45 = vld [vmem:[%s25007_s3 + $0xecc] ss:$48 sps:$4 sm:$0xff]   ;;  %v19532_v18 = vld [vmem:[%s25007_s3 + $0x1220] ss:$48 sps:$4 sm:$0xff]  }
 0x5fe   :  { %13623 = vmatprep.subr.bf16.mxu1 %v19477_v13  ;;  %v19529_v13 = vld [vmem:[%s25007_s3 + $0xec8] ss:$48 sps:$4 sm:$0xff]  }
 0x600   :  { %13395 = vmatpush1.bf16.msra.mxu0 %v19478_v52  ;;  %v19540_v52 = vld [vmem:[%s25007_s3 + $0x1284] ss:$48 sps:$4 sm:$0xff]  }
 0x601   :  { %13624 = vmatpush1.bf16.msra.mxu1 %v19475_v38  ;;  %13396 = vmatprep.subr.bf16.mxu0 %v19486_v1  ;;  %v19537_v38 = vld [vmem:[%s25007_s3 + $0xf2c] ss:$48 sps:$4 sm:$0xff]   ;;  %v19538_v1 = vld [vmem:[%s25007_s3 + $0x1280] ss:$48 sps:$4 sm:$0xff]  }
 0x602   :  { %13625 = vmatprep.subr.bf16.mxu1 %v19483_v51  ;;  %v19535_v51 = vld [vmem:[%s25007_s3 + $0xf28] ss:$48 sps:$4 sm:$0xff]  }
 0x604   :  { %13397 = vmatpush1.bf16.msra.mxu0 %v19484_v20  ;;  %v19546_v20 = vld [vmem:[%s25007_s3 + $0x12e4] ss:$48 sps:$4 sm:$0xff]  }
 0x605   :  { %13626 = vmatpush1.bf16.msra.mxu1 %v19481_v62  ;;  %13398 = vmatprep.subr.bf16.mxu0 %v19492_v60  ;;  %v19543_v62 = vld [vmem:[%s25007_s3 + $0xf8c] ss:$48 sps:$4 sm:$0xff]   ;;  %v19544_v60 = vld [vmem:[%s25007_s3 + $0x12e0] ss:$48 sps:$4 sm:$0xff]  }
 0x606   :  { %13638 = vmatprep.subr.bf16.mxu1 %v19489_v14  ;;  %v19541_v14 = vld [vmem:[%s25007_s3 + $0xf88] ss:$48 sps:$4 sm:$0xff]  }
 0x608   :  { %13628 = vmatmul.mubr.bf16.vlgmr.msra.gmra.mrb[72].mxu1 %v20449_v59  ;;  %13399 = vmatpush1.bf16.msra.mxu0 %v19490_v63  ;;  %v19504_v59 = vld [vmem:[%s25007_s3 + $0x1044] ss:$48 sps:$4 sm:$0xff]  }
 0x609   :  { %13639 = vmatpush1.bf16.msra.mxu1 %v19487_v22  ;;  %13670 = vmatprep.mubr.bf16.mxu1 %v20719_v55  ;;  %v19499_v55 = vld [vmem:[%s25007_s3 + $0xce8] ss:$48 sps:$4 sm:$0xff]   ;;  %v19549_v22 = vld [vmem:[%s25007_s3 + $0xfec] ss:$48 sps:$4 sm:$0xff]   ;;  %v19552_v63 = vld [vmem:[%s25007_s3 + $0x1344] ss:$48 sps:$4 sm:$0xff]  }
 0x60a   :  { %13640 = vmatprep.subr.bf16.mxu1 %v19495_v11  ;;  %13400 = vmatprep.subr.bf16.mxu0 %v19498_v19  ;;  %v19547_v11 = vld [vmem:[%s25007_s3 + $0xfe8] ss:$48 sps:$4 sm:$0xff]   ;;  %v19550_v19 = vld [vmem:[%s25007_s3 + $0x1340] ss:$48 sps:$4 sm:$0xff]  }
 0x60c   :  { %13401 = vmatpush1.bf16.msra.mxu0 %v19496_v15  ;;  %v19558_v15 = vld [vmem:[%s25007_s3 + $0x13a4] ss:$48 sps:$4 sm:$0xff]  }
 0x60d   :  { %13641 = vmatpush1.bf16.msra.mxu1 %v19493_v39  ;;  %13402 = vmatprep.subr.bf16.mxu0 %v19504_v59  ;;  %v19555_v39 = vld [vmem:[%s25007_s3 + $0x104c] ss:$48 sps:$4 sm:$0xff]   ;;  %v19556_v59 = vld [vmem:[%s25007_s3 + $0x13a0] ss:$48 sps:$4 sm:$0xff]  }
 0x60e   :  { %13642 = vmatprep.subr.bf16.mxu1 %v19501_v29  ;;  %v19553_v29 = vld [vmem:[%s25007_s3 + $0x1048] ss:$48 sps:$4 sm:$0xff]  }
 0x610   :  { %13403 = vmatpush1.bf16.msra.mxu0 %v19502_v9  ;;  %v19564_v9 = vld [vmem:[%s25007_s3 + $0x1404] ss:$48 sps:$4 sm:$0xff]  }
 0x611   :  { %13643 = vmatpush1.bf16.msra.mxu1 %v19499_v55  ;;  %13404 = vmatprep.subr.bf16.mxu0 %v19510_v28  ;;  %v19561_v55 = vld [vmem:[%s25007_s3 + $0x10ac] ss:$48 sps:$4 sm:$0xff]  }
 0x612   :  { %13644 = vmatprep.subr.bf16.mxu1 %v19507_v57  ;;  %v19877_v57 = vld [vmem:[%s25008_s4] sm:$0xff] }
 0x613   :  { %v6805_v28 = vrot.slane %v19877_v57, %v20353_v3 }
 0x614   :  { %13405 = vmatpush1.bf16.msra.mxu0 %v19508_v12  ;;  %v19559_v12 = vld [vmem:[%s25007_s3 + $0x10a8] ss:$48 sps:$4 sm:$0xff]  }
 0x615   :  { %13645 = vmatpush1.bf16.msra.mxu1 %v19505_v10  ;;  %13406 = vmatprep.subr.bf16.mxu0 %v19516_v46  ;;  %v6817_v10 = vrot.slane %v19877_v57, %v5612_v31  ;;  %v6821_v46 = vrot.slane %v19877_v57, %v5616_v21  ;;  %v19570_v31 = vld [vmem:[%s25007_s3 + $0x1464] ss:$48 sps:$4 sm:$0xff]  }
 0x616   :  { %13646 = vmatprep.subr.bf16.mxu1 %v19513_v26  ;;  %v6809_v26 = vrot.slane %v19877_v57, %v20433_v47  ;;  %v19598_v57 = vld [vmem:[%s25007_s3 + $0x1640] ss:$48 sps:$4 sm:$0xff]  }
 0x618   :  { %13407 = vmatpush1.bf16.msra.mxu0 %v19514_v32  ;;  %v19567_v32 = vld [vmem:[%s25007_s3 + $0x110c] ss:$48 sps:$4 sm:$0xff]  }
 0x619   :  { %13647 = vmatpush1.bf16.msra.mxu1 %v19511_v25  ;;  %13408 = vmatprep.subr.bf16.mxu0 %v19522_v27  ;;  %v19562_v25 = vld [vmem:[%s25007_s3 + $0x1400] ss:$48 sps:$4 sm:$0xff]   ;;  %v23642_v27 = vadd.f32 %v22497_v6, %v6805_v28 }
 0x61a   :  { %13648 = vmatprep.subr.bf16.mxu1 %v19519_v33  ;;  %v19568_v6 = vld [vmem:[%s25007_s3 + $0x1460] ss:$48 sps:$4 sm:$0xff]  }
 0x61c   :  { %13409 = vmatpush1.bf16.msra.mxu0 %v19520_v41  ;;  %v19565_v41 = vld [vmem:[%s25007_s3 + $0x1108] ss:$48 sps:$4 sm:$0xff]  }
 0x61d   :  { %13649 = vmatpush1.bf16.msra.mxu1 %v19517_v37  ;;  %13410 = vmatprep.subr.bf16.mxu0 %v19528_v44 }
 0x61e   :  { %13650 = vmatprep.subr.bf16.mxu1 %v19525_v0  ;;  %v23650_v0 = vadd.f32 %v22615_v4, %v6809_v26 }
 0x620   :  { %13411 = vmatpush1.bf16.msra.mxu0 %v19526_v56  ;;  %v19573_v56 = vld [vmem:[%s25007_s3 + $0x116c] ss:$48 sps:$4 sm:$0xff]  }
 0x621   :  { %13651 = vmatpush1.bf16.msra.mxu1 %v19523_v5  ;;  %13423 = vmatprep.subr.bf16.mxu0 %v19534_v42 }
 0x622   :  { %13652 = vmatprep.subr.bf16.mxu1 %v19531_v45  ;;  %v23661_v45 = vadd.f32 %v22510_v53, %v6805_v28  ;;  %v19603_v28 = vld [vmem:[%s25007_s3 + $0x134c] ss:$48 sps:$4 sm:$0xff]  }
 0x623   :  { %13413 = vmatmul.mubr.bf16.vlgmr.msra.gmra.mrb[56].mxu0 %v20714_v48 }
 0x624   :  { %13424 = vmatpush1.bf16.msra.mxu0 %v19532_v18  ;;  %13455 = vmatprep.mubr.bf16.mxu0 %v20867_v16  ;;  %v19576_v18 = vld [vmem:[%s25007_s3 + $0x14c4] ss:$48 sps:$4 sm:$0xff]  }
 0x625   :  { %13653 = vmatpush1.bf16.msra.mxu1 %v19529_v13  ;;  %13425 = vmatprep.subr.bf16.mxu0 %v19540_v52 }
 0x626   :  { %13654 = vmatprep.subr.bf16.mxu1 %v19537_v38  ;;  %v23671_v38 = vadd.f32 %v22625_v54, %v6809_v26  ;;  %v19574_v54 = vld [vmem:[%s25007_s3 + $0x14c0] ss:$48 sps:$4 sm:$0xff]  }
 0x627   :  { %v19604_v26 = vld [vmem:[%s25007_s3 + $0x16a0] ss:$48 sps:$4 sm:$0xff]  }
 0x628   :  { %13426 = vmatpush1.bf16.msra.mxu0 %v19538_v1  ;;  %v19571_v1 = vld [vmem:[%s25007_s3 + $0x1168] ss:$48 sps:$4 sm:$0xff]  }
 0x629   :  { %13655 = vmatpush1.bf16.msra.mxu1 %v19535_v51  ;;  %13427 = vmatprep.subr.bf16.mxu0 %v19546_v20  ;;  %v19579_v20 = vld [vmem:[%s25007_s3 + $0x11cc] ss:$48 sps:$4 sm:$0xff]  }
 0x62a   :  { %13656 = vmatprep.subr.bf16.mxu1 %v19543_v62 }
 0x62c   :  { %13428 = vmatpush1.bf16.msra.mxu0 %v19544_v60  ;;  %v19577_v60 = vld [vmem:[%s25007_s3 + $0x11c8] ss:$48 sps:$4 sm:$0xff]  }
 0x62d   :  { %13657 = vmatpush1.bf16.msra.mxu1 %v19541_v14  ;;  %13429 = vmatprep.subr.bf16.mxu0 %v19552_v63  ;;  %v19582_v14 = vld [vmem:[%s25007_s3 + $0x1524] ss:$48 sps:$4 sm:$0xff]   ;;  %v19585_v63 = vld [vmem:[%s25007_s3 + $0x122c] ss:$48 sps:$4 sm:$0xff]  }
 0x62e   :  { %13658 = vmatprep.subr.bf16.mxu1 %v19549_v22  ;;  %v19580_v22 = vld [vmem:[%s25007_s3 + $0x1520] ss:$48 sps:$4 sm:$0xff]  }
 0x630   :  { %13430 = vmatpush1.bf16.msra.mxu0 %v19550_v19  ;;  %v19583_v19 = vld [vmem:[%s25007_s3 + $0x1228] ss:$48 sps:$4 sm:$0xff]  }
 0x631   :  { %13659 = vmatpush1.bf16.msra.mxu1 %v19547_v11  ;;  %13431 = vmatprep.subr.bf16.mxu0 %v19558_v15  ;;  %v19588_v11 = vld [vmem:[%s25007_s3 + $0x1584] ss:$48 sps:$4 sm:$0xff]   ;;  %v19591_v15 = vld [vmem:[%s25007_s3 + $0x128c] ss:$48 sps:$4 sm:$0xff]  }
 0x632   :  { %13660 = vmatprep.subr.bf16.mxu1 %v19555_v39  ;;  %v19586_v39 = vld [vmem:[%s25007_s3 + $0x1580] ss:$48 sps:$4 sm:$0xff]  }
 0x634   :  { %13432 = vmatpush1.bf16.msra.mxu0 %v19556_v59  ;;  %v19589_v59 = vld [vmem:[%s25007_s3 + $0x1288] ss:$48 sps:$4 sm:$0xff]  }
 0x635   :  { %13661 = vmatpush1.bf16.msra.mxu1 %v19553_v29  ;;  %13433 = vmatprep.subr.bf16.mxu0 %v19564_v9  ;;  %v19594_v29 = vld [vmem:[%s25007_s3 + $0x15e4] ss:$48 sps:$4 sm:$0xff]   ;;  %v19597_v9 = vld [vmem:[%s25007_s3 + $0x12ec] ss:$48 sps:$4 sm:$0xff]  }
 0x636   :  { %13662 = vmatprep.subr.bf16.mxu1 %v19561_v55  ;;  %v13027_v33 = vpop.f32.mrb[52].mxu0  ;;  %v19592_v55 = vld [vmem:[%s25007_s3 + $0x15e0] ss:$48 sps:$4 sm:$0xff]  }
 0x637   :  { %v23644_v37 = vadd.f32 %v13027_v33, %v6817_v10  ;;  %v13029_v21 = vpop.f32.mrb[53].mxu0  ;;  %v19615_v33 = vld [vmem:[%s25007_s3 + $0x140c] ss:$48 sps:$4 sm:$0xff]  }
 0x638   :  { %v23652_v44 = vadd.f32 %v13029_v21, %v6821_v46  ;;  %v13031_v5 = vpop.f32.mrb[54].mxu0  ;;  %13434 = vmatpush1.bf16.msra.mxu0 %v19562_v25  ;;  %v19612_v25 = vld [vmem:[%s25007_s3 + $0x1704] ss:$48 sps:$4 sm:$0xff]  }
 0x639   :  { %13663 = vmatpush1.bf16.msra.mxu1 %v19559_v12  ;;  %v13811_v4 = vmax.f32 %v23642_v27, %v23644_v37  ;;  %v23665_v42 = vadd.f32 %v13031_v5, %v6817_v10  ;;  %v13033_v13 = vpop.f32.mrb[55].mxu0  ;;  %13435 = vmatprep.subr.bf16.mxu0 %v19570_v31  ;;  %v19606_v10 = vld [vmem:[%s25007_s3 + $0x16a4] ss:$48 sps:$4 sm:$0xff]   ;;  %v19601_v12 = vld [vmem:[%s25007_s3 + $0x1348] ss:$48 sps:$4 sm:$0xff]  }
 0x63a   :  { %13664 = vmatprep.subr.bf16.mxu1 %v19567_v32  ;;  %v13812_v52 = vmax.f32 %v23650_v0, %v23652_v44  ;;  %v23675_v51 = vadd.f32 %v13033_v13, %v6821_v46  ;;  %v19609_v46 = vld [vmem:[%s25007_s3 + $0x13ac] ss:$48 sps:$4 sm:$0xff]   ;;  %v19607_v32 = vld [vmem:[%s25007_s3 + $0x13a8] ss:$48 sps:$4 sm:$0xff]   ;;  %v19610_v31 = vld [vmem:[%s25007_s3 + $0x1700] ss:$48 sps:$4 sm:$0xff]  }
 0x63b   :  { %v13814_v53 = vmax.f32 %v23661_v45, %v23665_v42  ;;  %v19618_v21 = vld [vmem:[%s25007_s3 + $0x1764] ss:$48 sps:$4 sm:$0xff]   ;;  %v19616_v5 = vld [vmem:[%s25007_s3 + $0x1760] ss:$48 sps:$4 sm:$0xff]   ;;  %v13939_v0 = vld [vmem:[%s25009_s5 + $0x348] sm:$0xff] }
 0x63c   :  { %v13815_v62 = vmax.f32 %v23671_v38, %v23675_v51  ;;  %13436 = vmatpush1.bf16.msra.mxu0 %v19568_v6  ;;  %v19621_v6 = vld [vmem:[%s25007_s3 + $0x146c] ss:$48 sps:$4 sm:$0xff]   ;;  %v19624_v13 = vld [vmem:[%s25007_s3 + $0x17c4] ss:$48 sps:$4 sm:$0xff]  }
 0x63d   :  { %13665 = vmatpush1.bf16.msra.mxu1 %v19565_v41  ;;  %13437 = vmatprep.subr.bf16.mxu0 %v19576_v18  ;;  %v19613_v41 = vld [vmem:[%s25007_s3 + $0x1408] ss:$48 sps:$4 sm:$0xff]   ;;  %v13946_v38 = vld [vmem:[%s25009_s5 + $0x380] sm:$0xff]  ;;  %v13944_v51 = vld [vmem:[%s25009_s5 + $0x370] sm:$0xff] }
 0x63e   :  { %13666 = vmatprep.subr.bf16.mxu1 %v19573_v56  ;;  %v13943_v42 = vld [vmem:[%s25009_s5 + $0x368] sm:$0xff] }
 0x640   :  { %13438 = vmatpush1.bf16.msra.mxu0 %v19574_v54  ;;  %v19619_v54 = vld [vmem:[%s25007_s3 + $0x1468] ss:$48 sps:$4 sm:$0xff]  }
 0x641   :  { %13667 = vmatpush1.bf16.msra.mxu1 %v19571_v1  ;;  %13439 = vmatprep.subr.bf16.mxu0 %v19582_v14  ;;  %v19622_v14 = vld [vmem:[%s25007_s3 + $0x17c0] ss:$48 sps:$4 sm:$0xff]  }
 0x642   :  { %13668 = vmatprep.subr.bf16.mxu1 %v19579_v20 }
 0x644   :  { %13440 = vmatpush1.bf16.msra.mxu0 %v19580_v22  ;;  %v19630_v22 = vld [vmem:[%s25007_s3 + $0x1824] ss:$48 sps:$4 sm:$0xff]  }
 0x645   :  { %13669 = vmatpush1.bf16.msra.mxu1 %v19577_v60  ;;  %13441 = vmatprep.subr.bf16.mxu0 %v19588_v11  ;;  %v19627_v60 = vld [vmem:[%s25007_s3 + $0x14cc] ss:$48 sps:$4 sm:$0xff]   ;;  %v19628_v11 = vld [vmem:[%s25007_s3 + $0x1820] ss:$48 sps:$4 sm:$0xff]  }
 0x646   :  { %13681 = vmatprep.subr.bf16.mxu1 %v19585_v63  ;;  %v19625_v63 = vld [vmem:[%s25007_s3 + $0x14c8] ss:$48 sps:$4 sm:$0xff]  }
 0x648   :  { %13671 = vmatmul.mubr.bf16.vlgmr.msra.gmra.mrb[72].mxu1 %v20714_v48  ;;  %13442 = vmatpush1.bf16.msra.mxu0 %v19586_v39  ;;  %v19600_v48 = vld [vmem:[%s25007_s3 + $0x1644] ss:$48 sps:$4 sm:$0xff]  }
 0x649   :  { %13682 = vmatpush1.bf16.msra.mxu1 %v19583_v19  ;;  %13713 = vmatprep.mubr.bf16.mxu1 %v20867_v16  ;;  %v19595_v16 = vld [vmem:[%s25007_s3 + $0x12e8] ss:$48 sps:$4 sm:$0xff]   ;;  %v19633_v19 = vld [vmem:[%s25007_s3 + $0x152c] ss:$48 sps:$4 sm:$0xff]   ;;  %v19636_v39 = vld [vmem:[%s25007_s3 + $0x1884] ss:$48 sps:$4 sm:$0xff]  }
 0x64a   :  { %13683 = vmatprep.subr.bf16.mxu1 %v19591_v15  ;;  %13443 = vmatprep.subr.bf16.mxu0 %v19594_v29  ;;  %v19631_v15 = vld [vmem:[%s25007_s3 + $0x1528] ss:$48 sps:$4 sm:$0xff]   ;;  %v19634_v29 = vld [vmem:[%s25007_s3 + $0x1880] ss:$48 sps:$4 sm:$0xff]  }
 0x64c   :  { %13444 = vmatpush1.bf16.msra.mxu0 %v19592_v55  ;;  %v19642_v55 = vld [vmem:[%s25007_s3 + $0x18e4] ss:$48 sps:$4 sm:$0xff]  }
 0x64d   :  { %13684 = vmatpush1.bf16.msra.mxu1 %v19589_v59  ;;  %13445 = vmatprep.subr.bf16.mxu0 %v19600_v48  ;;  %v19639_v59 = vld [vmem:[%s25007_s3 + $0x158c] ss:$48 sps:$4 sm:$0xff]   ;;  %v19640_v48 = vld [vmem:[%s25007_s3 + $0x18e0] ss:$48 sps:$4 sm:$0xff]  }
 0x64e   :  { %13685 = vmatprep.subr.bf16.mxu1 %v19597_v9  ;;  %v19637_v9 = vld [vmem:[%s25007_s3 + $0x1588] ss:$48 sps:$4 sm:$0xff]  }
 0x650   :  { %13446 = vmatpush1.bf16.msra.mxu0 %v19598_v57  ;;  %v19648_v57 = vld [vmem:[%s25007_s3 + $0x1944] ss:$48 sps:$4 sm:$0xff]  }
 0x651   :  { %13686 = vmatpush1.bf16.msra.mxu1 %v19595_v16  ;;  %13447 = vmatprep.subr.bf16.mxu0 %v19606_v10  ;;  %v19645_v16 = vld [vmem:[%s25007_s3 + $0x15ec] ss:$48 sps:$4 sm:$0xff]   ;;  %v19646_v10 = vld [vmem:[%s25007_s3 + $0x1940] ss:$48 sps:$4 sm:$0xff]  }
 0x652   :  { %13687 = vmatprep.subr.bf16.mxu1 %v19603_v28  ;;  %v19643_v28 = vld [vmem:[%s25007_s3 + $0x15e8] ss:$48 sps:$4 sm:$0xff]  }
 0x654   :  { %13448 = vmatpush1.bf16.msra.mxu0 %v19604_v26  ;;  %v19654_v26 = vld [vmem:[%s25007_s3 + $0x19a4] ss:$48 sps:$4 sm:$0xff]  }
 0x655   :  { %13688 = vmatpush1.bf16.msra.mxu1 %v19601_v12  ;;  %13449 = vmatprep.subr.bf16.mxu0 %v19612_v25  ;;  %v19651_v12 = vld [vmem:[%s25007_s3 + $0x164c] ss:$48 sps:$4 sm:$0xff]   ;;  %v19652_v25 = vld [vmem:[%s25007_s3 + $0x19a0] ss:$48 sps:$4 sm:$0xff]  }
 0x656   :  { %13689 = vmatprep.subr.bf16.mxu1 %v19609_v46  ;;  %v19649_v46 = vld [vmem:[%s25007_s3 + $0x1648] ss:$48 sps:$4 sm:$0xff]  }
 0x658   :  { %13450 = vmatpush1.bf16.msra.mxu0 %v19610_v31  ;;  %v19660_v31 = vld [vmem:[%s25007_s3 + $0x1a04] ss:$48 sps:$4 sm:$0xff]  }
 0x659   :  { %13690 = vmatpush1.bf16.msra.mxu1 %v19607_v32  ;;  %13451 = vmatprep.subr.bf16.mxu0 %v19618_v21  ;;  %v19657_v32 = vld [vmem:[%s25007_s3 + $0x16ac] ss:$48 sps:$4 sm:$0xff]   ;;  %v19658_v21 = vld [vmem:[%s25007_s3 + $0x1a00] ss:$48 sps:$4 sm:$0xff]  }
 0x65a   :  { %13691 = vmatprep.subr.bf16.mxu1 %v19615_v33  ;;  %v19655_v33 = vld [vmem:[%s25007_s3 + $0x16a8] ss:$48 sps:$4 sm:$0xff]  }
 0x65b   :  { %v23776_v56 = vpop.f32.mrb[68].mxu1 }
 0x65c   :  { %v23781_v18 = vpop.f32.mrb[69].mxu1  ;;  %13452 = vmatpush1.bf16.msra.mxu0 %v19616_v5  ;;  %v19666_v5 = vld [vmem:[%s25007_s3 + $0x1a64] ss:$48 sps:$4 sm:$0xff]  }
 0x65d   :  { %v23783_v1 = vpop.f32.mrb[70].mxu1  ;;  %13692 = vmatpush1.bf16.msra.mxu1 %v19613_v41  ;;  %13453 = vmatprep.subr.bf16.mxu0 %v19624_v13  ;;  %v19663_v41 = vld [vmem:[%s25007_s3 + $0x170c] ss:$48 sps:$4 sm:$0xff]   ;;  %v19664_v13 = vld [vmem:[%s25007_s3 + $0x1a60] ss:$48 sps:$4 sm:$0xff]  }
 0x65e   :  { %v23788_v20 = vpop.f32.mrb[71].mxu1  ;;  %13693 = vmatprep.subr.bf16.mxu1 %v19621_v6  ;;  %v19661_v6 = vld [vmem:[%s25007_s3 + $0x1708] ss:$48 sps:$4 sm:$0xff]  }
 0x660   :  { %13454 = vmatpush1.bf16.msra.mxu0 %v19622_v14  ;;  %v19672_v14 = vld [vmem:[%s25007_s3 + $0x1ac4] ss:$48 sps:$4 sm:$0xff]  }
 0x661   :  { %13694 = vmatpush1.bf16.msra.mxu1 %v19619_v54  ;;  %13466 = vmatprep.subr.bf16.mxu0 %v19630_v22  ;;  %v19669_v54 = vld [vmem:[%s25007_s3 + $0x176c] ss:$48 sps:$4 sm:$0xff]   ;;  %v19670_v22 = vld [vmem:[%s25007_s3 + $0x1ac0] ss:$48 sps:$4 sm:$0xff]  }
 0x662   :  { %13695 = vmatprep.subr.bf16.mxu1 %v19627_v60  ;;  %v19667_v60 = vld [vmem:[%s25007_s3 + $0x1768] ss:$48 sps:$4 sm:$0xff]  }
 0x663   :  { %13456 = vmatmul.mubr.bf16.vlgmr.msra.gmra.mrb[56].mxu0 %v20859_v43 }
 0x664   :  { %13467 = vmatpush1.bf16.msra.mxu0 %v19628_v11  ;;  %13498 = vmatprep.mubr.bf16.mxu0 %v21474_v50  ;;  %v19678_v11 = vld [vmem:[%s25007_s3 + $0x1b24] ss:$48 sps:$4 sm:$0xff]  }
 0x665   :  { %13696 = vmatpush1.bf16.msra.mxu1 %v19625_v63  ;;  %13468 = vmatprep.subr.bf16.mxu0 %v19636_v39  ;;  %v19675_v63 = vld [vmem:[%s25007_s3 + $0x17cc] ss:$48 sps:$4 sm:$0xff]   ;;  %v19676_v39 = vld [vmem:[%s25007_s3 + $0x1b20] ss:$48 sps:$4 sm:$0xff]  }
 0x666   :  { %13697 = vmatprep.subr.bf16.mxu1 %v19633_v19  ;;  %v19673_v19 = vld [vmem:[%s25007_s3 + $0x17c8] ss:$48 sps:$4 sm:$0xff]  }
 0x668   :  { %13469 = vmatpush1.bf16.msra.mxu0 %v19634_v29  ;;  %v19684_v29 = vld [vmem:[%s25007_s3 + $0x1b84] ss:$48 sps:$4 sm:$0xff]  }
 0x669   :  { %13698 = vmatpush1.bf16.msra.mxu1 %v19631_v15  ;;  %13470 = vmatprep.subr.bf16.mxu0 %v19642_v55  ;;  %v19681_v15 = vld [vmem:[%s25007_s3 + $0x182c] ss:$48 sps:$4 sm:$0xff]   ;;  %v19682_v55 = vld [vmem:[%s25007_s3 + $0x1b80] ss:$48 sps:$4 sm:$0xff]  }
 0x66a   :  { %13699 = vmatprep.subr.bf16.mxu1 %v19639_v59  ;;  %v19679_v59 = vld [vmem:[%s25007_s3 + $0x1828] ss:$48 sps:$4 sm:$0xff]  }
 0x66c   :  { %13471 = vmatpush1.bf16.msra.mxu0 %v19640_v48  ;;  %v19690_v48 = vld [vmem:[%s25007_s3 + $0x1be4] ss:$48 sps:$4 sm:$0xff]  }
 0x66d   :  { %13700 = vmatpush1.bf16.msra.mxu1 %v19637_v9  ;;  %13472 = vmatprep.subr.bf16.mxu0 %v19648_v57  ;;  %v19687_v9 = vld [vmem:[%s25007_s3 + $0x188c] ss:$48 sps:$4 sm:$0xff]   ;;  %v19688_v57 = vld [vmem:[%s25007_s3 + $0x1be0] ss:$48 sps:$4 sm:$0xff]  }
 0x66e   :  { %13701 = vmatprep.subr.bf16.mxu1 %v19645_v16  ;;  %v19685_v16 = vld [vmem:[%s25007_s3 + $0x1888] ss:$48 sps:$4 sm:$0xff]  }
 0x670   :  { %13473 = vmatpush1.bf16.msra.mxu0 %v19646_v10  ;;  %v19694_v10 = vld [vmem:[%s25007_s3 + $0x1c40] ss:$48 sps:$4 sm:$0xff]  }
 0x671   :  { %13702 = vmatpush1.bf16.msra.mxu1 %v19643_v28  ;;  %13474 = vmatprep.subr.bf16.mxu0 %v19654_v26  ;;  %v19693_v28 = vld [vmem:[%s25007_s3 + $0x18ec] ss:$48 sps:$4 sm:$0xff]   ;;  %v19702_v26 = vld [vmem:[%s25007_s3 + $0x1ca4] ss:$48 sps:$4 sm:$0xff]  }
 0x672   :  { %13703 = vmatprep.subr.bf16.mxu1 %v19651_v12  ;;  %v19699_v12 = vld [vmem:[%s25007_s3 + $0x194c] ss:$48 sps:$4 sm:$0xff]  }
 0x674   :  { %13475 = vmatpush1.bf16.msra.mxu0 %v19652_v25  ;;  %v19700_v25 = vld [vmem:[%s25007_s3 + $0x1ca0] ss:$48 sps:$4 sm:$0xff]  }
 0x675   :  { %13704 = vmatpush1.bf16.msra.mxu1 %v19649_v46  ;;  %13476 = vmatprep.subr.bf16.mxu0 %v19660_v31  ;;  %v19697_v46 = vld [vmem:[%s25007_s3 + $0x1948] ss:$48 sps:$4 sm:$0xff]   ;;  %v19708_v31 = vld [vmem:[%s25007_s3 + $0x1d04] ss:$48 sps:$4 sm:$0xff]  }
 0x676   :  { %13705 = vmatprep.subr.bf16.mxu1 %v19657_v32  ;;  %v19705_v32 = vld [vmem:[%s25007_s3 + $0x19ac] ss:$48 sps:$4 sm:$0xff]  }
 0x678   :  { %13477 = vmatpush1.bf16.msra.mxu0 %v19658_v21  ;;  %v19706_v21 = vld [vmem:[%s25007_s3 + $0x1d00] ss:$48 sps:$4 sm:$0xff]  }
 0x679   :  { %13706 = vmatpush1.bf16.msra.mxu1 %v19655_v33  ;;  %13478 = vmatprep.subr.bf16.mxu0 %v19666_v5  ;;  %v19703_v33 = vld [vmem:[%s25007_s3 + $0x19a8] ss:$48 sps:$4 sm:$0xff]   ;;  %v19714_v5 = vld [vmem:[%s25007_s3 + $0x1d64] ss:$48 sps:$4 sm:$0xff]  }
 0x67a   :  { %13707 = vmatprep.subr.bf16.mxu1 %v19663_v41  ;;  %v19711_v41 = vld [vmem:[%s25007_s3 + $0x1a0c] ss:$48 sps:$4 sm:$0xff]  }
 0x67c   :  { %13479 = vmatpush1.bf16.msra.mxu0 %v19664_v13  ;;  %v19712_v13 = vld [vmem:[%s25007_s3 + $0x1d60] ss:$48 sps:$4 sm:$0xff]  }
 0x67d   :  { %13708 = vmatpush1.bf16.msra.mxu1 %v19661_v6  ;;  %13480 = vmatprep.subr.bf16.mxu0 %v19672_v14  ;;  %v19709_v6 = vld [vmem:[%s25007_s3 + $0x1a08] ss:$48 sps:$4 sm:$0xff]   ;;  %v19720_v14 = vld [vmem:[%s25007_s3 + $0x1dc4] ss:$48 sps:$4 sm:$0xff]  }
 0x67e   :  { %13709 = vmatprep.subr.bf16.mxu1 %v19669_v54  ;;  %v19717_v54 = vld [vmem:[%s25007_s3 + $0x1a6c] ss:$48 sps:$4 sm:$0xff]  }
 0x680   :  { %13481 = vmatpush1.bf16.msra.mxu0 %v19670_v22  ;;  %v19718_v22 = vld [vmem:[%s25007_s3 + $0x1dc0] ss:$48 sps:$4 sm:$0xff]  }
 0x681   :  { %13710 = vmatpush1.bf16.msra.mxu1 %v19667_v60  ;;  %13482 = vmatprep.subr.bf16.mxu0 %v19678_v11  ;;  %v19715_v60 = vld [vmem:[%s25007_s3 + $0x1a68] ss:$48 sps:$4 sm:$0xff]   ;;  %v19726_v11 = vld [vmem:[%s25007_s3 + $0x1e24] ss:$48 sps:$4 sm:$0xff]  }
 0x682   :  { %13711 = vmatprep.subr.bf16.mxu1 %v19675_v63  ;;  %v19723_v63 = vld [vmem:[%s25007_s3 + $0x1acc] ss:$48 sps:$4 sm:$0xff]  }
 0x684   :  { %13483 = vmatpush1.bf16.msra.mxu0 %v19676_v39  ;;  %v19724_v39 = vld [vmem:[%s25007_s3 + $0x1e20] ss:$48 sps:$4 sm:$0xff]  }
 0x685   :  { %13712 = vmatpush1.bf16.msra.mxu1 %v19673_v19  ;;  %13484 = vmatprep.subr.bf16.mxu0 %v19684_v29  ;;  %v19721_v19 = vld [vmem:[%s25007_s3 + $0x1ac8] ss:$48 sps:$4 sm:$0xff]   ;;  %v19732_v29 = vld [vmem:[%s25007_s3 + $0x1e84] ss:$48 sps:$4 sm:$0xff]  }
 0x686   :  { %13724 = vmatprep.subr.bf16.mxu1 %v19681_v15  ;;  %v19729_v15 = vld [vmem:[%s25007_s3 + $0x1b2c] ss:$48 sps:$4 sm:$0xff]  }
 0x688   :  { %13714 = vmatmul.mubr.bf16.vlgmr.msra.gmra.mrb[72].mxu1 %v20859_v43  ;;  %13485 = vmatpush1.bf16.msra.mxu0 %v19682_v55  ;;  %v19696_v43 = vld [vmem:[%s25007_s3 + $0x1c44] ss:$48 sps:$4 sm:$0xff]   ;;  %v19730_v55 = vld [vmem:[%s25007_s3 + $0x1e80] ss:$48 sps:$4 sm:$0xff]  }
 0x689   :  { %13725 = vmatpush1.bf16.msra.mxu1 %v19679_v59  ;;  %13756 = vmatprep.mubr.bf16.mxu1 %v21474_v50  ;;  %v19691_v50 = vld [vmem:[%s25007_s3 + $0x18e8] ss:$48 sps:$4 sm:$0xff]  }
 0x68a   :  { %13726 = vmatprep.subr.bf16.mxu1 %v19687_v9  ;;  %13486 = vmatprep.subr.bf16.mxu0 %v19690_v48  ;;  %v19727_v59 = vld [vmem:[%s25007_s3 + $0x1b28] ss:$48 sps:$4 sm:$0xff]   ;;  %v19735_v9 = vld [vmem:[%s25007_s3 + $0x1b8c] ss:$48 sps:$4 sm:$0xff]   ;;  %v19738_v48 = vld [vmem:[%s25007_s3 + $0x1ee4] ss:$48 sps:$4 sm:$0xff]  }
 0x68c   :  { %13487 = vmatpush1.bf16.msra.mxu0 %v19688_v57  ;;  %v19736_v57 = vld [vmem:[%s25007_s3 + $0x1ee0] ss:$48 sps:$4 sm:$0xff]  }
 0x68d   :  { %13727 = vmatpush1.bf16.msra.mxu1 %v19685_v16  ;;  %13488 = vmatprep.subr.bf16.mxu0 %v19696_v43  ;;  %v19733_v16 = vld [vmem:[%s25007_s3 + $0x1b88] ss:$48 sps:$4 sm:$0xff]   ;;  %v19744_v43 = vld [vmem:[%s25007_s3 + $0x1f44] ss:$48 sps:$4 sm:$0xff]  }
 0x68e   :  { %13728 = vmatprep.subr.bf16.mxu1 %v19693_v28  ;;  %v19741_v28 = vld [vmem:[%s25007_s3 + $0x1bec] ss:$48 sps:$4 sm:$0xff]  }
 0x690   :  { %13489 = vmatpush1.bf16.msra.mxu0 %v19694_v10  ;;  %v19742_v10 = vld [vmem:[%s25007_s3 + $0x1f40] ss:$48 sps:$4 sm:$0xff]  }
 0x691   :  { %13729 = vmatpush1.bf16.msra.mxu1 %v19691_v50  ;;  %13490 = vmatprep.subr.bf16.mxu0 %v19702_v26  ;;  %v19739_v50 = vld [vmem:[%s25007_s3 + $0x1be8] ss:$48 sps:$4 sm:$0xff]   ;;  %v19750_v26 = vld [vmem:[%s25007_s3 + $0x1fa4] ss:$48 sps:$4 sm:$0xff]  }
 0x692   :  { %13730 = vmatprep.subr.bf16.mxu1 %v19699_v12  ;;  %v19747_v12 = vld [vmem:[%s25007_s3 + $0x1c4c] ss:$48 sps:$4 sm:$0xff]  }
 0x694   :  { %13491 = vmatpush1.bf16.msra.mxu0 %v19700_v25  ;;  %v19748_v25 = vld [vmem:[%s25007_s3 + $0x1fa0] ss:$48 sps:$4 sm:$0xff]  }
 0x695   :  { %13731 = vmatpush1.bf16.msra.mxu1 %v19697_v46  ;;  %13492 = vmatprep.subr.bf16.mxu0 %v19708_v31  ;;  %v19745_v46 = vld [vmem:[%s25007_s3 + $0x1c48] ss:$48 sps:$4 sm:$0xff]   ;;  %v19756_v31 = vld [vmem:[%s25007_s3 + $0x2004] ss:$48 sps:$4 sm:$0xff]  }
 0x696   :  { %13732 = vmatprep.subr.bf16.mxu1 %v19705_v32  ;;  %v19753_v32 = vld [vmem:[%s25007_s3 + $0x1cac] ss:$48 sps:$4 sm:$0xff]  }
 0x698   :  { %13493 = vmatpush1.bf16.msra.mxu0 %v19706_v21  ;;  %v19754_v21 = vld [vmem:[%s25007_s3 + $0x2000] ss:$48 sps:$4 sm:$0xff]  }
 0x699   :  { %13733 = vmatpush1.bf16.msra.mxu1 %v19703_v33  ;;  %13494 = vmatprep.subr.bf16.mxu0 %v19714_v5  ;;  %v19751_v33 = vld [vmem:[%s25007_s3 + $0x1ca8] ss:$48 sps:$4 sm:$0xff]   ;;  %v19762_v5 = vld [vmem:[%s25007_s3 + $0x2064] ss:$48 sps:$4 sm:$0xff]  }
 0x69a   :  { %13734 = vmatprep.subr.bf16.mxu1 %v19711_v41  ;;  %v19759_v41 = vld [vmem:[%s25007_s3 + $0x1d0c] ss:$48 sps:$4 sm:$0xff]  }
 0x69c   :  { %13495 = vmatpush1.bf16.msra.mxu0 %v19712_v13  ;;  %v19760_v13 = vld [vmem:[%s25007_s3 + $0x2060] ss:$48 sps:$4 sm:$0xff]  }
 0x69d   :  { %13735 = vmatpush1.bf16.msra.mxu1 %v19709_v6  ;;  %13496 = vmatprep.subr.bf16.mxu0 %v19720_v14  ;;  %v19757_v6 = vld [vmem:[%s25007_s3 + $0x1d08] ss:$48 sps:$4 sm:$0xff]   ;;  %v19768_v14 = vld [vmem:[%s25007_s3 + $0x20c4] ss:$48 sps:$4 sm:$0xff]  }
 0x69e   :  { %13736 = vmatprep.subr.bf16.mxu1 %v19717_v54  ;;  %v19765_v54 = vld [vmem:[%s25007_s3 + $0x1d6c] ss:$48 sps:$4 sm:$0xff]  }
 0x6a0   :  { %13497 = vmatpush1.bf16.msra.mxu0 %v19718_v22  ;;  %v19766_v22 = vld [vmem:[%s25007_s3 + $0x20c0] ss:$48 sps:$4 sm:$0xff]  }
 0x6a1   :  { %13737 = vmatpush1.bf16.msra.mxu1 %v19715_v60  ;;  %13509 = vmatprep.subr.bf16.mxu0 %v19726_v11  ;;  %v19763_v60 = vld [vmem:[%s25007_s3 + $0x1d68] ss:$48 sps:$4 sm:$0xff]   ;;  %v19774_v11 = vld [vmem:[%s25007_s3 + $0x2124] ss:$48 sps:$4 sm:$0xff]  }
 0x6a2   :  { %13738 = vmatprep.subr.bf16.mxu1 %v19723_v63  ;;  %v19771_v63 = vld [vmem:[%s25007_s3 + $0x1dcc] ss:$48 sps:$4 sm:$0xff]  }
 0x6a3   :  { %13499 = vmatmul.mubr.bf16.vlgmr.msra.gmra.mrb[56].mxu0 %v21466_v30 }
 0x6a4   :  { %13510 = vmatpush1.bf16.msra.mxu0 %v19724_v39  ;;  %16437 = vmatprep.mubr.msk.bf16.mxu0 %vm12258_vm1, %v21604_v58  ;;  %v19772_v39 = vld [vmem:[%s25007_s3 + $0x2120] ss:$48 sps:$4 sm:$0xff]  }
 0x6a5   :  { %13739 = vmatpush1.bf16.msra.mxu1 %v19721_v19  ;;  %13511 = vmatprep.subr.bf16.mxu0 %v19732_v29  ;;  %v19769_v19 = vld [vmem:[%s25007_s3 + $0x1dc8] ss:$48 sps:$4 sm:$0xff]   ;;  %v19780_v29 = vld [vmem:[%s25007_s3 + $0x2184] ss:$48 sps:$4 sm:$0xff]  }
 0x6a6   :  { %13740 = vmatprep.subr.bf16.mxu1 %v19729_v15  ;;  %v19777_v15 = vld [vmem:[%s25007_s3 + $0x1e2c] ss:$48 sps:$4 sm:$0xff]  }
 0x6a8   :  { %13512 = vmatpush1.bf16.msra.mxu0 %v19730_v55  ;;  %v13838_v55 = vld [vmem:[%s25009_s5 + $0x20] sm:$0xff] }
 0x6a9   :  { %13741 = vmatpush1.bf16.msra.mxu1 %v19727_v59  ;;  %13513 = vmatprep.subr.bf16.mxu0 %v19738_v48  ;;  %v13835_v59 = vld [vmem:[%s25009_s5 + $0x8] sm:$0xff]  ;;  %v19778_v48 = vld [vmem:[%s25007_s3 + $0x2180] ss:$48 sps:$4 sm:$0xff]  }
 0x6aa   :  { %13742 = vmatprep.subr.bf16.mxu1 %v19735_v9  ;;  %v19775_v9 = vld [vmem:[%s25007_s3 + $0x1e28] ss:$48 sps:$4 sm:$0xff]  }
 0x6ac   :  { %13514 = vmatpush1.bf16.msra.mxu0 %v19736_v57  ;;  %v16537_v57 = vpack.c.bf16 %v13838_v55, %v13835_v59  ;;  %v19790_v59 = vld [vmem:[%s25007_s3 + $0x1fa8] ss:$48 sps:$4 sm:$0xff]   ;;  %v19795_v55 = vld [vmem:[%s25007_s3 + $0x200c] ss:$48 sps:$4 sm:$0xff]  }
 0x6ad   :  { %13743 = vmatpush1.bf16.msra.mxu1 %v19733_v16  ;;  %13515 = vmatprep.subr.bf16.mxu0 %v19744_v43  ;;  %v19783_v16 = vld [vmem:[%s25007_s3 + $0x1e8c] ss:$48 sps:$4 sm:$0xff]  }
 0x6ae   :  { %13744 = vmatprep.subr.bf16.mxu1 %v19741_v28  ;;  %v13834_v28 = vld [vmem:[%s25009_s5] sm:$0xff]  ;;  %v13837_v43 = vld [vmem:[%s25009_s5 + $0x18] sm:$0xff] }
 0x6b0   :  { %13516 = vmatpush1.bf16.msra.mxu0 %v19742_v10  ;;  %v13844_v10 = vld [vmem:[%s25009_s5 + $0x50] sm:$0xff] }
 0x6b1   :  { %13745 = vmatpush1.bf16.msra.mxu1 %v19739_v50  ;;  %13517 = vmatprep.subr.bf16.mxu0 %v19750_v26  ;;  %v13841_v50 = vld [vmem:[%s25009_s5 + $0x38] sm:$0xff]  ;;  %v16539_v26 = vpack.c.bf16 %v13837_v43, %v13834_v28 }
 0x6b2   :  { %13746 = vmatprep.subr.bf16.mxu1 %v19747_v12  ;;  %v19781_v12 = vld [vmem:[%s25007_s3 + $0x1e88] ss:$48 sps:$4 sm:$0xff]   ;;  %v19798_v43 = vld [vmem:[%s25007_s3 + $0x206c] ss:$48 sps:$4 sm:$0xff]  }
 0x6b3   :  { %v19793_v28 = vld [vmem:[%s25007_s3 + $0x2008] ss:$48 sps:$4 sm:$0xff]  }
 0x6b4   :  { %13518 = vmatpush1.bf16.msra.mxu0 %v19748_v25  ;;  %v13840_v25 = vld [vmem:[%s25009_s5 + $0x30] sm:$0xff] }
 0x6b5   :  { %13747 = vmatpush1.bf16.msra.mxu1 %v19745_v46  ;;  %13519 = vmatprep.subr.bf16.mxu0 %v19756_v31  ;;  %v16541_v46 = vpack.c.bf16 %v13844_v10, %v13841_v50  ;;  %v13850_v31 = vld [vmem:[%s25009_s5 + $0x80] sm:$0xff]  ;;  %v19796_v10 = vld [vmem:[%s25007_s3 + $0x2068] ss:$48 sps:$4 sm:$0xff]  }
 0x6b6   :  { %13748 = vmatprep.subr.bf16.mxu1 %v19753_v32  ;;  %v13847_v32 = vld [vmem:[%s25009_s5 + $0x68] sm:$0xff] }
 0x6b8   :  { %13520 = vmatpush1.bf16.msra.mxu0 %v19754_v21  ;;  %v19789_v21 = vld [vmem:[%s25007_s3 + $0x1f4c] ss:$48 sps:$4 sm:$0xff]  }
 0x6b9   :  { %13749 = vmatpush1.bf16.msra.mxu1 %v19751_v33  ;;  %13521 = vmatprep.subr.bf16.mxu0 %v19762_v5  ;;  %v19784_v33 = vld [vmem:[%s25007_s3 + $0x1ee8] ss:$48 sps:$4 sm:$0xff]   ;;  %v16545_v5 = vpack.c.bf16 %v13850_v31, %v13847_v32  ;;  %v13868_v31 = vld [vmem:[%s25009_s5 + $0x110] sm:$0xff] }
 0x6ba   :  { %13750 = vmatprep.subr.bf16.mxu1 %v19759_v41  ;;  %v13865_v32 = vld [vmem:[%s25009_s5 + $0xf8] sm:$0xff] }
 0x6bc   :  { %13522 = vmatpush1.bf16.msra.mxu0 %v19760_v13  ;;  %v13849_v13 = vld [vmem:[%s25009_s5 + $0x78] sm:$0xff] }
 0x6bd   :  { %13751 = vmatpush1.bf16.msra.mxu1 %v19757_v6  ;;  %13523 = vmatprep.subr.bf16.mxu0 %v19768_v14  ;;  %v13846_v6 = vld [vmem:[%s25009_s5 + $0x60] sm:$0xff]  ;;  %v13856_v14 = vld [vmem:[%s25009_s5 + $0xb0] sm:$0xff] }
 0x6be   :  { %13752 = vmatprep.subr.bf16.mxu1 %v19765_v54  ;;  %v13853_v54 = vld [vmem:[%s25009_s5 + $0x98] sm:$0xff] }
 0x6c0   :  { %13524 = vmatpush1.bf16.msra.mxu0 %v19766_v22  ;;  %v19792_v22 = vld [vmem:[%s25007_s3 + $0x1fac] ss:$48 sps:$4 sm:$0xff]  }
 0x6c1   :  { %13753 = vmatpush1.bf16.msra.mxu1 %v19763_v60  ;;  %13525 = vmatprep.subr.bf16.mxu0 %v19774_v11  ;;  %v19787_v60 = vld [vmem:[%s25007_s3 + $0x1f48] ss:$48 sps:$4 sm:$0xff]   ;;  %v16549_v11 = vpack.c.bf16 %v13856_v14, %v13853_v54  ;;  %v13870_v54 = vld [vmem:[%s25009_s5 + $0x120] sm:$0xff] }
 0x6c2   :  { %13754 = vmatprep.subr.bf16.mxu1 %v19771_v63  ;;  %v16547_v63 = vpack.c.bf16 %v13849_v13, %v13846_v6  ;;  %v13874_v6 = vld [vmem:[%s25009_s5 + $0x140] sm:$0xff]  ;;  %v13873_v14 = vld [vmem:[%s25009_s5 + $0x138] sm:$0xff] }
 0x6c4   :  { %13526 = vmatpush1.bf16.msra.mxu0 %v19772_v39  ;;  %v13855_v39 = vld [vmem:[%s25009_s5 + $0xa8] sm:$0xff] }
 0x6c5   :  { %13755 = vmatpush1.bf16.msra.mxu1 %v19769_v19  ;;  %13527 = vmatprep.subr.bf16.mxu0 %v19780_v29  ;;  %v13852_v19 = vld [vmem:[%s25009_s5 + $0x90] sm:$0xff]  ;;  %v13862_v29 = vld [vmem:[%s25009_s5 + $0xe0] sm:$0xff] }
 0x6c6   :  { %13767 = vmatprep.subr.bf16.mxu1 %v19777_v15  ;;  %v13859_v15 = vld [vmem:[%s25009_s5 + $0xc8] sm:$0xff] }
 0x6c8   :  { %13757 = vmatmul.mubr.bf16.vlgmr.msra.gmra.mrb[72].mxu1 %v21466_v30  ;;  %13528 = vmatpush1.bf16.msra.mxu0 %v19778_v48  ;;  %v19786_v30 = vld [vmem:[%s25007_s3 + $0x1eec] ss:$48 sps:$4 sm:$0xff]   ;;  %v16553_v48 = vpack.c.bf16 %v13862_v29, %v13859_v15 }
 0x6c9   :  { %13768 = vmatpush1.bf16.msra.mxu1 %v19775_v9  ;;  %16438 = vmatprep.mubr.msk.bf16.mxu1 %vm12258_vm1, %v21604_v58  ;;  %v13843_v58 = vld [vmem:[%s25009_s5 + $0x48] sm:$0xff]  ;;  %v16551_v9 = vpack.c.bf16 %v13855_v39, %v13852_v19  ;;  %v13876_v19 = vld [vmem:[%s25009_s5 + $0x150] sm:$0xff] }
 0x6ca   :  { %13769 = vmatprep.subr.bf16.mxu1 %v19783_v16  ;;  %16538 = vmatprep.subr.bf16.mxu0 %v16537_v57  ;;  %v16543_v41 = vpack.c.bf16 %v13843_v58, %v13840_v25  ;;  %v13858_v16 = vld [vmem:[%s25009_s5 + $0xc0] sm:$0xff]  ;;  %v13861_v57 = vld [vmem:[%s25009_s5 + $0xd8] sm:$0xff]  ;;  %v13879_v39 = vld [vmem:[%s25009_s5 + $0x168] sm:$0xff] }
 0x6cb   :  { %13542 = vmatmul.mubr.bf16.vlgmr.msra.gmra.mrb[56].mxu0 %v21596_v49  ;;  %v16555_v50 = vpack.c.bf16 %v13861_v57, %v13858_v16  ;;  %v19807_v25 = vld [vmem:[%s25007_s3 + $0x218c] ss:$48 sps:$4 sm:$0xff]   ;;  %v19805_v58 = vld [vmem:[%s25007_s3 + $0x2188] ss:$48 sps:$4 sm:$0xff]   ;;  %v16567_v15 = vpack.c.bf16 %v13879_v39, %v13876_v19  ;;  %v13882_v16 = vld [vmem:[%s25009_s5 + $0x180] sm:$0xff] }
 0x6cc   :  { %16540 = vmatpush1.bf16.msra.mxu0 %v16539_v26  ;;  %v19804_v26 = vld [vmem:[%s25007_s3 + $0x212c] ss:$48 sps:$4 sm:$0xff]   ;;  %v13848_v19 = vld [vmem:[%s25009_s5 + $0x70] sm:$0xff] }
 0x6cd   :  { %13770 = vmatpush1.bf16.msra.mxu1 %v19781_v12  ;;  %16542 = vmatprep.subr.bf16.mxu0 %v16541_v46  ;;  %v19801_v12 = vld [vmem:[%s25007_s3 + $0x20cc] ss:$48 sps:$4 sm:$0xff]   ;;  %v19802_v46 = vld [vmem:[%s25007_s3 + $0x2128] ss:$48 sps:$4 sm:$0xff]  }
 0x6ce   :  { %13771 = vmatprep.subr.bf16.mxu1 %v19786_v30  ;;  %v19799_v30 = vld [vmem:[%s25007_s3 + $0x20c8] ss:$48 sps:$4 sm:$0xff]  }
 0x6cf   :  { %v13883_v29 = vld [vmem:[%s25009_s5 + $0x188] sm:$0xff]  ;;  %v13885_v57 = vld [vmem:[%s25009_s5 + $0x198] sm:$0xff] }
 0x6d0   :  { %16544 = vmatpush1.bf16.msra.mxu0 %v16543_v41  ;;  %v13867_v41 = vld [vmem:[%s25009_s5 + $0x108] sm:$0xff] }
 0x6d1   :  { %13772 = vmatpush1.bf16.msra.mxu1 %v19784_v33  ;;  %16546 = vmatprep.subr.bf16.mxu0 %v16545_v5  ;;  %v16557_v33 = vpack.c.bf16 %v13868_v31, %v13865_v32  ;;  %v13888_v31 = vld [vmem:[%s25009_s5 + $0x1b0] sm:$0xff]  ;;  %v13851_v39 = vld [vmem:[%s25009_s5 + $0x88] sm:$0xff] }
 0x6d2   :  { %13773 = vmatprep.subr.bf16.mxu1 %v19789_v21  ;;  %v13864_v21 = vld [vmem:[%s25009_s5 + $0xf0] sm:$0xff] }
 0x6d3   :  { %v16559_v5 = vpack.c.bf16 %v13867_v41, %v13864_v21  ;;  %v13842_v21 = vld [vmem:[%s25009_s5 + $0x40] sm:$0xff] }
 0x6d4   :  { %16548 = vmatpush1.bf16.msra.mxu0 %v16547_v63  ;;  %v13880_v63 = vld [vmem:[%s25009_s5 + $0x170] sm:$0xff] }
 0x6d5   :  { %13774 = vmatpush1.bf16.msra.mxu1 %v19787_v60  ;;  %16550 = vmatprep.subr.bf16.mxu0 %v16549_v11  ;;  %v16563_v60 = vpack.c.bf16 %v13873_v14, %v13870_v54  ;;  %v13896_v14 = vld [vmem:[%s25009_s5 + $0x1f0] sm:$0xff] }
 0x6d6   :  { %13775 = vmatprep.subr.bf16.mxu1 %v19792_v22  ;;  %v13877_v22 = vld [vmem:[%s25009_s5 + $0x158] sm:$0xff] }
 0x6d7   :  { %v16565_v11 = vpack.c.bf16 %v13880_v63, %v13877_v22  ;;  %v13894_v22 = vld [vmem:[%s25009_s5 + $0x1e0] sm:$0xff] }
 0x6d8   :  { %16552 = vmatpush1.bf16.msra.mxu0 %v16551_v9 }
 0x6d9   :  { %13776 = vmatpush1.bf16.msra.mxu1 %v19790_v59  ;;  %16554 = vmatprep.subr.bf16.mxu0 %v16553_v48  ;;  %v13886_v59 = vld [vmem:[%s25009_s5 + $0x1a0] sm:$0xff]  ;;  %v13887_v48 = vld [vmem:[%s25009_s5 + $0x1a8] sm:$0xff] }
 0x6da   :  { %13777 = vmatprep.subr.bf16.mxu1 %v19795_v55  ;;  %v13884_v55 = vld [vmem:[%s25009_s5 + $0x190] sm:$0xff]  ;;  %v16569_v9 = vpack.c.bf16 %v13886_v59, %v13883_v29  ;;  %v13902_v59 = vld [vmem:[%s25009_s5 + $0x220] sm:$0xff] }
 0x6db   :  { %v13904_v29 = vld [vmem:[%s25009_s5 + $0x230] sm:$0xff] }
 0x6dc   :  { %16556 = vmatpush1.bf16.msra.mxu0 %v16555_v50  ;;  %v13836_v50 = vld [vmem:[%s25009_s5 + $0x10] sm:$0xff] }
 0x6dd   :  { %13778 = vmatpush1.bf16.msra.mxu1 %v19793_v28  ;;  %16558 = vmatprep.subr.bf16.mxu0 %v16557_v33  ;;  %v16633_v28 = vpack.c.bf16 %v13887_v48, %v13884_v55  ;;  %v13891_v33 = vld [vmem:[%s25009_s5 + $0x1c8] sm:$0xff]  ;;  %v13905_v48 = vld [vmem:[%s25009_s5 + $0x238] sm:$0xff] }
 0x6de   :  { %13779 = vmatprep.subr.bf16.mxu1 %v19798_v43  ;;  %v16571_v43 = vpack.c.bf16 %v13885_v57, %v13882_v16  ;;  %v16575_v41 = vpack.c.bf16 %v13891_v33, %v13888_v31  ;;  %v13900_v16 = vld [vmem:[%s25009_s5 + $0x210] sm:$0xff]  ;;  %v13903_v57 = vld [vmem:[%s25009_s5 + $0x228] sm:$0xff]  ;;  %v13909_v31 = vld [vmem:[%s25009_s5 + $0x258] sm:$0xff] }
 0x6e0   :  { %16560 = vmatpush1.bf16.msra.mxu0 %v16559_v5  ;;  %v13845_v5 = vld [vmem:[%s25009_s5 + $0x58] sm:$0xff] }
 0x6e1   :  { %13780 = vmatpush1.bf16.msra.mxu1 %v19796_v10  ;;  %v13839_v10 = vld [vmem:[%s25009_s5 + $0x28] sm:$0xff] }
 0x6e2   :  { %13781 = vmatprep.subr.bf16.mxu1 %v19801_v12  ;;  %v13889_v12 = vld [vmem:[%s25009_s5 + $0x1b8] sm:$0xff] }
 0x6e5   :  { %13782 = vmatpush1.bf16.msra.mxu1 %v19799_v30  ;;  %v16635_v30 = vpack.c.bf16 %v13839_v10, %v13836_v50  ;;  %v13854_v50 = vld [vmem:[%s25009_s5 + $0xa0] sm:$0xff]  ;;  %v13857_v10 = vld [vmem:[%s25009_s5 + $0xb8] sm:$0xff] }
 0x6e6   :  { %13783 = vmatprep.subr.bf16.mxu1 %v19804_v26  ;;  %v13892_v26 = vld [vmem:[%s25009_s5 + $0x1d0] sm:$0xff] }
 0x6e9   :  { %13784 = vmatpush1.bf16.msra.mxu1 %v19802_v46  ;;  %v13890_v46 = vld [vmem:[%s25009_s5 + $0x1c0] sm:$0xff] }
 0x6ea   :  { %13785 = vmatprep.subr.bf16.mxu1 %v19807_v25  ;;  %v13893_v25 = vld [vmem:[%s25009_s5 + $0x1d8] sm:$0xff] }
 0x6eb   :  { %v16637_v32 = vpack.c.bf16 %v13893_v25, %v13890_v46  ;;  %v13911_v46 = vld [vmem:[%s25009_s5 + $0x268] sm:$0xff]  ;;  %v16583_v25 = vpack.c.bf16 %v13903_v57, %v13900_v16 }
 0x6ec   :  { %v13923_v57 = vld [vmem:[%s25009_s5 + $0x2c8] sm:$0xff] }
 0x6ed   :  { %13786 = vmatpush1.bf16.msra.mxu1 %v19805_v58  ;;  %v16573_v58 = vpack.c.bf16 %v13892_v26, %v13889_v12  ;;  %v13907_v12 = vld [vmem:[%s25009_s5 + $0x248] sm:$0xff]  ;;  %v13908_v26 = vld [vmem:[%s25009_s5 + $0x250] sm:$0xff] }
 0x6ee   :  { %16634 = vmatprep.subr.bf16.mxu1 %v16633_v28 }
 0x6f0   :  { %13800 = vmatmul.mubr.bf16.vlgmr.msra.gmra.mrb[72].mxu1 %v21596_v49  ;;  %v13871_v49 = vld [vmem:[%s25009_s5 + $0x128] sm:$0xff] }
 0x6f1   :  { %v16561_v13 = vpack.c.bf16 %v13874_v6, %v13871_v49  ;;  %16636 = vmatpush3.bf16.msra.mxu1 %v16635_v30  ;;  %v13895_v49 = vld [vmem:[%s25009_s5 + $0x1e8] sm:$0xff]  ;;  %v13898_v6 = vld [vmem:[%s25009_s5 + $0x200] sm:$0xff] }
 0x6f2   :  { %16638 = vmatprep.subr.bf16.mxu1 %v16637_v32  ;;  %v16577_v54 = vpack.c.bf16 %v13898_v6, %v13895_v49  ;;  %v13910_v30 = vld [vmem:[%s25009_s5 + $0x260] sm:$0xff]  ;;  %v13913_v49 = vld [vmem:[%s25009_s5 + $0x278] sm:$0xff]  ;;  %v13916_v6 = vld [vmem:[%s25009_s5 + $0x290] sm:$0xff] }
 0x6f3   :  { %16562 = vmatprep.subr.bf16.mxu0 %v16561_v13  ;;  %v16639_v13 = vpack.c.bf16 %v13845_v5, %v13842_v21  ;;  %v13906_v32 = vld [vmem:[%s25009_s5 + $0x240] sm:$0xff]  ;;  %v16585_v33 = vpack.c.bf16 %v13910_v30, %v13907_v12  ;;  %v16649_v21 = vpack.c.bf16 %v13911_v46, %v13908_v26  ;;  %v13863_v5 = vld [vmem:[%s25009_s5 + $0xe8] sm:$0xff]  ;;  %v13872_v12 = vld [vmem:[%s25009_s5 + $0x130] sm:$0xff] }
 0x6f4   :  { %16564 = vmatpush1.bf16.msra.mxu0 %v16563_v60  ;;  %v13899_v60 = vld [vmem:[%s25009_s5 + $0x208] sm:$0xff]  ;;  %v13925_v46 = vld [vmem:[%s25009_s5 + $0x2d8] sm:$0xff] }
 0x6f5   :  { %16566 = vmatprep.subr.bf16.mxu0 %v16565_v11  ;;  %v16641_v63 = vpack.c.bf16 %v13899_v60, %v13896_v14  ;;  %v13897_v11 = vld [vmem:[%s25009_s5 + $0x1f8] sm:$0xff]  ;;  %16640 = vmatpush3.bf16.msra.mxu1 %v16639_v13  ;;  %v13914_v13 = vld [vmem:[%s25009_s5 + $0x280] sm:$0xff]  ;;  %v16587_v14 = vpack.c.bf16 %v13909_v31, %v13906_v32  ;;  %v13875_v30 = vld [vmem:[%s25009_s5 + $0x148] sm:$0xff] }
 0x6f6   :  { %v16579_v55 = vpack.c.bf16 %v13897_v11, %v13894_v22  ;;  %v13912_v22 = vld [vmem:[%s25009_s5 + $0x270] sm:$0xff]  ;;  %v16659_v26 = vpack.c.bf16 %v13875_v30, %v13872_v12  ;;  %v13929_v31 = vld [vmem:[%s25009_s5 + $0x2f8] sm:$0xff] }
 0x6f7   :  { %16642 = vmatprep.subr.bf16.mxu1 %v16641_v63  ;;  %v16589_v63 = vpack.c.bf16 %v13916_v6, %v13913_v49  ;;  %v13878_v49 = vld [vmem:[%s25009_s5 + $0x160] sm:$0xff]  ;;  %v13881_v6 = vld [vmem:[%s25009_s5 + $0x178] sm:$0xff] }
 0x6f8   :  { %16568 = vmatpush1.bf16.msra.mxu0 %v16567_v15  ;;  %v13901_v15 = vld [vmem:[%s25009_s5 + $0x218] sm:$0xff] }
 0x6f9   :  { %16570 = vmatprep.subr.bf16.mxu0 %v16569_v9  ;;  %v16643_v9 = vpack.c.bf16 %v13851_v39, %v13848_v19  ;;  %v16581_v28 = vpack.c.bf16 %v13904_v29, %v13901_v15  ;;  %v13915_v19 = vld [vmem:[%s25009_s5 + $0x288] sm:$0xff]  ;;  %v13866_v39 = vld [vmem:[%s25009_s5 + $0x100] sm:$0xff]  ;;  %v13869_v15 = vld [vmem:[%s25009_s5 + $0x118] sm:$0xff] }
 0x6fa   :  { %v16591_v29 = vpack.c.bf16 %v13915_v19, %v13912_v22  ;;  %v6795_v19 = vld [vmem:[%s25008_s4 + $0x8] sm:$0xf] }
 0x6fb   :  { %16644 = vmatpush3.bf16.msra.mxu1 %v16643_v9  ;;  %v13922_v9 = vld [vmem:[%s25009_s5 + $0x2c0] sm:$0xff]  ;;  %v6841_v30 = vrot.slane %v6795_v19, %v20433_v47 }
 0x6fc   :  { %16572 = vmatpush1.bf16.msra.mxu0 %v16571_v43  ;;  %v16645_v43 = vpack.c.bf16 %v13905_v48, %v13902_v59  ;;  %v16655_v59 = vpack.c.bf16 %v13869_v15, %v13866_v39  ;;  %v13920_v48 = vld [vmem:[%s25009_s5 + $0x2b0] sm:$0xff]  ;;  %v19878_v39 = vld [vmem:[%s25008_s4] sm:$0xff] }
 0x6fd   :  { %16574 = vmatprep.subr.bf16.mxu0 %v16573_v58  ;;  %v16647_v58 = vpack.c.bf16 %v13857_v10, %v13854_v50  ;;  %v16657_v50 = vpack.c.bf16 %v13923_v57, %v13920_v48  ;;  %v6825_v15 = vrot.slane %v19878_v39, %v5620_v2 }
 0x6fe   :  { %16646 = vmatprep.subr.bf16.mxu1 %v16645_v43  ;;  %v13921_v43 = vld [vmem:[%s25009_s5 + $0x2b8] sm:$0xff] }
 0x6ff   :  { %16648 = vmatpush3.bf16.msra.mxu1 %v16647_v58  ;;  %v13926_v58 = vld [vmem:[%s25009_s5 + $0x2e0] sm:$0xff] }
 0x700   :  { %16576 = vmatpush1.bf16.msra.mxu0 %v16575_v41  ;;  %v13860_v41 = vld [vmem:[%s25009_s5 + $0xd0] sm:$0xff]  ;;  %16650 = vmatprep.subr.bf16.mxu1 %v16649_v21  ;;  %v13927_v21 = vld [vmem:[%s25009_s5 + $0x2e8] sm:$0xff] }
 0x701   :  { %16578 = vmatprep.subr.bf16.mxu0 %v16577_v54  ;;  %v13917_v54 = vld [vmem:[%s25009_s5 + $0x298] sm:$0xff]  ;;  %v16651_v60 = vpack.c.bf16 %v13863_v5, %v13860_v41  ;;  %v16661_v41 = vpack.c.bf16 %v13929_v31, %v13926_v58 }
 0x702   :  { %v16653_v11 = vpack.c.bf16 %v13917_v54, %v13914_v13  ;;  %v16663_v13 = vpack.c.bf16 %v13881_v6, %v13878_v49  ;;  %v13931_v54 = vld [vmem:[%s25009_s5 + $0x308] sm:$0xff]  ;;  %v13940_v49 = vld [vmem:[%s25009_s5 + $0x350] sm:$0xff]  ;;  %v13938_v6 = vld [vmem:[%s25009_s5 + $0x340] sm:$0xff] }
 0x703   :  { %16652 = vmatpush3.bf16.msra.mxu1 %v16651_v60  ;;  %v13932_v60 = vld [vmem:[%s25009_s5 + $0x310] sm:$0xff] }
 0x704   :  { %16580 = vmatpush1.bf16.msra.mxu0 %v16579_v55  ;;  %16654 = vmatprep.subr.bf16.mxu1 %v16653_v11  ;;  %v13919_v55 = vld [vmem:[%s25009_s5 + $0x2a8] sm:$0xff] }
 0x705   :  { %16582 = vmatprep.subr.bf16.mxu0 %v16581_v28  ;;  %v16593_v16 = vpack.c.bf16 %v13922_v9, %v13919_v55  ;;  %v13918_v28 = vld [vmem:[%s25009_s5 + $0x2a0] sm:$0xff]  ;;  %v16839_v9 = vadd.f32 %v23776_v56, %v6825_v15  ;;  %v6829_v56 = vrot.slane %v19878_v39, %v5624_v8 }
 0x706   :  { %v16595_v10 = vpack.c.bf16 %v13921_v43, %v13918_v28  ;;  %v16841_v28 = vadd.f32 %v23783_v1, %v6825_v15  ;;  %v6845_v1 = vrot.slane %v6795_v19, %v20436_v17  ;;  %v13930_v17 = vld [vmem:[%s25009_s5 + $0x300] sm:$0xff]  ;;  %v13945_v15 = vld [vmem:[%s25009_s5 + $0x378] sm:$0xff] }
 0x707   :  { %16656 = vmatpush3.bf16.msra.mxu1 %v16655_v59  ;;  %v16842_v34 = vadd.f32 %v23788_v20, %v6829_v56  ;;  %v13937_v20 = vld [vmem:[%s25009_s5 + $0x338] sm:$0xff]  ;;  %v13942_v39 = vld [vmem:[%s25009_s5 + $0x360] sm:$0xff] }
 0x708   :  { %16584 = vmatpush1.bf16.msra.mxu0 %v16583_v25  ;;  %16658 = vmatprep.subr.bf16.mxu1 %v16657_v50  ;;  %v13928_v25 = vld [vmem:[%s25009_s5 + $0x2f0] sm:$0xff] }
 0x709   :  { %16586 = vmatprep.subr.bf16.mxu0 %v16585_v33  ;;  %v16597_v32 = vpack.c.bf16 %v13928_v25, %v13925_v46  ;;  %v13924_v33 = vld [vmem:[%s25009_s5 + $0x2d0] sm:$0xff]  ;;  %v16840_v25 = vadd.f32 %v23781_v18, %v6829_v56  ;;  %v13933_v18 = vld [vmem:[%s25009_s5 + $0x318] sm:$0xff]  ;;  %v13959_v56 = vld [vmem:[%s25009_s5 + $0x3e8] sm:$0xff] }
 0x70a   :  { %v16599_v5 = vpack.c.bf16 %v13927_v21, %v13924_v33 }
 0x70b   :  { %16660 = vmatpush3.bf16.msra.mxu1 %v16659_v26  ;;  %v6833_v26 = vrot.slane %v6795_v19, %v20350_v40 }
 0x70c   :  { %16588 = vmatpush1.bf16.msra.mxu0 %v16587_v14  ;;  %16662 = vmatprep.subr.bf16.mxu1 %v16661_v41  ;;  %v13934_v14 = vld [vmem:[%s25009_s5 + $0x320] sm:$0xff] }
 0x70d   :  { %16590 = vmatprep.subr.bf16.mxu0 %v16589_v63  ;;  %v16601_v22 = vpack.c.bf16 %v13934_v14, %v13931_v54  ;;  %v13935_v63 = vld [vmem:[%s25009_s5 + $0x328] sm:$0xff] }
 0x70e   :  { %v24471_v11 = vpack.c.bf16 %v13935_v63, %v13932_v60 }
 0x70f   :  { %16664 = vmatpush3.bf16.msra.mxu1 %v16663_v13  ;;  %v13941_v13 = vld [vmem:[%s25009_s5 + $0x358] sm:$0xff] }
 0x710   :  { %16592 = vmatpush1.bf16.msra.mxu0 %v16591_v29  ;;  %16666 = vmatprep.subr.bf16.mxu1 %v24471_v11  ;;  %v6837_v29 = vrot.slane %v6795_v19, %v20353_v3  ;;  %v16669_v45 = vpack.c.bf16 %v13941_v13, %v13938_v6  ;;  %v16609_v19 = vpack.c.bf16 %v13946_v38, %v13943_v42  ;;  %v13973_v6 = vld [vmem:[%s25009_s5 + $0x458] sm:$0xff]  ;;  %v13976_v13 = vld [vmem:[%s25009_s5 + $0x470] sm:$0xff] }
 0x711   :  { %16594 = vmatprep.subr.bf16.mxu0 %v16593_v16 }
 0x714   :  { %16596 = vmatpush1.bf16.msra.mxu0 %v16595_v10 }
 0x715   :  { %16598 = vmatprep.subr.bf16.mxu0 %v16597_v32 }
 0x718   :  { %16600 = vmatpush1.bf16.msra.mxu0 %v16599_v5 }
 0x719   :  { %16602 = vmatprep.subr.bf16.mxu0 %v16601_v22  ;;  %v13936_v22 = vld [vmem:[%s25009_s5 + $0x330] sm:$0xff] }
 0x79e   :  { %v13543_v59 = vpop.f32.mrb[56].mxu0 }
 0x79f   :  { %v13545_v55 = vpop.f32.mrb[57].mxu0 }
 0x7a0   :  { %v16844_v48 = vadd.f32 %v13545_v55, %v6837_v29  ;;  %v13547_v16 = vpop.f32.mrb[58].mxu0  ;;  %v13950_v55 = vld [vmem:[%s25009_s5 + $0x3a0] sm:$0xff] }
 0x7a1   :  { %v13549_v57 = vpop.f32.mrb[59].mxu0  ;;  %v16845_v8 = vadd.f32 %v13547_v16, %v6833_v26  ;;  %v16611_v16 = vpack.c.bf16 %v13945_v15, %v13942_v39 }
 0x7a2   :  { %v13816_v43 = vmax.f32 %v16839_v9, %v16844_v48  ;;  %v16846_v50 = vadd.f32 %v13549_v57, %v6837_v29  ;;  %v13949_v29 = vld [vmem:[%s25009_s5 + $0x398] sm:$0xff] }
 0x7a3   :  { %v13953_v9 = vld [vmem:[%s25009_s5 + $0x3b8] sm:$0xff] }
 0x7a4   :  { %v13822_v10 = vmax.f32 %v13810_v7, %v13816_v43  ;;  %v13819_v12 = vmax.f32 %v16841_v28, %v16846_v50  ;;  %v16843_v7 = vadd.f32 %v13543_v59, %v6833_v26  ;;  %v13952_v59 = vld [vmem:[%s25009_s5 + $0x3b0] sm:$0xff]  ;;  %v16677_v28 = vpack.c.bf16 %v13953_v9, %v13950_v55  ;;  %v13951_v50 = vld [vmem:[%s25009_s5 + $0x3a8] sm:$0xff]  ;;  %v14316_v55 = vld [vmem:[%s25011_s7 + $0x58] sm:$0xff] }
 0x7a5   :  { %v16613_v57 = vpack.c.bf16 %v13952_v59, %v13949_v29  ;;  %v13948_v43 = vld [vmem:[%s25009_s5 + $0x390] sm:$0xff]  ;;  %v14309_v29 = vld [vmem:[%s25011_s7 + $0x20] sm:$0xff]  ;;  %v14314_v59 = vld [vmem:[%s25011_s7 + $0x48] sm:$0xff] }
 0x7a6   :  { %v24491_v2 = vmax.f32 %v13813_v24, %v13819_v12  ;;  %v13828_v14 = vmax.f32 %v13822_v10, 0.0  ;;  %v13955_v10 = vld [vmem:[%s25009_s5 + $0x3c8] sm:$0xff]  ;;  %v13958_v12 = vld [vmem:[%s25009_s5 + $0x3e0] sm:$0xff]  ;;  %v16615_v26 = vpack.c.bf16 %v13951_v50, %v13948_v43  ;;  %v16705_v9 = vpack.c.bf16 %v14316_v55, %v14314_v59 }
 0x7a7   :  { %v14317_v50 = vld [vmem:[%s25011_s7 + $0x60] sm:$0xff] }
 0x7a8   :  { %v13831_v63 = vmax.f32 %v24491_v2, 0.0  ;;  %v13956_v2 = vld [vmem:[%s25009_s5 + $0x3d0] sm:$0xff]  ;;  %v14369_v55 = vld [vmem:[%s25011_s7 + $0x200] sm:$0xff] }
 0x7c3   :  { %v13801_v46 = vpop.f32.mrb[72].mxu1 }
 0x7c4   :  { %v16847_v36 = vadd.f32 %v13801_v46, %v6841_v30  ;;  %v13803_v35 = vpop.f32.mrb[73].mxu1  ;;  %v16681_v46 = vpack.c.bf16 %v13959_v56, %v13956_v2  ;;  %v14324_v2 = vld [vmem:[%s25011_s7 + $0x98] sm:$0xff] }
 0x7c5   :  { %v16848_v58 = vadd.f32 %v13803_v35, %v6845_v1  ;;  %v13805_v32 = vpop.f32.mrb[74].mxu1  ;;  %v13961_v35 = vld [vmem:[%s25009_s5 + $0x3f8] sm:$0xff] }
 0x7c6   :  { %v13817_v23 = vmax.f32 %v16840_v25, %v16847_v36  ;;  %v16849_v24 = vadd.f32 %v13805_v32, %v6841_v30  ;;  %v13807_v61 = vpop.f32.mrb[75].mxu1  ;;  %v19907_v30 = vmov 0.0   ;;  %v13954_v25 = vld [vmem:[%s25009_s5 + $0x3c0] sm:$0xff]  ;;  %v13957_v36 = vld [vmem:[%s25009_s5 + $0x3d8] sm:$0xff] }
 0x7c7   :  { %v13818_v31 = vmax.f32 %v16843_v7, %v16848_v58  ;;  %v16850_v33 = vadd.f32 %v13807_v61, %v6845_v1  ;;  %v16617_v1 = vpack.c.bf16 %v13958_v12, %v13955_v10  ;;  %v13964_v7 = vld [vmem:[%s25009_s5 + $0x410] sm:$0xff]  ;;  %v13962_v58 = vld [vmem:[%s25009_s5 + $0x400] sm:$0xff]  ;;  %v13965_v32 = vld [vmem:[%s25009_s5 + $0x418] sm:$0xff] }
 0x7c8   :  { %v13820_v21 = vmax.f32 %v16842_v34, %v16849_v24  ;;  %v13823_v41 = vmax.f32 %v13811_v4, %v13817_v23  ;;  %v16603_v4 = vpack.c.bf16 %v13933_v18, %v13930_v17  ;;  %v16619_v34 = vpack.c.bf16 %v13957_v36, %v13954_v25  ;;  %v13960_v61 = vld [vmem:[%s25009_s5 + $0x3f0] sm:$0xff]  ;;  %v13971_v18 = vld [vmem:[%s25009_s5 + $0x448] sm:$0xff]  ;;  %v14328_v36 = vld [vmem:[%s25011_s7 + $0xb8] sm:$0xff] }
 0x7c9   :  { %v13821_v5 = vmax.f32 %v16845_v8, %v16850_v33  ;;  %v24524_v27 = vmax.f32 %v13812_v52, %v13818_v31  ;;  %v16605_v52 = vpack.c.bf16 %v13940_v49, %v13937_v20  ;;  %v16621_v23 = vpack.c.bf16 %v13964_v7, %v13961_v35  ;;  %v13963_v8 = vld [vmem:[%s25009_s5 + $0x408] sm:$0xff]  ;;  %v13970_v33 = vld [vmem:[%s25009_s5 + $0x440] sm:$0xff]  ;;  %v13968_v17 = vld [vmem:[%s25009_s5 + $0x430] sm:$0xff] }
 0x7ca   :  { %v13829_v37 = vmax.f32 %v13823_v41, 0.0  ;;  %v13826_v54 = vmax.f32 %v13814_v53, %v13820_v21  ;;  %v13947_v53 = vld [vmem:[%s25009_s5 + $0x388] sm:$0xff]  ;;  %v16685_v24 = vpack.c.bf16 %v13965_v32, %v13962_v58  ;;  %v16623_v21 = vpack.c.bf16 %v13963_v8, %v13960_v61  ;;  %v13969_v49 = vld [vmem:[%s25009_s5 + $0x438] sm:$0xff]  ;;  %v14319_v10 = vld [vmem:[%s25011_s7 + $0x70] sm:$0xff] }
 0x7cb   :  { %v24532_v60 = vmax.f32 %v13815_v62, %v13821_v5  ;;  %v16607_v62 = vpack.c.bf16 %v13939_v0, %v13936_v22  ;;  %v13830_v48 = vmax.f32 %v24524_v27, 0.0  ;;  %v13967_v31 = vld [vmem:[%s25009_s5 + $0x428] sm:$0xff]  ;;  %v16689_v20 = vpack.c.bf16 %v13971_v18, %v13968_v17  ;;  %v13966_v5 = vld [vmem:[%s25009_s5 + $0x420] sm:$0xff]  ;;  %v13972_v0 = vld [vmem:[%s25009_s5 + $0x450] sm:$0xff] }
 0x7cc   :  { %14059 = vmatprep.mubr.f32.mxu0 %v13829_v37  ;;  %14213 = vmatprep.mubr.f32.mxu1 %v13829_v37  ;;  %v13832_v44 = vmax.f32 %v13826_v54, 0.0  ;;  %v16625_v41 = vpack.c.bf16 %v13970_v33, %v13967_v31  ;;  %v13974_v37 = vld [vmem:[%s25009_s5 + $0x460] sm:$0xff]  ;;  %v16627_v54 = vpack.c.bf16 %v13969_v49, %v13966_v5  ;;  %v14318_v27 = vld [vmem:[%s25011_s7 + $0x68] sm:$0xff]  ;;  %v16711_v56 = vpack.c.bf16 %v14319_v10, %v14317_v50  ;;  %v14327_v32 = vld [vmem:[%s25011_s7 + $0xb0] sm:$0xff] }
 0x7cd   :  { %14060 = vmatmul.mubr.f32.vlgmr.msra.gmra.mrb[60].mxu0 %v13828_v14  ;;  %14214 = vmatmul.mubr.f32.vlgmr.msra.gmra.mrb[76].mxu1 %v13828_v14  ;;  %v16629_v14 = vpack.c.bf16 %v13976_v13, %v13973_v6  ;;  %v13833_v39 = vmax.f32 %v24532_v60, 0.0  ;;  %v14322_v12 = vld [vmem:[%s25011_s7 + $0x88] sm:$0xff]  ;;  %v14325_v58 = vld [vmem:[%s25011_s7 + $0xa0] sm:$0xff]  ;;  %v14331_v31 = vld [vmem:[%s25011_s7 + $0xd0] sm:$0xff] }
 0x7ce   :  { %16604 = vmatpush1.bf16.msra.mxu0 %v16603_v4  ;;  %16668 = vmatpush3.bf16.msra.mxu1 %v24471_v11  ;;  %v16673_v11 = vpack.c.bf16 %v13947_v53, %v13944_v51  ;;  %v13977_v4 = vld [vmem:[%s25009_s5 + $0x478] sm:$0xff]  ;;  %v14305_v51 = vld [vmem:[%s25011_s7] sm:$0xff]  ;;  %v14307_v53 = vld [vmem:[%s25011_s7 + $0x10] sm:$0xff] }
 0x7cf   :  { %14065 = vmatprep.mubr.f32.mxu0 %v13832_v44  ;;  %14218 = vmatprep.mubr.f32.mxu1 %v13832_v44  ;;  %v16693_v22 = vpack.c.bf16 %v13977_v4, %v13974_v37  ;;  %v13975_v44 = vld [vmem:[%s25009_s5 + $0x468] sm:$0xff]  ;;  %v14329_v8 = vld [vmem:[%s25011_s7 + $0xc0] sm:$0xff]  ;;  %v14336_v18 = vld [vmem:[%s25011_s7 + $0xf8] sm:$0xff] }
 0x7d0   :  { %16606 = vmatprep.subr.bf16.mxu0 %v16605_v52  ;;  %16670 = vmatprep.subr.bf16.mxu1 %v16669_v45  ;;  %v14306_v52 = vld [vmem:[%s25011_s7 + $0x8] sm:$0xff]  ;;  %v16631_v42 = vpack.c.bf16 %v13975_v44, %v13972_v0  ;;  %v16723_v33 = vpack.c.bf16 %v14331_v31, %v14329_v8  ;;  %v14340_v6 = vld [vmem:[%s25011_s7 + $0x118] sm:$0xff]  ;;  %v14337_v37 = vld [vmem:[%s25011_s7 + $0x100] sm:$0xff] }
 0x7d1   :  { %14066 = vmatmul.mubr.f32.gmra.mrb[62].mxu0 %v13831_v63  ;;  %14219 = vmatmul.mubr.f32.gmra.mrb[78].mxu1 %v13831_v63  ;;  %v14312_v63 = vld [vmem:[%s25011_s7 + $0x38] sm:$0xff]  ;;  %v14326_v25 = vld [vmem:[%s25011_s7 + $0xa8] sm:$0xff]  ;;  %v14339_v4 = vld [vmem:[%s25011_s7 + $0x110] sm:$0xff] }
 0x7d2   :  { %16608 = vmatpush1.bf16.msra.mxu0 %v16607_v62  ;;  %16672 = vmatpush3.bf16.msra.mxu1 %v16669_v45  ;;  %v14308_v45 = vld [vmem:[%s25011_s7 + $0x18] sm:$0xff]  ;;  %v14310_v62 = vld [vmem:[%s25011_s7 + $0x28] sm:$0xff]  ;;  %v16717_v7 = vpack.c.bf16 %v14328_v36, %v14326_v25  ;;  %v14341_v0 = vld [vmem:[%s25011_s7 + $0x120] sm:$0xff] }
 0x7d3   :  { %16534 = vmatprep.mubr.f32.mxu1 %v13830_v48  ;;  %16610 = vmatprep.subr.bf16.mxu0 %v16609_v19  ;;  %v16697_v38 = vpack.c.bf16 %v14308_v45, %v14306_v52  ;;  %v16699_v19 = vpack.c.bf16 %v14307_v53, %v14305_v51  ;;  %v16701_v15 = vpack.c.bf16 %v14312_v63, %v14310_v62  ;;  %v14334_v17 = vld [vmem:[%s25011_s7 + $0xe8] sm:$0xff]  ;;  %v14343_v52 = vld [vmem:[%s25011_s7 + $0x130] sm:$0xff]  ;;  %v14345_v53 = vld [vmem:[%s25011_s7 + $0x140] sm:$0xff] }
 0x7d4   :  { %16674 = vmatprep.subr.bf16.mxu1 %v16673_v11  ;;  %14136 = vmatprep.mubr.f32.mxu0 %v19907_v30  ;;  %v14338_v49 = vld [vmem:[%s25011_s7 + $0x108] sm:$0xff]  ;;  %v14347_v62 = vld [vmem:[%s25011_s7 + $0x150] sm:$0xff]  ;;  %v14373_v10 = vld [vmem:[%s25011_s7 + $0x220] sm:$0xff] }
 0x7d5   :  { %v16729_v13 = vpack.c.bf16 %v14340_v6, %v14338_v49  ;;  %v14346_v45 = vld [vmem:[%s25011_s7 + $0x148] sm:$0xff]  ;;  %v14360_v36 = vld [vmem:[%s25011_s7 + $0x1b8] sm:$0xff]  ;;  %v14361_v8 = vld [vmem:[%s25011_s7 + $0x1c0] sm:$0xff] }
 0x7d6   :  { %16612 = vmatpush1.bf16.msra.mxu0 %v16611_v16  ;;  %16676 = vmatpush3.bf16.msra.mxu1 %v16673_v11  ;;  %v14311_v11 = vld [vmem:[%s25011_s7 + $0x30] sm:$0xff]  ;;  %v14313_v16 = vld [vmem:[%s25011_s7 + $0x40] sm:$0xff]  ;;  %v14350_v63 = vld [vmem:[%s25011_s7 + $0x168] sm:$0xff] }
 0x7d7   :  { %16614 = vmatprep.subr.bf16.mxu0 %v16613_v57  ;;  %16678 = vmatprep.subr.bf16.mxu1 %v16677_v28  ;;  %v16703_v60 = vpack.c.bf16 %v14311_v11, %v14309_v29  ;;  %v14315_v57 = vld [vmem:[%s25011_s7 + $0x50] sm:$0xff]  ;;  %v16739_v29 = vpack.c.bf16 %v14347_v62, %v14345_v53  ;;  %v14349_v11 = vld [vmem:[%s25011_s7 + $0x160] sm:$0xff]  ;;  %v14358_v25 = vld [vmem:[%s25011_s7 + $0x1a8] sm:$0xff] }
 0x7d8   :  { %v14363_v31 = vld [vmem:[%s25011_s7 + $0x1d0] sm:$0xff] }
 0x7d9   :  { %v14379_v6 = vld [vmem:[%s25011_s7 + $0x250] sm:$0xf] }
 0x7da   :  { %16616 = vmatpush1.bf16.msra.mxu0 %v16615_v26  ;;  %16680 = vmatpush3.bf16.msra.mxu1 %v16677_v28  ;;  %v16707_v28 = vpack.c.bf16 %v14315_v57, %v14313_v16  ;;  %v16713_v26 = vpack.c.bf16 %v14324_v2, %v14322_v12  ;;  %v14354_v16 = vld [vmem:[%s25011_s7 + $0x188] sm:$0xff]  ;;  %v14371_v57 = vld [vmem:[%s25011_s7 + $0x210] sm:$0xff] }
 0x7db   :  { %16618 = vmatprep.subr.bf16.mxu0 %v16617_v1  ;;  %16682 = vmatprep.subr.bf16.mxu1 %v16681_v46  ;;  %v14321_v1 = vld [vmem:[%s25011_s7 + $0x80] sm:$0xff]  ;;  %v14375_v12 = vld [vmem:[%s25011_s7 + $0x230] sm:$0xff] }
 0x7de   :  { %16620 = vmatpush1.bf16.msra.mxu0 %v16619_v34  ;;  %16684 = vmatpush3.bf16.msra.mxu1 %v16681_v46  ;;  %v14323_v46 = vld [vmem:[%s25011_s7 + $0x90] sm:$0xff]  ;;  %v14330_v34 = vld [vmem:[%s25011_s7 + $0xc8] sm:$0xff] }
 0x7df   :  { %16622 = vmatprep.subr.bf16.mxu0 %v16621_v23  ;;  %16686 = vmatprep.subr.bf16.mxu1 %v16685_v24  ;;  %v16715_v35 = vpack.c.bf16 %v14323_v46, %v14321_v1  ;;  %v14332_v23 = vld [vmem:[%s25011_s7 + $0xd8] sm:$0xff]  ;;  %v14353_v1 = vld [vmem:[%s25011_s7 + $0x180] sm:$0xff]  ;;  %v14355_v46 = vld [vmem:[%s25011_s7 + $0x190] sm:$0xff] }
 0x7e0   :  { %v16721_v61 = vpack.c.bf16 %v14332_v23, %v14330_v34  ;;  %v14362_v34 = vld [vmem:[%s25011_s7 + $0x1c8] sm:$0xff]  ;;  %v14364_v23 = vld [vmem:[%s25011_s7 + $0x1d8] sm:$0xff] }
 0x7e2   :  { %16624 = vmatpush1.bf16.msra.mxu0 %v16623_v21  ;;  %16688 = vmatpush3.bf16.msra.mxu1 %v16685_v24  ;;  %v16719_v24 = vpack.c.bf16 %v14327_v32, %v14325_v58  ;;  %v16725_v21 = vpack.c.bf16 %v14336_v18, %v14334_v17  ;;  %v14357_v58 = vld [vmem:[%s25011_s7 + $0x1a0] sm:$0xff]  ;;  %v14359_v32 = vld [vmem:[%s25011_s7 + $0x1b0] sm:$0xff]  ;;  %v14378_v17 = vld [vmem:[%s25011_s7 + $0x248] sm:$0xff] }
 0x7e3   :  { %16626 = vmatprep.subr.bf16.mxu0 %v16625_v41  ;;  %16690 = vmatprep.subr.bf16.mxu1 %v16689_v20  ;;  %v14333_v41 = vld [vmem:[%s25011_s7 + $0xe0] sm:$0xff]  ;;  %v14380_v18 = vld [vmem:[%s25011_s7 + $0x258] sm:$0xf] }
 0x7e6   :  { %16628 = vmatpush1.bf16.msra.mxu0 %v16627_v54  ;;  %16692 = vmatpush3.bf16.msra.mxu1 %v16689_v20  ;;  %v14335_v20 = vld [vmem:[%s25011_s7 + $0xf0] sm:$0xff]  ;;  %v16731_v54 = vpack.c.bf16 %v14339_v4, %v14337_v37 }
 0x7e7   :  { %16630 = vmatprep.subr.bf16.mxu0 %v16629_v14  ;;  %16694 = vmatprep.subr.bf16.mxu1 %v16693_v22  ;;  %v16727_v5 = vpack.c.bf16 %v14335_v20, %v14333_v41  ;;  %v14342_v14 = vld [vmem:[%s25011_s7 + $0x128] sm:$0xff]  ;;  %v14368_v20 = vld [vmem:[%s25011_s7 + $0x1f8] sm:$0xff]  ;;  %v14367_v4 = vld [vmem:[%s25011_s7 + $0x1f0] sm:$0xff] }
 0x7e8   :  { %v14366_v41 = vld [vmem:[%s25011_s7 + $0x1e8] sm:$0xff] }
 0x7e9   :  { %v16757_v49 = vpack.c.bf16 %v14368_v20, %v14366_v41  ;;  %v14579_v41 = vld [vmem:[%s25013_s9 + $0x70] sm:$0xff]  ;;  %v14580_v20 = vld [vmem:[%s25013_s9 + $0x78] sm:$0xff] }
 0x7ea   :  { %16632 = vmatpush1.bf16.msra.mxu0 %v16631_v42  ;;  %16696 = vmatpush3.bf16.msra.mxu1 %v16693_v22  ;;  %v14344_v22 = vld [vmem:[%s25011_s7 + $0x138] sm:$0xff] }
 0x7eb   :  { %16698 = vmatprep.subr.bf16.mxu1 %v16697_v38  ;;  %v16733_v44 = vpack.c.bf16 %v14344_v22, %v14342_v14  ;;  %v14348_v42 = vld [vmem:[%s25011_s7 + $0x158] sm:$0xff]  ;;  %v16735_v38 = vpack.c.bf16 %v14343_v52, %v14341_v0  ;;  %v19909_v14 = vmov 0.0|0.0  }
 0x7ec   :  { %v16737_v51 = vpack.c.bf16 %v14348_v42, %v14346_v45 }
 0x7ed   :  { %14137 = vmatmul.mubr.f32.vlgmr.msra.gmra.mrb[60].mxu0 %v13830_v48  ;;  %16535 = vmatmul.mubr.f32.vlgmr.msra.gmra.mrb[80].mxu1 %v13833_v39  ;;  %v14320_v48 = vld [vmem:[%s25011_s7 + $0x78] sm:$0xff] }
 0x7ee   :  { %14142 = vmatprep.mubr.f32.mxu0 %v19907_v30  ;;  %16700 = vmatpush1.bf16.msra.mxu1 %v16699_v19  ;;  %v16709_v43 = vpack.c.bf16 %v14320_v48, %v14318_v27  ;;  %v14352_v19 = vld [vmem:[%s25011_s7 + $0x178] sm:$0xff]  ;;  %v16763_v48 = vpack.c.bf16 %v14371_v57, %v14369_v55 }
 0x7ef   :  { %16702 = vmatprep.subr.bf16.mxu1 %v16701_v15  ;;  %v14372_v15 = vld [vmem:[%s25011_s7 + $0x218] sm:$0xff] }
 0x7f0   :  { %v14356_v27 = vld [vmem:[%s25011_s7 + $0x198] sm:$0xff] }
 0x7f1   :  { %14143 = vmatmul.mubr.f32.gmra.mrb[62].mxu0 %v13833_v39  ;;  %v14370_v39 = vld [vmem:[%s25011_s7 + $0x208] sm:$0xff] }
 0x7f2   :  { %16704 = vmatpush1.bf16.msra.mxu1 %v16703_v60  ;;  %14548 = vmatprep.mubr.f32.mxu0 %v19907_v30  ;;  %v16761_v59 = vpack.c.bf16 %v14372_v15, %v14370_v39  ;;  %v16741_v60 = vpack.c.bf16 %v14352_v19, %v14350_v63 }
 0x7f3   :  { %16706 = vmatprep.subr.bf16.mxu1 %v16705_v9  ;;  %v14351_v9 = vld [vmem:[%s25011_s7 + $0x170] sm:$0xff] }
 0x7f4   :  { %16762 = vmatprep.subr.bf16.mxu0 %v16761_v59  ;;  %v16743_v2 = vpack.c.bf16 %v14351_v9, %v14349_v11 }
 0x7f5   :  { %16764 = vmatpush1.bf16.msra.mxu0 %v16763_v48 }
 0x7f6   :  { %16708 = vmatpush1.bf16.msra.mxu1 %v16707_v28  ;;  %v14374_v28 = vld [vmem:[%s25011_s7 + $0x228] sm:$0xff] }
 0x7f7   :  { %16710 = vmatprep.subr.bf16.mxu1 %v16709_v43  ;;  %v14376_v43 = vld [vmem:[%s25011_s7 + $0x238] sm:$0xff] }
 0x7f8   :  { %v16765_v50 = vpack.c.bf16 %v14376_v43, %v14374_v28 }
 0x7fa   :  { %16712 = vmatpush1.bf16.msra.mxu1 %v16711_v56  ;;  %v16767_v56 = vpack.c.bf16 %v14375_v12, %v14373_v10  ;;  %16766 = vmatprep.subr.bf16.mxu0 %v16765_v50  ;;  %v14567_v12 = vld [vmem:[%s25013_s9 + $0x10] sm:$0xff] }
 0x7fb   :  { %16714 = vmatprep.subr.bf16.mxu1 %v16713_v26  ;;  %v16745_v26 = vpack.c.bf16 %v14356_v27, %v14354_v16 }
 0x7fc   :  { %16768 = vmatpush1.bf16.msra.mxu0 %v16767_v56 }
 0x7fe   :  { %16716 = vmatpush1.bf16.msra.mxu1 %v16715_v35  ;;  %v16747_v35 = vpack.c.bf16 %v14355_v46, %v14353_v1 }
 0x7ff   :  { %16718 = vmatprep.subr.bf16.mxu1 %v16717_v7  ;;  %v16749_v7 = vpack.c.bf16 %v14360_v36, %v14358_v25  ;;  %v14569_v36 = vld [vmem:[%s25013_s9 + $0x20] sm:$0xff] }
 0x802   :  { %16720 = vmatpush1.bf16.msra.mxu1 %v16719_v24  ;;  %v16751_v24 = vpack.c.bf16 %v14359_v32, %v14357_v58  ;;  %v14571_v58 = vld [vmem:[%s25013_s9 + $0x30] sm:$0xff]  ;;  %v14572_v32 = vld [vmem:[%s25013_s9 + $0x38] sm:$0xff] }
 0x803   :  { %16722 = vmatprep.subr.bf16.mxu1 %v16721_v61  ;;  %v16753_v61 = vpack.c.bf16 %v14364_v23, %v14362_v34  ;;  %v16785_v34 = vpack.c.bf16 %v14572_v32, %v14571_v58  ;;  %v14573_v23 = vld [vmem:[%s25013_s9 + $0x40] sm:$0xff] }
 0x806   :  { %16724 = vmatpush1.bf16.msra.mxu1 %v16723_v33  ;;  %v16755_v33 = vpack.c.bf16 %v14363_v31, %v14361_v8  ;;  %v14575_v8 = vld [vmem:[%s25013_s9 + $0x50] sm:$0xff]  ;;  %v14576_v31 = vld [vmem:[%s25013_s9 + $0x58] sm:$0xff] }
 0x807   :  { %16726 = vmatprep.subr.bf16.mxu1 %v16725_v21  ;;  %v16769_v21 = vpack.c.bf16 %v14380_v18, %v14378_v17  ;;  %v14577_v17 = vld [vmem:[%s25013_s9 + $0x60] sm:$0xff]  ;;  %v14578_v18 = vld [vmem:[%s25013_s9 + $0x68] sm:$0xff] }
 0x809   :  { %16771 = vmatprep.subr.msk.bf16.mxu0 %vm16770_vm4, %v16769_v21  ;;  %v16794_v21 = vpack.c.bf16 %v14578_v18, %v14577_v17 }
 0x80a   :  { %16728 = vmatpush1.bf16.msra.mxu1 %v16727_v5  ;;  %v14377_v5 = vld [vmem:[%s25011_s7 + $0x240] sm:$0xff] }
 0x80b   :  { %16730 = vmatprep.subr.bf16.mxu1 %v16729_v13  ;;  %v14365_v13 = vld [vmem:[%s25011_s7 + $0x1e0] sm:$0xff]  ;;  %v16772_v37 = vpack.c.bf16 %v14379_v6, %v14377_v5  ;;  %v16797_v5 = vpack.c.bf16 %v14580_v20, %v14579_v41  ;;  %v14582_v6 = vld [vmem:[%s25013_s9 + $0x88] sm:$0xff] }
 0x80d   :  { %16774 = vmatpush1.bf16.msk.msra.mxu0 %vm16770_vm4, %v16772_v37  ;;  %v14583_v37 = vld [vmem:[%s25013_s9 + $0x90] sm:$0xff] }
 0x80e   :  { %16732 = vmatpush1.bf16.msra.mxu1 %v16731_v54  ;;  %v16759_v54 = vpack.c.bf16 %v14367_v4, %v14365_v13  ;;  %16775 = vmatprep.subr.bf16.mxu0 %v19909_v14  ;;  %v14584_v4 = vld [vmem:[%s25013_s9 + $0x98] sm:$0xff] }
 0x80f   :  { %16734 = vmatprep.subr.bf16.mxu1 %v16733_v44 }
 0x812   :  { %16736 = vmatpush1.bf16.msra.mxu1 %v16735_v38  ;;  %v13978_v38 = vld [vmem:[%s25010_s6] sm:$0x7] }
 0x813   :  { %16738 = vmatprep.subr.bf16.mxu1 %v16737_v51  ;;  %v13991_v51 = vrot.slane %v13978_v38, %v20433_v47  ;;  %v13983_v53 = vrot.slane %v13978_v38, %v20350_v40  ;;  %v13987_v62 = vrot.slane %v13978_v38, %v20353_v3  ;;  %v14566_v47 = vld [vmem:[%s25013_s9 + $0x8] sm:$0xff]  ;;  %v14589_v38 = vld [vmem:[%s25013_s9 + $0xc0] sm:$0xff] }
 0x816   :  { %16740 = vmatpush1.bf16.msra.mxu1 %v16739_v29 }
 0x817   :  { %16742 = vmatprep.subr.bf16.mxu1 %v16741_v60  ;;  %v14565_v60 = vld [vmem:[%s25013_s9] sm:$0xff] }
 0x818   :  { %v16776_v28 = vpack.c.bf16 %v14566_v47, %v14565_v60 }
 0x81a   :  { %16744 = vmatpush1.bf16.msra.mxu1 %v16743_v2  ;;  %v14568_v2 = vld [vmem:[%s25013_s9 + $0x18] sm:$0xff] }
 0x81b   :  { %16746 = vmatprep.subr.bf16.mxu1 %v16745_v26  ;;  %v16779_v46 = vpack.c.bf16 %v14568_v2, %v14567_v12 }
 0x81e   :  { %16748 = vmatpush1.bf16.msra.mxu1 %v16747_v35  ;;  %v14570_v35 = vld [vmem:[%s25013_s9 + $0x28] sm:$0xff] }
 0x81f   :  { %16750 = vmatprep.subr.bf16.mxu1 %v16749_v7  ;;  %v16782_v7 = vpack.c.bf16 %v14570_v35, %v14569_v36 }
 0x822   :  { %16752 = vmatpush1.bf16.msra.mxu1 %v16751_v24  ;;  %v14574_v24 = vld [vmem:[%s25013_s9 + $0x48] sm:$0xff] }
 0x823   :  { %16754 = vmatprep.subr.bf16.mxu1 %v16753_v61  ;;  %v16788_v61 = vpack.c.bf16 %v14574_v24, %v14573_v23 }
 0x826   :  { %16756 = vmatpush1.bf16.msra.mxu1 %v16755_v33  ;;  %v16791_v33 = vpack.c.bf16 %v14576_v31, %v14575_v8 }
 0x827   :  { %16758 = vmatprep.subr.bf16.mxu1 %v16757_v49  ;;  %v14581_v49 = vld [vmem:[%s25013_s9 + $0x80] sm:$0xff] }
 0x828   :  { %v16800_v13 = vpack.c.bf16 %v14582_v6, %v14581_v49 }
 0x82a   :  { %16760 = vmatpush1.bf16.msra.mxu1 %v16759_v54  ;;  %v16803_v54 = vpack.c.bf16 %v14584_v4, %v14583_v37 }
 0x8a0   :  { %v16478_v22 = vpop.f32.mrb[76].mxu1 }
 0x8a1   :  { %v16479_v0 = vpop.f32.mrb[77].mxu1 }
 0x8a2   :  { %v16480_v44 = vadd.f32 %v16479_v0, %v16478_v22  ;;  %v14585_v22 = vld [vmem:[%s25013_s9 + $0xa0] sm:$0xff]  ;;  %v14586_v0 = vld [vmem:[%s25013_s9 + $0xa8] sm:$0xff] }
 0x8a4   :  { %v16481_v52 = vpop.f32.mrb[78].mxu1  ;;  %v14216_v15 = vadd.f32 %v16480_v44, %v13991_v51  ;;  %v16806_v44 = vpack.c.bf16 %v14586_v0, %v14585_v22 }
 0x8a5   :  { %v16482_v45 = vpop.f32.mrb[79].mxu1 }
 0x8a6   :  { %v16483_v42 = vadd.f32 %v16482_v45, %v16481_v52  ;;  %v14587_v52 = vld [vmem:[%s25013_s9 + $0xb0] sm:$0xff]  ;;  %v14588_v45 = vld [vmem:[%s25013_s9 + $0xb8] sm:$0xff] }
 0x8a8   :  { %v14221_v63 = vadd.f32 %v16483_v42, %v13991_v51  ;;  %v16809_v42 = vpack.c.bf16 %v14588_v45, %v14587_v52 }
 0x8c0   :  { %v14138_v19 = vpop.f32.mrb[60].mxu0  ;;  %v16536_v39 = vpop.f32.mrb[80].mxu1 }
 0x8c1   :  { %v16851_v29 = vadd.f32 %v14138_v19, %v13983_v53  ;;  %v14296_v11 = vadd.f32 %v16536_v39, %v14221_v63  ;;  %v14140_v59 = vpop.f32.mrb[61].mxu0  ;;  %v14290_v55 = vpop.f32.mrb[81].mxu1 }
 0x8c2   :  { %v16852_v9 = vadd.f32 %v14140_v59, %v13987_v62  ;;  %v14291_v16 = vadd.f32 %v14290_v55, %v14216_v15 }
 0x8c3   :  { %v14299_v43 = vmax.f32 %v16851_v29, 0.0  ;;  %v14304_v26 = vmax.f32 %v14296_v11, 0.0 }
 0x8c4   :  { %v14300_v57 = vmax.f32 %v16852_v9, 0.0  ;;  %v14301_v27 = vmax.f32 %v14291_v16, 0.0  ;;  %v14144_v48 = vpop.f32.mrb[62].mxu0 }
 0x8c5   :  { %v16853_v50 = vadd.f32 %v14144_v48, %v13983_v53  ;;  %v14146_v10 = vpop.f32.mrb[63].mxu0 }
 0x8c6   :  { %v16854_v56 = vadd.f32 %v14146_v10, %v13987_v62  ;;  %14471 = vmatprep.mubr.f32.mxu1 %v14300_v57  ;;  %16441 = vmatmul.mubr.msk.f32.vlgmr.msra.gmra.mrb[64].mxu0 %vm14393_vm5, %v14301_v27 }
 0x8c7   :  { %14472 = vmatmul.mubr.f32.vlgmr.msra.gmra.mrb[82].mxu1 %v14299_v43  ;;  %14554 = vmatprep.mubr.f32.mxu0 %v19907_v30  ;;  %v14302_v25 = vmax.f32 %v16853_v50, 0.0  ;;  %v16443_v43 = vld [vmem:[%s25014_s10] ss:$0 sm:$0xff] }
 0x8c8   :  { %v14303_v1 = vmax.f32 %v16854_v56, 0.0  ;;  %16777 = vmatpush1.bf16.msra.mxu0 %v16776_v28 }
 0x8c9   :  { %16778 = vmatprep.subr.bf16.mxu0 %v19909_v14 }
 0x8ca   :  { %14477 = vmatprep.mubr.f32.mxu1 %v14303_v1  ;;  %16442 = vmatmul.mubr.msk.f32.gmra.mrb[66].mxu0 %vm14393_vm5, %v14304_v26 }
 0x8cb   :  { %14478 = vmatmul.mubr.f32.gmra.mrb[84].mxu1 %v14302_v25 }
 0x8cc   :  { %16780 = vmatpush1.bf16.msra.mxu0 %v16779_v46 }
 0x8cd   :  { %16781 = vmatprep.subr.bf16.mxu0 %v19909_v14 }
 0x8d0   :  { %16783 = vmatpush1.bf16.msra.mxu0 %v16782_v7 }
 0x8d1   :  { %16784 = vmatprep.subr.bf16.mxu0 %v19909_v14 }
 0x8d4   :  { %16786 = vmatpush1.bf16.msra.mxu0 %v16785_v34 }
 0x8d5   :  { %16787 = vmatprep.subr.bf16.mxu0 %v19909_v14 }
 0x8d8   :  { %16789 = vmatpush1.bf16.msra.mxu0 %v16788_v61 }
 0x8d9   :  { %16790 = vmatprep.subr.bf16.mxu0 %v19909_v14 }
 0x8dc   :  { %16792 = vmatpush1.bf16.msra.mxu0 %v16791_v33 }
 0x8dd   :  { %16793 = vmatprep.subr.bf16.mxu0 %v19909_v14 }
 0x8e0   :  { %16795 = vmatpush1.bf16.msra.mxu0 %v16794_v21 }
 0x8e1   :  { %16796 = vmatprep.subr.bf16.mxu0 %v19909_v14 }
 0x8e4   :  { %16798 = vmatpush1.bf16.msra.mxu0 %v16797_v5 }
 0x8e5   :  { %16799 = vmatprep.subr.bf16.mxu0 %v19909_v14 }
 0x8e8   :  { %16801 = vmatpush1.bf16.msra.mxu0 %v16800_v13 }
 0x8e9   :  { %16802 = vmatprep.subr.bf16.mxu0 %v19909_v14 }
 0x8ec   :  { %16804 = vmatpush1.bf16.msra.mxu0 %v16803_v54 }
 0x8ed   :  { %16805 = vmatprep.subr.bf16.mxu0 %v19909_v14 }
 0x8f0   :  { %16807 = vmatpush1.bf16.msra.mxu0 %v16806_v44 }
 0x8f1   :  { %16808 = vmatprep.subr.bf16.mxu0 %v19909_v14  ;;  %v14381_v14 = vld [vmem:[%s25012_s8] sm:$0x3] }
 0x8f2   :  { %v14386_v51 = vrot.slane %v14381_v14, %v20350_v40  ;;  %v14390_v53 = vrot.slane %v14381_v14, %v20353_v3 }
 0x8f4   :  { %16810 = vmatpush1.bf16.msra.mxu0 %v16809_v42 }
 0x8f5   :  { %14652 = vmatprep.subr.mxu0 %v19907_v30 }
 0x8f8   :  { %14653 = vmatpush1.msra.mxu0 %v14589_v38 }
 0x999   :  { %v14550_v62 = vpop.f32.mrb[64].mxu0 }
 0x99a   :  { %v14473_v63 = vpop.f32.mrb[82].mxu1  ;;  %v14552_v19 = vpop.f32.mrb[65].mxu0 }
 0x99b   :  { %v14474_v39 = vadd.f32 %v14473_v63, %v14386_v51  ;;  %v14475_v15 = vpop.f32.mrb[83].mxu1 }
 0x99c   :  { %v14476_v29 = vadd.f32 %v14475_v15, %v14390_v53 }
 0x99d   :  { %v14551_v30 = vadd.f32 %v14550_v62, %v14474_v39  ;;  %v14556_v11 = vpop.f32.mrb[66].mxu0 }
 0x99e   :  { %v14553_v59 = vadd.f32 %v14552_v19, %v14476_v29  ;;  %v14479_v55 = vpop.f32.mrb[84].mxu1  ;;  %v14558_v60 = vpop.f32.mrb[67].mxu0 }
 0x99f   :  { %v14480_v47 = vadd.f32 %v14479_v55, %v14386_v51  ;;  %v14481_v9 = vpop.f32.mrb[85].mxu1  ;;  %v14561_v27 = vmax.f32 %v14551_v30, 0.0 }
 0x9a0   :  { %v14562_v16 = vmax.f32 %v14553_v59, 0.0  ;;  %v14482_v57 = vadd.f32 %v14481_v9, %v14390_v53 }
 0x9a1   :  { %v14557_v40 = vadd.f32 %v14556_v11, %v14480_v47 }
 0x9a2   :  { %v14559_v48 = vadd.f32 %v14558_v60, %v14482_v57  ;;  %16444 = vmatprep.mubr.msk.f32.mxu0 %vm14597_vm6, %v14562_v16 }
 0x9a3   :  { %14669 = vmatmul.mubr.f32.vlgmr.msra.gmra.mrb[68].mxu0 %v14561_v27  ;;  %v14563_v28 = vmax.f32 %v14557_v40, 0.0 }
 0x9a4   :  { %v14564_v3 = vmax.f32 %v14559_v48, 0.0 }
 0x9a6   :  { %16445 = vmatprep.mubr.msk.f32.mxu0 %vm14597_vm6, %v14564_v3 }
 0x9a7   :  { %14674 = vmatmul.mubr.f32.gmra.mrb[70].mxu0 %v14563_v28 }
 0xa76   :  { %v14670_v50 = vpop.f32.mrb[68].mxu0 }
 0xa77   :  { %v14671_v10 = vadd.f32 %v16443_v43, %v14670_v50  ;;  %v14672_v12 = vpop.f32.mrb[69].mxu0 }
 0xa79   :  { %v14680_v2 = vsel %vm14679_vm7, %v14671_v10, -inf }
 0xa7a   :  { %v14675_v56 = vpop.f32.mrb[70].mxu0  ;;  %14681 = vmax.xlane.f32.xlu0 %v14680_v2 }
 0xa7b   :  { %v14676_v26 = vadd.f32 %v16443_v43, %v14675_v56  ;;  %v14677_v1 = vpop.f32.mrb[71].mxu0 }
 0xa7d   :  { %v14683_v46 = vsel %vm14679_vm7, %v14676_v26, -inf }
 0xa7e   :  { %14684 = vmax.xlane.f32.xlu0 %v14683_v46 }
 0xb07   :  { %v14682_v25 = vpop.xlane.xlu0 %14681 }
 0xb08   :  { %v14686_v36 = vsub.f32 %v14671_v10, %v14682_v25 }
 0xb0a   :  { %v14688_v35 = vmul.f32 1.442695, %v14686_v36 }
 0xb0b   :  { %v14685_v7 = vpop.xlane.xlu0 %14684 }
 0xb0c   :  { %19808 = vpow2.f32 %v14688_v35  ;;  %v14687_v58 = vsub.f32 %v14676_v26, %v14685_v7 }
 0xb0e   :  { %v14690_v32 = vmul.f32 1.442695, %v14687_v58 }
 0xb10   :  { %19810 = vpow2.f32 %v14690_v32 }
 0xb16   :  { %v19809_v34 = vpop.eup %19808 }
 0xb17   :  { %v14692_v23 = vsel %vm14679_vm7, %v19809_v34, 0.0 }
 0xb18   :  { %14693 = vadd.xlane.f32.xlu1 %v14692_v23 }
 0xb1a   :  { %v19811_v24 = vpop.eup %19810 }
 0xb1b   :  { %v14695_v61 = vsel %vm14679_vm7, %v19811_v24, 0.0 }
 0xb1c   :  { %14696 = vadd.xlane.f32.xlu1 %v14695_v61 }
 0xba5   :  { %v14694_v8 = vpop.xlane.xlu1 %14693 }
 0xba6   :  { %19812 = vlog2.f32 %v14694_v8 }
 0xba9   :  { %v14697_v31 = vpop.xlane.xlu1 %14696 }
 0xbaa   :  { %19814 = vlog2.f32 %v14697_v31 }
 0xbb0   :  { %v19813_v33 = vpop.eup %19812 }
 0xbb1   :  { %v14699_v17 = vmul.f32 0.6931472, %v19813_v33 }
 0xbb3   :  { %v14702_v18 = vadd.f32 %v14699_v17, %v14682_v25 }
 0xbb4   :  { %v19815_v21 = vpop.eup %19814 }
 0xbb5   :  { %v14704_v41 = vsub.f32 %v14671_v10, %v14702_v18  ;;  %v14701_v20 = vmul.f32 0.6931472, %v19815_v21 }
 0xbb7   :  { %14706 = vst.msk [vmem:[%s25015_s11] sm:$0xff] %vm14679_vm7, %v14704_v41  ;;  %v14703_v5 = vadd.f32 %v14701_v20, %v14685_v7 }
 0xbb9   :  { %v14705_v49 = vsub.f32 %v14676_v26, %v14703_v5 }
 0xbbb   :  { %14707 = vst.msk [vmem:[%s25015_s11 + $0x8] sm:$0xff] %vm14679_vm7, %v14705_v49 }
 0xbbc   :  { %14712 = vsyncpa [#allocation3], 1 }

</bundles_post_ra>
